<compile_context>
chip_gen: v6e
topology: v6e:2x2x1
jax: 0.10.0
libtpu: 0.0.40
codegen_flags: <defaults>
</compile_context>

<pallas_src>
import jax
import jax.numpy as jnp
from jax.experimental import pallas as pl
from jax.experimental.pallas import tpu as pltpu

# --- hyperparameters (match the PyTorch module) ---
N_EMBD = 128
BLOCK_SIZE = 128
N_HEAD = 4
N_LAYER = 4
HEAD_SIZE = N_EMBD // N_HEAD
VOCAB_SIZE = 65        # deterministic synthetic choice for len(sorted(set(text)))
VOCAB_PAD = 128        # lane-dense padded lm_head width
LN_EPS = 1e-5          # PyTorch nn.LayerNorm default
MASK_VALUE = -1e30     # finite causal-mask fill (safe for bf16/f32 score path)


def _layernorm(x, gamma, beta):
    # x: (T, C) f32; gamma/beta: (1, C) f32
    mu = jnp.mean(x, axis=-1, keepdims=True)
    var = jnp.mean((x - mu) ** 2, axis=-1, keepdims=True)
    return (x - mu) * jax.lax.rsqrt(var + LN_EPS) * gamma + beta


def _mm_t(x, w):
    # x: (T, in), w: (out, in) -> (T, out); contraction on last dims (== x @ w.T)
    return jax.lax.dot_general(
        x, w, (((1,), (1,)), ((), ())), preferred_element_type=jnp.float32)


# ---------------- Fused full-model Pallas kernel ----------------

def gpt_kernel(x_ref,
               ln1_g_ref, ln1_b_ref, wqkv_ref, wproj_ref, bproj_ref,
               ln2_g_ref, ln2_b_ref, w1_ref, b1_ref, w2_ref, b2_ref,
               lnf_g_ref, lnf_b_ref, wlm_ref, blm_ref,
               out_ref):
    """All N_LAYER pre-LN transformer blocks + ln_f + lm_head for one batch row."""
    x = x_ref[0].astype(jnp.float32)                      # (T, C) residual stream, f32
    T = x.shape[0]

    # Causal mask, built once and reused by every layer/head.
    row = jax.lax.broadcasted_iota(jnp.int32, (T, T), 0)
    col = jax.lax.broadcasted_iota(jnp.int32, (T, T), 1)
    causal = row >= col
    scale = HEAD_SIZE ** -0.5

    for l in range(N_LAYER):                              # static unroll (N_LAYER = 4)
        # ---- self-attention branch (pre-LN) ----
        xn = _layernorm(x, ln1_g_ref[l], ln1_b_ref[l])
        xn_b = xn.astype(jnp.bfloat16)

        # Fused QKV projection: one (T,C) x (C,3C) MXU matmul, f32 accumulate.
        qkv = _mm_t(xn_b, wqkv_ref[l])                    # (T, 3C) f32
        wproj = wproj_ref[l]                              # (C, C) bf16

        sa = None
        for h in range(N_HEAD):                           # static unroll (N_HEAD = 4)
            lo = h * HEAD_SIZE
            q = qkv[:, lo:lo + HEAD_SIZE].astype(jnp.bfloat16)                   # (T, hs)
            k = qkv[:, N_EMBD + lo:N_EMBD + lo + HEAD_SIZE].astype(jnp.bfloat16)
            v = qkv[:, 2 * N_EMBD + lo:2 * N_EMBD + lo + HEAD_SIZE].astype(jnp.bfloat16)

            # scores = q @ k.T expressed via contraction dims (no transpose materialized)
            wei = jax.lax.dot_general(
                q, k, (((1,), (1,)), ((), ())),
                preferred_element_type=jnp.float32) * scale                      # (T, T)
            wei = jnp.where(causal, wei, MASK_VALUE)
            wei = wei - jnp.max(wei, axis=-1, keepdims=True)
            p = jnp.exp(wei)
            denom = jnp.sum(p, axis=-1, keepdims=True)
            p = p * pl.reciprocal(denom, approx=True)     # softmax; divide on EUP
            # dropout(p): identity in eval mode

            o = jnp.dot(p.astype(jnp.bfloat16), v,
                        preferred_element_type=jnp.float32)                      # (T, hs)
            # Accumulate output projection per head against the matching lane
            # slice of W_proj: replaces concat + (C,C) matmul, keeps N=128.
            contrib = jax.lax.dot_general(
                o.astype(jnp.bfloat16), wproj[:, lo:lo + HEAD_SIZE],
                (((1,), (1,)), ((), ())), preferred_element_type=jnp.float32)    # (T, C)
            sa = contrib if sa is None else sa + contrib

        # dropout: identity in eval mode
        x = x + sa + bproj_ref[l]

        # ---- feed-forward branch (pre-LN) ----
        xn2 = _layernorm(x, ln2_g_ref[l], ln2_b_ref[l])
        h1 = _mm_t(xn2.astype(jnp.bfloat16), w1_ref[l]) + b1_ref[l]              # (T, 4C)
        h1 = jnp.maximum(h1, 0.0)                                                # ReLU
        ff = _mm_t(h1.astype(jnp.bfloat16), w2_ref[l]) + b2_ref[l]               # (T, C)
        # dropout: identity in eval mode
        x = x + ff

    # ---- final LayerNorm + lm_head (lane-dense padded to VOCAB_PAD) ----
    xn = _layernorm(x, lnf_g_ref[...], lnf_b_ref[...])
    logits = _mm_t(xn.astype(jnp.bfloat16), wlm_ref[...]) + blm_ref[...]         # (T, VOCAB_PAD)
    out_ref[0] = logits.astype(out_ref.dtype)


# ---------------- Parameter packing (wrapper-side, pure XLA glue) ----------------

def pack_params(p):
    """Stack per-layer weights along a leading layer axis; matmul weights in bf16."""
    blocks = p['blocks']

    def stack_vec(key, width):
        return jnp.stack([blk[key].reshape(1, width) for blk in blocks]).astype(jnp.float32)

    wqkv = jnp.stack([
        jnp.concatenate([blk['wq'].reshape(N_EMBD, N_EMBD),
                         blk['wk'].reshape(N_EMBD, N_EMBD),
                         blk['wv'].reshape(N_EMBD, N_EMBD)], axis=0)
        for blk in blocks]).astype(jnp.bfloat16)                      # (L, 3C, C)
    wproj = jnp.stack([blk['wproj'] for blk in blocks]).astype(jnp.bfloat16)   # (L, C, C)
    w1 = jnp.stack([blk['w1'] for blk in blocks]).astype(jnp.bfloat16)         # (L, 4C, C)
    w2 = jnp.stack([blk['w2'] for blk in blocks]).astype(jnp.bfloat16)         # (L, C, 4C)

    wlm_pad = jnp.pad(p['wlm'], ((0, VOCAB_PAD - VOCAB_SIZE), (0, 0))).astype(jnp.bfloat16)
    blm_pad = jnp.pad(p['blm'].reshape(1, -1),
                      ((0, 0), (0, VOCAB_PAD - VOCAB_SIZE))).astype(jnp.float32)

    return (
        stack_vec('ln1_g', N_EMBD), stack_vec('ln1_b', N_EMBD),
        wqkv, wproj, stack_vec('bproj', N_EMBD),
        stack_vec('ln2_g', N_EMBD), stack_vec('ln2_b', N_EMBD),
        w1, stack_vec('b1', 4 * N_EMBD), w2, stack_vec('b2', N_EMBD),
        p['lnf_g'].reshape(1, N_EMBD).astype(jnp.float32),
        p['lnf_b'].reshape(1, N_EMBD).astype(jnp.float32),
        wlm_pad, blm_pad,
    )


def _full_spec(a):
    nd = a.ndim
    return pl.BlockSpec(a.shape, lambda b, _n=nd: (0,) * _n)


# ---------------- Full forward ----------------

def gpt_forward(idx, params):
    """idx: (B, T) int32 token ids, T <= BLOCK_SIZE. Returns (logits, loss=None)."""
    B, T = idx.shape
    tok_emb = jnp.take(params['tok_emb'], idx, axis=0)        # (B, T, C) gather (glue)
    pos_emb = params['pos_emb'][:T]                           # (T, C)
    x = (tok_emb + pos_emb).astype(jnp.float32)

    weights = pack_params(params)

    logits_pad = pl.pallas_call(
        gpt_kernel,
        out_shape=jax.ShapeDtypeStruct((B, T, VOCAB_PAD), jnp.float32),
        grid=(B,),
        in_specs=[pl.BlockSpec((1, T, N_EMBD), lambda b: (b, 0, 0))]
                 + [_full_spec(a) for a in weights],
        out_specs=pl.BlockSpec((1, T, VOCAB_PAD), lambda b: (b, 0, 0)),
        compiler_params=pltpu.CompilerParams(
            dimension_semantics=("parallel",)),               # batch rows -> both TCs on v7x
    )(x, *weights)

    logits = logits_pad[:, :, :VOCAB_SIZE]                    # drop lane padding
    # TODO(synk): targets path (F.cross_entropy) not implemented; forward here is eval-only.
    return logits, None


# ---------------- Parameter init (deterministic, matches _init_weights) ----------------

def init_params(key):
    std = 0.02
    ks = iter(jax.random.split(key, 8 + N_LAYER * 8))
    nrm = lambda shape: std * jax.random.normal(next(ks), shape, dtype=jnp.float32)

    params = {
        'tok_emb': nrm((VOCAB_SIZE, N_EMBD)),
        'pos_emb': nrm((BLOCK_SIZE, N_EMBD)),
        'lnf_g': jnp.ones((N_EMBD,), jnp.float32),
        'lnf_b': jnp.zeros((N_EMBD,), jnp.float32),
        'wlm': nrm((VOCAB_SIZE, N_EMBD)),
        'blm': jnp.zeros((VOCAB_SIZE,), jnp.float32),
        'blocks': [],
    }
    for _ in range(N_LAYER):
        params['blocks'].append({
            'ln1_g': jnp.ones((N_EMBD,), jnp.float32),
            'ln1_b': jnp.zeros((N_EMBD,), jnp.float32),
            'wq': nrm((N_HEAD, HEAD_SIZE, N_EMBD)),
            'wk': nrm((N_HEAD, HEAD_SIZE, N_EMBD)),
            'wv': nrm((N_HEAD, HEAD_SIZE, N_EMBD)),
            'wproj': nrm((N_EMBD, N_EMBD)),
            'bproj': jnp.zeros((N_EMBD,), jnp.float32),
            'ln2_g': jnp.ones((N_EMBD,), jnp.float32),
            'ln2_b': jnp.zeros((N_EMBD,), jnp.float32),
            'w1': nrm((4 * N_EMBD, N_EMBD)),
            'b1': jnp.zeros((4 * N_EMBD,), jnp.float32),
            'w2': nrm((N_EMBD, 4 * N_EMBD)),
            'b2': jnp.zeros((N_EMBD,), jnp.float32),
        })
    return params


if __name__ == "__main__":
    key = jax.random.PRNGKey(0)
    pkey, ikey = jax.random.split(key)
    params = init_params(pkey)

    B, T = 2, 16
    idx = jax.random.randint(ikey, (B, T), 0, VOCAB_SIZE, dtype=jnp.int32)

    logits, loss = gpt_forward(idx, params)
    logits = jax.block_until_ready(logits)
    assert logits.shape == (B, T, VOCAB_SIZE)
    assert loss is None
    assert bool(jnp.all(jnp.isfinite(logits)))
    print("KERNEL_OK")
</pallas_src>

<mosaic_0001>
module attributes {stable_mosaic.version = 11 : i64} {
  func.func @gpt_kernel(%arg0: i32, %arg1: memref<1x16x128xf32, #tpu.memory_space<vmem>>, %arg2: memref<4x1x128xf32, #tpu.memory_space<vmem>>, %arg3: memref<4x1x128xf32, #tpu.memory_space<vmem>>, %arg4: memref<4x384x128xbf16, #tpu.memory_space<vmem>>, %arg5: memref<4x128x128xbf16, #tpu.memory_space<vmem>>, %arg6: memref<4x1x128xf32, #tpu.memory_space<vmem>>, %arg7: memref<4x1x128xf32, #tpu.memory_space<vmem>>, %arg8: memref<4x1x128xf32, #tpu.memory_space<vmem>>, %arg9: memref<4x512x128xbf16, #tpu.memory_space<vmem>>, %arg10: memref<4x1x512xf32, #tpu.memory_space<vmem>>, %arg11: memref<4x128x512xbf16, #tpu.memory_space<vmem>>, %arg12: memref<4x1x128xf32, #tpu.memory_space<vmem>>, %arg13: memref<1x128xf32, #tpu.memory_space<vmem>>, %arg14: memref<1x128xf32, #tpu.memory_space<vmem>>, %arg15: memref<128x128xbf16, #tpu.memory_space<vmem>>, %arg16: memref<1x128xf32, #tpu.memory_space<vmem>>, %arg17: memref<1x16x128xf32, #tpu.memory_space<vmem>>) attributes {dimension_semantics = [#tpu.dimension_semantics<parallel>], iteration_bounds = array<i64: 2>, scalar_prefetch = 0 : i64, scratch_operands = 0 : i64, tpu.core_type = #tpu.core_type<tc>, window_params = [{transform_indices = @transform_0, window_bounds = array<i64: 1, 16, 128>}, {pipeline_mode = #tpu.pipeline_mode<synchronous>, transform_indices = @transform_1, window_bounds = array<i64: 4, 1, 128>}, {pipeline_mode = #tpu.pipeline_mode<synchronous>, transform_indices = @transform_2, window_bounds = array<i64: 4, 1, 128>}, {pipeline_mode = #tpu.pipeline_mode<synchronous>, transform_indices = @transform_3, window_bounds = array<i64: 4, 384, 128>}, {pipeline_mode = #tpu.pipeline_mode<synchronous>, transform_indices = @transform_4, window_bounds = array<i64: 4, 128, 128>}, {pipeline_mode = #tpu.pipeline_mode<synchronous>, transform_indices = @transform_5, window_bounds = array<i64: 4, 1, 128>}, {pipeline_mode = #tpu.pipeline_mode<synchronous>, transform_indices = @transform_6, window_bounds = array<i64: 4, 1, 128>}, {pipeline_mode = #tpu.pipeline_mode<synchronous>, transform_indices = @transform_7, window_bounds = array<i64: 4, 1, 128>}, {pipeline_mode = #tpu.pipeline_mode<synchronous>, transform_indices = @transform_8, window_bounds = array<i64: 4, 512, 128>}, {pipeline_mode = #tpu.pipeline_mode<synchronous>, transform_indices = @transform_9, window_bounds = array<i64: 4, 1, 512>}, {pipeline_mode = #tpu.pipeline_mode<synchronous>, transform_indices = @transform_10, window_bounds = array<i64: 4, 128, 512>}, {pipeline_mode = #tpu.pipeline_mode<synchronous>, transform_indices = @transform_11, window_bounds = array<i64: 4, 1, 128>}, {pipeline_mode = #tpu.pipeline_mode<synchronous>, transform_indices = @transform_12, window_bounds = array<i64: 1, 128>}, {pipeline_mode = #tpu.pipeline_mode<synchronous>, transform_indices = @transform_13, window_bounds = array<i64: 1, 128>}, {pipeline_mode = #tpu.pipeline_mode<synchronous>, transform_indices = @transform_14, window_bounds = array<i64: 128, 128>}, {pipeline_mode = #tpu.pipeline_mode<synchronous>, transform_indices = @transform_15, window_bounds = array<i64: 1, 128>}, {transform_indices = @transform_16, window_bounds = array<i64: 1, 16, 128>}]} {
    %c0 = arith.constant 0 : index
    %c0_0 = arith.constant 0 : index
    %c0_1 = arith.constant 0 : index
    %0 = vector.load %arg1[%c0, %c0_0, %c0_1] : memref<1x16x128xf32, #tpu.memory_space<vmem>>, vector<1x16x128xf32>
    %1 = vector.shape_cast %0 : vector<1x16x128xf32> to vector<16x128xf32>
    %2 = tpu.iota {dimensions = array<i32: 0>} : vector<16x16xi32>
    %3 = tpu.iota {dimensions = array<i32: 1>} : vector<16x16xi32>
    %4 = arith.cmpi sge, %2, %3 : vector<16x16xi32>
    %c0_2 = arith.constant 0 : index
    %c0_3 = arith.constant 0 : index
    %c0_4 = arith.constant 0 : index
    %5 = vector.load %arg2[%c0_2, %c0_3, %c0_4] : memref<4x1x128xf32, #tpu.memory_space<vmem>>, vector<1x1x128xf32>
    %6 = vector.shape_cast %5 : vector<1x1x128xf32> to vector<1x128xf32>
    %c0_5 = arith.constant 0 : index
    %c0_6 = arith.constant 0 : index
    %c0_7 = arith.constant 0 : index
    %7 = vector.load %arg3[%c0_5, %c0_6, %c0_7] : memref<4x1x128xf32, #tpu.memory_space<vmem>>, vector<1x1x128xf32>
    %8 = vector.shape_cast %7 : vector<1x1x128xf32> to vector<1x128xf32>
    %cst = arith.constant dense<0.000000e+00> : vector<16xf32>
    %9 = vector.multi_reduction <add>, %1, %cst [1] : vector<16x128xf32> to vector<16xf32>
    %10 = vector.shape_cast %9 : vector<16xf32> to vector<16x1xf32>
    %cst_8 = arith.constant 1.280000e+02 : f32
    %11 = vector.broadcast %cst_8 : f32 to vector<16x1xf32>
    %12 = arith.divf %10, %11 : vector<16x1xf32>
    %13 = vector.broadcast %12 : vector<16x1xf32> to vector<16x128xf32>
    %14 = arith.subf %1, %13 : vector<16x128xf32>
    %15 = arith.mulf %14, %14 : vector<16x128xf32>
    %cst_9 = arith.constant dense<0.000000e+00> : vector<16xf32>
    %16 = vector.multi_reduction <add>, %15, %cst_9 [1] : vector<16x128xf32> to vector<16xf32>
    %17 = vector.shape_cast %16 : vector<16xf32> to vector<16x1xf32>
    %cst_10 = arith.constant 1.280000e+02 : f32
    %18 = vector.broadcast %cst_10 : f32 to vector<16x1xf32>
    %19 = arith.divf %17, %18 : vector<16x1xf32>
    %20 = vector.broadcast %12 : vector<16x1xf32> to vector<16x128xf32>
    %21 = arith.subf %1, %20 : vector<16x128xf32>
    %cst_11 = arith.constant 9.99999974E-6 : f32
    %22 = vector.broadcast %cst_11 : f32 to vector<16x1xf32>
    %23 = arith.addf %19, %22 : vector<16x1xf32>
    %24 = math.rsqrt %23 : vector<16x1xf32>
    %25 = vector.broadcast %24 : vector<16x1xf32> to vector<16x128xf32>
    %26 = arith.mulf %21, %25 : vector<16x128xf32>
    %27 = vector.broadcast %6 : vector<1x128xf32> to vector<16x128xf32>
    %28 = arith.mulf %26, %27 : vector<16x128xf32>
    %29 = vector.broadcast %8 : vector<1x128xf32> to vector<16x128xf32>
    %30 = arith.addf %28, %29 : vector<16x128xf32>
    %31 = arith.truncf %30 : vector<16x128xf32> to vector<16x128xbf16>
    %c0_12 = arith.constant 0 : index
    %c0_13 = arith.constant 0 : index
    %c0_14 = arith.constant 0 : index
    %32 = vector.load %arg4[%c0_12, %c0_13, %c0_14] : memref<4x384x128xbf16, #tpu.memory_space<vmem>>, vector<1x384x128xbf16>
    %33 = vector.shape_cast %32 : vector<1x384x128xbf16> to vector<384x128xbf16>
    %cst_15 = arith.constant dense<0.000000e+00> : vector<16x384xf32>
    %34 = tpu.matmul %31, %33, %cst_15 {dimension_numbers = #tpu.dot_dimension_numbers<[1], [1], [0], [0], [0, 0, 1, 0], [], []>} : vector<16x128xbf16>, vector<384x128xbf16>, vector<16x384xf32> -> vector<16x384xf32>
    %c0_16 = arith.constant 0 : index
    %c0_17 = arith.constant 0 : index
    %c0_18 = arith.constant 0 : index
    %35 = vector.load %arg5[%c0_16, %c0_17, %c0_18] : memref<4x128x128xbf16, #tpu.memory_space<vmem>>, vector<1x128x128xbf16>
    %36 = vector.shape_cast %35 : vector<1x128x128xbf16> to vector<128x128xbf16>
    %37 = vector.extract_strided_slice %34 {offsets = [0, 0], sizes = [16, 32], strides = [1, 1]} : vector<16x384xf32> to vector<16x32xf32>
    %38 = arith.truncf %37 : vector<16x32xf32> to vector<16x32xbf16>
    %39 = vector.extract_strided_slice %34 {offsets = [0, 128], sizes = [16, 32], strides = [1, 1]} : vector<16x384xf32> to vector<16x32xf32>
    %40 = arith.truncf %39 : vector<16x32xf32> to vector<16x32xbf16>
    %41 = vector.extract_strided_slice %34 {offsets = [0, 256], sizes = [16, 32], strides = [1, 1]} : vector<16x384xf32> to vector<16x32xf32>
    %42 = arith.truncf %41 : vector<16x32xf32> to vector<16x32xbf16>
    %cst_19 = arith.constant dense<0.000000e+00> : vector<16x16xf32>
    %43 = tpu.matmul %38, %40, %cst_19 {dimension_numbers = #tpu.dot_dimension_numbers<[1], [1], [0], [0], [0, 0, 1, 0], [], []>} : vector<16x32xbf16>, vector<16x32xbf16>, vector<16x16xf32> -> vector<16x16xf32>
    %cst_20 = arith.constant 0.176776692 : f32
    %44 = vector.broadcast %cst_20 : f32 to vector<16x16xf32>
    %45 = arith.mulf %43, %44 : vector<16x16xf32>
    %cst_21 = arith.constant -1.000000e+30 : f32
    %46 = vector.broadcast %cst_21 : f32 to vector<16x16xf32>
    %47 = arith.select %4, %45, %46 : vector<16x16xi1>, vector<16x16xf32>
    %cst_22 = arith.constant dense<0xFF800000> : vector<16xf32>
    %48 = vector.multi_reduction <maximumf>, %47, %cst_22 [1] : vector<16x16xf32> to vector<16xf32>
    %49 = vector.shape_cast %48 : vector<16xf32> to vector<16x1xf32>
    %50 = vector.broadcast %49 : vector<16x1xf32> to vector<16x16xf32>
    %51 = arith.subf %47, %50 : vector<16x16xf32>
    %52 = math.exp %51 : vector<16x16xf32>
    %cst_23 = arith.constant dense<0.000000e+00> : vector<16xf32>
    %53 = vector.multi_reduction <add>, %52, %cst_23 [1] : vector<16x16xf32> to vector<16xf32>
    %54 = vector.shape_cast %53 : vector<16xf32> to vector<16x1xf32>
    %55 = tpu.reciprocal %54 {approx = true} : vector<16x1xf32> -> vector<16x1xf32>
    %56 = vector.broadcast %55 : vector<16x1xf32> to vector<16x16xf32>
    %57 = arith.mulf %52, %56 : vector<16x16xf32>
    %58 = arith.truncf %57 : vector<16x16xf32> to vector<16x16xbf16>
    %cst_24 = arith.constant dense<0.000000e+00> : vector<16x32xf32>
    %59 = tpu.matmul %58, %42, %cst_24 {dimension_numbers = #tpu.dot_dimension_numbers<[1], [0], [0], [1], [0, 0, 1, 1], [], []>} : vector<16x16xbf16>, vector<16x32xbf16>, vector<16x32xf32> -> vector<16x32xf32>
    %60 = arith.truncf %59 : vector<16x32xf32> to vector<16x32xbf16>
    %61 = vector.extract_strided_slice %36 {offsets = [0, 0], sizes = [128, 32], strides = [1, 1]} : vector<128x128xbf16> to vector<128x32xbf16>
    %cst_25 = arith.constant dense<0.000000e+00> : vector<16x128xf32>
    %62 = tpu.matmul %60, %61, %cst_25 {dimension_numbers = #tpu.dot_dimension_numbers<[1], [1], [0], [0], [0, 0, 1, 0], [], []>} : vector<16x32xbf16>, vector<128x32xbf16>, vector<16x128xf32> -> vector<16x128xf32>
    %63 = vector.extract_strided_slice %34 {offsets = [0, 32], sizes = [16, 32], strides = [1, 1]} : vector<16x384xf32> to vector<16x32xf32>
    %64 = arith.truncf %63 : vector<16x32xf32> to vector<16x32xbf16>
    %65 = vector.extract_strided_slice %34 {offsets = [0, 160], sizes = [16, 32], strides = [1, 1]} : vector<16x384xf32> to vector<16x32xf32>
    %66 = arith.truncf %65 : vector<16x32xf32> to vector<16x32xbf16>
    %67 = vector.extract_strided_slice %34 {offsets = [0, 288], sizes = [16, 32], strides = [1, 1]} : vector<16x384xf32> to vector<16x32xf32>
    %68 = arith.truncf %67 : vector<16x32xf32> to vector<16x32xbf16>
    %cst_26 = arith.constant dense<0.000000e+00> : vector<16x16xf32>
    %69 = tpu.matmul %64, %66, %cst_26 {dimension_numbers = #tpu.dot_dimension_numbers<[1], [1], [0], [0], [0, 0, 1, 0], [], []>} : vector<16x32xbf16>, vector<16x32xbf16>, vector<16x16xf32> -> vector<16x16xf32>
    %cst_27 = arith.constant 0.176776692 : f32
    %70 = vector.broadcast %cst_27 : f32 to vector<16x16xf32>
    %71 = arith.mulf %69, %70 : vector<16x16xf32>
    %cst_28 = arith.constant -1.000000e+30 : f32
    %72 = vector.broadcast %cst_28 : f32 to vector<16x16xf32>
    %73 = arith.select %4, %71, %72 : vector<16x16xi1>, vector<16x16xf32>
    %cst_29 = arith.constant dense<0xFF800000> : vector<16xf32>
    %74 = vector.multi_reduction <maximumf>, %73, %cst_29 [1] : vector<16x16xf32> to vector<16xf32>
    %75 = vector.shape_cast %74 : vector<16xf32> to vector<16x1xf32>
    %76 = vector.broadcast %75 : vector<16x1xf32> to vector<16x16xf32>
    %77 = arith.subf %73, %76 : vector<16x16xf32>
    %78 = math.exp %77 : vector<16x16xf32>
    %cst_30 = arith.constant dense<0.000000e+00> : vector<16xf32>
    %79 = vector.multi_reduction <add>, %78, %cst_30 [1] : vector<16x16xf32> to vector<16xf32>
    %80 = vector.shape_cast %79 : vector<16xf32> to vector<16x1xf32>
    %81 = tpu.reciprocal %80 {approx = true} : vector<16x1xf32> -> vector<16x1xf32>
    %82 = vector.broadcast %81 : vector<16x1xf32> to vector<16x16xf32>
    %83 = arith.mulf %78, %82 : vector<16x16xf32>
    %84 = arith.truncf %83 : vector<16x16xf32> to vector<16x16xbf16>
    %cst_31 = arith.constant dense<0.000000e+00> : vector<16x32xf32>
    %85 = tpu.matmul %84, %68, %cst_31 {dimension_numbers = #tpu.dot_dimension_numbers<[1], [0], [0], [1], [0, 0, 1, 1], [], []>} : vector<16x16xbf16>, vector<16x32xbf16>, vector<16x32xf32> -> vector<16x32xf32>
    %86 = arith.truncf %85 : vector<16x32xf32> to vector<16x32xbf16>
    %87 = vector.extract_strided_slice %36 {offsets = [0, 32], sizes = [128, 32], strides = [1, 1]} : vector<128x128xbf16> to vector<128x32xbf16>
    %cst_32 = arith.constant dense<0.000000e+00> : vector<16x128xf32>
    %88 = tpu.matmul %86, %87, %cst_32 {dimension_numbers = #tpu.dot_dimension_numbers<[1], [1], [0], [0], [0, 0, 1, 0], [], []>} : vector<16x32xbf16>, vector<128x32xbf16>, vector<16x128xf32> -> vector<16x128xf32>
    %89 = arith.addf %62, %88 : vector<16x128xf32>
    %90 = vector.extract_strided_slice %34 {offsets = [0, 64], sizes = [16, 32], strides = [1, 1]} : vector<16x384xf32> to vector<16x32xf32>
    %91 = arith.truncf %90 : vector<16x32xf32> to vector<16x32xbf16>
    %92 = vector.extract_strided_slice %34 {offsets = [0, 192], sizes = [16, 32], strides = [1, 1]} : vector<16x384xf32> to vector<16x32xf32>
    %93 = arith.truncf %92 : vector<16x32xf32> to vector<16x32xbf16>
    %94 = vector.extract_strided_slice %34 {offsets = [0, 320], sizes = [16, 32], strides = [1, 1]} : vector<16x384xf32> to vector<16x32xf32>
    %95 = arith.truncf %94 : vector<16x32xf32> to vector<16x32xbf16>
    %cst_33 = arith.constant dense<0.000000e+00> : vector<16x16xf32>
    %96 = tpu.matmul %91, %93, %cst_33 {dimension_numbers = #tpu.dot_dimension_numbers<[1], [1], [0], [0], [0, 0, 1, 0], [], []>} : vector<16x32xbf16>, vector<16x32xbf16>, vector<16x16xf32> -> vector<16x16xf32>
    %cst_34 = arith.constant 0.176776692 : f32
    %97 = vector.broadcast %cst_34 : f32 to vector<16x16xf32>
    %98 = arith.mulf %96, %97 : vector<16x16xf32>
    %cst_35 = arith.constant -1.000000e+30 : f32
    %99 = vector.broadcast %cst_35 : f32 to vector<16x16xf32>
    %100 = arith.select %4, %98, %99 : vector<16x16xi1>, vector<16x16xf32>
    %cst_36 = arith.constant dense<0xFF800000> : vector<16xf32>
    %101 = vector.multi_reduction <maximumf>, %100, %cst_36 [1] : vector<16x16xf32> to vector<16xf32>
    %102 = vector.shape_cast %101 : vector<16xf32> to vector<16x1xf32>
    %103 = vector.broadcast %102 : vector<16x1xf32> to vector<16x16xf32>
    %104 = arith.subf %100, %103 : vector<16x16xf32>
    %105 = math.exp %104 : vector<16x16xf32>
    %cst_37 = arith.constant dense<0.000000e+00> : vector<16xf32>
    %106 = vector.multi_reduction <add>, %105, %cst_37 [1] : vector<16x16xf32> to vector<16xf32>
    %107 = vector.shape_cast %106 : vector<16xf32> to vector<16x1xf32>
    %108 = tpu.reciprocal %107 {approx = true} : vector<16x1xf32> -> vector<16x1xf32>
    %109 = vector.broadcast %108 : vector<16x1xf32> to vector<16x16xf32>
    %110 = arith.mulf %105, %109 : vector<16x16xf32>
    %111 = arith.truncf %110 : vector<16x16xf32> to vector<16x16xbf16>
    %cst_38 = arith.constant dense<0.000000e+00> : vector<16x32xf32>
    %112 = tpu.matmul %111, %95, %cst_38 {dimension_numbers = #tpu.dot_dimension_numbers<[1], [0], [0], [1], [0, 0, 1, 1], [], []>} : vector<16x16xbf16>, vector<16x32xbf16>, vector<16x32xf32> -> vector<16x32xf32>
    %113 = arith.truncf %112 : vector<16x32xf32> to vector<16x32xbf16>
    %114 = vector.extract_strided_slice %36 {offsets = [0, 64], sizes = [128, 32], strides = [1, 1]} : vector<128x128xbf16> to vector<128x32xbf16>
    %cst_39 = arith.constant dense<0.000000e+00> : vector<16x128xf32>
    %115 = tpu.matmul %113, %114, %cst_39 {dimension_numbers = #tpu.dot_dimension_numbers<[1], [1], [0], [0], [0, 0, 1, 0], [], []>} : vector<16x32xbf16>, vector<128x32xbf16>, vector<16x128xf32> -> vector<16x128xf32>
    %116 = arith.addf %89, %115 : vector<16x128xf32>
    %117 = vector.extract_strided_slice %34 {offsets = [0, 96], sizes = [16, 32], strides = [1, 1]} : vector<16x384xf32> to vector<16x32xf32>
    %118 = arith.truncf %117 : vector<16x32xf32> to vector<16x32xbf16>
    %119 = vector.extract_strided_slice %34 {offsets = [0, 224], sizes = [16, 32], strides = [1, 1]} : vector<16x384xf32> to vector<16x32xf32>
    %120 = arith.truncf %119 : vector<16x32xf32> to vector<16x32xbf16>
    %121 = vector.extract_strided_slice %34 {offsets = [0, 352], sizes = [16, 32], strides = [1, 1]} : vector<16x384xf32> to vector<16x32xf32>
    %122 = arith.truncf %121 : vector<16x32xf32> to vector<16x32xbf16>
    %cst_40 = arith.constant dense<0.000000e+00> : vector<16x16xf32>
    %123 = tpu.matmul %118, %120, %cst_40 {dimension_numbers = #tpu.dot_dimension_numbers<[1], [1], [0], [0], [0, 0, 1, 0], [], []>} : vector<16x32xbf16>, vector<16x32xbf16>, vector<16x16xf32> -> vector<16x16xf32>
    %cst_41 = arith.constant 0.176776692 : f32
    %124 = vector.broadcast %cst_41 : f32 to vector<16x16xf32>
    %125 = arith.mulf %123, %124 : vector<16x16xf32>
    %cst_42 = arith.constant -1.000000e+30 : f32
    %126 = vector.broadcast %cst_42 : f32 to vector<16x16xf32>
    %127 = arith.select %4, %125, %126 : vector<16x16xi1>, vector<16x16xf32>
    %cst_43 = arith.constant dense<0xFF800000> : vector<16xf32>
    %128 = vector.multi_reduction <maximumf>, %127, %cst_43 [1] : vector<16x16xf32> to vector<16xf32>
    %129 = vector.shape_cast %128 : vector<16xf32> to vector<16x1xf32>
    %130 = vector.broadcast %129 : vector<16x1xf32> to vector<16x16xf32>
    %131 = arith.subf %127, %130 : vector<16x16xf32>
    %132 = math.exp %131 : vector<16x16xf32>
    %cst_44 = arith.constant dense<0.000000e+00> : vector<16xf32>
    %133 = vector.multi_reduction <add>, %132, %cst_44 [1] : vector<16x16xf32> to vector<16xf32>
    %134 = vector.shape_cast %133 : vector<16xf32> to vector<16x1xf32>
    %135 = tpu.reciprocal %134 {approx = true} : vector<16x1xf32> -> vector<16x1xf32>
    %136 = vector.broadcast %135 : vector<16x1xf32> to vector<16x16xf32>
    %137 = arith.mulf %132, %136 : vector<16x16xf32>
    %138 = arith.truncf %137 : vector<16x16xf32> to vector<16x16xbf16>
    %cst_45 = arith.constant dense<0.000000e+00> : vector<16x32xf32>
    %139 = tpu.matmul %138, %122, %cst_45 {dimension_numbers = #tpu.dot_dimension_numbers<[1], [0], [0], [1], [0, 0, 1, 1], [], []>} : vector<16x16xbf16>, vector<16x32xbf16>, vector<16x32xf32> -> vector<16x32xf32>
    %140 = arith.truncf %139 : vector<16x32xf32> to vector<16x32xbf16>
    %141 = vector.extract_strided_slice %36 {offsets = [0, 96], sizes = [128, 32], strides = [1, 1]} : vector<128x128xbf16> to vector<128x32xbf16>
    %cst_46 = arith.constant dense<0.000000e+00> : vector<16x128xf32>
    %142 = tpu.matmul %140, %141, %cst_46 {dimension_numbers = #tpu.dot_dimension_numbers<[1], [1], [0], [0], [0, 0, 1, 0], [], []>} : vector<16x32xbf16>, vector<128x32xbf16>, vector<16x128xf32> -> vector<16x128xf32>
    %143 = arith.addf %116, %142 : vector<16x128xf32>
    %144 = arith.addf %1, %143 : vector<16x128xf32>
    %c0_47 = arith.constant 0 : index
    %c0_48 = arith.constant 0 : index
    %c0_49 = arith.constant 0 : index
    %145 = vector.load %arg6[%c0_47, %c0_48, %c0_49] : memref<4x1x128xf32, #tpu.memory_space<vmem>>, vector<1x1x128xf32>
    %146 = vector.shape_cast %145 : vector<1x1x128xf32> to vector<1x128xf32>
    %147 = vector.broadcast %146 : vector<1x128xf32> to vector<16x128xf32>
    %148 = arith.addf %144, %147 : vector<16x128xf32>
    %c0_50 = arith.constant 0 : index
    %c0_51 = arith.constant 0 : index
    %c0_52 = arith.constant 0 : index
    %149 = vector.load %arg7[%c0_50, %c0_51, %c0_52] : memref<4x1x128xf32, #tpu.memory_space<vmem>>, vector<1x1x128xf32>
    %150 = vector.shape_cast %149 : vector<1x1x128xf32> to vector<1x128xf32>
    %c0_53 = arith.constant 0 : index
    %c0_54 = arith.constant 0 : index
    %c0_55 = arith.constant 0 : index
    %151 = vector.load %arg8[%c0_53, %c0_54, %c0_55] : memref<4x1x128xf32, #tpu.memory_space<vmem>>, vector<1x1x128xf32>
    %152 = vector.shape_cast %151 : vector<1x1x128xf32> to vector<1x128xf32>
    %cst_56 = arith.constant dense<0.000000e+00> : vector<16xf32>
    %153 = vector.multi_reduction <add>, %148, %cst_56 [1] : vector<16x128xf32> to vector<16xf32>
    %154 = vector.shape_cast %153 : vector<16xf32> to vector<16x1xf32>
    %cst_57 = arith.constant 1.280000e+02 : f32
    %155 = vector.broadcast %cst_57 : f32 to vector<16x1xf32>
    %156 = arith.divf %154, %155 : vector<16x1xf32>
    %157 = vector.broadcast %156 : vector<16x1xf32> to vector<16x128xf32>
    %158 = arith.subf %148, %157 : vector<16x128xf32>
    %159 = arith.mulf %158, %158 : vector<16x128xf32>
    %cst_58 = arith.constant dense<0.000000e+00> : vector<16xf32>
    %160 = vector.multi_reduction <add>, %159, %cst_58 [1] : vector<16x128xf32> to vector<16xf32>
    %161 = vector.shape_cast %160 : vector<16xf32> to vector<16x1xf32>
    %cst_59 = arith.constant 1.280000e+02 : f32
    %162 = vector.broadcast %cst_59 : f32 to vector<16x1xf32>
    %163 = arith.divf %161, %162 : vector<16x1xf32>
    %164 = vector.broadcast %156 : vector<16x1xf32> to vector<16x128xf32>
    %165 = arith.subf %148, %164 : vector<16x128xf32>
    %cst_60 = arith.constant 9.99999974E-6 : f32
    %166 = vector.broadcast %cst_60 : f32 to vector<16x1xf32>
    %167 = arith.addf %163, %166 : vector<16x1xf32>
    %168 = math.rsqrt %167 : vector<16x1xf32>
    %169 = vector.broadcast %168 : vector<16x1xf32> to vector<16x128xf32>
    %170 = arith.mulf %165, %169 : vector<16x128xf32>
    %171 = vector.broadcast %150 : vector<1x128xf32> to vector<16x128xf32>
    %172 = arith.mulf %170, %171 : vector<16x128xf32>
    %173 = vector.broadcast %152 : vector<1x128xf32> to vector<16x128xf32>
    %174 = arith.addf %172, %173 : vector<16x128xf32>
    %175 = arith.truncf %174 : vector<16x128xf32> to vector<16x128xbf16>
    %c0_61 = arith.constant 0 : index
    %c0_62 = arith.constant 0 : index
    %c0_63 = arith.constant 0 : index
    %176 = vector.load %arg9[%c0_61, %c0_62, %c0_63] : memref<4x512x128xbf16, #tpu.memory_space<vmem>>, vector<1x512x128xbf16>
    %177 = vector.shape_cast %176 : vector<1x512x128xbf16> to vector<512x128xbf16>
    %cst_64 = arith.constant dense<0.000000e+00> : vector<16x512xf32>
    %178 = tpu.matmul %175, %177, %cst_64 {dimension_numbers = #tpu.dot_dimension_numbers<[1], [1], [0], [0], [0, 0, 1, 0], [], []>} : vector<16x128xbf16>, vector<512x128xbf16>, vector<16x512xf32> -> vector<16x512xf32>
    %c0_65 = arith.constant 0 : index
    %c0_66 = arith.constant 0 : index
    %c0_67 = arith.constant 0 : index
    %179 = vector.load %arg10[%c0_65, %c0_66, %c0_67] : memref<4x1x512xf32, #tpu.memory_space<vmem>>, vector<1x1x512xf32>
    %180 = vector.shape_cast %179 : vector<1x1x512xf32> to vector<1x512xf32>
    %181 = vector.broadcast %180 : vector<1x512xf32> to vector<16x512xf32>
    %182 = arith.addf %178, %181 : vector<16x512xf32>
    %cst_68 = arith.constant 0.000000e+00 : f32
    %183 = vector.broadcast %cst_68 : f32 to vector<16x512xf32>
    %184 = arith.maximumf %182, %183 : vector<16x512xf32>
    %185 = arith.truncf %184 : vector<16x512xf32> to vector<16x512xbf16>
    %c0_69 = arith.constant 0 : index
    %c0_70 = arith.constant 0 : index
    %c0_71 = arith.constant 0 : index
    %186 = vector.load %arg11[%c0_69, %c0_70, %c0_71] : memref<4x128x512xbf16, #tpu.memory_space<vmem>>, vector<1x128x512xbf16>
    %187 = vector.shape_cast %186 : vector<1x128x512xbf16> to vector<128x512xbf16>
    %cst_72 = arith.constant dense<0.000000e+00> : vector<16x128xf32>
    %188 = tpu.matmul %185, %187, %cst_72 {dimension_numbers = #tpu.dot_dimension_numbers<[1], [1], [0], [0], [0, 0, 1, 0], [], []>} : vector<16x512xbf16>, vector<128x512xbf16>, vector<16x128xf32> -> vector<16x128xf32>
    %c0_73 = arith.constant 0 : index
    %c0_74 = arith.constant 0 : index
    %c0_75 = arith.constant 0 : index
    %189 = vector.load %arg12[%c0_73, %c0_74, %c0_75] : memref<4x1x128xf32, #tpu.memory_space<vmem>>, vector<1x1x128xf32>
    %190 = vector.shape_cast %189 : vector<1x1x128xf32> to vector<1x128xf32>
    %191 = vector.broadcast %190 : vector<1x128xf32> to vector<16x128xf32>
    %192 = arith.addf %188, %191 : vector<16x128xf32>
    %193 = arith.addf %148, %192 : vector<16x128xf32>
    %c1 = arith.constant 1 : index
    %c0_76 = arith.constant 0 : index
    %c0_77 = arith.constant 0 : index
    %194 = vector.load %arg2[%c1, %c0_76, %c0_77] : memref<4x1x128xf32, #tpu.memory_space<vmem>>, vector<1x1x128xf32>
    %195 = vector.shape_cast %194 : vector<1x1x128xf32> to vector<1x128xf32>
    %c1_78 = arith.constant 1 : index
    %c0_79 = arith.constant 0 : index
    %c0_80 = arith.constant 0 : index
    %196 = vector.load %arg3[%c1_78, %c0_79, %c0_80] : memref<4x1x128xf32, #tpu.memory_space<vmem>>, vector<1x1x128xf32>
    %197 = vector.shape_cast %196 : vector<1x1x128xf32> to vector<1x128xf32>
    %cst_81 = arith.constant dense<0.000000e+00> : vector<16xf32>
    %198 = vector.multi_reduction <add>, %193, %cst_81 [1] : vector<16x128xf32> to vector<16xf32>
    %199 = vector.shape_cast %198 : vector<16xf32> to vector<16x1xf32>
    %cst_82 = arith.constant 1.280000e+02 : f32
    %200 = vector.broadcast %cst_82 : f32 to vector<16x1xf32>
    %201 = arith.divf %199, %200 : vector<16x1xf32>
    %202 = vector.broadcast %201 : vector<16x1xf32> to vector<16x128xf32>
    %203 = arith.subf %193, %202 : vector<16x128xf32>
    %204 = arith.mulf %203, %203 : vector<16x128xf32>
    %cst_83 = arith.constant dense<0.000000e+00> : vector<16xf32>
    %205 = vector.multi_reduction <add>, %204, %cst_83 [1] : vector<16x128xf32> to vector<16xf32>
    %206 = vector.shape_cast %205 : vector<16xf32> to vector<16x1xf32>
    %cst_84 = arith.constant 1.280000e+02 : f32
    %207 = vector.broadcast %cst_84 : f32 to vector<16x1xf32>
    %208 = arith.divf %206, %207 : vector<16x1xf32>
    %209 = vector.broadcast %201 : vector<16x1xf32> to vector<16x128xf32>
    %210 = arith.subf %193, %209 : vector<16x128xf32>
    %cst_85 = arith.constant 9.99999974E-6 : f32
    %211 = vector.broadcast %cst_85 : f32 to vector<16x1xf32>
    %212 = arith.addf %208, %211 : vector<16x1xf32>
    %213 = math.rsqrt %212 : vector<16x1xf32>
    %214 = vector.broadcast %213 : vector<16x1xf32> to vector<16x128xf32>
    %215 = arith.mulf %210, %214 : vector<16x128xf32>
    %216 = vector.broadcast %195 : vector<1x128xf32> to vector<16x128xf32>
    %217 = arith.mulf %215, %216 : vector<16x128xf32>
    %218 = vector.broadcast %197 : vector<1x128xf32> to vector<16x128xf32>
    %219 = arith.addf %217, %218 : vector<16x128xf32>
    %220 = arith.truncf %219 : vector<16x128xf32> to vector<16x128xbf16>
    %c1_86 = arith.constant 1 : index
    %c0_87 = arith.constant 0 : index
    %c0_88 = arith.constant 0 : index
    %221 = vector.load %arg4[%c1_86, %c0_87, %c0_88] : memref<4x384x128xbf16, #tpu.memory_space<vmem>>, vector<1x384x128xbf16>
    %222 = vector.shape_cast %221 : vector<1x384x128xbf16> to vector<384x128xbf16>
    %cst_89 = arith.constant dense<0.000000e+00> : vector<16x384xf32>
    %223 = tpu.matmul %220, %222, %cst_89 {dimension_numbers = #tpu.dot_dimension_numbers<[1], [1], [0], [0], [0, 0, 1, 0], [], []>} : vector<16x128xbf16>, vector<384x128xbf16>, vector<16x384xf32> -> vector<16x384xf32>
    %c1_90 = arith.constant 1 : index
    %c0_91 = arith.constant 0 : index
    %c0_92 = arith.constant 0 : index
    %224 = vector.load %arg5[%c1_90, %c0_91, %c0_92] : memref<4x128x128xbf16, #tpu.memory_space<vmem>>, vector<1x128x128xbf16>
    %225 = vector.shape_cast %224 : vector<1x128x128xbf16> to vector<128x128xbf16>
    %226 = vector.extract_strided_slice %223 {offsets = [0, 0], sizes = [16, 32], strides = [1, 1]} : vector<16x384xf32> to vector<16x32xf32>
    %227 = arith.truncf %226 : vector<16x32xf32> to vector<16x32xbf16>
    %228 = vector.extract_strided_slice %223 {offsets = [0, 128], sizes = [16, 32], strides = [1, 1]} : vector<16x384xf32> to vector<16x32xf32>
    %229 = arith.truncf %228 : vector<16x32xf32> to vector<16x32xbf16>
    %230 = vector.extract_strided_slice %223 {offsets = [0, 256], sizes = [16, 32], strides = [1, 1]} : vector<16x384xf32> to vector<16x32xf32>
    %231 = arith.truncf %230 : vector<16x32xf32> to vector<16x32xbf16>
    %cst_93 = arith.constant dense<0.000000e+00> : vector<16x16xf32>
    %232 = tpu.matmul %227, %229, %cst_93 {dimension_numbers = #tpu.dot_dimension_numbers<[1], [1], [0], [0], [0, 0, 1, 0], [], []>} : vector<16x32xbf16>, vector<16x32xbf16>, vector<16x16xf32> -> vector<16x16xf32>
    %cst_94 = arith.constant 0.176776692 : f32
    %233 = vector.broadcast %cst_94 : f32 to vector<16x16xf32>
    %234 = arith.mulf %232, %233 : vector<16x16xf32>
    %cst_95 = arith.constant -1.000000e+30 : f32
    %235 = vector.broadcast %cst_95 : f32 to vector<16x16xf32>
    %236 = arith.select %4, %234, %235 : vector<16x16xi1>, vector<16x16xf32>
    %cst_96 = arith.constant dense<0xFF800000> : vector<16xf32>
    %237 = vector.multi_reduction <maximumf>, %236, %cst_96 [1] : vector<16x16xf32> to vector<16xf32>
    %238 = vector.shape_cast %237 : vector<16xf32> to vector<16x1xf32>
    %239 = vector.broadcast %238 : vector<16x1xf32> to vector<16x16xf32>
    %240 = arith.subf %236, %239 : vector<16x16xf32>
    %241 = math.exp %240 : vector<16x16xf32>
    %cst_97 = arith.constant dense<0.000000e+00> : vector<16xf32>
    %242 = vector.multi_reduction <add>, %241, %cst_97 [1] : vector<16x16xf32> to vector<16xf32>
    %243 = vector.shape_cast %242 : vector<16xf32> to vector<16x1xf32>
    %244 = tpu.reciprocal %243 {approx = true} : vector<16x1xf32> -> vector<16x1xf32>
    %245 = vector.broadcast %244 : vector<16x1xf32> to vector<16x16xf32>
    %246 = arith.mulf %241, %245 : vector<16x16xf32>
    %247 = arith.truncf %246 : vector<16x16xf32> to vector<16x16xbf16>
    %cst_98 = arith.constant dense<0.000000e+00> : vector<16x32xf32>
    %248 = tpu.matmul %247, %231, %cst_98 {dimension_numbers = #tpu.dot_dimension_numbers<[1], [0], [0], [1], [0, 0, 1, 1], [], []>} : vector<16x16xbf16>, vector<16x32xbf16>, vector<16x32xf32> -> vector<16x32xf32>
    %249 = arith.truncf %248 : vector<16x32xf32> to vector<16x32xbf16>
    %250 = vector.extract_strided_slice %225 {offsets = [0, 0], sizes = [128, 32], strides = [1, 1]} : vector<128x128xbf16> to vector<128x32xbf16>
    %cst_99 = arith.constant dense<0.000000e+00> : vector<16x128xf32>
    %251 = tpu.matmul %249, %250, %cst_99 {dimension_numbers = #tpu.dot_dimension_numbers<[1], [1], [0], [0], [0, 0, 1, 0], [], []>} : vector<16x32xbf16>, vector<128x32xbf16>, vector<16x128xf32> -> vector<16x128xf32>
    %252 = vector.extract_strided_slice %223 {offsets = [0, 32], sizes = [16, 32], strides = [1, 1]} : vector<16x384xf32> to vector<16x32xf32>
    %253 = arith.truncf %252 : vector<16x32xf32> to vector<16x32xbf16>
    %254 = vector.extract_strided_slice %223 {offsets = [0, 160], sizes = [16, 32], strides = [1, 1]} : vector<16x384xf32> to vector<16x32xf32>
    %255 = arith.truncf %254 : vector<16x32xf32> to vector<16x32xbf16>
    %256 = vector.extract_strided_slice %223 {offsets = [0, 288], sizes = [16, 32], strides = [1, 1]} : vector<16x384xf32> to vector<16x32xf32>
    %257 = arith.truncf %256 : vector<16x32xf32> to vector<16x32xbf16>
    %cst_100 = arith.constant dense<0.000000e+00> : vector<16x16xf32>
    %258 = tpu.matmul %253, %255, %cst_100 {dimension_numbers = #tpu.dot_dimension_numbers<[1], [1], [0], [0], [0, 0, 1, 0], [], []>} : vector<16x32xbf16>, vector<16x32xbf16>, vector<16x16xf32> -> vector<16x16xf32>
    %cst_101 = arith.constant 0.176776692 : f32
    %259 = vector.broadcast %cst_101 : f32 to vector<16x16xf32>
    %260 = arith.mulf %258, %259 : vector<16x16xf32>
    %cst_102 = arith.constant -1.000000e+30 : f32
    %261 = vector.broadcast %cst_102 : f32 to vector<16x16xf32>
    %262 = arith.select %4, %260, %261 : vector<16x16xi1>, vector<16x16xf32>
    %cst_103 = arith.constant dense<0xFF800000> : vector<16xf32>
    %263 = vector.multi_reduction <maximumf>, %262, %cst_103 [1] : vector<16x16xf32> to vector<16xf32>
    %264 = vector.shape_cast %263 : vector<16xf32> to vector<16x1xf32>
    %265 = vector.broadcast %264 : vector<16x1xf32> to vector<16x16xf32>
    %266 = arith.subf %262, %265 : vector<16x16xf32>
    %267 = math.exp %266 : vector<16x16xf32>
    %cst_104 = arith.constant dense<0.000000e+00> : vector<16xf32>
    %268 = vector.multi_reduction <add>, %267, %cst_104 [1] : vector<16x16xf32> to vector<16xf32>
    %269 = vector.shape_cast %268 : vector<16xf32> to vector<16x1xf32>
    %270 = tpu.reciprocal %269 {approx = true} : vector<16x1xf32> -> vector<16x1xf32>
    %271 = vector.broadcast %270 : vector<16x1xf32> to vector<16x16xf32>
    %272 = arith.mulf %267, %271 : vector<16x16xf32>
    %273 = arith.truncf %272 : vector<16x16xf32> to vector<16x16xbf16>
    %cst_105 = arith.constant dense<0.000000e+00> : vector<16x32xf32>
    %274 = tpu.matmul %273, %257, %cst_105 {dimension_numbers = #tpu.dot_dimension_numbers<[1], [0], [0], [1], [0, 0, 1, 1], [], []>} : vector<16x16xbf16>, vector<16x32xbf16>, vector<16x32xf32> -> vector<16x32xf32>
    %275 = arith.truncf %274 : vector<16x32xf32> to vector<16x32xbf16>
    %276 = vector.extract_strided_slice %225 {offsets = [0, 32], sizes = [128, 32], strides = [1, 1]} : vector<128x128xbf16> to vector<128x32xbf16>
    %cst_106 = arith.constant dense<0.000000e+00> : vector<16x128xf32>
    %277 = tpu.matmul %275, %276, %cst_106 {dimension_numbers = #tpu.dot_dimension_numbers<[1], [1], [0], [0], [0, 0, 1, 0], [], []>} : vector<16x32xbf16>, vector<128x32xbf16>, vector<16x128xf32> -> vector<16x128xf32>
    %278 = arith.addf %251, %277 : vector<16x128xf32>
    %279 = vector.extract_strided_slice %223 {offsets = [0, 64], sizes = [16, 32], strides = [1, 1]} : vector<16x384xf32> to vector<16x32xf32>
    %280 = arith.truncf %279 : vector<16x32xf32> to vector<16x32xbf16>
    %281 = vector.extract_strided_slice %223 {offsets = [0, 192], sizes = [16, 32], strides = [1, 1]} : vector<16x384xf32> to vector<16x32xf32>
    %282 = arith.truncf %281 : vector<16x32xf32> to vector<16x32xbf16>
    %283 = vector.extract_strided_slice %223 {offsets = [0, 320], sizes = [16, 32], strides = [1, 1]} : vector<16x384xf32> to vector<16x32xf32>
    %284 = arith.truncf %283 : vector<16x32xf32> to vector<16x32xbf16>
    %cst_107 = arith.constant dense<0.000000e+00> : vector<16x16xf32>
    %285 = tpu.matmul %280, %282, %cst_107 {dimension_numbers = #tpu.dot_dimension_numbers<[1], [1], [0], [0], [0, 0, 1, 0], [], []>} : vector<16x32xbf16>, vector<16x32xbf16>, vector<16x16xf32> -> vector<16x16xf32>
    %cst_108 = arith.constant 0.176776692 : f32
    %286 = vector.broadcast %cst_108 : f32 to vector<16x16xf32>
    %287 = arith.mulf %285, %286 : vector<16x16xf32>
    %cst_109 = arith.constant -1.000000e+30 : f32
    %288 = vector.broadcast %cst_109 : f32 to vector<16x16xf32>
    %289 = arith.select %4, %287, %288 : vector<16x16xi1>, vector<16x16xf32>
    %cst_110 = arith.constant dense<0xFF800000> : vector<16xf32>
    %290 = vector.multi_reduction <maximumf>, %289, %cst_110 [1] : vector<16x16xf32> to vector<16xf32>
    %291 = vector.shape_cast %290 : vector<16xf32> to vector<16x1xf32>
    %292 = vector.broadcast %291 : vector<16x1xf32> to vector<16x16xf32>
    %293 = arith.subf %289, %292 : vector<16x16xf32>
    %294 = math.exp %293 : vector<16x16xf32>
    %cst_111 = arith.constant dense<0.000000e+00> : vector<16xf32>
    %295 = vector.multi_reduction <add>, %294, %cst_111 [1] : vector<16x16xf32> to vector<16xf32>
    %296 = vector.shape_cast %295 : vector<16xf32> to vector<16x1xf32>
    %297 = tpu.reciprocal %296 {approx = true} : vector<16x1xf32> -> vector<16x1xf32>
    %298 = vector.broadcast %297 : vector<16x1xf32> to vector<16x16xf32>
    %299 = arith.mulf %294, %298 : vector<16x16xf32>
    %300 = arith.truncf %299 : vector<16x16xf32> to vector<16x16xbf16>
    %cst_112 = arith.constant dense<0.000000e+00> : vector<16x32xf32>
    %301 = tpu.matmul %300, %284, %cst_112 {dimension_numbers = #tpu.dot_dimension_numbers<[1], [0], [0], [1], [0, 0, 1, 1], [], []>} : vector<16x16xbf16>, vector<16x32xbf16>, vector<16x32xf32> -> vector<16x32xf32>
    %302 = arith.truncf %301 : vector<16x32xf32> to vector<16x32xbf16>
    %303 = vector.extract_strided_slice %225 {offsets = [0, 64], sizes = [128, 32], strides = [1, 1]} : vector<128x128xbf16> to vector<128x32xbf16>
    %cst_113 = arith.constant dense<0.000000e+00> : vector<16x128xf32>
    %304 = tpu.matmul %302, %303, %cst_113 {dimension_numbers = #tpu.dot_dimension_numbers<[1], [1], [0], [0], [0, 0, 1, 0], [], []>} : vector<16x32xbf16>, vector<128x32xbf16>, vector<16x128xf32> -> vector<16x128xf32>
    %305 = arith.addf %278, %304 : vector<16x128xf32>
    %306 = vector.extract_strided_slice %223 {offsets = [0, 96], sizes = [16, 32], strides = [1, 1]} : vector<16x384xf32> to vector<16x32xf32>
    %307 = arith.truncf %306 : vector<16x32xf32> to vector<16x32xbf16>
    %308 = vector.extract_strided_slice %223 {offsets = [0, 224], sizes = [16, 32], strides = [1, 1]} : vector<16x384xf32> to vector<16x32xf32>
    %309 = arith.truncf %308 : vector<16x32xf32> to vector<16x32xbf16>
    %310 = vector.extract_strided_slice %223 {offsets = [0, 352], sizes = [16, 32], strides = [1, 1]} : vector<16x384xf32> to vector<16x32xf32>
    %311 = arith.truncf %310 : vector<16x32xf32> to vector<16x32xbf16>
    %cst_114 = arith.constant dense<0.000000e+00> : vector<16x16xf32>
    %312 = tpu.matmul %307, %309, %cst_114 {dimension_numbers = #tpu.dot_dimension_numbers<[1], [1], [0], [0], [0, 0, 1, 0], [], []>} : vector<16x32xbf16>, vector<16x32xbf16>, vector<16x16xf32> -> vector<16x16xf32>
    %cst_115 = arith.constant 0.176776692 : f32
    %313 = vector.broadcast %cst_115 : f32 to vector<16x16xf32>
    %314 = arith.mulf %312, %313 : vector<16x16xf32>
    %cst_116 = arith.constant -1.000000e+30 : f32
    %315 = vector.broadcast %cst_116 : f32 to vector<16x16xf32>
    %316 = arith.select %4, %314, %315 : vector<16x16xi1>, vector<16x16xf32>
    %cst_117 = arith.constant dense<0xFF800000> : vector<16xf32>
    %317 = vector.multi_reduction <maximumf>, %316, %cst_117 [1] : vector<16x16xf32> to vector<16xf32>
    %318 = vector.shape_cast %317 : vector<16xf32> to vector<16x1xf32>
    %319 = vector.broadcast %318 : vector<16x1xf32> to vector<16x16xf32>
    %320 = arith.subf %316, %319 : vector<16x16xf32>
    %321 = math.exp %320 : vector<16x16xf32>
    %cst_118 = arith.constant dense<0.000000e+00> : vector<16xf32>
    %322 = vector.multi_reduction <add>, %321, %cst_118 [1] : vector<16x16xf32> to vector<16xf32>
    %323 = vector.shape_cast %322 : vector<16xf32> to vector<16x1xf32>
    %324 = tpu.reciprocal %323 {approx = true} : vector<16x1xf32> -> vector<16x1xf32>
    %325 = vector.broadcast %324 : vector<16x1xf32> to vector<16x16xf32>
    %326 = arith.mulf %321, %325 : vector<16x16xf32>
    %327 = arith.truncf %326 : vector<16x16xf32> to vector<16x16xbf16>
    %cst_119 = arith.constant dense<0.000000e+00> : vector<16x32xf32>
    %328 = tpu.matmul %327, %311, %cst_119 {dimension_numbers = #tpu.dot_dimension_numbers<[1], [0], [0], [1], [0, 0, 1, 1], [], []>} : vector<16x16xbf16>, vector<16x32xbf16>, vector<16x32xf32> -> vector<16x32xf32>
    %329 = arith.truncf %328 : vector<16x32xf32> to vector<16x32xbf16>
    %330 = vector.extract_strided_slice %225 {offsets = [0, 96], sizes = [128, 32], strides = [1, 1]} : vector<128x128xbf16> to vector<128x32xbf16>
    %cst_120 = arith.constant dense<0.000000e+00> : vector<16x128xf32>
    %331 = tpu.matmul %329, %330, %cst_120 {dimension_numbers = #tpu.dot_dimension_numbers<[1], [1], [0], [0], [0, 0, 1, 0], [], []>} : vector<16x32xbf16>, vector<128x32xbf16>, vector<16x128xf32> -> vector<16x128xf32>
    %332 = arith.addf %305, %331 : vector<16x128xf32>
    %333 = arith.addf %193, %332 : vector<16x128xf32>
    %c1_121 = arith.constant 1 : index
    %c0_122 = arith.constant 0 : index
    %c0_123 = arith.constant 0 : index
    %334 = vector.load %arg6[%c1_121, %c0_122, %c0_123] : memref<4x1x128xf32, #tpu.memory_space<vmem>>, vector<1x1x128xf32>
    %335 = vector.shape_cast %334 : vector<1x1x128xf32> to vector<1x128xf32>
    %336 = vector.broadcast %335 : vector<1x128xf32> to vector<16x128xf32>
    %337 = arith.addf %333, %336 : vector<16x128xf32>
    %c1_124 = arith.constant 1 : index
    %c0_125 = arith.constant 0 : index
    %c0_126 = arith.constant 0 : index
    %338 = vector.load %arg7[%c1_124, %c0_125, %c0_126] : memref<4x1x128xf32, #tpu.memory_space<vmem>>, vector<1x1x128xf32>
    %339 = vector.shape_cast %338 : vector<1x1x128xf32> to vector<1x128xf32>
    %c1_127 = arith.constant 1 : index
    %c0_128 = arith.constant 0 : index
    %c0_129 = arith.constant 0 : index
    %340 = vector.load %arg8[%c1_127, %c0_128, %c0_129] : memref<4x1x128xf32, #tpu.memory_space<vmem>>, vector<1x1x128xf32>
    %341 = vector.shape_cast %340 : vector<1x1x128xf32> to vector<1x128xf32>
    %cst_130 = arith.constant dense<0.000000e+00> : vector<16xf32>
    %342 = vector.multi_reduction <add>, %337, %cst_130 [1] : vector<16x128xf32> to vector<16xf32>
    %343 = vector.shape_cast %342 : vector<16xf32> to vector<16x1xf32>
    %cst_131 = arith.constant 1.280000e+02 : f32
    %344 = vector.broadcast %cst_131 : f32 to vector<16x1xf32>
    %345 = arith.divf %343, %344 : vector<16x1xf32>
    %346 = vector.broadcast %345 : vector<16x1xf32> to vector<16x128xf32>
    %347 = arith.subf %337, %346 : vector<16x128xf32>
    %348 = arith.mulf %347, %347 : vector<16x128xf32>
    %cst_132 = arith.constant dense<0.000000e+00> : vector<16xf32>
    %349 = vector.multi_reduction <add>, %348, %cst_132 [1] : vector<16x128xf32> to vector<16xf32>
    %350 = vector.shape_cast %349 : vector<16xf32> to vector<16x1xf32>
    %cst_133 = arith.constant 1.280000e+02 : f32
    %351 = vector.broadcast %cst_133 : f32 to vector<16x1xf32>
    %352 = arith.divf %350, %351 : vector<16x1xf32>
    %353 = vector.broadcast %345 : vector<16x1xf32> to vector<16x128xf32>
    %354 = arith.subf %337, %353 : vector<16x128xf32>
    %cst_134 = arith.constant 9.99999974E-6 : f32
    %355 = vector.broadcast %cst_134 : f32 to vector<16x1xf32>
    %356 = arith.addf %352, %355 : vector<16x1xf32>
    %357 = math.rsqrt %356 : vector<16x1xf32>
    %358 = vector.broadcast %357 : vector<16x1xf32> to vector<16x128xf32>
    %359 = arith.mulf %354, %358 : vector<16x128xf32>
    %360 = vector.broadcast %339 : vector<1x128xf32> to vector<16x128xf32>
    %361 = arith.mulf %359, %360 : vector<16x128xf32>
    %362 = vector.broadcast %341 : vector<1x128xf32> to vector<16x128xf32>
    %363 = arith.addf %361, %362 : vector<16x128xf32>
    %364 = arith.truncf %363 : vector<16x128xf32> to vector<16x128xbf16>
    %c1_135 = arith.constant 1 : index
    %c0_136 = arith.constant 0 : index
    %c0_137 = arith.constant 0 : index
    %365 = vector.load %arg9[%c1_135, %c0_136, %c0_137] : memref<4x512x128xbf16, #tpu.memory_space<vmem>>, vector<1x512x128xbf16>
    %366 = vector.shape_cast %365 : vector<1x512x128xbf16> to vector<512x128xbf16>
    %cst_138 = arith.constant dense<0.000000e+00> : vector<16x512xf32>
    %367 = tpu.matmul %364, %366, %cst_138 {dimension_numbers = #tpu.dot_dimension_numbers<[1], [1], [0], [0], [0, 0, 1, 0], [], []>} : vector<16x128xbf16>, vector<512x128xbf16>, vector<16x512xf32> -> vector<16x512xf32>
    %c1_139 = arith.constant 1 : index
    %c0_140 = arith.constant 0 : index
    %c0_141 = arith.constant 0 : index
    %368 = vector.load %arg10[%c1_139, %c0_140, %c0_141] : memref<4x1x512xf32, #tpu.memory_space<vmem>>, vector<1x1x512xf32>
    %369 = vector.shape_cast %368 : vector<1x1x512xf32> to vector<1x512xf32>
    %370 = vector.broadcast %369 : vector<1x512xf32> to vector<16x512xf32>
    %371 = arith.addf %367, %370 : vector<16x512xf32>
    %cst_142 = arith.constant 0.000000e+00 : f32
    %372 = vector.broadcast %cst_142 : f32 to vector<16x512xf32>
    %373 = arith.maximumf %371, %372 : vector<16x512xf32>
    %374 = arith.truncf %373 : vector<16x512xf32> to vector<16x512xbf16>
    %c1_143 = arith.constant 1 : index
    %c0_144 = arith.constant 0 : index
    %c0_145 = arith.constant 0 : index
    %375 = vector.load %arg11[%c1_143, %c0_144, %c0_145] : memref<4x128x512xbf16, #tpu.memory_space<vmem>>, vector<1x128x512xbf16>
    %376 = vector.shape_cast %375 : vector<1x128x512xbf16> to vector<128x512xbf16>
    %cst_146 = arith.constant dense<0.000000e+00> : vector<16x128xf32>
    %377 = tpu.matmul %374, %376, %cst_146 {dimension_numbers = #tpu.dot_dimension_numbers<[1], [1], [0], [0], [0, 0, 1, 0], [], []>} : vector<16x512xbf16>, vector<128x512xbf16>, vector<16x128xf32> -> vector<16x128xf32>
    %c1_147 = arith.constant 1 : index
    %c0_148 = arith.constant 0 : index
    %c0_149 = arith.constant 0 : index
    %378 = vector.load %arg12[%c1_147, %c0_148, %c0_149] : memref<4x1x128xf32, #tpu.memory_space<vmem>>, vector<1x1x128xf32>
    %379 = vector.shape_cast %378 : vector<1x1x128xf32> to vector<1x128xf32>
    %380 = vector.broadcast %379 : vector<1x128xf32> to vector<16x128xf32>
    %381 = arith.addf %377, %380 : vector<16x128xf32>
    %382 = arith.addf %337, %381 : vector<16x128xf32>
    %c2 = arith.constant 2 : index
    %c0_150 = arith.constant 0 : index
    %c0_151 = arith.constant 0 : index
    %383 = vector.load %arg2[%c2, %c0_150, %c0_151] : memref<4x1x128xf32, #tpu.memory_space<vmem>>, vector<1x1x128xf32>
    %384 = vector.shape_cast %383 : vector<1x1x128xf32> to vector<1x128xf32>
    %c2_152 = arith.constant 2 : index
    %c0_153 = arith.constant 0 : index
    %c0_154 = arith.constant 0 : index
    %385 = vector.load %arg3[%c2_152, %c0_153, %c0_154] : memref<4x1x128xf32, #tpu.memory_space<vmem>>, vector<1x1x128xf32>
    %386 = vector.shape_cast %385 : vector<1x1x128xf32> to vector<1x128xf32>
    %cst_155 = arith.constant dense<0.000000e+00> : vector<16xf32>
    %387 = vector.multi_reduction <add>, %382, %cst_155 [1] : vector<16x128xf32> to vector<16xf32>
    %388 = vector.shape_cast %387 : vector<16xf32> to vector<16x1xf32>
    %cst_156 = arith.constant 1.280000e+02 : f32
    %389 = vector.broadcast %cst_156 : f32 to vector<16x1xf32>
    %390 = arith.divf %388, %389 : vector<16x1xf32>
    %391 = vector.broadcast %390 : vector<16x1xf32> to vector<16x128xf32>
    %392 = arith.subf %382, %391 : vector<16x128xf32>
    %393 = arith.mulf %392, %392 : vector<16x128xf32>
    %cst_157 = arith.constant dense<0.000000e+00> : vector<16xf32>
    %394 = vector.multi_reduction <add>, %393, %cst_157 [1] : vector<16x128xf32> to vector<16xf32>
    %395 = vector.shape_cast %394 : vector<16xf32> to vector<16x1xf32>
    %cst_158 = arith.constant 1.280000e+02 : f32
    %396 = vector.broadcast %cst_158 : f32 to vector<16x1xf32>
    %397 = arith.divf %395, %396 : vector<16x1xf32>
    %398 = vector.broadcast %390 : vector<16x1xf32> to vector<16x128xf32>
    %399 = arith.subf %382, %398 : vector<16x128xf32>
    %cst_159 = arith.constant 9.99999974E-6 : f32
    %400 = vector.broadcast %cst_159 : f32 to vector<16x1xf32>
    %401 = arith.addf %397, %400 : vector<16x1xf32>
    %402 = math.rsqrt %401 : vector<16x1xf32>
    %403 = vector.broadcast %402 : vector<16x1xf32> to vector<16x128xf32>
    %404 = arith.mulf %399, %403 : vector<16x128xf32>
    %405 = vector.broadcast %384 : vector<1x128xf32> to vector<16x128xf32>
    %406 = arith.mulf %404, %405 : vector<16x128xf32>
    %407 = vector.broadcast %386 : vector<1x128xf32> to vector<16x128xf32>
    %408 = arith.addf %406, %407 : vector<16x128xf32>
    %409 = arith.truncf %408 : vector<16x128xf32> to vector<16x128xbf16>
    %c2_160 = arith.constant 2 : index
    %c0_161 = arith.constant 0 : index
    %c0_162 = arith.constant 0 : index
    %410 = vector.load %arg4[%c2_160, %c0_161, %c0_162] : memref<4x384x128xbf16, #tpu.memory_space<vmem>>, vector<1x384x128xbf16>
    %411 = vector.shape_cast %410 : vector<1x384x128xbf16> to vector<384x128xbf16>
    %cst_163 = arith.constant dense<0.000000e+00> : vector<16x384xf32>
    %412 = tpu.matmul %409, %411, %cst_163 {dimension_numbers = #tpu.dot_dimension_numbers<[1], [1], [0], [0], [0, 0, 1, 0], [], []>} : vector<16x128xbf16>, vector<384x128xbf16>, vector<16x384xf32> -> vector<16x384xf32>
    %c2_164 = arith.constant 2 : index
    %c0_165 = arith.constant 0 : index
    %c0_166 = arith.constant 0 : index
    %413 = vector.load %arg5[%c2_164, %c0_165, %c0_166] : memref<4x128x128xbf16, #tpu.memory_space<vmem>>, vector<1x128x128xbf16>
    %414 = vector.shape_cast %413 : vector<1x128x128xbf16> to vector<128x128xbf16>
    %415 = vector.extract_strided_slice %412 {offsets = [0, 0], sizes = [16, 32], strides = [1, 1]} : vector<16x384xf32> to vector<16x32xf32>
    %416 = arith.truncf %415 : vector<16x32xf32> to vector<16x32xbf16>
    %417 = vector.extract_strided_slice %412 {offsets = [0, 128], sizes = [16, 32], strides = [1, 1]} : vector<16x384xf32> to vector<16x32xf32>
    %418 = arith.truncf %417 : vector<16x32xf32> to vector<16x32xbf16>
    %419 = vector.extract_strided_slice %412 {offsets = [0, 256], sizes = [16, 32], strides = [1, 1]} : vector<16x384xf32> to vector<16x32xf32>
    %420 = arith.truncf %419 : vector<16x32xf32> to vector<16x32xbf16>
    %cst_167 = arith.constant dense<0.000000e+00> : vector<16x16xf32>
    %421 = tpu.matmul %416, %418, %cst_167 {dimension_numbers = #tpu.dot_dimension_numbers<[1], [1], [0], [0], [0, 0, 1, 0], [], []>} : vector<16x32xbf16>, vector<16x32xbf16>, vector<16x16xf32> -> vector<16x16xf32>
    %cst_168 = arith.constant 0.176776692 : f32
    %422 = vector.broadcast %cst_168 : f32 to vector<16x16xf32>
    %423 = arith.mulf %421, %422 : vector<16x16xf32>
    %cst_169 = arith.constant -1.000000e+30 : f32
    %424 = vector.broadcast %cst_169 : f32 to vector<16x16xf32>
    %425 = arith.select %4, %423, %424 : vector<16x16xi1>, vector<16x16xf32>
    %cst_170 = arith.constant dense<0xFF800000> : vector<16xf32>
    %426 = vector.multi_reduction <maximumf>, %425, %cst_170 [1] : vector<16x16xf32> to vector<16xf32>
    %427 = vector.shape_cast %426 : vector<16xf32> to vector<16x1xf32>
    %428 = vector.broadcast %427 : vector<16x1xf32> to vector<16x16xf32>
    %429 = arith.subf %425, %428 : vector<16x16xf32>
    %430 = math.exp %429 : vector<16x16xf32>
    %cst_171 = arith.constant dense<0.000000e+00> : vector<16xf32>
    %431 = vector.multi_reduction <add>, %430, %cst_171 [1] : vector<16x16xf32> to vector<16xf32>
    %432 = vector.shape_cast %431 : vector<16xf32> to vector<16x1xf32>
    %433 = tpu.reciprocal %432 {approx = true} : vector<16x1xf32> -> vector<16x1xf32>
    %434 = vector.broadcast %433 : vector<16x1xf32> to vector<16x16xf32>
    %435 = arith.mulf %430, %434 : vector<16x16xf32>
    %436 = arith.truncf %435 : vector<16x16xf32> to vector<16x16xbf16>
    %cst_172 = arith.constant dense<0.000000e+00> : vector<16x32xf32>
    %437 = tpu.matmul %436, %420, %cst_172 {dimension_numbers = #tpu.dot_dimension_numbers<[1], [0], [0], [1], [0, 0, 1, 1], [], []>} : vector<16x16xbf16>, vector<16x32xbf16>, vector<16x32xf32> -> vector<16x32xf32>
    %438 = arith.truncf %437 : vector<16x32xf32> to vector<16x32xbf16>
    %439 = vector.extract_strided_slice %414 {offsets = [0, 0], sizes = [128, 32], strides = [1, 1]} : vector<128x128xbf16> to vector<128x32xbf16>
    %cst_173 = arith.constant dense<0.000000e+00> : vector<16x128xf32>
    %440 = tpu.matmul %438, %439, %cst_173 {dimension_numbers = #tpu.dot_dimension_numbers<[1], [1], [0], [0], [0, 0, 1, 0], [], []>} : vector<16x32xbf16>, vector<128x32xbf16>, vector<16x128xf32> -> vector<16x128xf32>
    %441 = vector.extract_strided_slice %412 {offsets = [0, 32], sizes = [16, 32], strides = [1, 1]} : vector<16x384xf32> to vector<16x32xf32>
    %442 = arith.truncf %441 : vector<16x32xf32> to vector<16x32xbf16>
    %443 = vector.extract_strided_slice %412 {offsets = [0, 160], sizes = [16, 32], strides = [1, 1]} : vector<16x384xf32> to vector<16x32xf32>
    %444 = arith.truncf %443 : vector<16x32xf32> to vector<16x32xbf16>
    %445 = vector.extract_strided_slice %412 {offsets = [0, 288], sizes = [16, 32], strides = [1, 1]} : vector<16x384xf32> to vector<16x32xf32>
    %446 = arith.truncf %445 : vector<16x32xf32> to vector<16x32xbf16>
    %cst_174 = arith.constant dense<0.000000e+00> : vector<16x16xf32>
    %447 = tpu.matmul %442, %444, %cst_174 {dimension_numbers = #tpu.dot_dimension_numbers<[1], [1], [0], [0], [0, 0, 1, 0], [], []>} : vector<16x32xbf16>, vector<16x32xbf16>, vector<16x16xf32> -> vector<16x16xf32>
    %cst_175 = arith.constant 0.176776692 : f32
    %448 = vector.broadcast %cst_175 : f32 to vector<16x16xf32>
    %449 = arith.mulf %447, %448 : vector<16x16xf32>
    %cst_176 = arith.constant -1.000000e+30 : f32
    %450 = vector.broadcast %cst_176 : f32 to vector<16x16xf32>
    %451 = arith.select %4, %449, %450 : vector<16x16xi1>, vector<16x16xf32>
    %cst_177 = arith.constant dense<0xFF800000> : vector<16xf32>
    %452 = vector.multi_reduction <maximumf>, %451, %cst_177 [1] : vector<16x16xf32> to vector<16xf32>
    %453 = vector.shape_cast %452 : vector<16xf32> to vector<16x1xf32>
    %454 = vector.broadcast %453 : vector<16x1xf32> to vector<16x16xf32>
    %455 = arith.subf %451, %454 : vector<16x16xf32>
    %456 = math.exp %455 : vector<16x16xf32>
    %cst_178 = arith.constant dense<0.000000e+00> : vector<16xf32>
    %457 = vector.multi_reduction <add>, %456, %cst_178 [1] : vector<16x16xf32> to vector<16xf32>
    %458 = vector.shape_cast %457 : vector<16xf32> to vector<16x1xf32>
    %459 = tpu.reciprocal %458 {approx = true} : vector<16x1xf32> -> vector<16x1xf32>
    %460 = vector.broadcast %459 : vector<16x1xf32> to vector<16x16xf32>
    %461 = arith.mulf %456, %460 : vector<16x16xf32>
    %462 = arith.truncf %461 : vector<16x16xf32> to vector<16x16xbf16>
    %cst_179 = arith.constant dense<0.000000e+00> : vector<16x32xf32>
    %463 = tpu.matmul %462, %446, %cst_179 {dimension_numbers = #tpu.dot_dimension_numbers<[1], [0], [0], [1], [0, 0, 1, 1], [], []>} : vector<16x16xbf16>, vector<16x32xbf16>, vector<16x32xf32> -> vector<16x32xf32>
    %464 = arith.truncf %463 : vector<16x32xf32> to vector<16x32xbf16>
    %465 = vector.extract_strided_slice %414 {offsets = [0, 32], sizes = [128, 32], strides = [1, 1]} : vector<128x128xbf16> to vector<128x32xbf16>
    %cst_180 = arith.constant dense<0.000000e+00> : vector<16x128xf32>
    %466 = tpu.matmul %464, %465, %cst_180 {dimension_numbers = #tpu.dot_dimension_numbers<[1], [1], [0], [0], [0, 0, 1, 0], [], []>} : vector<16x32xbf16>, vector<128x32xbf16>, vector<16x128xf32> -> vector<16x128xf32>
    %467 = arith.addf %440, %466 : vector<16x128xf32>
    %468 = vector.extract_strided_slice %412 {offsets = [0, 64], sizes = [16, 32], strides = [1, 1]} : vector<16x384xf32> to vector<16x32xf32>
    %469 = arith.truncf %468 : vector<16x32xf32> to vector<16x32xbf16>
    %470 = vector.extract_strided_slice %412 {offsets = [0, 192], sizes = [16, 32], strides = [1, 1]} : vector<16x384xf32> to vector<16x32xf32>
    %471 = arith.truncf %470 : vector<16x32xf32> to vector<16x32xbf16>
    %472 = vector.extract_strided_slice %412 {offsets = [0, 320], sizes = [16, 32], strides = [1, 1]} : vector<16x384xf32> to vector<16x32xf32>
    %473 = arith.truncf %472 : vector<16x32xf32> to vector<16x32xbf16>
    %cst_181 = arith.constant dense<0.000000e+00> : vector<16x16xf32>
    %474 = tpu.matmul %469, %471, %cst_181 {dimension_numbers = #tpu.dot_dimension_numbers<[1], [1], [0], [0], [0, 0, 1, 0], [], []>} : vector<16x32xbf16>, vector<16x32xbf16>, vector<16x16xf32> -> vector<16x16xf32>
    %cst_182 = arith.constant 0.176776692 : f32
    %475 = vector.broadcast %cst_182 : f32 to vector<16x16xf32>
    %476 = arith.mulf %474, %475 : vector<16x16xf32>
    %cst_183 = arith.constant -1.000000e+30 : f32
    %477 = vector.broadcast %cst_183 : f32 to vector<16x16xf32>
    %478 = arith.select %4, %476, %477 : vector<16x16xi1>, vector<16x16xf32>
    %cst_184 = arith.constant dense<0xFF800000> : vector<16xf32>
    %479 = vector.multi_reduction <maximumf>, %478, %cst_184 [1] : vector<16x16xf32> to vector<16xf32>
    %480 = vector.shape_cast %479 : vector<16xf32> to vector<16x1xf32>
    %481 = vector.broadcast %480 : vector<16x1xf32> to vector<16x16xf32>
    %482 = arith.subf %478, %481 : vector<16x16xf32>
    %483 = math.exp %482 : vector<16x16xf32>
    %cst_185 = arith.constant dense<0.000000e+00> : vector<16xf32>
    %484 = vector.multi_reduction <add>, %483, %cst_185 [1] : vector<16x16xf32> to vector<16xf32>
    %485 = vector.shape_cast %484 : vector<16xf32> to vector<16x1xf32>
    %486 = tpu.reciprocal %485 {approx = true} : vector<16x1xf32> -> vector<16x1xf32>
    %487 = vector.broadcast %486 : vector<16x1xf32> to vector<16x16xf32>
    %488 = arith.mulf %483, %487 : vector<16x16xf32>
    %489 = arith.truncf %488 : vector<16x16xf32> to vector<16x16xbf16>
    %cst_186 = arith.constant dense<0.000000e+00> : vector<16x32xf32>
    %490 = tpu.matmul %489, %473, %cst_186 {dimension_numbers = #tpu.dot_dimension_numbers<[1], [0], [0], [1], [0, 0, 1, 1], [], []>} : vector<16x16xbf16>, vector<16x32xbf16>, vector<16x32xf32> -> vector<16x32xf32>
    %491 = arith.truncf %490 : vector<16x32xf32> to vector<16x32xbf16>
    %492 = vector.extract_strided_slice %414 {offsets = [0, 64], sizes = [128, 32], strides = [1, 1]} : vector<128x128xbf16> to vector<128x32xbf16>
    %cst_187 = arith.constant dense<0.000000e+00> : vector<16x128xf32>
    %493 = tpu.matmul %491, %492, %cst_187 {dimension_numbers = #tpu.dot_dimension_numbers<[1], [1], [0], [0], [0, 0, 1, 0], [], []>} : vector<16x32xbf16>, vector<128x32xbf16>, vector<16x128xf32> -> vector<16x128xf32>
    %494 = arith.addf %467, %493 : vector<16x128xf32>
    %495 = vector.extract_strided_slice %412 {offsets = [0, 96], sizes = [16, 32], strides = [1, 1]} : vector<16x384xf32> to vector<16x32xf32>
    %496 = arith.truncf %495 : vector<16x32xf32> to vector<16x32xbf16>
    %497 = vector.extract_strided_slice %412 {offsets = [0, 224], sizes = [16, 32], strides = [1, 1]} : vector<16x384xf32> to vector<16x32xf32>
    %498 = arith.truncf %497 : vector<16x32xf32> to vector<16x32xbf16>
    %499 = vector.extract_strided_slice %412 {offsets = [0, 352], sizes = [16, 32], strides = [1, 1]} : vector<16x384xf32> to vector<16x32xf32>
    %500 = arith.truncf %499 : vector<16x32xf32> to vector<16x32xbf16>
    %cst_188 = arith.constant dense<0.000000e+00> : vector<16x16xf32>
    %501 = tpu.matmul %496, %498, %cst_188 {dimension_numbers = #tpu.dot_dimension_numbers<[1], [1], [0], [0], [0, 0, 1, 0], [], []>} : vector<16x32xbf16>, vector<16x32xbf16>, vector<16x16xf32> -> vector<16x16xf32>
    %cst_189 = arith.constant 0.176776692 : f32
    %502 = vector.broadcast %cst_189 : f32 to vector<16x16xf32>
    %503 = arith.mulf %501, %502 : vector<16x16xf32>
    %cst_190 = arith.constant -1.000000e+30 : f32
    %504 = vector.broadcast %cst_190 : f32 to vector<16x16xf32>
    %505 = arith.select %4, %503, %504 : vector<16x16xi1>, vector<16x16xf32>
    %cst_191 = arith.constant dense<0xFF800000> : vector<16xf32>
    %506 = vector.multi_reduction <maximumf>, %505, %cst_191 [1] : vector<16x16xf32> to vector<16xf32>
    %507 = vector.shape_cast %506 : vector<16xf32> to vector<16x1xf32>
    %508 = vector.broadcast %507 : vector<16x1xf32> to vector<16x16xf32>
    %509 = arith.subf %505, %508 : vector<16x16xf32>
    %510 = math.exp %509 : vector<16x16xf32>
    %cst_192 = arith.constant dense<0.000000e+00> : vector<16xf32>
    %511 = vector.multi_reduction <add>, %510, %cst_192 [1] : vector<16x16xf32> to vector<16xf32>
    %512 = vector.shape_cast %511 : vector<16xf32> to vector<16x1xf32>
    %513 = tpu.reciprocal %512 {approx = true} : vector<16x1xf32> -> vector<16x1xf32>
    %514 = vector.broadcast %513 : vector<16x1xf32> to vector<16x16xf32>
    %515 = arith.mulf %510, %514 : vector<16x16xf32>
    %516 = arith.truncf %515 : vector<16x16xf32> to vector<16x16xbf16>
    %cst_193 = arith.constant dense<0.000000e+00> : vector<16x32xf32>
    %517 = tpu.matmul %516, %500, %cst_193 {dimension_numbers = #tpu.dot_dimension_numbers<[1], [0], [0], [1], [0, 0, 1, 1], [], []>} : vector<16x16xbf16>, vector<16x32xbf16>, vector<16x32xf32> -> vector<16x32xf32>
    %518 = arith.truncf %517 : vector<16x32xf32> to vector<16x32xbf16>
    %519 = vector.extract_strided_slice %414 {offsets = [0, 96], sizes = [128, 32], strides = [1, 1]} : vector<128x128xbf16> to vector<128x32xbf16>
    %cst_194 = arith.constant dense<0.000000e+00> : vector<16x128xf32>
    %520 = tpu.matmul %518, %519, %cst_194 {dimension_numbers = #tpu.dot_dimension_numbers<[1], [1], [0], [0], [0, 0, 1, 0], [], []>} : vector<16x32xbf16>, vector<128x32xbf16>, vector<16x128xf32> -> vector<16x128xf32>
    %521 = arith.addf %494, %520 : vector<16x128xf32>
    %522 = arith.addf %382, %521 : vector<16x128xf32>
    %c2_195 = arith.constant 2 : index
    %c0_196 = arith.constant 0 : index
    %c0_197 = arith.constant 0 : index
    %523 = vector.load %arg6[%c2_195, %c0_196, %c0_197] : memref<4x1x128xf32, #tpu.memory_space<vmem>>, vector<1x1x128xf32>
    %524 = vector.shape_cast %523 : vector<1x1x128xf32> to vector<1x128xf32>
    %525 = vector.broadcast %524 : vector<1x128xf32> to vector<16x128xf32>
    %526 = arith.addf %522, %525 : vector<16x128xf32>
    %c2_198 = arith.constant 2 : index
    %c0_199 = arith.constant 0 : index
    %c0_200 = arith.constant 0 : index
    %527 = vector.load %arg7[%c2_198, %c0_199, %c0_200] : memref<4x1x128xf32, #tpu.memory_space<vmem>>, vector<1x1x128xf32>
    %528 = vector.shape_cast %527 : vector<1x1x128xf32> to vector<1x128xf32>
    %c2_201 = arith.constant 2 : index
    %c0_202 = arith.constant 0 : index
    %c0_203 = arith.constant 0 : index
    %529 = vector.load %arg8[%c2_201, %c0_202, %c0_203] : memref<4x1x128xf32, #tpu.memory_space<vmem>>, vector<1x1x128xf32>
    %530 = vector.shape_cast %529 : vector<1x1x128xf32> to vector<1x128xf32>
    %cst_204 = arith.constant dense<0.000000e+00> : vector<16xf32>
    %531 = vector.multi_reduction <add>, %526, %cst_204 [1] : vector<16x128xf32> to vector<16xf32>
    %532 = vector.shape_cast %531 : vector<16xf32> to vector<16x1xf32>
    %cst_205 = arith.constant 1.280000e+02 : f32
    %533 = vector.broadcast %cst_205 : f32 to vector<16x1xf32>
    %534 = arith.divf %532, %533 : vector<16x1xf32>
    %535 = vector.broadcast %534 : vector<16x1xf32> to vector<16x128xf32>
    %536 = arith.subf %526, %535 : vector<16x128xf32>
    %537 = arith.mulf %536, %536 : vector<16x128xf32>
    %cst_206 = arith.constant dense<0.000000e+00> : vector<16xf32>
    %538 = vector.multi_reduction <add>, %537, %cst_206 [1] : vector<16x128xf32> to vector<16xf32>
    %539 = vector.shape_cast %538 : vector<16xf32> to vector<16x1xf32>
    %cst_207 = arith.constant 1.280000e+02 : f32
    %540 = vector.broadcast %cst_207 : f32 to vector<16x1xf32>
    %541 = arith.divf %539, %540 : vector<16x1xf32>
    %542 = vector.broadcast %534 : vector<16x1xf32> to vector<16x128xf32>
    %543 = arith.subf %526, %542 : vector<16x128xf32>
    %cst_208 = arith.constant 9.99999974E-6 : f32
    %544 = vector.broadcast %cst_208 : f32 to vector<16x1xf32>
    %545 = arith.addf %541, %544 : vector<16x1xf32>
    %546 = math.rsqrt %545 : vector<16x1xf32>
    %547 = vector.broadcast %546 : vector<16x1xf32> to vector<16x128xf32>
    %548 = arith.mulf %543, %547 : vector<16x128xf32>
    %549 = vector.broadcast %528 : vector<1x128xf32> to vector<16x128xf32>
    %550 = arith.mulf %548, %549 : vector<16x128xf32>
    %551 = vector.broadcast %530 : vector<1x128xf32> to vector<16x128xf32>
    %552 = arith.addf %550, %551 : vector<16x128xf32>
    %553 = arith.truncf %552 : vector<16x128xf32> to vector<16x128xbf16>
    %c2_209 = arith.constant 2 : index
    %c0_210 = arith.constant 0 : index
    %c0_211 = arith.constant 0 : index
    %554 = vector.load %arg9[%c2_209, %c0_210, %c0_211] : memref<4x512x128xbf16, #tpu.memory_space<vmem>>, vector<1x512x128xbf16>
    %555 = vector.shape_cast %554 : vector<1x512x128xbf16> to vector<512x128xbf16>
    %cst_212 = arith.constant dense<0.000000e+00> : vector<16x512xf32>
    %556 = tpu.matmul %553, %555, %cst_212 {dimension_numbers = #tpu.dot_dimension_numbers<[1], [1], [0], [0], [0, 0, 1, 0], [], []>} : vector<16x128xbf16>, vector<512x128xbf16>, vector<16x512xf32> -> vector<16x512xf32>
    %c2_213 = arith.constant 2 : index
    %c0_214 = arith.constant 0 : index
    %c0_215 = arith.constant 0 : index
    %557 = vector.load %arg10[%c2_213, %c0_214, %c0_215] : memref<4x1x512xf32, #tpu.memory_space<vmem>>, vector<1x1x512xf32>
    %558 = vector.shape_cast %557 : vector<1x1x512xf32> to vector<1x512xf32>
    %559 = vector.broadcast %558 : vector<1x512xf32> to vector<16x512xf32>
    %560 = arith.addf %556, %559 : vector<16x512xf32>
    %cst_216 = arith.constant 0.000000e+00 : f32
    %561 = vector.broadcast %cst_216 : f32 to vector<16x512xf32>
    %562 = arith.maximumf %560, %561 : vector<16x512xf32>
    %563 = arith.truncf %562 : vector<16x512xf32> to vector<16x512xbf16>
    %c2_217 = arith.constant 2 : index
    %c0_218 = arith.constant 0 : index
    %c0_219 = arith.constant 0 : index
    %564 = vector.load %arg11[%c2_217, %c0_218, %c0_219] : memref<4x128x512xbf16, #tpu.memory_space<vmem>>, vector<1x128x512xbf16>
    %565 = vector.shape_cast %564 : vector<1x128x512xbf16> to vector<128x512xbf16>
    %cst_220 = arith.constant dense<0.000000e+00> : vector<16x128xf32>
    %566 = tpu.matmul %563, %565, %cst_220 {dimension_numbers = #tpu.dot_dimension_numbers<[1], [1], [0], [0], [0, 0, 1, 0], [], []>} : vector<16x512xbf16>, vector<128x512xbf16>, vector<16x128xf32> -> vector<16x128xf32>
    %c2_221 = arith.constant 2 : index
    %c0_222 = arith.constant 0 : index
    %c0_223 = arith.constant 0 : index
    %567 = vector.load %arg12[%c2_221, %c0_222, %c0_223] : memref<4x1x128xf32, #tpu.memory_space<vmem>>, vector<1x1x128xf32>
    %568 = vector.shape_cast %567 : vector<1x1x128xf32> to vector<1x128xf32>
    %569 = vector.broadcast %568 : vector<1x128xf32> to vector<16x128xf32>
    %570 = arith.addf %566, %569 : vector<16x128xf32>
    %571 = arith.addf %526, %570 : vector<16x128xf32>
    %c3 = arith.constant 3 : index
    %c0_224 = arith.constant 0 : index
    %c0_225 = arith.constant 0 : index
    %572 = vector.load %arg2[%c3, %c0_224, %c0_225] : memref<4x1x128xf32, #tpu.memory_space<vmem>>, vector<1x1x128xf32>
    %573 = vector.shape_cast %572 : vector<1x1x128xf32> to vector<1x128xf32>
    %c3_226 = arith.constant 3 : index
    %c0_227 = arith.constant 0 : index
    %c0_228 = arith.constant 0 : index
    %574 = vector.load %arg3[%c3_226, %c0_227, %c0_228] : memref<4x1x128xf32, #tpu.memory_space<vmem>>, vector<1x1x128xf32>
    %575 = vector.shape_cast %574 : vector<1x1x128xf32> to vector<1x128xf32>
    %cst_229 = arith.constant dense<0.000000e+00> : vector<16xf32>
    %576 = vector.multi_reduction <add>, %571, %cst_229 [1] : vector<16x128xf32> to vector<16xf32>
    %577 = vector.shape_cast %576 : vector<16xf32> to vector<16x1xf32>
    %cst_230 = arith.constant 1.280000e+02 : f32
    %578 = vector.broadcast %cst_230 : f32 to vector<16x1xf32>
    %579 = arith.divf %577, %578 : vector<16x1xf32>
    %580 = vector.broadcast %579 : vector<16x1xf32> to vector<16x128xf32>
    %581 = arith.subf %571, %580 : vector<16x128xf32>
    %582 = arith.mulf %581, %581 : vector<16x128xf32>
    %cst_231 = arith.constant dense<0.000000e+00> : vector<16xf32>
    %583 = vector.multi_reduction <add>, %582, %cst_231 [1] : vector<16x128xf32> to vector<16xf32>
    %584 = vector.shape_cast %583 : vector<16xf32> to vector<16x1xf32>
    %cst_232 = arith.constant 1.280000e+02 : f32
    %585 = vector.broadcast %cst_232 : f32 to vector<16x1xf32>
    %586 = arith.divf %584, %585 : vector<16x1xf32>
    %587 = vector.broadcast %579 : vector<16x1xf32> to vector<16x128xf32>
    %588 = arith.subf %571, %587 : vector<16x128xf32>
    %cst_233 = arith.constant 9.99999974E-6 : f32
    %589 = vector.broadcast %cst_233 : f32 to vector<16x1xf32>
    %590 = arith.addf %586, %589 : vector<16x1xf32>
    %591 = math.rsqrt %590 : vector<16x1xf32>
    %592 = vector.broadcast %591 : vector<16x1xf32> to vector<16x128xf32>
    %593 = arith.mulf %588, %592 : vector<16x128xf32>
    %594 = vector.broadcast %573 : vector<1x128xf32> to vector<16x128xf32>
    %595 = arith.mulf %593, %594 : vector<16x128xf32>
    %596 = vector.broadcast %575 : vector<1x128xf32> to vector<16x128xf32>
    %597 = arith.addf %595, %596 : vector<16x128xf32>
    %598 = arith.truncf %597 : vector<16x128xf32> to vector<16x128xbf16>
    %c3_234 = arith.constant 3 : index
    %c0_235 = arith.constant 0 : index
    %c0_236 = arith.constant 0 : index
    %599 = vector.load %arg4[%c3_234, %c0_235, %c0_236] : memref<4x384x128xbf16, #tpu.memory_space<vmem>>, vector<1x384x128xbf16>
    %600 = vector.shape_cast %599 : vector<1x384x128xbf16> to vector<384x128xbf16>
    %cst_237 = arith.constant dense<0.000000e+00> : vector<16x384xf32>
    %601 = tpu.matmul %598, %600, %cst_237 {dimension_numbers = #tpu.dot_dimension_numbers<[1], [1], [0], [0], [0, 0, 1, 0], [], []>} : vector<16x128xbf16>, vector<384x128xbf16>, vector<16x384xf32> -> vector<16x384xf32>
    %c3_238 = arith.constant 3 : index
    %c0_239 = arith.constant 0 : index
    %c0_240 = arith.constant 0 : index
    %602 = vector.load %arg5[%c3_238, %c0_239, %c0_240] : memref<4x128x128xbf16, #tpu.memory_space<vmem>>, vector<1x128x128xbf16>
    %603 = vector.shape_cast %602 : vector<1x128x128xbf16> to vector<128x128xbf16>
    %604 = vector.extract_strided_slice %601 {offsets = [0, 0], sizes = [16, 32], strides = [1, 1]} : vector<16x384xf32> to vector<16x32xf32>
    %605 = arith.truncf %604 : vector<16x32xf32> to vector<16x32xbf16>
    %606 = vector.extract_strided_slice %601 {offsets = [0, 128], sizes = [16, 32], strides = [1, 1]} : vector<16x384xf32> to vector<16x32xf32>
    %607 = arith.truncf %606 : vector<16x32xf32> to vector<16x32xbf16>
    %608 = vector.extract_strided_slice %601 {offsets = [0, 256], sizes = [16, 32], strides = [1, 1]} : vector<16x384xf32> to vector<16x32xf32>
    %609 = arith.truncf %608 : vector<16x32xf32> to vector<16x32xbf16>
    %cst_241 = arith.constant dense<0.000000e+00> : vector<16x16xf32>
    %610 = tpu.matmul %605, %607, %cst_241 {dimension_numbers = #tpu.dot_dimension_numbers<[1], [1], [0], [0], [0, 0, 1, 0], [], []>} : vector<16x32xbf16>, vector<16x32xbf16>, vector<16x16xf32> -> vector<16x16xf32>
    %cst_242 = arith.constant 0.176776692 : f32
    %611 = vector.broadcast %cst_242 : f32 to vector<16x16xf32>
    %612 = arith.mulf %610, %611 : vector<16x16xf32>
    %cst_243 = arith.constant -1.000000e+30 : f32
    %613 = vector.broadcast %cst_243 : f32 to vector<16x16xf32>
    %614 = arith.select %4, %612, %613 : vector<16x16xi1>, vector<16x16xf32>
    %cst_244 = arith.constant dense<0xFF800000> : vector<16xf32>
    %615 = vector.multi_reduction <maximumf>, %614, %cst_244 [1] : vector<16x16xf32> to vector<16xf32>
    %616 = vector.shape_cast %615 : vector<16xf32> to vector<16x1xf32>
    %617 = vector.broadcast %616 : vector<16x1xf32> to vector<16x16xf32>
    %618 = arith.subf %614, %617 : vector<16x16xf32>
    %619 = math.exp %618 : vector<16x16xf32>
    %cst_245 = arith.constant dense<0.000000e+00> : vector<16xf32>
    %620 = vector.multi_reduction <add>, %619, %cst_245 [1] : vector<16x16xf32> to vector<16xf32>
    %621 = vector.shape_cast %620 : vector<16xf32> to vector<16x1xf32>
    %622 = tpu.reciprocal %621 {approx = true} : vector<16x1xf32> -> vector<16x1xf32>
    %623 = vector.broadcast %622 : vector<16x1xf32> to vector<16x16xf32>
    %624 = arith.mulf %619, %623 : vector<16x16xf32>
    %625 = arith.truncf %624 : vector<16x16xf32> to vector<16x16xbf16>
    %cst_246 = arith.constant dense<0.000000e+00> : vector<16x32xf32>
    %626 = tpu.matmul %625, %609, %cst_246 {dimension_numbers = #tpu.dot_dimension_numbers<[1], [0], [0], [1], [0, 0, 1, 1], [], []>} : vector<16x16xbf16>, vector<16x32xbf16>, vector<16x32xf32> -> vector<16x32xf32>
    %627 = arith.truncf %626 : vector<16x32xf32> to vector<16x32xbf16>
    %628 = vector.extract_strided_slice %603 {offsets = [0, 0], sizes = [128, 32], strides = [1, 1]} : vector<128x128xbf16> to vector<128x32xbf16>
    %cst_247 = arith.constant dense<0.000000e+00> : vector<16x128xf32>
    %629 = tpu.matmul %627, %628, %cst_247 {dimension_numbers = #tpu.dot_dimension_numbers<[1], [1], [0], [0], [0, 0, 1, 0], [], []>} : vector<16x32xbf16>, vector<128x32xbf16>, vector<16x128xf32> -> vector<16x128xf32>
    %630 = vector.extract_strided_slice %601 {offsets = [0, 32], sizes = [16, 32], strides = [1, 1]} : vector<16x384xf32> to vector<16x32xf32>
    %631 = arith.truncf %630 : vector<16x32xf32> to vector<16x32xbf16>
    %632 = vector.extract_strided_slice %601 {offsets = [0, 160], sizes = [16, 32], strides = [1, 1]} : vector<16x384xf32> to vector<16x32xf32>
    %633 = arith.truncf %632 : vector<16x32xf32> to vector<16x32xbf16>
    %634 = vector.extract_strided_slice %601 {offsets = [0, 288], sizes = [16, 32], strides = [1, 1]} : vector<16x384xf32> to vector<16x32xf32>
    %635 = arith.truncf %634 : vector<16x32xf32> to vector<16x32xbf16>
    %cst_248 = arith.constant dense<0.000000e+00> : vector<16x16xf32>
    %636 = tpu.matmul %631, %633, %cst_248 {dimension_numbers = #tpu.dot_dimension_numbers<[1], [1], [0], [0], [0, 0, 1, 0], [], []>} : vector<16x32xbf16>, vector<16x32xbf16>, vector<16x16xf32> -> vector<16x16xf32>
    %cst_249 = arith.constant 0.176776692 : f32
    %637 = vector.broadcast %cst_249 : f32 to vector<16x16xf32>
    %638 = arith.mulf %636, %637 : vector<16x16xf32>
    %cst_250 = arith.constant -1.000000e+30 : f32
    %639 = vector.broadcast %cst_250 : f32 to vector<16x16xf32>
    %640 = arith.select %4, %638, %639 : vector<16x16xi1>, vector<16x16xf32>
    %cst_251 = arith.constant dense<0xFF800000> : vector<16xf32>
    %641 = vector.multi_reduction <maximumf>, %640, %cst_251 [1] : vector<16x16xf32> to vector<16xf32>
    %642 = vector.shape_cast %641 : vector<16xf32> to vector<16x1xf32>
    %643 = vector.broadcast %642 : vector<16x1xf32> to vector<16x16xf32>
    %644 = arith.subf %640, %643 : vector<16x16xf32>
    %645 = math.exp %644 : vector<16x16xf32>
    %cst_252 = arith.constant dense<0.000000e+00> : vector<16xf32>
    %646 = vector.multi_reduction <add>, %645, %cst_252 [1] : vector<16x16xf32> to vector<16xf32>
    %647 = vector.shape_cast %646 : vector<16xf32> to vector<16x1xf32>
    %648 = tpu.reciprocal %647 {approx = true} : vector<16x1xf32> -> vector<16x1xf32>
    %649 = vector.broadcast %648 : vector<16x1xf32> to vector<16x16xf32>
    %650 = arith.mulf %645, %649 : vector<16x16xf32>
    %651 = arith.truncf %650 : vector<16x16xf32> to vector<16x16xbf16>
    %cst_253 = arith.constant dense<0.000000e+00> : vector<16x32xf32>
    %652 = tpu.matmul %651, %635, %cst_253 {dimension_numbers = #tpu.dot_dimension_numbers<[1], [0], [0], [1], [0, 0, 1, 1], [], []>} : vector<16x16xbf16>, vector<16x32xbf16>, vector<16x32xf32> -> vector<16x32xf32>
    %653 = arith.truncf %652 : vector<16x32xf32> to vector<16x32xbf16>
    %654 = vector.extract_strided_slice %603 {offsets = [0, 32], sizes = [128, 32], strides = [1, 1]} : vector<128x128xbf16> to vector<128x32xbf16>
    %cst_254 = arith.constant dense<0.000000e+00> : vector<16x128xf32>
    %655 = tpu.matmul %653, %654, %cst_254 {dimension_numbers = #tpu.dot_dimension_numbers<[1], [1], [0], [0], [0, 0, 1, 0], [], []>} : vector<16x32xbf16>, vector<128x32xbf16>, vector<16x128xf32> -> vector<16x128xf32>
    %656 = arith.addf %629, %655 : vector<16x128xf32>
    %657 = vector.extract_strided_slice %601 {offsets = [0, 64], sizes = [16, 32], strides = [1, 1]} : vector<16x384xf32> to vector<16x32xf32>
    %658 = arith.truncf %657 : vector<16x32xf32> to vector<16x32xbf16>
    %659 = vector.extract_strided_slice %601 {offsets = [0, 192], sizes = [16, 32], strides = [1, 1]} : vector<16x384xf32> to vector<16x32xf32>
    %660 = arith.truncf %659 : vector<16x32xf32> to vector<16x32xbf16>
    %661 = vector.extract_strided_slice %601 {offsets = [0, 320], sizes = [16, 32], strides = [1, 1]} : vector<16x384xf32> to vector<16x32xf32>
    %662 = arith.truncf %661 : vector<16x32xf32> to vector<16x32xbf16>
    %cst_255 = arith.constant dense<0.000000e+00> : vector<16x16xf32>
    %663 = tpu.matmul %658, %660, %cst_255 {dimension_numbers = #tpu.dot_dimension_numbers<[1], [1], [0], [0], [0, 0, 1, 0], [], []>} : vector<16x32xbf16>, vector<16x32xbf16>, vector<16x16xf32> -> vector<16x16xf32>
    %cst_256 = arith.constant 0.176776692 : f32
    %664 = vector.broadcast %cst_256 : f32 to vector<16x16xf32>
    %665 = arith.mulf %663, %664 : vector<16x16xf32>
    %cst_257 = arith.constant -1.000000e+30 : f32
    %666 = vector.broadcast %cst_257 : f32 to vector<16x16xf32>
    %667 = arith.select %4, %665, %666 : vector<16x16xi1>, vector<16x16xf32>
    %cst_258 = arith.constant dense<0xFF800000> : vector<16xf32>
    %668 = vector.multi_reduction <maximumf>, %667, %cst_258 [1] : vector<16x16xf32> to vector<16xf32>
    %669 = vector.shape_cast %668 : vector<16xf32> to vector<16x1xf32>
    %670 = vector.broadcast %669 : vector<16x1xf32> to vector<16x16xf32>
    %671 = arith.subf %667, %670 : vector<16x16xf32>
    %672 = math.exp %671 : vector<16x16xf32>
    %cst_259 = arith.constant dense<0.000000e+00> : vector<16xf32>
    %673 = vector.multi_reduction <add>, %672, %cst_259 [1] : vector<16x16xf32> to vector<16xf32>
    %674 = vector.shape_cast %673 : vector<16xf32> to vector<16x1xf32>
    %675 = tpu.reciprocal %674 {approx = true} : vector<16x1xf32> -> vector<16x1xf32>
    %676 = vector.broadcast %675 : vector<16x1xf32> to vector<16x16xf32>
    %677 = arith.mulf %672, %676 : vector<16x16xf32>
    %678 = arith.truncf %677 : vector<16x16xf32> to vector<16x16xbf16>
    %cst_260 = arith.constant dense<0.000000e+00> : vector<16x32xf32>
    %679 = tpu.matmul %678, %662, %cst_260 {dimension_numbers = #tpu.dot_dimension_numbers<[1], [0], [0], [1], [0, 0, 1, 1], [], []>} : vector<16x16xbf16>, vector<16x32xbf16>, vector<16x32xf32> -> vector<16x32xf32>
    %680 = arith.truncf %679 : vector<16x32xf32> to vector<16x32xbf16>
    %681 = vector.extract_strided_slice %603 {offsets = [0, 64], sizes = [128, 32], strides = [1, 1]} : vector<128x128xbf16> to vector<128x32xbf16>
    %cst_261 = arith.constant dense<0.000000e+00> : vector<16x128xf32>
    %682 = tpu.matmul %680, %681, %cst_261 {dimension_numbers = #tpu.dot_dimension_numbers<[1], [1], [0], [0], [0, 0, 1, 0], [], []>} : vector<16x32xbf16>, vector<128x32xbf16>, vector<16x128xf32> -> vector<16x128xf32>
    %683 = arith.addf %656, %682 : vector<16x128xf32>
    %684 = vector.extract_strided_slice %601 {offsets = [0, 96], sizes = [16, 32], strides = [1, 1]} : vector<16x384xf32> to vector<16x32xf32>
    %685 = arith.truncf %684 : vector<16x32xf32> to vector<16x32xbf16>
    %686 = vector.extract_strided_slice %601 {offsets = [0, 224], sizes = [16, 32], strides = [1, 1]} : vector<16x384xf32> to vector<16x32xf32>
    %687 = arith.truncf %686 : vector<16x32xf32> to vector<16x32xbf16>
    %688 = vector.extract_strided_slice %601 {offsets = [0, 352], sizes = [16, 32], strides = [1, 1]} : vector<16x384xf32> to vector<16x32xf32>
    %689 = arith.truncf %688 : vector<16x32xf32> to vector<16x32xbf16>
    %cst_262 = arith.constant dense<0.000000e+00> : vector<16x16xf32>
    %690 = tpu.matmul %685, %687, %cst_262 {dimension_numbers = #tpu.dot_dimension_numbers<[1], [1], [0], [0], [0, 0, 1, 0], [], []>} : vector<16x32xbf16>, vector<16x32xbf16>, vector<16x16xf32> -> vector<16x16xf32>
    %cst_263 = arith.constant 0.176776692 : f32
    %691 = vector.broadcast %cst_263 : f32 to vector<16x16xf32>
    %692 = arith.mulf %690, %691 : vector<16x16xf32>
    %cst_264 = arith.constant -1.000000e+30 : f32
    %693 = vector.broadcast %cst_264 : f32 to vector<16x16xf32>
    %694 = arith.select %4, %692, %693 : vector<16x16xi1>, vector<16x16xf32>
    %cst_265 = arith.constant dense<0xFF800000> : vector<16xf32>
    %695 = vector.multi_reduction <maximumf>, %694, %cst_265 [1] : vector<16x16xf32> to vector<16xf32>
    %696 = vector.shape_cast %695 : vector<16xf32> to vector<16x1xf32>
    %697 = vector.broadcast %696 : vector<16x1xf32> to vector<16x16xf32>
    %698 = arith.subf %694, %697 : vector<16x16xf32>
    %699 = math.exp %698 : vector<16x16xf32>
    %cst_266 = arith.constant dense<0.000000e+00> : vector<16xf32>
    %700 = vector.multi_reduction <add>, %699, %cst_266 [1] : vector<16x16xf32> to vector<16xf32>
    %701 = vector.shape_cast %700 : vector<16xf32> to vector<16x1xf32>
    %702 = tpu.reciprocal %701 {approx = true} : vector<16x1xf32> -> vector<16x1xf32>
    %703 = vector.broadcast %702 : vector<16x1xf32> to vector<16x16xf32>
    %704 = arith.mulf %699, %703 : vector<16x16xf32>
    %705 = arith.truncf %704 : vector<16x16xf32> to vector<16x16xbf16>
    %cst_267 = arith.constant dense<0.000000e+00> : vector<16x32xf32>
    %706 = tpu.matmul %705, %689, %cst_267 {dimension_numbers = #tpu.dot_dimension_numbers<[1], [0], [0], [1], [0, 0, 1, 1], [], []>} : vector<16x16xbf16>, vector<16x32xbf16>, vector<16x32xf32> -> vector<16x32xf32>
    %707 = arith.truncf %706 : vector<16x32xf32> to vector<16x32xbf16>
    %708 = vector.extract_strided_slice %603 {offsets = [0, 96], sizes = [128, 32], strides = [1, 1]} : vector<128x128xbf16> to vector<128x32xbf16>
    %cst_268 = arith.constant dense<0.000000e+00> : vector<16x128xf32>
    %709 = tpu.matmul %707, %708, %cst_268 {dimension_numbers = #tpu.dot_dimension_numbers<[1], [1], [0], [0], [0, 0, 1, 0], [], []>} : vector<16x32xbf16>, vector<128x32xbf16>, vector<16x128xf32> -> vector<16x128xf32>
    %710 = arith.addf %683, %709 : vector<16x128xf32>
    %711 = arith.addf %571, %710 : vector<16x128xf32>
    %c3_269 = arith.constant 3 : index
    %c0_270 = arith.constant 0 : index
    %c0_271 = arith.constant 0 : index
    %712 = vector.load %arg6[%c3_269, %c0_270, %c0_271] : memref<4x1x128xf32, #tpu.memory_space<vmem>>, vector<1x1x128xf32>
    %713 = vector.shape_cast %712 : vector<1x1x128xf32> to vector<1x128xf32>
    %714 = vector.broadcast %713 : vector<1x128xf32> to vector<16x128xf32>
    %715 = arith.addf %711, %714 : vector<16x128xf32>
    %c3_272 = arith.constant 3 : index
    %c0_273 = arith.constant 0 : index
    %c0_274 = arith.constant 0 : index
    %716 = vector.load %arg7[%c3_272, %c0_273, %c0_274] : memref<4x1x128xf32, #tpu.memory_space<vmem>>, vector<1x1x128xf32>
    %717 = vector.shape_cast %716 : vector<1x1x128xf32> to vector<1x128xf32>
    %c3_275 = arith.constant 3 : index
    %c0_276 = arith.constant 0 : index
    %c0_277 = arith.constant 0 : index
    %718 = vector.load %arg8[%c3_275, %c0_276, %c0_277] : memref<4x1x128xf32, #tpu.memory_space<vmem>>, vector<1x1x128xf32>
    %719 = vector.shape_cast %718 : vector<1x1x128xf32> to vector<1x128xf32>
    %cst_278 = arith.constant dense<0.000000e+00> : vector<16xf32>
    %720 = vector.multi_reduction <add>, %715, %cst_278 [1] : vector<16x128xf32> to vector<16xf32>
    %721 = vector.shape_cast %720 : vector<16xf32> to vector<16x1xf32>
    %cst_279 = arith.constant 1.280000e+02 : f32
    %722 = vector.broadcast %cst_279 : f32 to vector<16x1xf32>
    %723 = arith.divf %721, %722 : vector<16x1xf32>
    %724 = vector.broadcast %723 : vector<16x1xf32> to vector<16x128xf32>
    %725 = arith.subf %715, %724 : vector<16x128xf32>
    %726 = arith.mulf %725, %725 : vector<16x128xf32>
    %cst_280 = arith.constant dense<0.000000e+00> : vector<16xf32>
    %727 = vector.multi_reduction <add>, %726, %cst_280 [1] : vector<16x128xf32> to vector<16xf32>
    %728 = vector.shape_cast %727 : vector<16xf32> to vector<16x1xf32>
    %cst_281 = arith.constant 1.280000e+02 : f32
    %729 = vector.broadcast %cst_281 : f32 to vector<16x1xf32>
    %730 = arith.divf %728, %729 : vector<16x1xf32>
    %731 = vector.broadcast %723 : vector<16x1xf32> to vector<16x128xf32>
    %732 = arith.subf %715, %731 : vector<16x128xf32>
    %cst_282 = arith.constant 9.99999974E-6 : f32
    %733 = vector.broadcast %cst_282 : f32 to vector<16x1xf32>
    %734 = arith.addf %730, %733 : vector<16x1xf32>
    %735 = math.rsqrt %734 : vector<16x1xf32>
    %736 = vector.broadcast %735 : vector<16x1xf32> to vector<16x128xf32>
    %737 = arith.mulf %732, %736 : vector<16x128xf32>
    %738 = vector.broadcast %717 : vector<1x128xf32> to vector<16x128xf32>
    %739 = arith.mulf %737, %738 : vector<16x128xf32>
    %740 = vector.broadcast %719 : vector<1x128xf32> to vector<16x128xf32>
    %741 = arith.addf %739, %740 : vector<16x128xf32>
    %742 = arith.truncf %741 : vector<16x128xf32> to vector<16x128xbf16>
    %c3_283 = arith.constant 3 : index
    %c0_284 = arith.constant 0 : index
    %c0_285 = arith.constant 0 : index
    %743 = vector.load %arg9[%c3_283, %c0_284, %c0_285] : memref<4x512x128xbf16, #tpu.memory_space<vmem>>, vector<1x512x128xbf16>
    %744 = vector.shape_cast %743 : vector<1x512x128xbf16> to vector<512x128xbf16>
    %cst_286 = arith.constant dense<0.000000e+00> : vector<16x512xf32>
    %745 = tpu.matmul %742, %744, %cst_286 {dimension_numbers = #tpu.dot_dimension_numbers<[1], [1], [0], [0], [0, 0, 1, 0], [], []>} : vector<16x128xbf16>, vector<512x128xbf16>, vector<16x512xf32> -> vector<16x512xf32>
    %c3_287 = arith.constant 3 : index
    %c0_288 = arith.constant 0 : index
    %c0_289 = arith.constant 0 : index
    %746 = vector.load %arg10[%c3_287, %c0_288, %c0_289] : memref<4x1x512xf32, #tpu.memory_space<vmem>>, vector<1x1x512xf32>
    %747 = vector.shape_cast %746 : vector<1x1x512xf32> to vector<1x512xf32>
    %748 = vector.broadcast %747 : vector<1x512xf32> to vector<16x512xf32>
    %749 = arith.addf %745, %748 : vector<16x512xf32>
    %cst_290 = arith.constant 0.000000e+00 : f32
    %750 = vector.broadcast %cst_290 : f32 to vector<16x512xf32>
    %751 = arith.maximumf %749, %750 : vector<16x512xf32>
    %752 = arith.truncf %751 : vector<16x512xf32> to vector<16x512xbf16>
    %c3_291 = arith.constant 3 : index
    %c0_292 = arith.constant 0 : index
    %c0_293 = arith.constant 0 : index
    %753 = vector.load %arg11[%c3_291, %c0_292, %c0_293] : memref<4x128x512xbf16, #tpu.memory_space<vmem>>, vector<1x128x512xbf16>
    %754 = vector.shape_cast %753 : vector<1x128x512xbf16> to vector<128x512xbf16>
    %cst_294 = arith.constant dense<0.000000e+00> : vector<16x128xf32>
    %755 = tpu.matmul %752, %754, %cst_294 {dimension_numbers = #tpu.dot_dimension_numbers<[1], [1], [0], [0], [0, 0, 1, 0], [], []>} : vector<16x512xbf16>, vector<128x512xbf16>, vector<16x128xf32> -> vector<16x128xf32>
    %c3_295 = arith.constant 3 : index
    %c0_296 = arith.constant 0 : index
    %c0_297 = arith.constant 0 : index
    %756 = vector.load %arg12[%c3_295, %c0_296, %c0_297] : memref<4x1x128xf32, #tpu.memory_space<vmem>>, vector<1x1x128xf32>
    %757 = vector.shape_cast %756 : vector<1x1x128xf32> to vector<1x128xf32>
    %758 = vector.broadcast %757 : vector<1x128xf32> to vector<16x128xf32>
    %759 = arith.addf %755, %758 : vector<16x128xf32>
    %760 = arith.addf %715, %759 : vector<16x128xf32>
    %c0_298 = arith.constant 0 : index
    %c0_299 = arith.constant 0 : index
    %761 = vector.load %arg13[%c0_298, %c0_299] : memref<1x128xf32, #tpu.memory_space<vmem>>, vector<1x128xf32>
    %c0_300 = arith.constant 0 : index
    %c0_301 = arith.constant 0 : index
    %762 = vector.load %arg14[%c0_300, %c0_301] : memref<1x128xf32, #tpu.memory_space<vmem>>, vector<1x128xf32>
    %cst_302 = arith.constant dense<0.000000e+00> : vector<16xf32>
    %763 = vector.multi_reduction <add>, %760, %cst_302 [1] : vector<16x128xf32> to vector<16xf32>
    %764 = vector.shape_cast %763 : vector<16xf32> to vector<16x1xf32>
    %cst_303 = arith.constant 1.280000e+02 : f32
    %765 = vector.broadcast %cst_303 : f32 to vector<16x1xf32>
    %766 = arith.divf %764, %765 : vector<16x1xf32>
    %767 = vector.broadcast %766 : vector<16x1xf32> to vector<16x128xf32>
    %768 = arith.subf %760, %767 : vector<16x128xf32>
    %769 = arith.mulf %768, %768 : vector<16x128xf32>
    %cst_304 = arith.constant dense<0.000000e+00> : vector<16xf32>
    %770 = vector.multi_reduction <add>, %769, %cst_304 [1] : vector<16x128xf32> to vector<16xf32>
    %771 = vector.shape_cast %770 : vector<16xf32> to vector<16x1xf32>
    %cst_305 = arith.constant 1.280000e+02 : f32
    %772 = vector.broadcast %cst_305 : f32 to vector<16x1xf32>
    %773 = arith.divf %771, %772 : vector<16x1xf32>
    %774 = vector.broadcast %766 : vector<16x1xf32> to vector<16x128xf32>
    %775 = arith.subf %760, %774 : vector<16x128xf32>
    %cst_306 = arith.constant 9.99999974E-6 : f32
    %776 = vector.broadcast %cst_306 : f32 to vector<16x1xf32>
    %777 = arith.addf %773, %776 : vector<16x1xf32>
    %778 = math.rsqrt %777 : vector<16x1xf32>
    %779 = vector.broadcast %778 : vector<16x1xf32> to vector<16x128xf32>
    %780 = arith.mulf %775, %779 : vector<16x128xf32>
    %781 = vector.broadcast %761 : vector<1x128xf32> to vector<16x128xf32>
    %782 = arith.mulf %780, %781 : vector<16x128xf32>
    %783 = vector.broadcast %762 : vector<1x128xf32> to vector<16x128xf32>
    %784 = arith.addf %782, %783 : vector<16x128xf32>
    %785 = arith.truncf %784 : vector<16x128xf32> to vector<16x128xbf16>
    %c0_307 = arith.constant 0 : index
    %c0_308 = arith.constant 0 : index
    %786 = vector.load %arg15[%c0_307, %c0_308] : memref<128x128xbf16, #tpu.memory_space<vmem>>, vector<128x128xbf16>
    %cst_309 = arith.constant dense<0.000000e+00> : vector<16x128xf32>
    %787 = tpu.matmul %785, %786, %cst_309 {dimension_numbers = #tpu.dot_dimension_numbers<[1], [1], [0], [0], [0, 0, 1, 0], [], []>} : vector<16x128xbf16>, vector<128x128xbf16>, vector<16x128xf32> -> vector<16x128xf32>
    %c0_310 = arith.constant 0 : index
    %c0_311 = arith.constant 0 : index
    %788 = vector.load %arg16[%c0_310, %c0_311] : memref<1x128xf32, #tpu.memory_space<vmem>>, vector<1x128xf32>
    %789 = vector.broadcast %788 : vector<1x128xf32> to vector<16x128xf32>
    %790 = arith.addf %787, %789 : vector<16x128xf32>
    %c0_312 = arith.constant 0 : index
    %c0_313 = arith.constant 0 : index
    %c0_314 = arith.constant 0 : index
    %791 = vector.load %arg17[%c0_312, %c0_313, %c0_314] : memref<1x16x128xf32, #tpu.memory_space<vmem>>, vector<1x16x128xf32>
    %792 = vector.shape_cast %791 : vector<1x16x128xf32> to vector<16x128xf32>
    %793 = vector.shape_cast %790 : vector<16x128xf32> to vector<1x16x128xf32>
    tpu.vector_store %arg17[%c0_312, %c0_313, %c0_314], %793 {strides = array<i32>} : memref<1x16x128xf32, #tpu.memory_space<vmem>>, vector<1x16x128xf32>,
    return
  }
  func.func @transform_0(%arg0: i32) -> (i32, i32, i32) {
    %c0_i32 = arith.constant 0 : i32
    %c0_i32_0 = arith.constant 0 : i32
    %c0_i32_1 = arith.constant 0 : i32
    return %arg0, %c0_i32, %c0_i32_0 : i32, i32, i32
  }
  func.func @transform_1(%arg0: i32) -> (i32, i32, i32) {
    %c0_i32 = arith.constant 0 : i32
    %c0_i32_0 = arith.constant 0 : i32
    %c0_i32_1 = arith.constant 0 : i32
    %c0_i32_2 = arith.constant 0 : i32
    return %c0_i32, %c0_i32_0, %c0_i32_1 : i32, i32, i32
  }
  func.func @transform_2(%arg0: i32) -> (i32, i32, i32) {
    %c0_i32 = arith.constant 0 : i32
    %c0_i32_0 = arith.constant 0 : i32
    %c0_i32_1 = arith.constant 0 : i32
    %c0_i32_2 = arith.constant 0 : i32
    return %c0_i32, %c0_i32_0, %c0_i32_1 : i32, i32, i32
  }
  func.func @transform_3(%arg0: i32) -> (i32, i32, i32) {
    %c0_i32 = arith.constant 0 : i32
    %c0_i32_0 = arith.constant 0 : i32
    %c0_i32_1 = arith.constant 0 : i32
    %c0_i32_2 = arith.constant 0 : i32
    return %c0_i32, %c0_i32_0, %c0_i32_1 : i32, i32, i32
  }
  func.func @transform_4(%arg0: i32) -> (i32, i32, i32) {
    %c0_i32 = arith.constant 0 : i32
    %c0_i32_0 = arith.constant 0 : i32
    %c0_i32_1 = arith.constant 0 : i32
    %c0_i32_2 = arith.constant 0 : i32
    return %c0_i32, %c0_i32_0, %c0_i32_1 : i32, i32, i32
  }
  func.func @transform_5(%arg0: i32) -> (i32, i32, i32) {
    %c0_i32 = arith.constant 0 : i32
    %c0_i32_0 = arith.constant 0 : i32
    %c0_i32_1 = arith.constant 0 : i32
    %c0_i32_2 = arith.constant 0 : i32
    return %c0_i32, %c0_i32_0, %c0_i32_1 : i32, i32, i32
  }
  func.func @transform_6(%arg0: i32) -> (i32, i32, i32) {
    %c0_i32 = arith.constant 0 : i32
    %c0_i32_0 = arith.constant 0 : i32
    %c0_i32_1 = arith.constant 0 : i32
    %c0_i32_2 = arith.constant 0 : i32
    return %c0_i32, %c0_i32_0, %c0_i32_1 : i32, i32, i32
  }
  func.func @transform_7(%arg0: i32) -> (i32, i32, i32) {
    %c0_i32 = arith.constant 0 : i32
    %c0_i32_0 = arith.constant 0 : i32
    %c0_i32_1 = arith.constant 0 : i32
    %c0_i32_2 = arith.constant 0 : i32
    return %c0_i32, %c0_i32_0, %c0_i32_1 : i32, i32, i32
  }
  func.func @transform_8(%arg0: i32) -> (i32, i32, i32) {
    %c0_i32 = arith.constant 0 : i32
    %c0_i32_0 = arith.constant 0 : i32
    %c0_i32_1 = arith.constant 0 : i32
    %c0_i32_2 = arith.constant 0 : i32
    return %c0_i32, %c0_i32_0, %c0_i32_1 : i32, i32, i32
  }
  func.func @transform_9(%arg0: i32) -> (i32, i32, i32) {
    %c0_i32 = arith.constant 0 : i32
    %c0_i32_0 = arith.constant 0 : i32
    %c0_i32_1 = arith.constant 0 : i32
    %c0_i32_2 = arith.constant 0 : i32
    return %c0_i32, %c0_i32_0, %c0_i32_1 : i32, i32, i32
  }
  func.func @transform_10(%arg0: i32) -> (i32, i32, i32) {
    %c0_i32 = arith.constant 0 : i32
    %c0_i32_0 = arith.constant 0 : i32
    %c0_i32_1 = arith.constant 0 : i32
    %c0_i32_2 = arith.constant 0 : i32
    return %c0_i32, %c0_i32_0, %c0_i32_1 : i32, i32, i32
  }
  func.func @transform_11(%arg0: i32) -> (i32, i32, i32) {
    %c0_i32 = arith.constant 0 : i32
    %c0_i32_0 = arith.constant 0 : i32
    %c0_i32_1 = arith.constant 0 : i32
    %c0_i32_2 = arith.constant 0 : i32
    return %c0_i32, %c0_i32_0, %c0_i32_1 : i32, i32, i32
  }
  func.func @transform_12(%arg0: i32) -> (i32, i32) {
    %c0_i32 = arith.constant 0 : i32
    %c0_i32_0 = arith.constant 0 : i32
    %c0_i32_1 = arith.constant 0 : i32
    return %c0_i32, %c0_i32_0 : i32, i32
  }
  func.func @transform_13(%arg0: i32) -> (i32, i32) {
    %c0_i32 = arith.constant 0 : i32
    %c0_i32_0 = arith.constant 0 : i32
    %c0_i32_1 = arith.constant 0 : i32
    return %c0_i32, %c0_i32_0 : i32, i32
  }
  func.func @transform_14(%arg0: i32) -> (i32, i32) {
    %c0_i32 = arith.constant 0 : i32
    %c0_i32_0 = arith.constant 0 : i32
    %c0_i32_1 = arith.constant 0 : i32
    return %c0_i32, %c0_i32_0 : i32, i32
  }
  func.func @transform_15(%arg0: i32) -> (i32, i32) {
    %c0_i32 = arith.constant 0 : i32
    %c0_i32_0 = arith.constant 0 : i32
    %c0_i32_1 = arith.constant 0 : i32
    return %c0_i32, %c0_i32_0 : i32, i32
  }
  func.func @transform_16(%arg0: i32) -> (i32, i32, i32) {
    %c0_i32 = arith.constant 0 : i32
    %c0_i32_0 = arith.constant 0 : i32
    %c0_i32_1 = arith.constant 0 : i32
    return %arg0, %c0_i32, %c0_i32_0 : i32, i32, i32
  }
}

</mosaic_0001>

<bundles_post_ra>
// kernel: tpu_custom_call.1
= control target key start
LH: loop header
LB: loop body
LE: loop exit
PB: predicated region body
PF: predicated region fallthrough
CT: control target
= control target key end

     0   :  { %s13166_s0 = inlined_call_operand.hbm [shape: f32[2,16,128], index: 0, kind: input, shape index: {}]   ;;  %s13167_s1 = inlined_call_operand.hbm [shape: f32[4,1,128], index: 1, kind: input, shape index: {}]   ;;  %s13168_s2 = inlined_call_operand.hbm [shape: f32[4,1,128], index: 2, kind: input, shape index: {}]   ;;  %s13169_s3 = inlined_call_operand.hbm [shape: bf16[4,384,128], index: 3, kind: input, shape index: {}]   ;;  %s13170_s4 = inlined_call_operand.hbm [shape: bf16[4,128,128], index: 4, kind: input, shape index: {}]   ;;  %s13171_s5 = inlined_call_operand.hbm [shape: f32[4,1,128], index: 5, kind: input, shape index: {}]   ;;  %s13172_s6 = inlined_call_operand.hbm [shape: f32[4,1,128], index: 6, kind: input, shape index: {}]   ;;  %s13173_s7 = inlined_call_operand.hbm [shape: f32[4,1,128], index: 7, kind: input, shape index: {}]   ;;  %s13174_s8 = inlined_call_operand.hbm [shape: bf16[4,512,128], index: 8, kind: input, shape index: {}]   ;;  %s13175_s9 = inlined_call_operand.vmem [shape: f32[4,1,512], index: 9, kind: input, shape index: {}]   ;;  %s13176_s10 = inlined_call_operand.hbm [shape: bf16[4,128,512], index: 10, kind: input, shape index: {}]   ;;  %s13177_s11 = inlined_call_operand.vmem [shape: f32[4,1,128], index: 11, kind: input, shape index: {}]   ;;  %s13178_s12 = inlined_call_operand.vmem [shape: f32[1,128], index: 12, kind: input, shape index: {}]   ;;  %s13179_s13 = inlined_call_operand.vmem [shape: f32[1,128], index: 13, kind: input, shape index: {}]   ;;  %s13180_s14 = inlined_call_operand.hbm [shape: bf16[128,128], index: 14, kind: input, shape index: {}]   ;;  %s13181_s15 = inlined_call_operand.vmem [shape: f32[1,128], index: 15, kind: input, shape index: {}]   ;;  %s13182_s16 = inlined_call_operand.hbm [shape: f32[2,16,128], index: 16, kind: output, shape index: {}]  }
   0x1   :  { %13196 = sst [smem:[#allocation28_spill]] %s13166_s0 }
   0x2   :  { %13197 = sst [smem:[#allocation29_spill]] %s13167_s1 }
   0x3   :  { %13198 = sst [smem:[#allocation30_spill]] %s13168_s2 }
   0x4   :  { %13199 = sst [smem:[#allocation31_spill]] %s13169_s3 }
   0x5   :  { %13200 = sst [smem:[#allocation32_spill]] %s13170_s4 }
   0x6   :  { %13201 = sst [smem:[#allocation33_spill]] %s13171_s5 }
   0x7   :  { %13202 = sst [smem:[#allocation34_spill]] %s13172_s6 }
   0x8   :  { %13203 = sst [smem:[#allocation35_spill]] %s13173_s7 }
   0x9   :  { %13204 = sst [smem:[#allocation36_spill]] %s13179_s13 }
   0xa   :  { %13205 = sst [smem:[#allocation37_spill]] %s13181_s15 }
   0xb   :  { %13206 = sst [smem:[#allocation38_spill]] %s13182_s16 }
   0xc   :  { %21 = vsyncpa [#allocation3], 0 }
   0xd   :  { %23 = vsyncpa [#allocation3 + $0x1], 0 }
   0xe   :  { %24 = vsyncpa [#allocation6], 0 }
   0xf   :  { %25 = vsyncpa [#allocation9], 0 }
  0x10   :  { %26 = vsyncpa [#allocation12], 0 }
  0x11   :  { %27 = vsyncpa [#allocation15], 0 }
  0x12   :  { %28 = vsyncpa [#allocation18], 0 }
  0x13   :  { %29 = vsyncpa [#allocation4], 0 }
  0x14   :  { %31 = vsyncpa [#allocation4 + $0x1], 0  ;;  %s11570_s21 = smov 0   ;;  %s11572_s22 = smov 0  }
  0x15   :  { %s11574_s23 = smov 0   ;;  %s11576_s24 = smov 0  }
  0x16 LB: > { %s11459_s25 = smov [#allocation5]   ;;  %s11591_s27 = sadd.s32 4294967295, %s11457_s24   ;;  %s11457_s24 = sphi %s11576_s24, %s13251_s24   ;;  %s11453_s23 = sphi %s11574_s23, %s13250_s23   ;;  %s11449_s22 = sphi %s11572_s22, %s13249_s22   ;;  %s11445_s21 = sphi %s11570_s21, %s13248_s21  }
  0x17   : > { %s421_s26 = sshll.u32 %s11459_s25, 4  ;;  %p8713_p0 = scmp.ge.s32.totalorder %s11457_s24, 1  ;;  %s422_s26 = int_to_ptr.vmem [resolvable:$true] %s421_s26 }
  0x18   : > { %p13192_p1 = scmp.eq.s32.totalorder %s11591_s27, 0  ;;  %p409_p2 = scmp.lt.s32.totalorder %s11457_s24, 3 }
  0x19   : > { %s11460_s29 = smov [#allocation8]   ;;  %s11461_s17 = smov [#allocation11]  }
  0x1a   : > { %p11596_p3 = pnand %p8713_p0, %p409_p2  ;;  %s447_s30 = sshll.u32 %s11460_s29, 4  ;;  %s11609_s30 = int_to_ptr.vmem [resolvable:$true] %s447_s30 }
  0x1b   : > { %s11611_s18 = sshll.u32 %s11461_s17, 4  ;;  %s11096_s20 = scalar_lea.vmem %s422_s26, 64  ;;  %s474_s18 = int_to_ptr.vmem [resolvable:$true] %s11611_s18 }
  0x1c   : > { %s13207_s28 = scalar_select %p11596_p3, 1, 0 }
  0x1d   : > { %p10346_p5 = pneg %p11596_p3  ;;  %p11097_p8 = scmp.ne.s32.totalorder %s422_s26, %s11096_s20 }
  0x1e   : > { %p11104_p11 = scmp.lt.s32.totalorder %s422_s26, %s422_s26  ;;  %p11105_p12 = scmp.lt.s32.totalorder %s11096_s20, %s11096_s20 }
  0x1f   : > { %p11605_p6 = pnand %p10346_p5, %p13192_p1 }
  0x20   : > { %p11106_p13 = por %p11105_p12, %p11104_p11 }
  0x21   : > { %p11615_p7 = pneg %p11605_p6 }
  0x23   : > { %p11099_p9 = pnand %p11097_p8, %p11615_p7 }
  0x25   : > { %p11100_p10 = pneg %p11099_p9 }
  0x27   : > { %p11107_p0 = pnand %p11106_p13, %p11100_p10 }
  0x29   : > { %11110 = shalt.err (!%p11107_p0)
}
  0x2a   : > { %s13191_s25 = smov 16   ;;  %s13189_s29 = smov 1  }
  0x2b   : > { %s13210_s1 = sld [smem:[#allocation29_spill]]  ;;  %s11122_s15 = scalar_lea.vmem %s11609_s30, 12288 }
  0x2c   : > { %p11123_p2 = scmp.ne.s32.totalorder %s11609_s30, %s11122_s15  ;;  %p11130_p9 = scmp.lt.s32.totalorder %s11609_s30, %s11609_s30 }
  0x2d   : > { %p11131_p10 = scmp.lt.s32.totalorder %s11122_s15, %s11122_s15 }
  0x2e   : > { %p11125_p5 = pnand %p11123_p2, %p11615_p7 }
  0x2f   : > { %p11132_p11 = por %p11131_p10, %p11130_p9 }
  0x30   : > { %p11126_p8 = pneg %p11125_p5 }
  0x31   : > { %10349 = dma.hbm_to_vmem [thread:$0]  (!%p11605_p6), %s13210_s1, 64, %s422_s26, [#allocation6], %s13191_s25, %s13191_s25, %s13189_s29  }
  0x32   : > { %p11133_p12 = pnand %p11132_p11, %p11126_p8 }
  0x34   : > { %11136 = shalt.err (!%p11133_p12)
}
  0x35   : > { %s13185_s20 = smov 64   ;;  %s13187_s13 = smov 4  }
  0x36   : > { %s13211_s3 = sld [smem:[#allocation31_spill]]  ;;  %s11148_s17 = scalar_lea.vmem %s474_s18, 64 }
  0x37   : > { %p11149_p13 = scmp.ne.s32.totalorder %s474_s18, %s11148_s17  ;;  %p11156_p5 = scmp.lt.s32.totalorder %s474_s18, %s474_s18 }
  0x38   : > { %p11157_p8 = scmp.lt.s32.totalorder %s11148_s17, %s11148_s17 }
  0x39   : > { %p11151_p0 = pnand %p11149_p13, %p11615_p7 }
  0x3a   : > { %p11158_p9 = por %p11157_p8, %p11156_p5 }
  0x3b   : > { %p11152_p2 = pneg %p11151_p0 }
  0x3c   : > { %10355 = dma.hbm_to_vmem [thread:$0]  (!%p11605_p6), %s13211_s3, 12288, %s11609_s30, [#allocation9], %s13185_s20, %s13185_s20, %s13187_s13  }
  0x3d   : > { %p11159_p10 = pnand %p11158_p9, %p11152_p2 }
  0x3f   : > { %11162 = shalt.err (!%p11159_p10)
}
  0x40   : > { %s13212_s5 = sld [smem:[#allocation33_spill]]  ;;  %s11466_s30 = smov [#allocation14]  }
  0x41   : > { %s499_s16 = sshll.u32 %s11466_s30, 4  ;;  %s11467_s26 = smov [#allocation17]   ;;  %s500_s16 = int_to_ptr.vmem [resolvable:$true] %s499_s16 }
  0x42   : > { %s528_s20 = sshll.u32 %s11467_s26, 4  ;;  %s11174_s13 = scalar_lea.vmem %s500_s16, 64  ;;  %s529_s20 = int_to_ptr.vmem [resolvable:$true] %s528_s20 }
  0x43   : > { %p11175_p11 = scmp.ne.s32.totalorder %s500_s16, %s11174_s13  ;;  %p11182_p0 = scmp.lt.s32.totalorder %s500_s16, %s500_s16 }
  0x44   : > { %p11183_p2 = scmp.lt.s32.totalorder %s11174_s13, %s11174_s13 }
  0x45   : > { %p11177_p12 = pnand %p11175_p11, %p11615_p7 }
  0x46   : > { %10361 = dma.hbm_to_vmem [thread:$0]  (!%p11605_p6), %s13212_s5, 64, %s474_s18, [#allocation12], %s13191_s25, %s13191_s25, %s13189_s29  }
  0x47   : > { %p11178_p13 = pneg %p11177_p12  ;;  %p11184_p5 = por %p11183_p2, %p11182_p0 }
  0x49   : > { %p11185_p8 = pnand %p11184_p5, %p11178_p13 }
  0x4b   : > { %11188 = shalt.err (!%p11185_p8)
}
  0x4c   : > { %s13213_s7 = sld [smem:[#allocation35_spill]]  ;;  %s11200_s17 = scalar_lea.vmem %s529_s20, 16384 }
  0x4d   : > { %p11201_p9 = scmp.ne.s32.totalorder %s529_s20, %s11200_s17  ;;  %p11208_p12 = scmp.lt.s32.totalorder %s529_s20, %s529_s20 }
  0x4e   : > { %p11209_p0 = scmp.lt.s32.totalorder %s11200_s17, %s11200_s17 }
  0x4f   : > { %p11203_p10 = pnand %p11201_p9, %p11615_p7 }
  0x50   : > { %p11210_p13 = por %p11209_p0, %p11208_p12 }
  0x51   : > { %p11204_p11 = pneg %p11203_p10 }
  0x52   : > { %10367 = dma.hbm_to_vmem [thread:$0]  (!%p11605_p6), %s13213_s7, 64, %s500_s16, [#allocation15], %s13191_s25, %s13191_s25, %s13189_s29  }
  0x53   : > { %p11211_p2 = pnand %p11210_p13, %p11204_p11 }
  0x55   : > { %11214 = shalt.err (!%p11211_p2)
}
  0x56   : > { %s11468_s13 = smov 256   ;;  %s11469_s16 = smov [#allocation7]  }
  0x57   : > { %10373 = dma.hbm_to_vmem [thread:$0]  (!%p11605_p6), %s13176_s10, 16384, %s529_s20, [#allocation18], %s11468_s13, %s11468_s13, %s13191_s25  }
  0x58   : > { %s434_s26 = sshll.u32 %s11469_s16, 4  ;;  %s11470_s1 = smov [#allocation10]   ;;  %s435_s26 = int_to_ptr.vmem [resolvable:$true] %s434_s26 }
  0x59   : > { %s460_s18 = sshll.u32 %s11470_s1, 4  ;;  %s11226_s29 = scalar_lea.vmem %s435_s26, 64  ;;  %s461_s18 = int_to_ptr.vmem [resolvable:$true] %s460_s18 }
  0x5a   : > { %p11227_p5 = scmp.ne.s32.totalorder %s435_s26, %s11226_s29  ;;  %p11234_p10 = scmp.lt.s32.totalorder %s435_s26, %s435_s26 }
  0x5b   : > { %p11235_p11 = scmp.lt.s32.totalorder %s11226_s29, %s11226_s29 }
  0x5c   : > { %p11229_p8 = pnand %p11227_p5, %p11615_p7 }
  0x5d   : > { %p11236_p12 = por %p11235_p11, %p11234_p10 }
  0x5e   : > { %p11230_p9 = pneg %p11229_p8 }
  0x60   : > { %p11237_p0 = pnand %p11236_p12, %p11230_p9 }
  0x62   : > { %11240 = shalt.err (!%p11237_p0)
}
  0x63   : > { %s13214_s17 = smov 1   ;;  %s13215_s2 = sld [smem:[#allocation30_spill]] }
  0x64   : > { %s11252_s15 = scalar_lea.vmem %s461_s18, 4096  ;;  %p11260_p8 = scmp.lt.s32.totalorder %s461_s18, %s461_s18 }
  0x65   : > { %p11253_p13 = scmp.ne.s32.totalorder %s461_s18, %s11252_s15  ;;  %p11261_p4 = scmp.lt.s32.totalorder %s11252_s15, %s11252_s15 }
  0x67   : > { %p11255_p2 = pnand %p11253_p13, %p11615_p7  ;;  %p11262_p10 = por %p11261_p4, %p11260_p8 }
  0x69   : > { %10352 = dma.hbm_to_vmem [thread:$0]  (!%p11605_p6), %s13215_s2, 64, %s435_s26, [#allocation6], %s13191_s25, %s13191_s25, %s13214_s17  }
  0x6a   : > { %p11256_p5 = pneg %p11255_p2 }
  0x6c   : > { %p11263_p9 = pnand %p11262_p10, %p11256_p5 }
  0x6e   : > { %11266 = shalt.err (!%p11263_p9)
}
  0x6f   : > { %s13216_s29 = smov 4   ;;  %s13217_s30 = smov 64  }
  0x70   : > { %s13218_s4 = sld [smem:[#allocation32_spill]]  ;;  %s11471_s26 = smov [#allocation13]  }
  0x71   : > { %s486_s20 = sshll.u32 %s11471_s26, 4  ;;  %s11472_s13 = smov [#allocation16]   ;;  %s487_s20 = int_to_ptr.vmem [resolvable:$true] %s486_s20 }
  0x72   : > { %s512_s25 = sshll.u32 %s11472_s13, 4  ;;  %s11278_s15 = scalar_lea.vmem %s487_s20, 64  ;;  %s513_s25 = int_to_ptr.vmem [resolvable:$true] %s512_s25 }
  0x73   : > { %p11279_p4 = scmp.ne.s32.totalorder %s487_s20, %s11278_s15  ;;  %p11286_p0 = scmp.lt.s32.totalorder %s487_s20, %s487_s20 }
  0x74   : > { %p11287_p13 = scmp.lt.s32.totalorder %s11278_s15, %s11278_s15 }
  0x75   : > { %p11281_p11 = pnand %p11279_p4, %p11615_p7 }
  0x76   : > { %10358 = dma.hbm_to_vmem [thread:$0]  (!%p11605_p6), %s13218_s4, 4096, %s461_s18, [#allocation9], %s13217_s30, %s13217_s30, %s13216_s29  }
  0x77   : > { %p11282_p12 = pneg %p11281_p11  ;;  %p11288_p2 = por %p11287_p13, %p11286_p0 }
  0x79   : > { %p11289_p5 = pnand %p11288_p2, %p11282_p12 }
  0x7b   : > { %11292 = shalt.err (!%p11289_p5)
}
  0x7c   : > { %s13219_s18 = smov 16   ;;  %s13220_s6 = sld [smem:[#allocation34_spill]] }
  0x7d   : > { %s11304_s26 = scalar_lea.vmem %s513_s25, 16384  ;;  %p11312_p4 = scmp.lt.s32.totalorder %s513_s25, %s513_s25 }
  0x7e   : > { %p11305_p8 = scmp.ne.s32.totalorder %s513_s25, %s11304_s26  ;;  %p11313_p11 = scmp.lt.s32.totalorder %s11304_s26, %s11304_s26 }
  0x80   : > { %p11307_p10 = pnand %p11305_p8, %p11615_p7  ;;  %p11314_p0 = por %p11313_p11, %p11312_p4 }
  0x82   : > { %10364 = dma.hbm_to_vmem [thread:$0]  (!%p11605_p6), %s13220_s6, 64, %s487_s20, [#allocation12], %s13219_s18, %s13219_s18, %s13214_s17  }
  0x83   : > { %p11308_p9 = pneg %p11307_p10 }
  0x85   : > { %p11315_p12 = pnand %p11314_p0, %p11308_p9 }
  0x87   : > { %11318 = shalt.err (!%p11315_p12)
}
  0x88   : > { %10370 = dma.hbm_to_vmem [thread:$0]  (!%p11605_p6), %s13174_s8, 16384, %s513_s25, [#allocation15], %s13217_s30, %s13217_s30, %s13216_s29  }
  0x89   : > { %s11473_s17 = smov [#allocation19]  }
  0x8a   : > { %s550_s20 = sshll.u32 %s11473_s17, 4  ;;  %s551_s20 = int_to_ptr.vmem [resolvable:$true] %s550_s20 }
  0x8b   : > { %s11330_s18 = scalar_lea.vmem %s551_s20, 1024  ;;  %p11338_p8 = scmp.lt.s32.totalorder %s551_s20, %s551_s20 }
  0x8c   : > { %p11331_p13 = scmp.ne.s32.totalorder %s551_s20, %s11330_s18  ;;  %p11339_p10 = scmp.lt.s32.totalorder %s11330_s18, %s11330_s18 }
  0x8e   : > { %p11333_p2 = pnand %p11331_p13, %p11615_p7  ;;  %p11340_p9 = por %p11339_p10, %p11338_p8 }
  0x90   : > { %p11334_p5 = pneg %p11333_p2 }
  0x92   : > { %p11341_p4 = pnand %p11340_p9, %p11334_p5 }
  0x94   : > { %11344 = shalt.err (!%p11341_p4)
}
  0x95   : > { %10376 = dma.hbm_to_vmem [thread:$0]  (!%p11605_p6), %s13180_s14, 1024, %s551_s20, [#allocation18], %s13217_s30, %s13217_s30, %s13216_s29  }
  0x96   : > { %s8712_s0 = sadd.s32 4294967294, %s11457_s24   ;;  %s11725_s19 = sadd.s32 1, %s11457_s24  }
  0x97   : > { %s44_s1 = sadd.s32 1, %s11453_s23  ;;  %s41_s26 = ssub.s32 %s11457_s24, %s11725_s19 }
  0x98   : > { %p51_p7 = scmp.ne.s32.totalorder %s11453_s23, %s11449_s22  ;;  %p42_p11 = scmp.eq.s32.totalorder %s41_s26, 0 }
  0x99   : > { %p52_p0 = scmp.eq.s32.totalorder %s11457_s24, 0  ;;  %p57_p12 = scmp.ne.s32.totalorder %s11449_s22, %s11445_s21 }
  0x9a   : > { %p396_p13 = scmp.eq.s32.totalorder %s11591_s27, 1  ;;  %p402_p8 = scmp.eq.s32.totalorder %s8712_s0, 1 }
  0x9b   : > { %s11737_s13 = scalar_select %p42_p11, %s11453_s23, %s44_s1  }
  0x9c   : > { %p53_p2 = por %p52_p0, %p51_p7  ;;  %p11741_p5 = por %p13192_p1, %p57_p12 }
  0x9d   : > { %p11745_p6 = por %p396_p13, %p51_p7  ;;  %p10395_p10 = scmp.lt.s32.totalorder %s11457_s24, 2 }
  0x9e   : > { %s13221_s15 = scalar_select %p11741_p5, 1, 0 }
  0x9f   : > { %s13222_s29 = scalar_select %p11745_p6, 1, 0 }
  0xa0   : > { %s567_s30 = sand.u32 1, %s11453_s23   ;;  %p11751_p9 = por %p402_p8, %p57_p12 }
  0xa1   : > { %s8725_s20 = sshll.u32 %s567_s30, 4  ;;  %s9219_s18 = sshll.u32 %s11457_s24, 8 }
  0xa2   : > { %s13223_s17 = scalar_select %p11751_p9, 1, 0 }
  0xa3   : > { %s13224_s1 = sld [smem:[#allocation28_spill]]  ;;  %s571_s2 = scalar_lea.vmem [#allocation2], %s8725_s20 }
  0xa4   : > { %s578_s3 = sshll.u32 %s571_s2, 4  ;;  %p11761_p4 = pnand %p10395_p10, %p53_p2  ;;  %s11765_s3 = int_to_ptr.vmem [resolvable:$true] %s578_s3 }
  0xa5   : > { %s11767_s4 = scalar_lea.sflag [#allocation3], %s567_s30 }
  0xa6   : > { %p11347_p11 = pneg %p11761_p4 }
  0xa9   : > { %s11759_s26 = scalar_lea.hbm %s13224_s1, %s9219_s18  ;;  %s11350_s20 = scalar_lea.hbm %s13224_s1, 512 }
  0xaa   : > { %s11345_s5 = scalar_lea.hbm %s11759_s26, 256  ;;  %p11351_p13 = scmp.lt.s32.totalorder %s11759_s26, %s13224_s1 }
  0xab   : > { %p11346_p7 = scmp.ne.s32.totalorder %s11759_s26, %s11345_s5  ;;  %p11352_p2 = scmp.lt.s32.totalorder %s11350_s20, %s11345_s5 }
  0xad   : > { %p11348_p0 = pnand %p11347_p11, %p11346_p7  ;;  %p11353_p8 = por %p11352_p2, %p11351_p13 }
  0xaf   : > { %p11349_p12 = pneg %p11348_p0 }
  0xb1   : > { %p11354_p10 = pnand %p11353_p8, %p11349_p12 }
  0xb3   : > { %11357 = shalt.err (!%p11354_p10)
}
  0xb4   : > { %s11358_s30 = scalar_lea.vmem %s11765_s3, 256  ;;  %s11474_s6 = smov [#allocation2]  }
  0xb5   : > { %p11359_p1 = scmp.ne.s32.totalorder %s11765_s3, %s11358_s30  ;;  %s11363_s7 = sshll.u32 %s11474_s6, 4  ;;  %s11364_s7 = int_to_ptr.vmem [resolvable:$false] %s11363_s7 }
  0xb6   : > { %s11365_s18 = scalar_lea.vmem %s11364_s7, 512  ;;  %p11366_p0 = scmp.lt.s32.totalorder %s11765_s3, %s11364_s7 }
  0xb7   : > { %p11361_p9 = pnand %p11359_p1, %p11347_p11  ;;  %p11367_p6 = scmp.lt.s32.totalorder %s11365_s18, %s11358_s30 }
  0xb9   : > { %p11362_p7 = pneg %p11361_p9  ;;  %p11368_p5 = por %p11367_p6, %p11366_p0 }
  0xbb   : > { %p11369_p3 = pnand %p11368_p5, %p11362_p7 }
  0xbd   : > { %11372 = shalt.err (!%p11369_p3)
}
  0xbe   : > { %s11475_s5 = smov 128   ;;  %s11476_s16 = smov 8  }
  0xbf   : > { %10380 = dma.hbm_to_vmem [thread:$0]  (!%p11761_p4), %s11759_s26, 256, %s11765_s3, %s11767_s4, %s11475_s5, %s11475_s5, %s11476_s16  }
  0xc0   : > { %p13226_p1 = scmp.ne.s32.totalorder %s13207_s28, 0 }
  0xc1   : > { %s11791_s6 = sand.u32 (!%p13226_p1), 1, %s11449_s22   ;;  %p13227_p3 = scmp.ne.s32.totalorder (!%p13226_p1), %s13221_s15, 0 }
  0xc2   : > { %590 = sbr.rel (%p13226_p1) target bundleno = 16275 (0x3f93), region = 84  ;;  %s8729_s7 = sshll.u32 (!%p13226_p1), %s11791_s6, 4 }
  0xc3   : > { %s593_s20 = scalar_lea.sflag (!%p13226_p1), [#allocation3], %s11791_s6  ;;  %s11797_s2 = scalar_lea.vmem (!%p13226_p1), [#allocation2], %s8729_s7 }
  0xc7   : > { %11416 = dma.done.wait (%p13227_p3), %s593_s20, 256  }
  0xc8   : > { %11418 = vsyncadd (%p13227_p3), %s593_s20, 4294967040  ;;  %p13228_p5 = scmp.eq.s32.totalorder %s11591_s27, 0 }
  0xca   : > { %11420 = dma.done.wait (%p13228_p5), [#allocation6], 128   ;;  %p13229_p6 = pmov %p13228_p5 }
  0xcb   : > { %p13230_p9 = pmov %p13228_p5 }
  0xcc   : > { %11422 = vsyncadd (%p13229_p6), [#allocation6], 4294967168 }
  0xcd   : > { %11424 = dma.done.wait (%p13230_p9), [#allocation9], 16384   ;;  %p13231_p4 = pmov %p13228_p5 }
  0xcf   : > { %11426 = vsyncadd (%p13231_p4), [#allocation9], 4294950912  ;;  %p13232_p11 = pmov %p13231_p4 }
  0xd0   : > { %p13233_p12 = pmov %p13231_p4 }
  0xd1   : > { %11428 = dma.done.wait (%p13232_p11), [#allocation12], 128  }
  0xd2   : > { %11430 = vsyncadd (%p13233_p12), [#allocation12], 4294967168  ;;  %p13234_p13 = pmov %p13231_p4 }
  0xd3   : > { %p13235_p2 = pmov %p13231_p4 }
  0xd4   : > { %11432 = dma.done.wait (%p13234_p13), [#allocation15], 16448  }
  0xd5   : > { %11434 = vsyncadd (%p13235_p2), [#allocation15], 4294950848  ;;  %p13236_p8 = pmov %p13235_p2 }
  0xd6   : > { %p13237_p10 = pmov %p13235_p2 }
  0xd7   : > { %11436 = dma.done.wait (%p13236_p8), [#allocation18], 17408  }
  0xd8   : > { %11438 = vsyncadd (%p13237_p10), [#allocation18], 4294949888  ;;  %v686_v0 = vld [vmem:[%s11797_s2] sm:$0xff]  ;;  %v687_v1 = vld [vmem:[%s11797_s2 + $0x8] sm:$0xff]  ;;  %v11477_v5 = vmov 0.0   ;;  %vm11478_vm0 = vmmov 0  }
  0xd9   : > { %697 = vadd.xlane.f32.xlu0 %v686_v0  ;;  %v10463_v2 = vld [vmem:[#allocation8 + $0x78] sm:$0xff]   ;;  %9690 = vmatprep.subr.bf16.mxu1 %v11477_v5  ;;  %v10466_v6 = vld [vmem:[#allocation8 + $0x70] sm:$0xff]   ;;  %v10469_v9 = vld [vmem:[#allocation8 + $0x68] sm:$0xff]   ;;  %vm1032_vm1 = vcmask 261120   ;;  %vm1084_vm3 = vcmask 130048   ;;  %s11479_s3 = smov 96  }
  0xda   : > { %v10464_v3 = vld [vmem:[#allocation8 + $0xb8] sm:$0xff]   ;;  %9221 = vmatprep.subr.bf16.mxu0 %v10463_v2  ;;  %v10467_v7 = vld [vmem:[#allocation8 + $0xb0] sm:$0xff]   ;;  %v10470_v10 = vld [vmem:[#allocation8 + $0xa8] sm:$0xff]   ;;  %9706 = vmatprep.mubr.msk.bf16.mxu1 %vm11478_vm0, %v11477_v5  ;;  %s11480_s4 = smov 64   ;;  %s11481_s28 = smov 32  }
  0xdb   : > { %v10465_v4 = vld [vmem:[#allocation8 + $0x38] sm:$0xff]   ;;  %9691 = vmatpush3.bf16.xpose.msra.mxu1 %v10464_v3  ;;  %v10468_v8 = vld [vmem:[#allocation8 + $0x30] sm:$0xff]   ;;  %v10471_v11 = vld [vmem:[#allocation8 + $0x28] sm:$0xff]   ;;  %s13242_s16 = sld [smem:[#allocation36_spill]]  ;;  %s684_s26 = scalar_lea.vmem [#allocation20], %s8729_s7 }
  0xdc   : > { %9222 = vmatpush3.bf16.xpose.msra.mxu0 %v10465_v4  ;;  %9692 = vmatprep.subr.bf16.mxu1 %v11477_v5  ;;  %v10472_v12 = vld [vmem:[#allocation8 + $0x60] sm:$0xff]   ;;  %v10475_v15 = vld [vmem:[#allocation8 + $0x58] sm:$0xff]   ;;  %v10478_v26 = vld [vmem:[#allocation8 + $0x50] sm:$0xff]   ;;  %s13243_s15 = sld [smem:[#allocation37_spill]]  ;;  %s8531_s7 = scalar_lea.sflag [#allocation4], %s11791_s6 }
  0xdd   : > { %699 = vadd.xlane.f32.xlu0 %v687_v1  ;;  %9223 = vmatprep.subr.bf16.mxu0 %v10466_v6  ;;  %v10473_v13 = vld [vmem:[#allocation8 + $0xa0] sm:$0xff]   ;;  %v10476_v16 = vld [vmem:[#allocation8 + $0x98] sm:$0xff]   ;;  %v10479_v27 = vld [vmem:[#allocation8 + $0x90] sm:$0xff]   ;;  %s13244_s25 = sld [smem:[#allocation38_spill]]  ;;  %p13245_p0 = scmp.ne.s32.totalorder %s13222_s29, 0 }
  0xde   : > { %v10474_v14 = vld [vmem:[#allocation8 + $0x20] sm:$0xff]   ;;  %v10477_v25 = vld [vmem:[#allocation8 + $0x18] sm:$0xff]   ;;  %v10480_v28 = vld [vmem:[#allocation8 + $0x10] sm:$0xff]  }
  0xdf   : > { %v10481_v29 = vld [vmem:[#allocation8 + $0x48] sm:$0xff]   ;;  %v10484_v32 = vld [vmem:[#allocation8 + $0x40] sm:$0xff]   ;;  %v8741_v43 = vld [vmem:[#allocation5] ss:$0 sm:$0xff] }
  0xe0   : > { %v10482_v30 = vld [vmem:[#allocation8 + $0x88] sm:$0xff]   ;;  %v10485_v33 = vld [vmem:[#allocation8 + $0x80] sm:$0xff]   ;;  %v8742_v47 = vld [vmem:[#allocation7] ss:$0 sm:$0xff] }
  0xe1   : > { %v10483_v31 = vld [vmem:[#allocation8 + $0x8] sm:$0xff]   ;;  %v10486_v34 = vld [vmem:[#allocation8] sm:$0xff]  }
  0xe3   : > { %9693 = vmatpush3.bf16.xpose.msra.mxu1 %v10467_v7 }
  0xe4   : > { %9224 = vmatpush3.bf16.xpose.msra.mxu0 %v10468_v8  ;;  %9694 = vmatprep.subr.bf16.mxu1 %v11477_v5 }
  0xe5   : > { %9225 = vmatprep.subr.bf16.mxu0 %v10469_v9 }
  0xeb   : > { %9695 = vmatpush3.bf16.xpose.msra.mxu1 %v10470_v10 }
  0xec   : > { %9226 = vmatpush3.bf16.xpose.msra.mxu0 %v10471_v11  ;;  %9696 = vmatprep.subr.bf16.mxu1 %v11477_v5 }
  0xed   : > { %9227 = vmatprep.subr.bf16.mxu0 %v10472_v12 }
  0xf3   : > { %9697 = vmatpush3.bf16.xpose.msra.mxu1 %v10473_v13 }
  0xf4   : > { %9228 = vmatpush3.bf16.xpose.msra.mxu0 %v10474_v14  ;;  %9698 = vmatprep.subr.bf16.mxu1 %v11477_v5 }
  0xf5   : > { %9229 = vmatprep.subr.bf16.mxu0 %v10475_v15 }
  0xfb   : > { %9699 = vmatpush3.bf16.xpose.msra.mxu1 %v10476_v16 }
  0xfc   : > { %9700 = vmatprep.subr.bf16.mxu1 %v11477_v5  ;;  %9230 = vmatpush3.bf16.xpose.msra.mxu0 %v10477_v25 }
  0xfd   : > { %9231 = vmatprep.subr.bf16.mxu0 %v10478_v26 }
 0x103   : > { %9701 = vmatpush3.bf16.xpose.msra.mxu1 %v10479_v27 }
 0x104   : > { %9232 = vmatpush3.bf16.xpose.msra.mxu0 %v10480_v28  ;;  %9702 = vmatprep.subr.bf16.mxu1 %v11477_v5 }
 0x105   : > { %9233 = vmatprep.subr.bf16.mxu0 %v10481_v29 }
 0x10b   : > { %9703 = vmatpush3.bf16.xpose.msra.mxu1 %v10482_v30 }
 0x10c   : > { %9234 = vmatpush3.bf16.xpose.msra.mxu0 %v10483_v31  ;;  %9704 = vmatprep.subr.bf16.mxu1 %v11477_v5 }
 0x10d   : > { %9235 = vmatprep.subr.bf16.mxu0 %v10484_v32 }
 0x113   : > { %9705 = vmatpush3.bf16.xpose.msra.mxu1 %v10485_v33 }
 0x114   : > { %9236 = vmatpush3.bf16.xpose.msra.mxu0 %v10486_v34  ;;  %9710 = vmatprep.subr.bf16.mxu1 %v11477_v5 }
 0x115   : > { %9734 = vmatprep.subr.bf16.mxu0 %v11477_v5 }
 0x162   : > { %v698_v17 = vpop.xlane.xlu0 %697 }
 0x163   : > { %v702_v18 = vmul.f32 0.0078125, %v698_v17 }
 0x165   : > { %v704_v19 = vsub.f32 %v686_v0, %v702_v18  ;;  %v688_v0 = vlaneseq }
 0x166   : > { %v700_v20 = vpop.xlane.xlu0 %699 }
 0x167   : > { %v703_v21 = vmul.f32 0.0078125, %v700_v20  ;;  %v706_v22 = vmul.f32 %v704_v19, %v704_v19  ;;  %v692_v2 = vand.u32 127, %v688_v0 }
 0x169   : > { %708 = vadd.xlane.f32.xlu1 %v706_v22  ;;  %v705_v23 = vsub.f32 %v687_v1, %v703_v21  ;;  %v11856_v1 = vshrl.u32 %v688_v0, 7 }
 0x16b   : > { %v707_v24 = vmul.f32 %v705_v23, %v705_v23  ;;  %vm11859_vm2 = vcmp.ge.s32.totalorder %v11856_v1, %v692_v2  ;;  %v690_v6 = vadd.s32 8, %v11856_v1 }
 0x16d   : > { %710 = vadd.xlane.f32.xlu1 %v707_v24  ;;  %vm11867_vm4 = vcmp.ge.s32.totalorder %v690_v6, %v692_v2 }
 0x1f2   : > { %v709_v35 = vpop.xlane.xlu1 %708 }
 0x1f3   : > { %v712_v36 = vmul.f32 0.0078125, %v709_v35 }
 0x1f5   : > { %v714_v37 = vadd.f32 1e-05, %v712_v36 }
 0x1f6   : > { %v711_v38 = vpop.xlane.xlu1 %710 }
 0x1f7   : > { %10919 = vrsqrt.f32 %v714_v37  ;;  %v713_v39 = vmul.f32 0.0078125, %v711_v38 }
 0x1f9   : > { %v715_v40 = vadd.f32 1e-05, %v713_v39 }
 0x1fb   : > { %10921 = vrsqrt.f32 %v715_v40 }
 0x204   : > { %v10920_v41 = vpop.eup %10919 }
 0x205   : > { %v718_v42 = vmul.f32 %v10920_v41, %v704_v19 }
 0x207   : > { %v726_v46 = vmul.f32 %v8741_v43, %v718_v42 }
 0x208   : > { %v10922_v44 = vpop.eup %10921 }
 0x209   : > { %v719_v45 = vmul.f32 %v10922_v44, %v705_v23  ;;  %v734_v49 = vadd.f32 %v8742_v47, %v726_v46 }
 0x20b   : > { %v727_v48 = vmul.f32 %v8741_v43, %v719_v45 }
 0x20d   : > { %v735_v50 = vadd.f32 %v8742_v47, %v727_v48 }
 0x20f   : > { %v736_v51 = vpack.c.bf16 %v735_v50, %v734_v49 }
 0x211   : > { %9237 = vmatprep.mubr.bf16.mxu0 %v736_v51  ;;  %9707 = vmatmul.mubr.bf16.vlgmr.msra.gmra.mxu1 %v736_v51 }
 0x212   : > { %9238 = vmatmul.mubr.bf16.vlgmr.msra.gmra.mxu0 %v736_v51  ;;  %9712 = vmatprep.mubr.msk.bf16.mxu1 %vm11478_vm0, %v11477_v5 }
 0x213   : > { %9750 = vmatprep.mubr.msk.bf16.mxu0 %vm11478_vm0, %v11477_v5 }
 0x2d1   : > { %v1006_v52 = vpop.f32.mrf.mxu1 }
 0x2d2   : > { %v963_v53 = vpop.f32.mrf.mxu0 }
 0x2d3   : > { %v9708_v54 = vpop.f32.mrf.mxu1 }
 0x2d4   : > { %v965_v55 = vpop.f32.mrf.mxu0 }
 0x2d5   : > { %v1009_v56 = vpop.f32.mrf.mxu1 }
 0x2d6   : > { %v967_v57 = vpop.f32.mrf.mxu0  ;;  %v11848_v63 = vpack.c.bf16 %v1009_v56, %v1006_v52 }
 0x2d7   : > { %v9709_v58 = vpop.f32.mrf.mxu1  ;;  %v11846_v62 = vpack.c.bf16 %v967_v57, %v963_v53 }
 0x2d8   : > { %v969_v59 = vpop.f32.mrf.mxu0 }
 0x2d9   : > { %v11841_v60 = vpack.c.bf16 %v969_v59, %v965_v55 }
 0x2db   : > { %v1037_v61 = vsel %vm1032_vm1, %v11841_v60, 0 }
 0x2dc   : > { %9711 = vmatpush3.bf16.xpose.msra.mxu1 %v1037_v61 }
 0x2dd   : > { %9716 = vmatprep.subr.bf16.mxu1 %v11477_v5 }
 0x2e3   : > { %9713 = vmatmul.mubr.msk.bf16.vlgmr.msra.gmra.mxu1 %vm1032_vm1, %v11846_v62 }
 0x2e4   : > { %9717 = vmatpush3.bf16.msra.mxu1 %v11848_v63  ;;  %9718 = vmatprep.mubr.msk.bf16.mxu1 %vm11478_vm0, %v11477_v5 }
 0x2e5   : > { %9722 = vmatprep.subr.bf16.mxu1 %v11477_v5 }
 0x3a3   : > { %v1073_v3 = vpop.f32.mrf.mxu1 }
 0x3a4   : > { %v1080_v7 = vmul.f32 0.17677669, %v1073_v3 }
 0x3a5   : > { %v9714_v8 = vpop.f32.mrf.mxu1 }
 0x3a6   : > { %v1082_v9 = vsel %vm11859_vm2, %v1080_v7, -1e+30  ;;  %v11909_v8 = vld [vmem:[#allocation10 + $0x38] sm:$0xff]  }
 0x3a7   : > { %v1076_v10 = vpop.f32.mrf.mxu1  ;;  %v1085_v11 = vsel %vm1084_vm3, %v1082_v9, -inf }
 0x3a8   : > { %v1081_v13 = vmul.f32 0.17677669, %v1076_v10  ;;  %1086 = vmax.xlane.f32.xlu0 %v1085_v11 }
 0x3a9   : > { %v9715_v14 = vpop.f32.mrf.mxu1 }
 0x3aa   : > { %v1083_v15 = vsel %vm11867_vm4, %v1081_v13, -1e+30  ;;  %v1431_v14 = vsel %vm1032_vm1, %v11909_v8, 0 }
 0x3ab   : > { %v1088_v16 = vsel %vm1084_vm3, %v1083_v15, -inf }
 0x3ac   : > { %1089 = vmax.xlane.f32.xlu1 %v1088_v16 }
 0x431   : > { %v1087_v17 = vpop.xlane.xlu0 %1086 }
 0x432   : > { %v1091_v18 = vsub.f32 %v1082_v9, %v1087_v17  ;;  %v11922_v17 = vld [vmem:[#allocation10 + $0x28] sm:$0xff]  }
 0x434   : > { %v1093_v19 = vmul.f32 1.442695, %v1091_v18  ;;  %v1425_v18 = vsel %vm1032_vm1, %v11922_v17, 0 }
 0x435   : > { %v1090_v20 = vpop.xlane.xlu1 %1089 }
 0x436   : > { %10923 = vpow2.f32 %v1093_v19  ;;  %v1092_v21 = vsub.f32 %v1083_v15, %v1090_v20  ;;  %v11917_v15 = vld [vmem:[#allocation10 + $0x30] sm:$0xff]   ;;  %v11927_v19 = vld [vmem:[#allocation10 + $0x20] sm:$0xff]  }
 0x437   : > { %v1428_v16 = vsel %vm1032_vm1, %v11917_v15, 0  ;;  %v1422_v20 = vsel %vm1032_vm1, %v11927_v19, 0 }
 0x438   : > { %v1095_v22 = vmul.f32 1.442695, %v1092_v21  ;;  %v11932_v21 = vld [vmem:[#allocation10 + $0x18] sm:$0xff]  }
 0x43a   : > { %10925 = vpow2.f32 %v1095_v22  ;;  %v1419_v22 = vsel %vm1032_vm1, %v11932_v21, 0 }
 0x443   : > { %v10924_v23 = vpop.eup %10923 }
 0x444   : > { %v1097_v24 = vsel %vm1084_vm3, %v10924_v23, 0.0 }
 0x445   : > { %1098 = vadd.xlane.f32.xlu0 %v1097_v24 }
 0x447   : > { %v10926_v25 = vpop.eup %10925 }
 0x448   : > { %v1100_v26 = vsel %vm1084_vm3, %v10926_v25, 0.0 }
 0x449   : > { %1101 = vadd.xlane.f32.xlu1 %v1100_v26 }
 0x45a   : > { %1154 = vrot.lane.b32.xlu1 %v11846_v62, %s11479_s3 }
 0x45b   : > { %1157 = vrot.lane.b32.xlu0 %v11841_v60, %s11479_s3 }
 0x4ce   : > { %v1099_v27 = vpop.xlane.xlu0 %1098 }
 0x4cf   : > { %10927 = vrcp.f32 %v1099_v27  ;;  %v11947_v27 = vld [vmem:[#allocation10] sm:$0xff]  }
 0x4d2   : > { %v1102_v28 = vpop.xlane.xlu1 %1101  ;;  %v1158_v33 = vpop.permute.xlu0 %1157 }
 0x4d3   : > { %10929 = vrcp.f32 %v1102_v28  ;;  %v1163_v35 = vsel %vm1032_vm1, %v1158_v33, 0  ;;  %v1410_v28 = vsel %vm1032_vm1, %v11947_v27, 0 }
 0x4d6   : > { %v1155_v36 = vpop.permute.xlu1 %1154 }
 0x4dc   : > { %v10928_v29 = vpop.eup %10927 }
 0x4dd   : > { %v1105_v31 = vmul.f32 %v10928_v29, %v10924_v23  ;;  %v11937_v23 = vld [vmem:[#allocation10 + $0x10] sm:$0xff]  }
 0x4de   : > { %v1416_v24 = vsel %vm1032_vm1, %v11937_v23, 0 }
 0x4e0   : > { %v10930_v30 = vpop.eup %10929 }
 0x4e1   : > { %v1106_v32 = vmul.f32 %v10930_v30, %v10926_v25  ;;  %v11942_v25 = vld [vmem:[#allocation10 + $0x8] sm:$0xff]  }
 0x4e2   : > { %v1413_v26 = vsel %vm1032_vm1, %v11942_v25, 0 }
 0x4e3   : > { %v1107_v34 = vpack.c.bf16 %v1106_v32, %v1105_v31 }
 0x4e5   : > { %9719 = vmatmul.mubr.msk.bf16.vlgmr.msra.gmra.mxu1 %vm1084_vm3, %v1107_v34 }
 0x4e6   : > { %9723 = vmatpush3.bf16.xpose.msra.mxu1 %v1163_v35  ;;  %9724 = vmatprep.mubr.msk.bf16.mxu1 %vm11478_vm0, %v11477_v5 }
 0x4e7   : > { %9728 = vmatprep.subr.bf16.mxu1 %v11477_v5 }
 0x4ed   : > { %9725 = vmatmul.mubr.msk.bf16.vlgmr.msra.gmra.mxu1 %vm1032_vm1, %v1155_v36 }
 0x4ee   : > { %9730 = vmatprep.mubr.msk.bf16.mxu1 %vm11478_vm0, %v11477_v5 }
 0x5a5   : > { %v11888_v37 = vpop.f32.mrf.mxu1 }
 0x5a7   : > { %v9720_v38 = vpop.f32.mrf.mxu1 }
 0x5a9   : > { %v11890_v39 = vpop.f32.mrf.mxu1 }
 0x5aa   : > { %v1152_v40 = vpack.c.bf16 %v11890_v39, %v11888_v37 }
 0x5ab   : > { %v9721_v41 = vpop.f32.mrf.mxu1 }
 0x5ad   : > { %v1199_v42 = vpop.f32.mrf.mxu1 }
 0x5ae   : > { %v1206_v43 = vmul.f32 0.17677669, %v1199_v42 }
 0x5af   : > { %v9726_v44 = vpop.f32.mrf.mxu1 }
 0x5b0   : > { %v1208_v45 = vsel %vm11859_vm2, %v1206_v43, -1e+30 }
 0x5b1   : > { %v1202_v46 = vpop.f32.mrf.mxu1  ;;  %v1210_v47 = vsel %vm1084_vm3, %v1208_v45, -inf }
 0x5b2   : > { %v1207_v48 = vmul.f32 0.17677669, %v1202_v46  ;;  %1211 = vmax.xlane.f32.xlu1 %v1210_v47 }
 0x5b3   : > { %v9727_v49 = vpop.f32.mrf.mxu1 }
 0x5b4   : > { %v1209_v50 = vsel %vm11867_vm4, %v1207_v48, -1e+30 }
 0x5b5   : > { %v1213_v51 = vsel %vm1084_vm3, %v1209_v50, -inf }
 0x5b6   : > { %1214 = vmax.xlane.f32.xlu0 %v1213_v51 }
 0x63b   : > { %v1212_v52 = vpop.xlane.xlu1 %1211 }
 0x63c   : > { %v1216_v53 = vsub.f32 %v1208_v45, %v1212_v52 }
 0x63e   : > { %v1218_v54 = vmul.f32 1.442695, %v1216_v53 }
 0x63f   : > { %v1215_v55 = vpop.xlane.xlu0 %1214 }
 0x640   : > { %10931 = vpow2.f32 %v1218_v54  ;;  %v1217_v56 = vsub.f32 %v1209_v50, %v1215_v55 }
 0x642   : > { %v1220_v57 = vmul.f32 1.442695, %v1217_v56 }
 0x644   : > { %10933 = vpow2.f32 %v1220_v57 }
 0x64d   : > { %v10932_v58 = vpop.eup %10931 }
 0x64e   : > { %v1222_v59 = vsel %vm1084_vm3, %v10932_v58, 0.0 }
 0x64f   : > { %1223 = vadd.xlane.f32.xlu0 %v1222_v59 }
 0x651   : > { %v10934_v61 = vpop.eup %10933 }
 0x652   : > { %v1225_v0 = vsel %vm1084_vm3, %v10934_v61, 0.0 }
 0x653   : > { %1226 = vadd.xlane.f32.xlu1 %v1225_v0 }
 0x664   : > { %1476 = vrot.lane.b32.xlu1 %v11841_v60, %s11480_s4 }
 0x665   : > { %1234 = vrot.lane.b32.xlu0 %v11848_v63, %s11479_s3 }
 0x668   : > { %1474 = vrot.lane.b32.xlu1 %v11846_v62, %s11480_s4 }
 0x6d8   : > { %v1224_v2 = vpop.xlane.xlu0 %1223 }
 0x6d9   : > { %10935 = vrcp.f32 %v1224_v2 }
 0x6dc   : > { %v1227_v3 = vpop.xlane.xlu1 %1226  ;;  %v1235_v6 = vpop.permute.xlu0 %1234 }
 0x6dd   : > { %10937 = vrcp.f32 %v1227_v3  ;;  %9729 = vmatpush3.bf16.msra.mxu1 %v1235_v6 }
 0x6de   : > { %9754 = vmatprep.subr.bf16.mxu1 %v11477_v5 }
 0x6e0   : > { %v1477_v29 = vpop.permute.xlu1 %1476 }
 0x6e1   : > { %v1482_v30 = vsel %vm1032_vm1, %v1477_v29, 0 }
 0x6e4   : > { %v1475_v31 = vpop.permute.xlu1 %1474 }
 0x6e6   : > { %v10936_v7 = vpop.eup %10935 }
 0x6e7   : > { %v1230_v10 = vmul.f32 %v10936_v7, %v10932_v58 }
 0x6ea   : > { %v10938_v9 = vpop.eup %10937 }
 0x6eb   : > { %v1231_v11 = vmul.f32 %v10938_v9, %v10934_v61 }
 0x6ed   : > { %v1232_v13 = vpack.c.bf16 %v1231_v11, %v1230_v10 }
 0x6ef   : > { %9731 = vmatmul.mubr.msk.bf16.vlgmr.msra.gmra.mxu1 %vm1084_vm3, %v1232_v13 }
 0x6f0   : > { %9755 = vmatpush3.bf16.xpose.msra.mxu1 %v1431_v14  ;;  %9770 = vmatprep.mubr.msk.bf16.mxu1 %vm11478_vm0, %v11477_v5 }
 0x6f1   : > { %9756 = vmatprep.subr.bf16.mxu1 %v11477_v5 }
 0x6f8   : > { %9757 = vmatpush3.bf16.xpose.msra.mxu1 %v1428_v16 }
 0x6f9   : > { %9758 = vmatprep.subr.bf16.mxu1 %v11477_v5 }
 0x700   : > { %9759 = vmatpush3.bf16.xpose.msra.mxu1 %v1425_v18 }
 0x701   : > { %9760 = vmatprep.subr.bf16.mxu1 %v11477_v5 }
 0x708   : > { %9761 = vmatpush3.bf16.xpose.msra.mxu1 %v1422_v20 }
 0x709   : > { %9762 = vmatprep.subr.bf16.mxu1 %v11477_v5 }
 0x710   : > { %9763 = vmatpush3.bf16.xpose.msra.mxu1 %v1419_v22 }
 0x711   : > { %9764 = vmatprep.subr.bf16.mxu1 %v11477_v5 }
 0x718   : > { %9765 = vmatpush3.bf16.xpose.msra.mxu1 %v1416_v24 }
 0x719   : > { %9766 = vmatprep.subr.bf16.mxu1 %v11477_v5 }
 0x720   : > { %9767 = vmatpush3.bf16.xpose.msra.mxu1 %v1413_v26 }
 0x721   : > { %9768 = vmatprep.subr.bf16.mxu1 %v11477_v5 }
 0x728   : > { %9769 = vmatpush3.bf16.xpose.msra.mxu1 %v1410_v28 }
 0x729   : > { %9774 = vmatprep.subr.bf16.mxu1 %v11477_v5 }
 0x72f   : > { %9771 = vmatmul.mubr.msk.bf16.vlgmr.msra.gmra.mxu1 %vm1032_vm1, %v1152_v40 }
 0x730   : > { %9775 = vmatpush3.bf16.xpose.msra.mxu1 %v1482_v30  ;;  %9776 = vmatprep.mubr.msk.bf16.mxu1 %vm11478_vm0, %v11477_v5 }
 0x731   : > { %9780 = vmatprep.subr.bf16.mxu1 %v11477_v5 }
 0x737   : > { %9777 = vmatmul.mubr.msk.bf16.vlgmr.msra.gmra.mxu1 %vm1032_vm1, %v1475_v31 }
 0x738   : > { %9782 = vmatprep.mubr.msk.bf16.mxu1 %vm11478_vm0, %v11477_v5 }
 0x7af   : > { %v11963_v32 = vpop.f32.mrf.mxu1 }
 0x7b1   : > { %v9732_v33 = vpop.f32.mrf.mxu1 }
 0x7b3   : > { %v11965_v34 = vpop.f32.mrf.mxu1 }
 0x7b4   : > { %v1281_v35 = vpack.c.bf16 %v11965_v34, %v11963_v32 }
 0x7b5   : > { %v9733_v36 = vpop.f32.mrf.mxu1 }
 0x7ef   : > { %v11969_v37 = vpop.f32.mrf.mxu1 }
 0x7f1   : > { %v9772_v38 = vpop.f32.mrf.mxu1 }
 0x7f3   : > { %v11971_v39 = vpop.f32.mrf.mxu1 }
 0x7f5   : > { %v9773_v40 = vpop.f32.mrf.mxu1 }
 0x7f7   : > { %v1518_v41 = vpop.f32.mrf.mxu1 }
 0x7f8   : > { %v1525_v42 = vmul.f32 0.17677669, %v1518_v41 }
 0x7f9   : > { %v9778_v43 = vpop.f32.mrf.mxu1 }
 0x7fa   : > { %v1527_v44 = vsel %vm11859_vm2, %v1525_v42, -1e+30 }
 0x7fb   : > { %v1521_v45 = vpop.f32.mrf.mxu1  ;;  %v1529_v46 = vsel %vm1084_vm3, %v1527_v44, -inf }
 0x7fc   : > { %v1526_v47 = vmul.f32 0.17677669, %v1521_v45  ;;  %1530 = vmax.xlane.f32.xlu1 %v1529_v46 }
 0x7fd   : > { %v9779_v48 = vpop.f32.mrf.mxu1 }
 0x7fe   : > { %v1528_v49 = vsel %vm11867_vm4, %v1526_v47, -1e+30 }
 0x7ff   : > { %v1532_v50 = vsel %vm1084_vm3, %v1528_v49, -inf }
 0x800   : > { %1533 = vmax.xlane.f32.xlu0 %v1532_v50 }
 0x80d   : > { %1552 = vrot.lane.b32.xlu1 %v11848_v63, %s11480_s4 }
 0x811   : > { %1686 = vrot.lane.b32.xlu1 %v11846_v62, %s11481_s28 }
 0x885   : > { %v1531_v51 = vpop.xlane.xlu1 %1530 }
 0x886   : > { %v1535_v52 = vsub.f32 %v1527_v44, %v1531_v51 }
 0x888   : > { %v1537_v53 = vmul.f32 1.442695, %v1535_v52 }
 0x889   : > { %v1553_v54 = vpop.permute.xlu1 %1552  ;;  %v1534_v55 = vpop.xlane.xlu0 %1533 }
 0x88a   : > { %10939 = vpow2.f32 %v1537_v53  ;;  %v1536_v56 = vsub.f32 %v1528_v49, %v1534_v55  ;;  %9781 = vmatpush3.bf16.msra.mxu1 %v1553_v54 }
 0x88b   : > { %9806 = vmatprep.subr.bf16.mxu1 %v11477_v5 }
 0x88c   : > { %v1539_v57 = vmul.f32 1.442695, %v1536_v56 }
 0x88e   : > { %10941 = vpow2.f32 %v1539_v57 }
 0x897   : > { %v10940_v58 = vpop.eup %10939 }
 0x898   : > { %v1541_v59 = vsel %vm1084_vm3, %v10940_v58, 0.0 }
 0x899   : > { %1542 = vadd.xlane.f32.xlu0 %v1541_v59 }
 0x89b   : > { %v10942_v61 = vpop.eup %10941 }
 0x89c   : > { %v1544_v0 = vsel %vm1084_vm3, %v10942_v61, 0.0 }
 0x89d   : > { %1545 = vadd.xlane.f32.xlu0 %v1544_v0 }
 0x8b3   : > { %1688 = vrot.lane.b32.xlu0 %v11841_v60, %s11481_s28  ;;  %v1687_v60 = vpop.permute.xlu1 %1686 }
 0x922   : > { %v1543_v62 = vpop.xlane.xlu0 %1542 }
 0x923   : > { %10943 = vrcp.f32 %v1543_v62 }
 0x926   : > { %v1546_v2 = vpop.xlane.xlu0 %1545 }
 0x927   : > { %10945 = vrcp.f32 %v1546_v2 }
 0x92a   : > { %v1689_v10 = vpop.permute.xlu0 %1688 }
 0x92b   : > { %v1694_v13 = vsel %vm1032_vm1, %v1689_v10, 0 }
 0x930   : > { %v10944_v3 = vpop.eup %10943 }
 0x931   : > { %v1549_v7 = vmul.f32 %v10944_v3, %v10940_v58 }
 0x934   : > { %v10946_v6 = vpop.eup %10945 }
 0x935   : > { %v1550_v9 = vmul.f32 %v10946_v6, %v10942_v61 }
 0x937   : > { %v1551_v11 = vpack.c.bf16 %v1550_v9, %v1549_v7 }
 0x939   : > { %9783 = vmatmul.mubr.msk.bf16.vlgmr.msra.gmra.mxu1 %vm1084_vm3, %v1551_v11 }
 0x93a   : > { %9807 = vmatpush3.bf16.xpose.msra.mxu1 %v1694_v13  ;;  %9808 = vmatprep.mubr.msk.bf16.mxu1 %vm11478_vm0, %v11477_v5 }
 0x93b   : > { %9812 = vmatprep.subr.bf16.mxu1 %v11477_v5 }
 0x941   : > { %9809 = vmatmul.mubr.msk.bf16.vlgmr.msra.gmra.mxu1 %vm1032_vm1, %v1687_v60 }
 0x942   : > { %9814 = vmatprep.mubr.msk.bf16.mxu1 %vm11478_vm0, %v11477_v5 }
 0x9f9   : > { %v11996_v14 = vpop.f32.mrf.mxu1 }
 0x9fb   : > { %v9784_v16 = vpop.f32.mrf.mxu1 }
 0x9fd   : > { %v11998_v18 = vpop.f32.mrf.mxu1 }
 0x9fe   : > { %v1599_v20 = vpack.c.bf16 %v11998_v18, %v11996_v14 }
 0x9ff   : > { %v9785_v22 = vpop.f32.mrf.mxu1 }
 0xa01   : > { %v1730_v24 = vpop.f32.mrf.mxu1 }
 0xa02   : > { %v1737_v26 = vmul.f32 0.17677669, %v1730_v24 }
 0xa03   : > { %v9810_v28 = vpop.f32.mrf.mxu1 }
 0xa04   : > { %v1739_v29 = vsel %vm11859_vm2, %v1737_v26, -1e+30 }
 0xa05   : > { %v1733_v30 = vpop.f32.mrf.mxu1  ;;  %v1741_v31 = vsel %vm1084_vm3, %v1739_v29, -inf }
 0xa06   : > { %v1738_v33 = vmul.f32 0.17677669, %v1733_v30  ;;  %1742 = vmax.xlane.f32.xlu1 %v1741_v31 }
 0xa07   : > { %v9811_v36 = vpop.f32.mrf.mxu1 }
 0xa08   : > { %v1740_v38 = vsel %vm11867_vm4, %v1738_v33, -1e+30 }
 0xa09   : > { %v1744_v40 = vsel %vm1084_vm3, %v1740_v38, -inf }
 0xa0a   : > { %1745 = vmax.xlane.f32.xlu0 %v1744_v40 }
 0xa8f   : > { %v1743_v41 = vpop.xlane.xlu1 %1742 }
 0xa90   : > { %v1747_v42 = vsub.f32 %v1739_v29, %v1743_v41 }
 0xa92   : > { %v1749_v43 = vmul.f32 1.442695, %v1747_v42 }
 0xa93   : > { %v1746_v44 = vpop.xlane.xlu0 %1745 }
 0xa94   : > { %10947 = vpow2.f32 %v1749_v43  ;;  %v1748_v45 = vsub.f32 %v1740_v38, %v1746_v44 }
 0xa96   : > { %v1751_v46 = vmul.f32 1.442695, %v1748_v45 }
 0xa98   : > { %10949 = vpow2.f32 %v1751_v46 }
 0xaa1   : > { %v10948_v47 = vpop.eup %10947 }
 0xaa2   : > { %v1753_v48 = vsel %vm1084_vm3, %v10948_v47, 0.0 }
 0xaa3   : > { %1754 = vadd.xlane.f32.xlu0 %v1753_v48 }
 0xaa5   : > { %v10950_v49 = vpop.eup %10949 }
 0xaa6   : > { %v1756_v50 = vsel %vm1084_vm3, %v10950_v49, 0.0 }
 0xaa7   : > { %1757 = vadd.xlane.f32.xlu1 %v1756_v50 }
 0xab8   : > { %1336 = vrot.lane.b32.xlu1 %v11909_v8, %s11479_s3 }
 0xab9   : > { %1764 = vrot.lane.b32.xlu0 %v11848_v63, %s11481_s28 }
 0xabc   : > { %1334 = vrot.lane.b32.xlu1 %v11917_v15, %s11479_s3 }
 0xabd   : > { %1330 = vrot.lane.b32.xlu0 %v11927_v19, %s11479_s3 }
 0xac0   : > { %1332 = vrot.lane.b32.xlu1 %v11922_v17, %s11479_s3 }
 0xac1   : > { %1326 = vrot.lane.b32.xlu0 %v11937_v23, %s11479_s3 }
 0xac4   : > { %1328 = vrot.lane.b32.xlu1 %v11932_v21, %s11479_s3 }
 0xac5   : > { %1322 = vrot.lane.b32.xlu0 %v11947_v27, %s11479_s3 }
 0xac8   : > { %1324 = vrot.lane.b32.xlu1 %v11942_v25, %s11479_s3 }
 0xac9   : > { %1826 = vrot.lane.b32.xlu0 %v11909_v8, %s11481_s28 }
 0xacc   : > { %1614 = vrot.lane.b32.xlu1 %v11909_v8, %s11480_s4 }
 0xacd   : > { %1824 = vrot.lane.b32.xlu0 %v11917_v15, %s11481_s28 }
 0xad0   : > { %1612 = vrot.lane.b32.xlu1 %v11917_v15, %s11480_s4 }
 0xad1   : > { %1822 = vrot.lane.b32.xlu0 %v11922_v17, %s11481_s28 }
 0xad4   : > { %1610 = vrot.lane.b32.xlu1 %v11922_v17, %s11480_s4 }
 0xad5   : > { %1820 = vrot.lane.b32.xlu0 %v11927_v19, %s11481_s28 }
 0xad8   : > { %1608 = vrot.lane.b32.xlu1 %v11927_v19, %s11480_s4 }
 0xad9   : > { %1818 = vrot.lane.b32.xlu0 %v11932_v21, %s11481_s28 }
 0xadc   : > { %1606 = vrot.lane.b32.xlu1 %v11932_v21, %s11480_s4 }
 0xadd   : > { %1816 = vrot.lane.b32.xlu0 %v11937_v23, %s11481_s28 }
 0xae0   : > { %1604 = vrot.lane.b32.xlu1 %v11937_v23, %s11480_s4 }
 0xae1   : > { %1814 = vrot.lane.b32.xlu0 %v11942_v25, %s11481_s28 }
 0xae4   : > { %1602 = vrot.lane.b32.xlu1 %v11942_v25, %s11480_s4 }
 0xae5   : > { %1812 = vrot.lane.b32.xlu0 %v11947_v27, %s11481_s28 }
 0xae8   : > { %1600 = vrot.lane.b32.xlu1 %v11947_v27, %s11480_s4 }
 0xb2c   : > { %v1755_v63 = vpop.xlane.xlu0 %1754 }
 0xb2d   : > { %10951 = vrcp.f32 %v1755_v63 }
 0xb30   : > { %v1758_v8 = vpop.xlane.xlu1 %1757  ;;  %v1765_v15 = vpop.permute.xlu0 %1764 }
 0xb31   : > { %10953 = vrcp.f32 %v1758_v8  ;;  %9813 = vmatpush3.bf16.msra.mxu1 %v1765_v15 }
 0xb32   : > { %9818 = vmatprep.subr.bf16.mxu1 %v11477_v5 }
 0xb34   : > { %v1337_v17 = vpop.permute.xlu1 %1336  ;;  %v1331_v19 = vpop.permute.xlu0 %1330 }
 0xb35   : > { %v1363_v21 = vsel %vm1032_vm1, %v1337_v17, 0  ;;  %v1354_v2 = vsel %vm1032_vm1, %v1331_v19, 0 }
 0xb36   : > { %9735 = vmatpush3.bf16.xpose.msra.mxu0 %v1363_v21 }
 0xb37   : > { %9736 = vmatprep.subr.bf16.mxu0 %v11477_v5 }
 0xb38   : > { %v1335_v23 = vpop.permute.xlu1 %1334  ;;  %v1327_v25 = vpop.permute.xlu0 %1326 }
 0xb39   : > { %v1360_v51 = vsel %vm1032_vm1, %v1335_v23, 0  ;;  %v1348_v13 = vsel %vm1032_vm1, %v1327_v25, 0 }
 0xb3a   : > { %v10952_v27 = vpop.eup %10951 }
 0xb3b   : > { %v1761_v54 = vmul.f32 %v10952_v27, %v10948_v47 }
 0xb3c   : > { %v1323_v52 = vpop.permute.xlu0 %1322  ;;  %v1333_v56 = vpop.permute.xlu1 %1332 }
 0xb3d   : > { %v1357_v61 = vsel %vm1032_vm1, %v1333_v56, 0  ;;  %v1342_v29 = vsel %vm1032_vm1, %v1323_v52, 0 }
 0xb3e   : > { %v10954_v53 = vpop.eup %10953  ;;  %9737 = vmatpush3.bf16.xpose.msra.mxu0 %v1360_v51 }
 0xb3f   : > { %v1762_v55 = vmul.f32 %v10954_v53, %v10950_v49  ;;  %9738 = vmatprep.subr.bf16.mxu0 %v11477_v5 }
 0xb40   : > { %v1827_v57 = vpop.permute.xlu0 %1826  ;;  %v1329_v6 = vpop.permute.xlu1 %1328 }
 0xb41   : > { %v1763_v58 = vpack.c.bf16 %v1762_v55, %v1761_v54  ;;  %v1853_v59 = vsel %vm1032_vm1, %v1827_v57, 0  ;;  %v1351_v9 = vsel %vm1032_vm1, %v1329_v6, 0 }
 0xb43   : > { %9815 = vmatmul.mubr.msk.bf16.vlgmr.msra.gmra.mxu1 %vm1084_vm3, %v1763_v58 }
 0xb44   : > { %9819 = vmatpush3.bf16.xpose.msra.mxu1 %v1853_v59  ;;  %9834 = vmatprep.mubr.msk.bf16.mxu1 %vm11478_vm0, %v11477_v5  ;;  %v1825_v0 = vpop.permute.xlu0 %1824  ;;  %v1325_v16 = vpop.permute.xlu1 %1324 }
 0xb45   : > { %9820 = vmatprep.subr.bf16.mxu1 %v11477_v5  ;;  %v1850_v62 = vsel %vm1032_vm1, %v1825_v0, 0  ;;  %v1345_v24 = vsel %vm1032_vm1, %v1325_v16, 0  ;;  %v11083_v0 = vld [vmem:[%s11797_s2] sm:$0xff] }
 0xb46   : > { %9739 = vmatpush3.bf16.xpose.msra.mxu0 %v1357_v61  ;;  %v8787_v61 = vld [vmem:[#allocation11] ss:$0 sm:$0xff] }
 0xb47   : > { %9740 = vmatprep.subr.bf16.mxu0 %v11477_v5  ;;  %v10499_v16 = vld [vmem:[#allocation16 + $0x70] sm:$0xff]  }
 0xb48   : > { %v1823_v3 = vpop.permute.xlu0 %1822  ;;  %v1615_v31 = vpop.permute.xlu1 %1614 }
 0xb49   : > { %v1847_v7 = vsel %vm1032_vm1, %v1823_v3, 0  ;;  %v1641_v36 = vsel %vm1032_vm1, %v1615_v31, 0  ;;  %v10506_v31 = vld [vmem:[#allocation16 + $0xa8] sm:$0xff]  }
 0xb4c   : > { %9821 = vmatpush3.bf16.xpose.msra.mxu1 %v1850_v62  ;;  %v1821_v10 = vpop.permute.xlu0 %1820  ;;  %v1613_v40 = vpop.permute.xlu1 %1612 }
 0xb4d   : > { %9822 = vmatprep.subr.bf16.mxu1 %v11477_v5  ;;  %v1844_v11 = vsel %vm1032_vm1, %v1821_v10, 0  ;;  %v1638_v42 = vsel %vm1032_vm1, %v1613_v40, 0  ;;  %v10510_v40 = vld [vmem:[#allocation16 + $0xa0] sm:$0xff]  }
 0xb4e   : > { %9741 = vmatpush3.bf16.xpose.msra.mxu0 %v1354_v2 }
 0xb4f   : > { %9742 = vmatprep.subr.bf16.mxu0 %v11477_v5 }
 0xb50   : > { %v1819_v60 = vpop.permute.xlu0 %1818  ;;  %v1611_v32 = vpop.permute.xlu1 %1610 }
 0xb51   : > { %v1841_v22 = vsel %vm1032_vm1, %v1819_v60, 0  ;;  %v1635_v34 = vsel %vm1032_vm1, %v1611_v32, 0  ;;  %v10498_v60 = vld [vmem:[#allocation16 + $0xb8] sm:$0xff]  }
 0xb54   : > { %9823 = vmatpush3.bf16.xpose.msra.mxu1 %v1847_v7  ;;  %v1817_v26 = vpop.permute.xlu0 %1816  ;;  %v11084_v7 = vld [vmem:[%s11797_s2 + $0x8] sm:$0xff] }
 0xb55   : > { %9824 = vmatprep.subr.bf16.mxu1 %v11477_v5  ;;  %v1838_v28 = vsel %vm1032_vm1, %v1817_v26, 0  ;;  %v10502_v26 = vld [vmem:[#allocation16 + $0xb0] sm:$0xff]  }
 0xb56   : > { %9743 = vmatpush3.bf16.xpose.msra.mxu0 %v1351_v9 }
 0xb57   : > { %9744 = vmatprep.subr.bf16.mxu0 %v11477_v5 }
 0xb58   : > { %v1815_v30 = vpop.permute.xlu0 %1814 }
 0xb59   : > { %v1835_v33 = vsel %vm1032_vm1, %v1815_v30, 0  ;;  %v10505_v30 = vld [vmem:[#allocation16 + $0x28] sm:$0xff]  }
 0xb5c   : > { %9825 = vmatpush3.bf16.xpose.msra.mxu1 %v1844_v11  ;;  %v1813_v38 = vpop.permute.xlu0 %1812  ;;  %v10496_v11 = vld [vmem:[#allocation16 + $0xf8] sm:$0xff]  }
 0xb5d   : > { %9826 = vmatprep.subr.bf16.mxu1 %v11477_v5  ;;  %v1832_v41 = vsel %vm1032_vm1, %v1813_v38, 0  ;;  %v10509_v38 = vld [vmem:[#allocation16 + $0x20] sm:$0xff]  }
 0xb5e   : > { %9745 = vmatpush3.bf16.xpose.msra.mxu0 %v1348_v13  ;;  %v10497_v13 = vld [vmem:[#allocation16 + $0x38] sm:$0xff]  }
 0xb5f   : > { %9746 = vmatprep.subr.bf16.mxu0 %v11477_v5 }
 0xb64   : > { %9827 = vmatpush3.bf16.xpose.msra.mxu1 %v1841_v22  ;;  %v10500_v22 = vld [vmem:[#allocation16 + $0xf0] sm:$0xff]  }
 0xb65   : > { %9828 = vmatprep.subr.bf16.mxu1 %v11477_v5 }
 0xb66   : > { %9747 = vmatpush3.bf16.xpose.msra.mxu0 %v1345_v24  ;;  %v10501_v24 = vld [vmem:[#allocation16 + $0x30] sm:$0xff]  }
 0xb67   : > { %9748 = vmatprep.subr.bf16.mxu0 %v11477_v5 }
 0xb6c   : > { %9829 = vmatpush3.bf16.xpose.msra.mxu1 %v1838_v28  ;;  %v10503_v28 = vld [vmem:[#allocation16 + $0x68] sm:$0xff]  }
 0xb6d   : > { %9830 = vmatprep.subr.bf16.mxu1 %v11477_v5 }
 0xb6e   : > { %9749 = vmatpush3.bf16.xpose.msra.mxu0 %v1342_v29  ;;  %v10504_v29 = vld [vmem:[#allocation16 + $0xe8] sm:$0xff]  }
 0xb6f   : > { %9786 = vmatprep.subr.bf16.mxu0 %v11477_v5 }
 0xb74   : > { %9831 = vmatpush3.bf16.xpose.msra.mxu1 %v1835_v33  ;;  %v10507_v33 = vld [vmem:[#allocation16 + $0x60] sm:$0xff]  }
 0xb75   : > { %9751 = vmatmul.mubr.msk.bf16.vlgmr.msra.gmra.mxu0 %vm1032_vm1, %v1281_v35  ;;  %9832 = vmatprep.subr.bf16.mxu1 %v11477_v5  ;;  %v1609_v35 = vpop.permute.xlu1 %1608 }
 0xb76   : > { %9787 = vmatpush3.bf16.xpose.msra.mxu0 %v1641_v36  ;;  %9802 = vmatprep.mubr.msk.bf16.mxu0 %vm11478_vm0, %v11477_v5  ;;  %v1632_v43 = vsel %vm1032_vm1, %v1609_v35, 0  ;;  %v10508_v36 = vld [vmem:[#allocation16 + $0xe0] sm:$0xff]  }
 0xb77   : > { %9788 = vmatprep.subr.bf16.mxu0 %v11477_v5 }
 0xb79   : > { %v1607_v44 = vpop.permute.xlu1 %1606 }
 0xb7a   : > { %v1629_v45 = vsel %vm1032_vm1, %v1607_v44, 0 }
 0xb7c   : > { %9833 = vmatpush3.bf16.xpose.msra.mxu1 %v1832_v41  ;;  %v10511_v41 = vld [vmem:[#allocation16 + $0x58] sm:$0xff]  }
 0xb7d   : > { %v1605_v46 = vpop.permute.xlu1 %1604  ;;  %9318 = vmatprep.subr.bf16.mxu1 %v10496_v11  ;;  %v10527_v11 = vld [vmem:[#allocation17 + $0xe0] ss:$16 sps:$4 sm:$0xff]  }
 0xb7e   : > { %9789 = vmatpush3.bf16.xpose.msra.mxu0 %v1638_v42  ;;  %v1626_v47 = vsel %vm1032_vm1, %v1605_v46, 0  ;;  %v10512_v42 = vld [vmem:[#allocation16 + $0xd8] sm:$0xff]  }
 0xb7f   : > { %9790 = vmatprep.subr.bf16.mxu0 %v11477_v5 }
 0xb81   : > { %v1603_v48 = vpop.permute.xlu1 %1602 }
 0xb82   : > { %v1623_v49 = vsel %vm1032_vm1, %v1603_v48, 0  ;;  %v10513_v48 = vld [vmem:[#allocation16 + $0x18] sm:$0xff]  }
 0xb85   : > { %v1601_v50 = vpop.permute.xlu1 %1600 }
 0xb86   : > { %9791 = vmatpush3.bf16.xpose.msra.mxu0 %v1635_v34  ;;  %v1620_v63 = vsel %vm1032_vm1, %v1601_v50, 0  ;;  %v10515_v50 = vld [vmem:[#allocation16 + $0x50] sm:$0xff]  }
 0xb87   : > { %9792 = vmatprep.subr.bf16.mxu0 %v11477_v5 }
 0xb8e   : > { %9793 = vmatpush3.bf16.xpose.msra.mxu0 %v1632_v43 }
 0xb8f   : > { %9794 = vmatprep.subr.bf16.mxu0 %v11477_v5 }
 0xb96   : > { %9795 = vmatpush3.bf16.xpose.msra.mxu0 %v1629_v45 }
 0xb97   : > { %9796 = vmatprep.subr.bf16.mxu0 %v11477_v5 }
 0xb9e   : > { %9797 = vmatpush3.bf16.xpose.msra.mxu0 %v1626_v47 }
 0xb9f   : > { %9798 = vmatprep.subr.bf16.mxu0 %v11477_v5 }
 0xba6   : > { %9799 = vmatpush3.bf16.xpose.msra.mxu0 %v1623_v49  ;;  %v10514_v49 = vld [vmem:[#allocation16 + $0x98] sm:$0xff]  }
 0xba7   : > { %9800 = vmatprep.subr.bf16.mxu0 %v11477_v5 }
 0xbae   : > { %9801 = vmatpush3.bf16.xpose.msra.mxu0 %v1620_v63  ;;  %v10516_v63 = vld [vmem:[#allocation16 + $0xd0] sm:$0xff]  }
 0xbb5   : > { %9803 = vmatmul.mubr.msk.bf16.vlgmr.msra.gmra.mxu0 %vm1032_vm1, %v1599_v20 }
 0xc03   : > { %v1804_v8 = vpop.f32.mrf.mxu1 }
 0xc05   : > { %v9816_v15 = vpop.f32.mrf.mxu1 }
 0xc06   : > { %v10518_v15 = vld [vmem:[#allocation16 + $0x90] sm:$0xff]  }
 0xc07   : > { %v1807_v17 = vpop.f32.mrf.mxu1 }
 0xc08   : > { %v1811_v19 = vpack.c.bf16 %v1807_v17, %v1804_v8  ;;  %v10517_v8 = vld [vmem:[#allocation16 + $0x10] sm:$0xff]   ;;  %v10519_v17 = vld [vmem:[#allocation16 + $0x48] sm:$0xff]  }
 0xc09   : > { %v9817_v21 = vpop.f32.mrf.mxu1 }
 0xc0a   : > { %9835 = vmatmul.mubr.msk.bf16.vlgmr.msra.gmra.mxu1 %vm1032_vm1, %v1811_v19  ;;  %v10520_v19 = vld [vmem:[#allocation16 + $0xc8] sm:$0xff]  }
 0xc0b   : > { %9319 = vmatpush3.bf16.xpose.msra.mxu1 %v10498_v60  ;;  %v10521_v21 = vld [vmem:[#allocation16 + $0x8] sm:$0xff]   ;;  %v10535_v60 = vld [vmem:[#allocation17 + $0xc4] ss:$16 sps:$4 sm:$0xff]  }
 0xc0c   : > { %9320 = vmatprep.subr.bf16.mxu1 %v10500_v22  ;;  %v10533_v22 = vld [vmem:[#allocation17 + $0xc0] ss:$16 sps:$4 sm:$0xff]  }
 0xc13   : > { %9321 = vmatpush3.bf16.xpose.msra.mxu1 %v10502_v26  ;;  %v10541_v26 = vld [vmem:[#allocation17 + $0xa4] ss:$16 sps:$4 sm:$0xff]  }
 0xc14   : > { %9322 = vmatprep.subr.bf16.mxu1 %v10504_v29  ;;  %v10539_v29 = vld [vmem:[#allocation17 + $0xa0] ss:$16 sps:$4 sm:$0xff]  }
 0xc1b   : > { %9323 = vmatpush3.bf16.xpose.msra.mxu1 %v10506_v31  ;;  %v10547_v31 = vld [vmem:[#allocation17 + $0x84] ss:$16 sps:$4 sm:$0xff]  }
 0xc1c   : > { %9324 = vmatprep.subr.bf16.mxu1 %v10508_v36  ;;  %v10545_v36 = vld [vmem:[#allocation17 + $0x80] ss:$16 sps:$4 sm:$0xff]  }
 0xc23   : > { %9325 = vmatpush3.bf16.xpose.msra.mxu1 %v10510_v40  ;;  %v10553_v40 = vld [vmem:[#allocation17 + $0x64] ss:$16 sps:$4 sm:$0xff]  }
 0xc24   : > { %9326 = vmatprep.subr.bf16.mxu1 %v10512_v42  ;;  %v10551_v42 = vld [vmem:[#allocation17 + $0x60] ss:$16 sps:$4 sm:$0xff]  }
 0xc2b   : > { %9327 = vmatpush3.bf16.xpose.msra.mxu1 %v10514_v49  ;;  %v10571_v49 = vld [vmem:[#allocation17 + $0x4] ss:$16 sps:$4 sm:$0xff]  }
 0xc2c   : > { %9328 = vmatprep.subr.bf16.mxu1 %v10516_v63  ;;  %v10569_v63 = vld [vmem:[#allocation17] ss:$16 sps:$4 sm:$0xff]  }
 0xc33   : > { %9329 = vmatpush3.bf16.xpose.msra.mxu1 %v10518_v15  ;;  %v12135_v15 = vsub.s32 1, %v11856_v1 }
 0xc34   : > { %9330 = vmatprep.subr.bf16.mxu1 %v10520_v19  ;;  %v12141_v19 = vsub.s32 0, %v11856_v1 }
 0xc35   : > { %v1399_v23 = vpop.f32.mrf.mxu0 }
 0xc36   : > { %v1468_v52 = vadd.f32 %v11969_v37, %v1399_v23  ;;  %v10522_v23 = vld [vmem:[#allocation16 + $0x88] sm:$0xff]  }
 0xc37   : > { %v9752_v25 = vpop.f32.mrf.mxu0 }
 0xc38   : > { %v10523_v25 = vld [vmem:[#allocation16 + $0x40] sm:$0xff]  }
 0xc39   : > { %v1402_v51 = vpop.f32.mrf.mxu0 }
 0xc3a   : > { %v1471_v18 = vadd.f32 %v11971_v39, %v1402_v51  ;;  %v10495_v39 = vld [vmem:[#allocation16 + $0x78] sm:$0xff]   ;;  %v10524_v51 = vld [vmem:[#allocation16 + $0xc0] sm:$0xff]  }
 0xc3b   : > { %v9753_v27 = vpop.f32.mrf.mxu0  ;;  %9300 = vmatprep.subr.bf16.mxu0 %v10495_v39  ;;  %9331 = vmatpush3.bf16.xpose.msra.mxu1 %v10522_v23  ;;  %v2014_v23 = vld [vmem:[%s13175_s9] sm:$0xf] }
 0xc3c   : > { %9301 = vmatpush3.bf16.xpose.msra.mxu0 %v10497_v13  ;;  %9332 = vmatprep.subr.bf16.mxu1 %v10524_v51  ;;  %v10525_v27 = vld [vmem:[#allocation16] sm:$0xff]   ;;  %v10530_v13 = vld [vmem:[#allocation17 + $0xe8] ss:$16 sps:$4 sm:$0xff]  }
 0xc3d   : > { %9302 = vmatprep.subr.bf16.mxu0 %v10499_v16  ;;  %v10538_v16 = vld [vmem:[#allocation17 + $0xcc] ss:$16 sps:$4 sm:$0xff]  }
 0xc44   : > { %9303 = vmatpush3.bf16.xpose.msra.mxu0 %v10501_v24  ;;  %v10536_v24 = vld [vmem:[#allocation17 + $0xc8] ss:$16 sps:$4 sm:$0xff]  }
 0xc45   : > { %9304 = vmatprep.subr.bf16.mxu0 %v10503_v28  ;;  %v10544_v28 = vld [vmem:[#allocation17 + $0xac] ss:$16 sps:$4 sm:$0xff]  }
 0xc4c   : > { %9305 = vmatpush3.bf16.xpose.msra.mxu0 %v10505_v30  ;;  %v10542_v30 = vld [vmem:[#allocation17 + $0xa8] ss:$16 sps:$4 sm:$0xff]  }
 0xc4d   : > { %9306 = vmatprep.subr.bf16.mxu0 %v10507_v33  ;;  %v10550_v33 = vld [vmem:[#allocation17 + $0x8c] ss:$16 sps:$4 sm:$0xff]  }
 0xc54   : > { %9307 = vmatpush3.bf16.xpose.msra.mxu0 %v10509_v38  ;;  %v10548_v38 = vld [vmem:[#allocation17 + $0x88] ss:$16 sps:$4 sm:$0xff]  }
 0xc55   : > { %9308 = vmatprep.subr.bf16.mxu0 %v10511_v41  ;;  %v10556_v41 = vld [vmem:[#allocation17 + $0x6c] ss:$16 sps:$4 sm:$0xff]  }
 0xc5c   : > { %9309 = vmatpush3.bf16.xpose.msra.mxu0 %v10513_v48  ;;  %v10566_v48 = vld [vmem:[#allocation17 + $0x28] ss:$16 sps:$4 sm:$0xff]  }
 0xc5d   : > { %9310 = vmatprep.subr.bf16.mxu0 %v10515_v50  ;;  %v10574_v50 = vld [vmem:[#allocation17 + $0xc] ss:$16 sps:$4 sm:$0xff]  }
 0xc64   : > { %9311 = vmatpush3.bf16.xpose.msra.mxu0 %v10517_v8  ;;  %v10572_v8 = vld [vmem:[#allocation17 + $0x8] ss:$16 sps:$4 sm:$0xff]  }
 0xc65   : > { %9312 = vmatprep.subr.bf16.mxu0 %v10519_v17  ;;  %v12138_v17 = vsub.s32 3, %v11856_v1 }
 0xc6c   : > { %9313 = vmatpush3.bf16.xpose.msra.mxu0 %v10521_v21  ;;  %v12144_v21 = vsub.s32 2, %v11856_v1 }
 0xc6d   : > { %9314 = vmatprep.subr.bf16.mxu0 %v10523_v25 }
 0xc74   : > { %9315 = vmatpush3.bf16.xpose.msra.mxu0 %v10525_v27  ;;  %v2023_v27 = vrot.slane %v2014_v23, %v12135_v15 }
 0xc75   : > { %v1677_v53 = vpop.f32.mrf.mxu0 }
 0xc76   : > { %v1684_v54 = vadd.f32 %v1677_v53, %v1468_v52  ;;  %v10526_v52 = vld [vmem:[#allocation16 + $0x80] sm:$0xff]  }
 0xc77   : > { %v9804_v14 = vpop.f32.mrf.mxu0  ;;  %9333 = vmatpush3.bf16.xpose.msra.mxu1 %v10526_v52  ;;  %v10529_v53 = vld [vmem:[#allocation17 + $0xe4] ss:$16 sps:$4 sm:$0xff]   ;;  %v2031_v52 = vrot.slane %v2014_v23, %v12138_v17 }
 0xc78   : > { %2525 = vmatprep.subr.bf16.mxu0 %v10529_v53  ;;  %v2019_v53 = vrot.slane %v2014_v23, %v12141_v19 }
 0xc79   : > { %v1680_v20 = vpop.f32.mrf.mxu0 }
 0xc7a   : > { %v1685_v55 = vadd.f32 %v1680_v20, %v1471_v18 }
 0xc7b   : > { %v9805_v56 = vpop.f32.mrf.mxu0 }
 0xcca   : > { %v1889_v57 = vpop.f32.mrf.mxu1 }
 0xccb   : > { %v1896_v58 = vadd.f32 %v1889_v57, %v1684_v54  ;;  %v10532_v54 = vld [vmem:[#allocation17 + $0xec] ss:$16 sps:$4 sm:$0xff]  }
 0xccc   : > { %v9836_v59 = vpop.f32.mrf.mxu1  ;;  %2566 = vmatprep.subr.bf16.mxu1 %v10532_v54  ;;  %v2027_v54 = vrot.slane %v2014_v23, %v12144_v21  ;;  %v10584_v23 = vld [vmem:[#allocation8 + $0x120] sm:$0xff]  }
 0xccd   : > { %v1898_v62 = vadd.f32 %v11083_v0, %v1896_v58 }
 0xcce   : > { %v1892_v2 = vpop.f32.mrf.mxu1 }
 0xccf   : > { %v1897_v3 = vadd.f32 %v1892_v2, %v1685_v55  ;;  %v12124_v6 = vadd.f32 %v8787_v61, %v1898_v62 }
 0xcd0   : > { %v9837_v37 = vpop.f32.mrf.mxu1 }
 0xcd1   : > { %v1899_v9 = vadd.f32 %v11084_v7, %v1897_v3  ;;  %1911 = vadd.xlane.f32.xlu1 %v12124_v6  ;;  %v8789_v3 = vld [vmem:[#allocation14] ss:$0 sm:$0xff] }
 0xcd3   : > { %v12128_v10 = vadd.f32 %v8787_v61, %v1899_v9  ;;  %v8788_v61 = vld [vmem:[#allocation13] ss:$0 sm:$0xff] }
 0xcd5   : > { %1913 = vadd.xlane.f32.xlu0 %v12128_v10 }
 0xd5a   : > { %v1912_v32 = vpop.xlane.xlu1 %1911 }
 0xd5b   : > { %v1915_v34 = vmul.f32 0.0078125, %v1912_v32  ;;  %v10554_v32 = vld [vmem:[#allocation17 + $0x68] ss:$16 sps:$4 sm:$0xff]  }
 0xd5d   : > { %v1917_v35 = vsub.f32 %v12124_v6, %v1915_v34  ;;  %v10559_v34 = vld [vmem:[#allocation17 + $0x44] ss:$16 sps:$4 sm:$0xff]  }
 0xd5e   : > { %v1914_v43 = vpop.xlane.xlu0 %1913 }
 0xd5f   : > { %v1916_v44 = vmul.f32 0.0078125, %v1914_v43  ;;  %v1919_v45 = vmul.f32 %v1917_v35, %v1917_v35  ;;  %v10557_v43 = vld [vmem:[#allocation17 + $0x40] ss:$16 sps:$4 sm:$0xff]  }
 0xd61   : > { %1921 = vadd.xlane.f32.xlu0 %v1919_v45  ;;  %v1918_v46 = vsub.f32 %v12128_v10, %v1916_v44  ;;  %v10560_v44 = vld [vmem:[#allocation17 + $0x48] ss:$16 sps:$4 sm:$0xff]   ;;  %v10565_v45 = vld [vmem:[#allocation17 + $0x24] ss:$16 sps:$4 sm:$0xff]  }
 0xd63   : > { %v1920_v47 = vmul.f32 %v1918_v46, %v1918_v46 }
 0xd65   : > { %1923 = vadd.xlane.f32.xlu0 %v1920_v47  ;;  %v10563_v47 = vld [vmem:[#allocation17 + $0x20] ss:$16 sps:$4 sm:$0xff]  }
 0xdea   : > { %v1922_v14 = vpop.xlane.xlu0 %1921 }
 0xdeb   : > { %v1925_v18 = vmul.f32 0.0078125, %v1922_v14 }
 0xded   : > { %v1927_v20 = vadd.f32 1e-05, %v1925_v18 }
 0xdee   : > { %v1924_v55 = vpop.xlane.xlu0 %1923 }
 0xdef   : > { %10955 = vrsqrt.f32 %v1927_v20  ;;  %v1926_v56 = vmul.f32 0.0078125, %v1924_v55 }
 0xdf1   : > { %v1928_v57 = vadd.f32 1e-05, %v1926_v56 }
 0xdf3   : > { %10957 = vrsqrt.f32 %v1928_v57 }
 0xdfc   : > { %v10956_v58 = vpop.eup %10955 }
 0xdfd   : > { %v1931_v59 = vmul.f32 %v10956_v58, %v1917_v35  ;;  %v10562_v35 = vld [vmem:[#allocation17 + $0x4c] ss:$16 sps:$4 sm:$0xff]  }
 0xdff   : > { %v1939_v2 = vmul.f32 %v8788_v61, %v1931_v59 }
 0xe00   : > { %v10958_v0 = vpop.eup %10957 }
 0xe01   : > { %v1932_v62 = vmul.f32 %v10958_v0, %v1918_v46  ;;  %v1947_v7 = vadd.f32 %v8789_v3, %v1939_v2  ;;  %v10568_v46 = vld [vmem:[#allocation17 + $0x2c] ss:$16 sps:$4 sm:$0xff]  }
 0xe03   : > { %v1940_v37 = vmul.f32 %v8788_v61, %v1932_v62 }
 0xe05   : > { %v1948_v9 = vadd.f32 %v8789_v3, %v1940_v37 }
 0xe07   : > { %v1949_v39 = vpack.c.bf16 %v1948_v9, %v1947_v7 }
 0xe09   : > { %9316 = vmatprep.mubr.bf16.mxu0 %v1949_v39  ;;  %9334 = vmatprep.mubr.bf16.mxu1 %v1949_v39 }
 0xe0a   : > { %9317 = vmatmul.mubr.bf16.vlgmr.msra.gmra.mxu0 %v1949_v39  ;;  %9335 = vmatmul.mubr.bf16.vlgmr.msra.gmra.mxu1 %v1949_v39 }
 0xe0b   : > { %2526 = vmatpush1.bf16.xpose.msra.mxu0 %v10527_v11  ;;  %2567 = vmatpush1.bf16.xpose.msra.mxu1 %v10530_v13 }
 0xe0c   : > { %2527 = vmatprep.subr.bf16.mxu0 %v10535_v60  ;;  %2568 = vmatprep.subr.bf16.mxu1 %v10538_v16 }
 0xe13   : > { %2528 = vmatpush1.bf16.xpose.msra.mxu0 %v10533_v22  ;;  %2569 = vmatpush1.bf16.xpose.msra.mxu1 %v10536_v24 }
 0xe14   : > { %2529 = vmatprep.subr.bf16.mxu0 %v10541_v26  ;;  %2570 = vmatprep.subr.bf16.mxu1 %v10544_v28 }
 0xe1b   : > { %2530 = vmatpush1.bf16.xpose.msra.mxu0 %v10539_v29  ;;  %2571 = vmatpush1.bf16.xpose.msra.mxu1 %v10542_v30  ;;  %v8822_v29 = vld [vmem:[%s13177_s11] ss:$0 sm:$0xff] }
 0xe1c   : > { %2531 = vmatprep.subr.bf16.mxu0 %v10547_v31  ;;  %2572 = vmatprep.subr.bf16.mxu1 %v10550_v33 }
 0xe23   : > { %2532 = vmatpush1.bf16.xpose.msra.mxu0 %v10545_v36  ;;  %2573 = vmatpush1.bf16.xpose.msra.mxu1 %v10548_v38 }
 0xe24   : > { %2533 = vmatprep.subr.bf16.mxu0 %v10553_v40  ;;  %2574 = vmatprep.subr.bf16.mxu1 %v10556_v41 }
 0xe2b   : > { %2534 = vmatpush1.bf16.xpose.msra.mxu0 %v10551_v42  ;;  %2575 = vmatpush1.bf16.xpose.msra.mxu1 %v10554_v32 }
 0xe2c   : > { %2535 = vmatprep.subr.bf16.mxu0 %v10559_v34  ;;  %2576 = vmatprep.subr.bf16.mxu1 %v10562_v35 }
 0xe33   : > { %2536 = vmatpush1.bf16.xpose.msra.mxu0 %v10557_v43  ;;  %2577 = vmatpush1.bf16.xpose.msra.mxu1 %v10560_v44 }
 0xe34   : > { %2537 = vmatprep.subr.bf16.mxu0 %v10565_v45  ;;  %2578 = vmatprep.subr.bf16.mxu1 %v10568_v46  ;;  %v10575_v46 = vld [vmem:[#allocation8 + $0x138] sm:$0xff]  }
 0xe3b   : > { %2538 = vmatpush1.bf16.xpose.msra.mxu0 %v10563_v47  ;;  %2579 = vmatpush1.bf16.xpose.msra.mxu1 %v10566_v48  ;;  %v10576_v47 = vld [vmem:[#allocation8 + $0x178] sm:$0xff]  }
 0xe3c   : > { %2539 = vmatprep.subr.bf16.mxu0 %v10571_v49  ;;  %2580 = vmatprep.subr.bf16.mxu1 %v10574_v50  ;;  %v10577_v48 = vld [vmem:[#allocation8 + $0xf8] sm:$0xff]   ;;  %v10578_v49 = vld [vmem:[#allocation8 + $0x130] sm:$0xff]  }
 0xe3d   : > { %v10580_v50 = vld [vmem:[#allocation8 + $0xf0] sm:$0xff]  }
 0xe43   : > { %2540 = vmatpush1.bf16.xpose.msra.mxu0 %v10569_v63  ;;  %2581 = vmatpush1.bf16.xpose.msra.mxu1 %v10572_v8  ;;  %v10581_v63 = vld [vmem:[#allocation8 + $0x128] sm:$0xff]  }
 0xe44   : > { %9838 = vmatprep.subr.bf16.mxu1 %v11477_v5  ;;  %9336 = vmatprep.subr.bf16.mxu0 %v10575_v46  ;;  %v10583_v8 = vld [vmem:[#allocation8 + $0xe8] sm:$0xff]  }
 0xeca   : > { %v2262_v25 = vpop.f32.mrf.mxu0  ;;  %v2305_v51 = vpop.f32.mrf.mxu1 }
 0xecb   : > { %v2263_v59 = vadd.f32 %v2262_v25, %v2019_v53  ;;  %v2306_v61 = vadd.f32 %v2305_v51, %v2027_v54  ;;  %v10585_v25 = vld [vmem:[#allocation8 + $0x160] sm:$0xff]  }
 0xecc   : > { %v2264_v14 = vpop.f32.mrf.mxu0  ;;  %v2307_v18 = vpop.f32.mrf.mxu1  ;;  %v10586_v51 = vld [vmem:[#allocation8 + $0xe0] sm:$0xff]  }
 0xecd   : > { %v2265_v1 = vadd.f32 %v2264_v14, %v2023_v27  ;;  %v2308_v56 = vadd.f32 %v2307_v18, %v2031_v52  ;;  %v2314_v60 = vmax.f32 %v2263_v59, 0.0  ;;  %v2316_v16 = vmax.f32 %v2306_v61, 0.0  ;;  %v10591_v59 = vld [vmem:[#allocation8 + $0x150] sm:$0xff]  }
 0xece   : > { %v2266_v20 = vpop.f32.mrf.mxu0  ;;  %v2309_v55 = vpop.f32.mrf.mxu1  ;;  %v10592_v61 = vld [vmem:[#allocation8 + $0xd0] sm:$0xff]  }
 0xecf   : > { %v2267_v57 = vadd.f32 %v2266_v20, %v2019_v53  ;;  %v2310_v58 = vadd.f32 %v2309_v55, %v2027_v54  ;;  %v2315_v9 = vmax.f32 %v2265_v1, 0.0  ;;  %v2317_v39 = vmax.f32 %v2308_v56, 0.0 }
 0xed0   : > { %v2268_v0 = vpop.f32.mrf.mxu0  ;;  %v2311_v62 = vpop.f32.mrf.mxu1 }
 0xed1   : > { %v2269_v2 = vadd.f32 %v2268_v0, %v2023_v27  ;;  %v2312_v3 = vadd.f32 %v2311_v62, %v2031_v52  ;;  %v2318_v37 = vmax.f32 %v2267_v57, 0.0  ;;  %v2320_v7 = vmax.f32 %v2310_v58, 0.0  ;;  %v10587_v27 = vld [vmem:[#allocation8 + $0x118] sm:$0xff]   ;;  %v10590_v58 = vld [vmem:[#allocation8 + $0x110] sm:$0xff]   ;;  %v10593_v0 = vld [vmem:[#allocation8 + $0x108] sm:$0xff]  }
 0xed2   : > { %v10588_v52 = vld [vmem:[#allocation8 + $0x158] sm:$0xff]   ;;  %v10594_v62 = vld [vmem:[#allocation8 + $0x148] sm:$0xff]  }
 0xed3   : > { %v2319_v11 = vmax.f32 %v2269_v2, 0.0  ;;  %v2321_v13 = vmax.f32 %v2312_v3, 0.0  ;;  %v2322_v26 = vpack.c.bf16 %v2318_v37, %v2314_v60  ;;  %v2324_v28 = vpack.c.bf16 %v2320_v7, %v2316_v16  ;;  %v10589_v57 = vld [vmem:[#allocation8 + $0xd8] sm:$0xff]   ;;  %v10595_v2 = vld [vmem:[#allocation8 + $0xc8] sm:$0xff]   ;;  %v10596_v3 = vld [vmem:[#allocation8 + $0x100] sm:$0xff]  }
 0xed4   : > { %v10597_v37 = vld [vmem:[#allocation8 + $0x140] sm:$0xff]  }
 0xed5   : > { %v2323_v22 = vpack.c.bf16 %v2319_v11, %v2315_v9  ;;  %v2325_v24 = vpack.c.bf16 %v2321_v13, %v2317_v39  ;;  %v10598_v7 = vld [vmem:[#allocation8 + $0xc0] sm:$0xff]  }
 0xed7   : > { %2557 = vmatprep.mubr.bf16.mxu0 %v2323_v22  ;;  %2598 = vmatprep.mubr.bf16.mxu1 %v2325_v24 }
 0xed8   : > { %2558 = vmatmul.mubr.bf16.vlgmr.msra.gmra.mxu0 %v2322_v26  ;;  %2599 = vmatmul.mubr.bf16.vlgmr.msra.gmra.mxu1 %v2324_v28  ;;  %v8855_v26 = vld [vmem:[#allocation5 + $0x1] ss:$0 sm:$0xff] }
 0xed9   : > { %9854 = vmatprep.mubr.msk.bf16.mxu1 %vm11478_vm0, %v11477_v5  ;;  %9839 = vmatpush3.bf16.xpose.msra.mxu1 %v10576_v47 }
 0xeda   : > { %9337 = vmatpush3.bf16.xpose.msra.mxu0 %v10577_v48  ;;  %9840 = vmatprep.subr.bf16.mxu1 %v11477_v5 }
 0xedb   : > { %9338 = vmatprep.subr.bf16.mxu0 %v10578_v49 }
 0xee2   : > { %9339 = vmatpush3.bf16.xpose.msra.mxu0 %v10580_v50 }
 0xee3   : > { %9340 = vmatprep.subr.bf16.mxu0 %v10581_v63 }
 0xeea   : > { %9341 = vmatpush3.bf16.xpose.msra.mxu0 %v10583_v8 }
 0xeeb   : > { %9342 = vmatprep.subr.bf16.mxu0 %v10584_v23 }
 0xef2   : > { %9343 = vmatpush3.bf16.xpose.msra.mxu0 %v10586_v51 }
 0xef3   : > { %9344 = vmatprep.subr.bf16.mxu0 %v10587_v27 }
 0xefa   : > { %9345 = vmatpush3.bf16.xpose.msra.mxu0 %v10589_v57 }
 0xefb   : > { %9346 = vmatprep.subr.bf16.mxu0 %v10590_v58 }
 0xf02   : > { %9347 = vmatpush3.bf16.xpose.msra.mxu0 %v10592_v61 }
 0xf03   : > { %9348 = vmatprep.subr.bf16.mxu0 %v10593_v0 }
 0xf0a   : > { %9349 = vmatpush3.bf16.xpose.msra.mxu0 %v10595_v2 }
 0xf0b   : > { %9350 = vmatprep.subr.bf16.mxu0 %v10596_v3 }
 0xf12   : > { %9351 = vmatpush3.bf16.xpose.msra.mxu0 %v10598_v7 }
 0xf13   : > { %9858 = vmatprep.subr.bf16.mxu0 %v11477_v5 }
 0xf98   : > { %v2559_v30 = vpop.f32.mrf.mxu0  ;;  %v2600_v31 = vpop.f32.mrf.mxu1 }
 0xf99   : > { %v2560_v33 = vadd.f32 %v8822_v29, %v2559_v30 }
 0xf9a   : > { %v2561_v36 = vpop.f32.mrf.mxu0  ;;  %v2602_v38 = vpop.f32.mrf.mxu1 }
 0xf9b   : > { %v2601_v40 = vadd.f32 %v2600_v31, %v2560_v33  ;;  %v8856_v31 = vld [vmem:[#allocation7 + $0x1] ss:$0 sm:$0xff] }
 0xf9c   : > { %v2562_v41 = vpop.f32.mrf.mxu0  ;;  %v2603_v42 = vpop.f32.mrf.mxu1 }
 0xf9d   : > { %v12159_v32 = vadd.f32 %v2601_v40, %v12124_v6  ;;  %v2563_v34 = vadd.f32 %v8822_v29, %v2562_v41  ;;  %v10579_v6 = vld [vmem:[#allocation8 + $0x170] sm:$0xff]  }
 0xf9e   : > { %v2564_v35 = vpop.f32.mrf.mxu0  ;;  %v2605_v43 = vpop.f32.mrf.mxu1  ;;  %9841 = vmatpush3.bf16.xpose.msra.mxu1 %v10579_v6 }
 0xf9f   : > { %v2604_v44 = vadd.f32 %v2603_v42, %v2563_v34  ;;  %2613 = vadd.xlane.f32.xlu1 %v12159_v32  ;;  %9842 = vmatprep.subr.bf16.mxu1 %v11477_v5 }
 0xfa1   : > { %v12163_v45 = vadd.f32 %v2604_v44, %v12128_v10  ;;  %v10582_v10 = vld [vmem:[#allocation8 + $0x168] sm:$0xff]  }
 0xfa3   : > { %2615 = vadd.xlane.f32.xlu0 %v12163_v45 }
 0xfa6   : > { %9843 = vmatpush3.bf16.xpose.msra.mxu1 %v10582_v10 }
 0xfa7   : > { %9844 = vmatprep.subr.bf16.mxu1 %v11477_v5 }
 0xfae   : > { %9845 = vmatpush3.bf16.xpose.msra.mxu1 %v10585_v25 }
 0xfaf   : > { %9846 = vmatprep.subr.bf16.mxu1 %v11477_v5 }
 0xfb6   : > { %9847 = vmatpush3.bf16.xpose.msra.mxu1 %v10588_v52 }
 0xfb7   : > { %9848 = vmatprep.subr.bf16.mxu1 %v11477_v5 }
 0xfbe   : > { %9849 = vmatpush3.bf16.xpose.msra.mxu1 %v10591_v59 }
 0xfbf   : > { %9850 = vmatprep.subr.bf16.mxu1 %v11477_v5 }
 0xfc6   : > { %9851 = vmatpush3.bf16.xpose.msra.mxu1 %v10594_v62 }
 0xfc7   : > { %9852 = vmatprep.subr.bf16.mxu1 %v11477_v5 }
 0xfce   : > { %9853 = vmatpush3.bf16.xpose.msra.mxu1 %v10597_v37 }
 0xfcf   : > { %9876 = vmatprep.subr.bf16.mxu1 %v11477_v5 }
0x1028   : > { %v2614_v53 = vpop.xlane.xlu1 %2613 }
0x1029   : > { %v2617_v54 = vmul.f32 0.0078125, %v2614_v53 }
0x102b   : > { %v2619_v14 = vsub.f32 %v12159_v32, %v2617_v54 }
0x102c   : > { %v2616_v18 = vpop.xlane.xlu0 %2615 }
0x102d   : > { %v2618_v20 = vmul.f32 0.0078125, %v2616_v18  ;;  %v2621_v55 = vmul.f32 %v2619_v14, %v2619_v14 }
0x102f   : > { %2623 = vadd.xlane.f32.xlu1 %v2621_v55  ;;  %v2620_v1 = vsub.f32 %v12163_v45, %v2618_v20 }
0x1031   : > { %v2622_v56 = vmul.f32 %v2620_v1, %v2620_v1 }
0x1033   : > { %2625 = vadd.xlane.f32.xlu0 %v2622_v56 }
0x10b8   : > { %v2624_v9 = vpop.xlane.xlu1 %2623 }
0x10b9   : > { %v2627_v39 = vmul.f32 0.0078125, %v2624_v9 }
0x10bb   : > { %v2629_v11 = vadd.f32 1e-05, %v2627_v39 }
0x10bc   : > { %v2626_v13 = vpop.xlane.xlu0 %2625 }
0x10bd   : > { %10959 = vrsqrt.f32 %v2629_v11  ;;  %v2628_v60 = vmul.f32 0.0078125, %v2626_v13 }
0x10bf   : > { %v2630_v16 = vadd.f32 1e-05, %v2628_v60 }
0x10c1   : > { %10961 = vrsqrt.f32 %v2630_v16 }
0x10ca   : > { %v10960_v22 = vpop.eup %10959 }
0x10cb   : > { %v2633_v24 = vmul.f32 %v10960_v22, %v2619_v14 }
0x10cd   : > { %v2641_v30 = vmul.f32 %v8855_v26, %v2633_v24 }
0x10ce   : > { %v10962_v28 = vpop.eup %10961 }
0x10cf   : > { %v2634_v29 = vmul.f32 %v10962_v28, %v2620_v1  ;;  %v2649_v36 = vadd.f32 %v8856_v31, %v2641_v30 }
0x10d1   : > { %v2642_v33 = vmul.f32 %v8855_v26, %v2634_v29 }
0x10d3   : > { %v2650_v38 = vadd.f32 %v8856_v31, %v2642_v33 }
0x10d5   : > { %v2651_v40 = vpack.c.bf16 %v2650_v38, %v2649_v36 }
0x10d7   : > { %9352 = vmatprep.mubr.bf16.mxu0 %v2651_v40  ;;  %9855 = vmatmul.mubr.bf16.vlgmr.msra.gmra.mxu1 %v2651_v40 }
0x10d8   : > { %9353 = vmatmul.mubr.bf16.vlgmr.msra.gmra.mxu0 %v2651_v40  ;;  %9878 = vmatprep.mubr.msk.bf16.mxu1 %vm11478_vm0, %v11477_v5 }
0x10d9   : > { %9860 = vmatprep.mubr.msk.bf16.mxu0 %vm11478_vm0, %v11477_v5 }
0x1197   : > { %v2922_v41 = vpop.f32.mrf.mxu1 }
0x1198   : > { %v2879_v42 = vpop.f32.mrf.mxu0 }
0x1199   : > { %v9856_v34 = vpop.f32.mrf.mxu1 }
0x119a   : > { %v2881_v35 = vpop.f32.mrf.mxu0 }
0x119b   : > { %v2925_v43 = vpop.f32.mrf.mxu1 }
0x119c   : > { %v2883_v44 = vpop.f32.mrf.mxu0  ;;  %v12188_v50 = vpack.c.bf16 %v2925_v43, %v2922_v41 }
0x119d   : > { %v9857_v46 = vpop.f32.mrf.mxu1  ;;  %v12186_v6 = vpack.c.bf16 %v2883_v44, %v2879_v42 }
0x119e   : > { %v2885_v47 = vpop.f32.mrf.mxu0 }
0x119f   : > { %v12181_v48 = vpack.c.bf16 %v2885_v47, %v2881_v35 }
0x11a1   : > { %v2953_v49 = vsel %vm1032_vm1, %v12181_v48, 0 }
0x11a2   : > { %9859 = vmatpush3.bf16.xpose.msra.mxu0 %v2953_v49 }
0x11a3   : > { %9864 = vmatprep.subr.bf16.mxu0 %v11477_v5 }
0x11a9   : > { %9861 = vmatmul.mubr.msk.bf16.vlgmr.msra.gmra.mxu0 %vm1032_vm1, %v12186_v6 }
0x11aa   : > { %9865 = vmatpush3.bf16.msra.mxu0 %v12188_v50  ;;  %9866 = vmatprep.mubr.msk.bf16.mxu0 %vm11478_vm0, %v11477_v5 }
0x11ab   : > { %9870 = vmatprep.subr.bf16.mxu0 %v11477_v5 }
0x1269   : > { %v2989_v63 = vpop.f32.mrf.mxu0 }
0x126a   : > { %v2996_v10 = vmul.f32 0.17677669, %v2989_v63 }
0x126b   : > { %v9862_v8 = vpop.f32.mrf.mxu0 }
0x126c   : > { %v2998_v23 = vsel %vm11859_vm2, %v2996_v10, -1e+30 }
0x126d   : > { %v2992_v25 = vpop.f32.mrf.mxu0  ;;  %v3000_v51 = vsel %vm1084_vm3, %v2998_v23, -inf }
0x126e   : > { %v2997_v27 = vmul.f32 0.17677669, %v2992_v25  ;;  %3001 = vmax.xlane.f32.xlu1 %v3000_v51  ;;  %v12236_v25 = vld [vmem:[#allocation10 + $0x68] sm:$0xff]   ;;  %v12238_v51 = vld [vmem:[#allocation10 + $0x78] sm:$0xff]  }
0x126f   : > { %v9863_v52 = vpop.f32.mrf.mxu0 }
0x1270   : > { %v2999_v53 = vsel %vm11867_vm4, %v2997_v27, -1e+30  ;;  %v12242_v27 = vld [vmem:[#allocation10 + $0x60] sm:$0xff]   ;;  %v12246_v52 = vld [vmem:[#allocation10 + $0x58] sm:$0xff]  }
0x1271   : > { %v3003_v54 = vsel %vm1084_vm3, %v2999_v53, -inf }
0x1272   : > { %3004 = vmax.xlane.f32.xlu0 %v3003_v54  ;;  %v12254_v54 = vld [vmem:[#allocation10 + $0x48] sm:$0xff]  }
0x12f7   : > { %v3002_v14 = vpop.xlane.xlu1 %3001 }
0x12f8   : > { %v3006_v18 = vsub.f32 %v2998_v23, %v3002_v14  ;;  %v12232_v23 = vld [vmem:[#allocation10 + $0x70] sm:$0xff]   ;;  %v12258_v14 = vld [vmem:[#allocation10 + $0x40] sm:$0xff]  }
0x12fa   : > { %v3008_v20 = vmul.f32 1.442695, %v3006_v18 }
0x12fb   : > { %v3005_v55 = vpop.xlane.xlu0 %3004 }
0x12fc   : > { %10963 = vpow2.f32 %v3008_v20  ;;  %v3007_v1 = vsub.f32 %v2999_v53, %v3005_v55  ;;  %v12250_v53 = vld [vmem:[#allocation10 + $0x50] sm:$0xff]  }
0x12fe   : > { %v3010_v56 = vmul.f32 1.442695, %v3007_v1 }
0x1300   : > { %10965 = vpow2.f32 %v3010_v56 }
0x1309   : > { %v10964_v57 = vpop.eup %10963 }
0x130a   : > { %v3012_v58 = vsel %vm1084_vm3, %v10964_v57, 0.0 }
0x130b   : > { %3013 = vadd.xlane.f32.xlu1 %v3012_v58 }
0x130d   : > { %v10966_v59 = vpop.eup %10965 }
0x130e   : > { %v3015_v61 = vsel %vm1084_vm3, %v10966_v59, 0.0 }
0x130f   : > { %3016 = vadd.xlane.f32.xlu0 %v3015_v61 }
0x131c   : > { %3072 = vrot.lane.b32.xlu1 %v12181_v48, %s11479_s3 }
0x1325   : > { %3069 = vrot.lane.b32.xlu0 %v12186_v6, %s11479_s3 }
0x1394   : > { %v3014_v0 = vpop.xlane.xlu1 %3013 }
0x1395   : > { %10967 = vrcp.f32 %v3014_v0 }
0x1398   : > { %v3017_v62 = vpop.xlane.xlu0 %3016  ;;  %v3073_v9 = vpop.permute.xlu1 %3072 }
0x1399   : > { %10969 = vrcp.f32 %v3017_v62  ;;  %v3078_v11 = vsel %vm1032_vm1, %v3073_v9, 0  ;;  %v3343_v9 = vsel %vm1032_vm1, %v12232_v23, 0 }
0x139c   : > { %v3070_v13 = vpop.permute.xlu0 %3069 }
0x13a2   : > { %v10968_v2 = vpop.eup %10967 }
0x13a3   : > { %v3020_v37 = vmul.f32 %v10968_v2, %v10964_v57 }
0x13a6   : > { %v10970_v3 = vpop.eup %10969 }
0x13a7   : > { %v3021_v7 = vmul.f32 %v10970_v3, %v10966_v59  ;;  %v3346_v3 = vsel %vm1032_vm1, %v12238_v51, 0 }
0x13a9   : > { %v3022_v39 = vpack.c.bf16 %v3021_v7, %v3020_v37 }
0x13ab   : > { %9867 = vmatmul.mubr.msk.bf16.vlgmr.msra.gmra.mxu0 %vm1084_vm3, %v3022_v39 }
0x13ac   : > { %9871 = vmatpush3.bf16.xpose.msra.mxu0 %v3078_v11  ;;  %9872 = vmatprep.mubr.msk.bf16.mxu0 %vm11478_vm0, %v11477_v5 }
0x13ad   : > { %9882 = vmatprep.subr.bf16.mxu0 %v11477_v5 }
0x13b3   : > { %9873 = vmatmul.mubr.msk.bf16.vlgmr.msra.gmra.mxu0 %vm1032_vm1, %v3070_v13  ;;  %v3340_v13 = vsel %vm1032_vm1, %v12236_v25, 0 }
0x13b4   : > { %9898 = vmatprep.mubr.msk.bf16.mxu0 %vm11478_vm0, %v11477_v5 }
0x146b   : > { %v12216_v60 = vpop.f32.mrf.mxu0 }
0x146d   : > { %v9868_v16 = vpop.f32.mrf.mxu0 }
0x146f   : > { %v12218_v22 = vpop.f32.mrf.mxu0 }
0x1470   : > { %v3067_v24 = vpack.c.bf16 %v12218_v22, %v12216_v60 }
0x1471   : > { %v9869_v26 = vpop.f32.mrf.mxu0 }
0x1473   : > { %v3114_v28 = vpop.f32.mrf.mxu0 }
0x1474   : > { %v3121_v29 = vmul.f32 0.17677669, %v3114_v28  ;;  %v3337_v28 = vsel %vm1032_vm1, %v12242_v27, 0 }
0x1475   : > { %v9874_v30 = vpop.f32.mrf.mxu0 }
0x1476   : > { %v3123_v31 = vsel %vm11859_vm2, %v3121_v29, -1e+30 }
0x1477   : > { %v3117_v33 = vpop.f32.mrf.mxu0  ;;  %v3125_v36 = vsel %vm1084_vm3, %v3123_v31, -inf }
0x1478   : > { %v3122_v38 = vmul.f32 0.17677669, %v3117_v33  ;;  %3126 = vmax.xlane.f32.xlu1 %v3125_v36 }
0x1479   : > { %v9875_v40 = vpop.f32.mrf.mxu0 }
0x147a   : > { %v3124_v41 = vsel %vm11867_vm4, %v3122_v38, -1e+30  ;;  %v3331_v38 = vsel %vm1032_vm1, %v12250_v53, 0 }
0x147b   : > { %v3128_v42 = vsel %vm1084_vm3, %v3124_v41, -inf }
0x147c   : > { %3129 = vmax.xlane.f32.xlu0 %v3128_v42  ;;  %v3328_v42 = vsel %vm1032_vm1, %v12254_v54, 0 }
0x1501   : > { %v3127_v34 = vpop.xlane.xlu1 %3126 }
0x1502   : > { %v3131_v35 = vsub.f32 %v3123_v31, %v3127_v34  ;;  %v3334_v31 = vsel %vm1032_vm1, %v12246_v52, 0  ;;  %v3325_v34 = vsel %vm1032_vm1, %v12258_v14, 0 }
0x1504   : > { %v3133_v43 = vmul.f32 1.442695, %v3131_v35 }
0x1505   : > { %v3130_v44 = vpop.xlane.xlu0 %3129 }
0x1506   : > { %10971 = vpow2.f32 %v3133_v43  ;;  %v3132_v46 = vsub.f32 %v3124_v41, %v3130_v44 }
0x1508   : > { %v3135_v47 = vmul.f32 1.442695, %v3132_v46 }
0x150a   : > { %10973 = vpow2.f32 %v3135_v47 }
0x1513   : > { %v10972_v49 = vpop.eup %10971 }
0x1514   : > { %v3137_v63 = vsel %vm1084_vm3, %v10972_v49, 0.0 }
0x1515   : > { %3138 = vadd.xlane.f32.xlu1 %v3137_v63 }
0x1517   : > { %v10974_v10 = vpop.eup %10973 }
0x1518   : > { %v3140_v8 = vsel %vm1084_vm3, %v10974_v10, 0.0 }
0x1519   : > { %3141 = vadd.xlane.f32.xlu0 %v3140_v8 }
0x1526   : > { %3149 = vrot.lane.b32.xlu1 %v12188_v50, %s11479_s3 }
0x152a   : > { %3249 = vrot.lane.b32.xlu1 %v12232_v23, %s11479_s3 }
0x152e   : > { %3247 = vrot.lane.b32.xlu1 %v12236_v25, %s11479_s3 }
0x152f   : > { %3251 = vrot.lane.b32.xlu0 %v12238_v51, %s11479_s3 }
0x1532   : > { %3245 = vrot.lane.b32.xlu1 %v12242_v27, %s11479_s3 }
0x1533   : > { %3243 = vrot.lane.b32.xlu0 %v12246_v52, %s11479_s3 }
0x1536   : > { %3241 = vrot.lane.b32.xlu1 %v12250_v53, %s11479_s3 }
0x1537   : > { %3239 = vrot.lane.b32.xlu0 %v12254_v54, %s11479_s3 }
0x153a   : > { %3237 = vrot.lane.b32.xlu1 %v12258_v14, %s11479_s3 }
0x153b   : > { %3391 = vrot.lane.b32.xlu0 %v12181_v48, %s11480_s4 }
0x153e   : > { %3389 = vrot.lane.b32.xlu1 %v12186_v6, %s11480_s4 }
0x159e   : > { %v3139_v18 = vpop.xlane.xlu1 %3138 }
0x159f   : > { %10975 = vrcp.f32 %v3139_v18 }
0x15a2   : > { %v3150_v20 = vpop.permute.xlu1 %3149  ;;  %v3142_v55 = vpop.xlane.xlu0 %3141 }
0x15a3   : > { %10977 = vrcp.f32 %v3142_v55  ;;  %9877 = vmatpush3.bf16.msra.mxu1 %v3150_v20 }
0x15a4   : > { %9902 = vmatprep.subr.bf16.mxu1 %v11477_v5 }
0x15a6   : > { %v3252_v1 = vpop.permute.xlu0 %3251  ;;  %v3250_v57 = vpop.permute.xlu1 %3249 }
0x15a7   : > { %v3278_v56 = vsel %vm1032_vm1, %v3252_v1, 0  ;;  %v3275_v58 = vsel %vm1032_vm1, %v3250_v57, 0 }
0x15a8   : > { %9883 = vmatpush3.bf16.xpose.msra.mxu0 %v3278_v56 }
0x15a9   : > { %9884 = vmatprep.subr.bf16.mxu0 %v11477_v5 }
0x15aa   : > { %v3248_v37 = vpop.permute.xlu1 %3247  ;;  %v3244_v16 = vpop.permute.xlu0 %3243 }
0x15ab   : > { %v3272_v7 = vsel %vm1032_vm1, %v3248_v37, 0  ;;  %v3266_v26 = vsel %vm1032_vm1, %v3244_v16, 0 }
0x15ac   : > { %v10976_v59 = vpop.eup %10975 }
0x15ad   : > { %v3145_v0 = vmul.f32 %v10976_v59, %v10972_v49 }
0x15ae   : > { %v3246_v39 = vpop.permute.xlu1 %3245  ;;  %v3240_v33 = vpop.permute.xlu0 %3239 }
0x15af   : > { %v3269_v11 = vsel %vm1032_vm1, %v3246_v39, 0  ;;  %v3260_v36 = vsel %vm1032_vm1, %v3240_v33, 0 }
0x15b0   : > { %v10978_v61 = vpop.eup %10977  ;;  %9885 = vmatpush3.bf16.xpose.msra.mxu0 %v3275_v58 }
0x15b1   : > { %v3146_v62 = vmul.f32 %v10978_v61, %v10974_v10  ;;  %9886 = vmatprep.subr.bf16.mxu0 %v11477_v5 }
0x15b2   : > { %v3242_v29 = vpop.permute.xlu1 %3241  ;;  %v3392_v44 = vpop.permute.xlu0 %3391 }
0x15b3   : > { %v3147_v2 = vpack.c.bf16 %v3146_v62, %v3145_v0  ;;  %v3263_v30 = vsel %vm1032_vm1, %v3242_v29, 0  ;;  %v3397_v63 = vsel %vm1032_vm1, %v3392_v44, 0 }
0x15b5   : > { %9879 = vmatmul.mubr.msk.bf16.vlgmr.msra.gmra.mxu1 %vm1084_vm3, %v3147_v2 }
0x15b6   : > { %9903 = vmatpush3.bf16.xpose.msra.mxu1 %v3346_v3  ;;  %9918 = vmatprep.mubr.msk.bf16.mxu1 %vm11478_vm0, %v11477_v5  ;;  %v3238_v40 = vpop.permute.xlu1 %3237 }
0x15b7   : > { %9904 = vmatprep.subr.bf16.mxu1 %v11477_v5  ;;  %v3257_v41 = vsel %vm1032_vm1, %v3238_v40, 0 }
0x15b8   : > { %9887 = vmatpush3.bf16.xpose.msra.mxu0 %v3272_v7 }
0x15b9   : > { %9888 = vmatprep.subr.bf16.mxu0 %v11477_v5 }
0x15ba   : > { %v3390_v60 = vpop.permute.xlu1 %3389 }
0x15be   : > { %9905 = vmatpush3.bf16.xpose.msra.mxu1 %v3343_v9 }
0x15bf   : > { %9906 = vmatprep.subr.bf16.mxu1 %v11477_v5 }
0x15c0   : > { %9889 = vmatpush3.bf16.xpose.msra.mxu0 %v3269_v11 }
0x15c1   : > { %9890 = vmatprep.subr.bf16.mxu0 %v11477_v5 }
0x15c6   : > { %9907 = vmatpush3.bf16.xpose.msra.mxu1 %v3340_v13 }
0x15c7   : > { %9908 = vmatprep.subr.bf16.mxu1 %v11477_v5 }
0x15c8   : > { %9891 = vmatpush3.bf16.xpose.msra.mxu0 %v3266_v26 }
0x15c9   : > { %9892 = vmatprep.subr.bf16.mxu0 %v11477_v5 }
0x15ce   : > { %9909 = vmatpush3.bf16.xpose.msra.mxu1 %v3337_v28 }
0x15cf   : > { %9910 = vmatprep.subr.bf16.mxu1 %v11477_v5 }
0x15d0   : > { %9893 = vmatpush3.bf16.xpose.msra.mxu0 %v3263_v30 }
0x15d1   : > { %9894 = vmatprep.subr.bf16.mxu0 %v11477_v5 }
0x15d6   : > { %9911 = vmatpush3.bf16.xpose.msra.mxu1 %v3334_v31 }
0x15d7   : > { %9912 = vmatprep.subr.bf16.mxu1 %v11477_v5 }
0x15d8   : > { %9895 = vmatpush3.bf16.xpose.msra.mxu0 %v3260_v36 }
0x15d9   : > { %9896 = vmatprep.subr.bf16.mxu0 %v11477_v5 }
0x15de   : > { %9913 = vmatpush3.bf16.xpose.msra.mxu1 %v3331_v38 }
0x15df   : > { %9914 = vmatprep.subr.bf16.mxu1 %v11477_v5 }
0x15e0   : > { %9897 = vmatpush3.bf16.xpose.msra.mxu0 %v3257_v41 }
0x15e1   : > { %9922 = vmatprep.subr.bf16.mxu0 %v11477_v5 }
0x15e6   : > { %9915 = vmatpush3.bf16.xpose.msra.mxu1 %v3328_v42 }
0x15e7   : > { %9916 = vmatprep.subr.bf16.mxu1 %v11477_v5 }
0x15ee   : > { %9917 = vmatpush3.bf16.xpose.msra.mxu1 %v3325_v34 }
0x15ef   : > { %9928 = vmatprep.subr.bf16.mxu1 %v11477_v5 }
0x15f5   : > { %9919 = vmatmul.mubr.msk.bf16.vlgmr.msra.gmra.mxu1 %vm1032_vm1, %v3067_v24 }
0x15f6   : > { %9930 = vmatprep.mubr.msk.bf16.mxu1 %vm11478_vm0, %v11477_v5 }
0x1675   : > { %v3189_v35 = vpop.f32.mrf.mxu1 }
0x1677   : > { %v9880_v43 = vpop.f32.mrf.mxu1 }
0x1679   : > { %v3192_v46 = vpop.f32.mrf.mxu1 }
0x167a   : > { %v3196_v47 = vpack.c.bf16 %v3192_v46, %v3189_v35 }
0x167b   : > { %v9881_v49 = vpop.f32.mrf.mxu1 }
0x167c   : > { %9899 = vmatmul.mubr.msk.bf16.vlgmr.msra.gmra.mxu0 %vm1032_vm1, %v3196_v47 }
0x167d   : > { %9923 = vmatpush3.bf16.xpose.msra.mxu0 %v3397_v63  ;;  %9924 = vmatprep.mubr.msk.bf16.mxu0 %vm11478_vm0, %v11477_v5 }
0x167e   : > { %9934 = vmatprep.subr.bf16.mxu0 %v11477_v5 }
0x1684   : > { %9925 = vmatmul.mubr.msk.bf16.vlgmr.msra.gmra.mxu0 %vm1032_vm1, %v3390_v60 }
0x1685   : > { %9950 = vmatprep.mubr.msk.bf16.mxu0 %vm11478_vm0, %v11477_v5 }
0x16b5   : > { %v12326_v22 = vpop.f32.mrf.mxu1 }
0x16b7   : > { %v9920_v24 = vpop.f32.mrf.mxu1 }
0x16b9   : > { %v12328_v10 = vpop.f32.mrf.mxu1 }
0x16bb   : > { %v9921_v8 = vpop.f32.mrf.mxu1 }
0x173c   : > { %v12330_v18 = vpop.f32.mrf.mxu0 }
0x173e   : > { %v9900_v20 = vpop.f32.mrf.mxu0 }
0x1740   : > { %v12332_v55 = vpop.f32.mrf.mxu0 }
0x1742   : > { %v9901_v1 = vpop.f32.mrf.mxu0 }
0x1744   : > { %v3433_v56 = vpop.f32.mrf.mxu0 }
0x1745   : > { %v3440_v57 = vmul.f32 0.17677669, %v3433_v56 }
0x1746   : > { %v9926_v58 = vpop.f32.mrf.mxu0 }
0x1747   : > { %v3442_v59 = vsel %vm11859_vm2, %v3440_v57, -1e+30 }
0x1748   : > { %v3436_v61 = vpop.f32.mrf.mxu0  ;;  %v3444_v0 = vsel %vm1084_vm3, %v3442_v59, -inf }
0x1749   : > { %v3441_v62 = vmul.f32 0.17677669, %v3436_v61  ;;  %3445 = vmax.xlane.f32.xlu0 %v3444_v0 }
0x174a   : > { %v9927_v2 = vpop.f32.mrf.mxu0 }
0x174b   : > { %v3443_v3 = vsel %vm11867_vm4, %v3441_v62, -1e+30 }
0x174c   : > { %v3447_v37 = vsel %vm1084_vm3, %v3443_v3, -inf }
0x174d   : > { %3448 = vmax.xlane.f32.xlu1 %v3447_v37 }
0x175e   : > { %3603 = vrot.lane.b32.xlu1 %v12181_v48, %s11481_s28 }
0x1762   : > { %3601 = vrot.lane.b32.xlu1 %v12186_v6, %s11481_s28 }
0x17d2   : > { %v3446_v7 = vpop.xlane.xlu0 %3445 }
0x17d3   : > { %v3450_v9 = vsub.f32 %v3442_v59, %v3446_v7 }
0x17d5   : > { %v3452_v39 = vmul.f32 1.442695, %v3450_v9 }
0x17d6   : > { %v3449_v11 = vpop.xlane.xlu1 %3448 }
0x17d7   : > { %10979 = vpow2.f32 %v3452_v39  ;;  %v3451_v13 = vsub.f32 %v3443_v3, %v3449_v11 }
0x17d9   : > { %v3454_v16 = vmul.f32 1.442695, %v3451_v13 }
0x17da   : > { %v3604_v41 = vpop.permute.xlu1 %3603 }
0x17db   : > { %10981 = vpow2.f32 %v3454_v16  ;;  %v3609_v34 = vsel %vm1032_vm1, %v3604_v41, 0 }
0x17de   : > { %v3602_v35 = vpop.permute.xlu1 %3601 }
0x17e4   : > { %v10980_v26 = vpop.eup %10979 }
0x17e5   : > { %v3456_v28 = vsel %vm1084_vm3, %v10980_v26, 0.0 }
0x17e6   : > { %3457 = vadd.xlane.f32.xlu0 %v3456_v28 }
0x17e8   : > { %v10982_v29 = vpop.eup %10981 }
0x17e9   : > { %v3459_v30 = vsel %vm1084_vm3, %v10982_v29, 0.0 }
0x17ea   : > { %3460 = vadd.xlane.f32.xlu0 %v3459_v30 }
0x1800   : > { %3467 = vrot.lane.b32.xlu0 %v12188_v50, %s11480_s4 }
0x186f   : > { %v3458_v48 = vpop.xlane.xlu0 %3457 }
0x1870   : > { %10983 = vrcp.f32 %v3458_v48 }
0x1873   : > { %v3461_v6 = vpop.xlane.xlu0 %3460 }
0x1874   : > { %10985 = vrcp.f32 %v3461_v6 }
0x1877   : > { %v3468_v31 = vpop.permute.xlu0 %3467 }
0x1878   : > { %9929 = vmatpush3.bf16.msra.mxu1 %v3468_v31 }
0x1879   : > { %9954 = vmatprep.subr.bf16.mxu1 %v11477_v5 }
0x187d   : > { %v10984_v33 = vpop.eup %10983 }
0x187e   : > { %v3464_v38 = vmul.f32 %v10984_v33, %v10980_v26 }
0x1881   : > { %v10986_v36 = vpop.eup %10985 }
0x1882   : > { %v3465_v40 = vmul.f32 %v10986_v36, %v10982_v29 }
0x1884   : > { %v3466_v42 = vpack.c.bf16 %v3465_v40, %v3464_v38 }
0x1886   : > { %9931 = vmatmul.mubr.msk.bf16.vlgmr.msra.gmra.mxu1 %vm1084_vm3, %v3466_v42 }
0x1887   : > { %9955 = vmatpush3.bf16.xpose.msra.mxu1 %v3609_v34  ;;  %9956 = vmatprep.mubr.msk.bf16.mxu1 %vm11478_vm0, %v11477_v5 }
0x1888   : > { %9960 = vmatprep.subr.bf16.mxu1 %v11477_v5 }
0x188e   : > { %9957 = vmatmul.mubr.msk.bf16.vlgmr.msra.gmra.mxu1 %vm1032_vm1, %v3602_v35 }
0x188f   : > { %9962 = vmatprep.mubr.msk.bf16.mxu1 %vm11478_vm0, %v11477_v5 }
0x1946   : > { %v12357_v43 = vpop.f32.mrf.mxu1 }
0x1948   : > { %v9932_v44 = vpop.f32.mrf.mxu1 }
0x194a   : > { %v12359_v46 = vpop.f32.mrf.mxu1 }
0x194b   : > { %v3514_v47 = vpack.c.bf16 %v12359_v46, %v12357_v43 }
0x194c   : > { %v9933_v49 = vpop.f32.mrf.mxu1 }
0x194e   : > { %v3645_v63 = vpop.f32.mrf.mxu1 }
0x194f   : > { %v3652_v60 = vmul.f32 0.17677669, %v3645_v63 }
0x1950   : > { %v9958_v24 = vpop.f32.mrf.mxu1 }
0x1951   : > { %v3654_v8 = vsel %vm11859_vm2, %v3652_v60, -1e+30 }
0x1952   : > { %v3648_v20 = vpop.f32.mrf.mxu1  ;;  %v3656_v1 = vsel %vm1084_vm3, %v3654_v8, -inf }
0x1953   : > { %v3653_v56 = vmul.f32 0.17677669, %v3648_v20  ;;  %3657 = vmax.xlane.f32.xlu1 %v3656_v1 }
0x1954   : > { %v9959_v57 = vpop.f32.mrf.mxu1 }
0x1955   : > { %v3655_v58 = vsel %vm11867_vm4, %v3653_v56, -1e+30 }
0x1956   : > { %v3659_v59 = vsel %vm1084_vm3, %v3655_v58, -inf }
0x1957   : > { %3660 = vmax.xlane.f32.xlu0 %v3659_v59 }
0x1964   : > { %3679 = vrot.lane.b32.xlu1 %v12188_v50, %s11481_s28 }
0x1968   : > { %3741 = vrot.lane.b32.xlu1 %v12238_v51, %s11481_s28 }
0x196c   : > { %3527 = vrot.lane.b32.xlu1 %v12232_v23, %s11480_s4 }
0x1970   : > { %3739 = vrot.lane.b32.xlu1 %v12232_v23, %s11481_s28 }
0x1974   : > { %3737 = vrot.lane.b32.xlu1 %v12236_v25, %s11481_s28 }
0x1978   : > { %3735 = vrot.lane.b32.xlu1 %v12242_v27, %s11481_s28 }
0x197c   : > { %3733 = vrot.lane.b32.xlu1 %v12246_v52, %s11481_s28 }
0x1980   : > { %3731 = vrot.lane.b32.xlu1 %v12250_v53, %s11481_s28 }
0x1984   : > { %3729 = vrot.lane.b32.xlu1 %v12254_v54, %s11481_s28 }
0x1988   : > { %3727 = vrot.lane.b32.xlu1 %v12258_v14, %s11481_s28 }
0x19dc   : > { %v3658_v50 = vpop.xlane.xlu1 %3657 }
0x19dd   : > { %v3662_v23 = vsub.f32 %v3654_v8, %v3658_v50 }
0x19df   : > { %v3664_v61 = vmul.f32 1.442695, %v3662_v23 }
0x19e0   : > { %v3680_v0 = vpop.permute.xlu1 %3679  ;;  %v3661_v62 = vpop.xlane.xlu0 %3660 }
0x19e1   : > { %10987 = vpow2.f32 %v3664_v61  ;;  %v3663_v2 = vsub.f32 %v3655_v58, %v3661_v62  ;;  %9961 = vmatpush3.bf16.msra.mxu1 %v3680_v0 }
0x19e2   : > { %9966 = vmatprep.subr.bf16.mxu1 %v11477_v5 }
0x19e3   : > { %v3666_v3 = vmul.f32 1.442695, %v3663_v2 }
0x19e5   : > { %10989 = vpow2.f32 %v3666_v3 }
0x19ee   : > { %v10988_v37 = vpop.eup %10987 }
0x19ef   : > { %v3668_v7 = vsel %vm1084_vm3, %v10988_v37, 0.0 }
0x19f0   : > { %3669 = vadd.xlane.f32.xlu0 %v3668_v7 }
0x19f2   : > { %v10990_v9 = vpop.eup %10989 }
0x19f3   : > { %v3671_v39 = vsel %vm1084_vm3, %v10990_v9, 0.0 }
0x19f4   : > { %3672 = vadd.xlane.f32.xlu0 %v3671_v39 }
0x1a0a   : > { %3529 = vrot.lane.b32.xlu0 %v12238_v51, %s11480_s4 }
0x1a0e   : > { %3525 = vrot.lane.b32.xlu0 %v12236_v25, %s11480_s4  ;;  %v3742_v25 = vpop.permute.xlu1 %3741 }
0x1a0f   : > { %v3768_v29 = vsel %vm1032_vm1, %v3742_v25, 0 }
0x1a12   : > { %3523 = vrot.lane.b32.xlu0 %v12242_v27, %s11480_s4 }
0x1a16   : > { %3521 = vrot.lane.b32.xlu0 %v12246_v52, %s11480_s4  ;;  %v3528_v52 = vpop.permute.xlu1 %3527 }
0x1a1a   : > { %3519 = vrot.lane.b32.xlu0 %v12250_v53, %s11480_s4  ;;  %v3553_v53 = vsel %vm1032_vm1, %v3528_v52, 0  ;;  %v3740_v6 = vpop.permute.xlu1 %3739 }
0x1a1b   : > { %v3765_v33 = vsel %vm1032_vm1, %v3740_v6, 0  ;;  %v10616_v6 = vld [vmem:[#allocation16 + $0x1e8] sm:$0xff]  }
0x1a1e   : > { %3517 = vrot.lane.b32.xlu0 %v12254_v54, %s11480_s4  ;;  %v3738_v38 = vpop.permute.xlu1 %3737 }
0x1a1f   : > { %v3762_v41 = vsel %vm1032_vm1, %v3738_v38, 0  ;;  %v10620_v38 = vld [vmem:[#allocation16 + $0x1e0] sm:$0xff]  }
0x1a22   : > { %3515 = vrot.lane.b32.xlu0 %v12258_v14, %s11480_s4  ;;  %v3736_v34 = vpop.permute.xlu1 %3735 }
0x1a23   : > { %v3759_v44 = vsel %vm1032_vm1, %v3736_v34, 0  ;;  %v10624_v34 = vld [vmem:[#allocation16 + $0x1d8] sm:$0xff]  }
0x1a26   : > { %v3734_v63 = vpop.permute.xlu1 %3733 }
0x1a27   : > { %v3756_v24 = vsel %vm1032_vm1, %v3734_v63, 0 }
0x1a2a   : > { %v3732_v20 = vpop.permute.xlu1 %3731 }
0x1a2b   : > { %v3753_v56 = vsel %vm1032_vm1, %v3732_v20, 0 }
0x1a2e   : > { %v3730_v58 = vpop.permute.xlu1 %3729 }
0x1a2f   : > { %v3750_v59 = vsel %vm1032_vm1, %v3730_v58, 0  ;;  %v10628_v58 = vld [vmem:[#allocation16 + $0x1d0] sm:$0xff]  }
0x1a32   : > { %v3728_v50 = vpop.permute.xlu1 %3727 }
0x1a33   : > { %v3747_v23 = vsel %vm1032_vm1, %v3728_v50, 0  ;;  %v10630_v50 = vld [vmem:[#allocation16 + $0x190] sm:$0xff]  }
0x1a79   : > { %v3670_v11 = vpop.xlane.xlu0 %3669 }
0x1a7a   : > { %10991 = vrcp.f32 %v3670_v11 }
0x1a7d   : > { %v3673_v51 = vpop.xlane.xlu0 %3672 }
0x1a7e   : > { %10993 = vrcp.f32 %v3673_v51 }
0x1a81   : > { %v3530_v13 = vpop.permute.xlu0 %3529 }
0x1a82   : > { %v3556_v27 = vsel %vm1032_vm1, %v3530_v13, 0 }
0x1a83   : > { %9935 = vmatpush3.bf16.xpose.msra.mxu0 %v3556_v27  ;;  %v8901_v27 = vld [vmem:[#allocation11 + $0x1] ss:$0 sm:$0xff] }
0x1a84   : > { %9936 = vmatprep.subr.bf16.mxu0 %v11477_v5 }
0x1a85   : > { %v3526_v14 = vpop.permute.xlu0 %3525 }
0x1a86   : > { %v3550_v48 = vsel %vm1032_vm1, %v3526_v14, 0  ;;  %v10610_v14 = vld [vmem:[#allocation16 + $0x1b8] sm:$0xff]  }
0x1a87   : > { %v10992_v16 = vpop.eup %10991 }
0x1a88   : > { %v3676_v54 = vmul.f32 %v10992_v16, %v10988_v37  ;;  %v3383_v37 = vadd.f32 %v12326_v22, %v12330_v18 }
0x1a89   : > { %v3524_v31 = vpop.permute.xlu0 %3523 }
0x1a8a   : > { %v3547_v36 = vsel %vm1032_vm1, %v3524_v31, 0  ;;  %v10617_v31 = vld [vmem:[#allocation16 + $0x128] sm:$0xff]  }
0x1a8b   : > { %v10994_v26 = vpop.eup %10993  ;;  %9937 = vmatpush3.bf16.xpose.msra.mxu0 %v3553_v53 }
0x1a8c   : > { %v3677_v28 = vmul.f32 %v10994_v26, %v10990_v9  ;;  %9938 = vmatprep.subr.bf16.mxu0 %v11477_v5 }
0x1a8d   : > { %v3522_v40 = vpop.permute.xlu0 %3521 }
0x1a8e   : > { %v3678_v30 = vpack.c.bf16 %v3677_v28, %v3676_v54  ;;  %v3544_v42 = vsel %vm1032_vm1, %v3522_v40, 0  ;;  %v10609_v28 = vld [vmem:[#allocation16 + $0x138] sm:$0xff]   ;;  %v10621_v40 = vld [vmem:[#allocation16 + $0x120] sm:$0xff]  }
0x1a90   : > { %9963 = vmatmul.mubr.msk.bf16.vlgmr.msra.gmra.mxu1 %vm1084_vm3, %v3678_v30  ;;  %v10612_v30 = vld [vmem:[#allocation16 + $0x1f0] sm:$0xff]  }
0x1a91   : > { %9967 = vmatpush3.bf16.xpose.msra.mxu1 %v3768_v29  ;;  %9982 = vmatprep.mubr.msk.bf16.mxu1 %vm11478_vm0, %v11477_v5  ;;  %v3520_v35 = vpop.permute.xlu0 %3519  ;;  %v10611_v29 = vld [vmem:[#allocation16 + $0x170] sm:$0xff]  }
0x1a92   : > { %9968 = vmatprep.subr.bf16.mxu1 %v11477_v5  ;;  %v3541_v49 = vsel %vm1032_vm1, %v3520_v35, 0 }
0x1a93   : > { %9939 = vmatpush3.bf16.xpose.msra.mxu0 %v3550_v48  ;;  %v10615_v48 = vld [vmem:[#allocation16 + $0x168] sm:$0xff]  }
0x1a94   : > { %9940 = vmatprep.subr.bf16.mxu0 %v11477_v5 }
0x1a95   : > { %v3518_v60 = vpop.permute.xlu0 %3517 }
0x1a96   : > { %v3538_v8 = vsel %vm1032_vm1, %v3518_v60, 0 }
0x1a99   : > { %9969 = vmatpush3.bf16.xpose.msra.mxu1 %v3765_v33  ;;  %v3516_v1 = vpop.permute.xlu0 %3515  ;;  %v10618_v33 = vld [vmem:[#allocation16 + $0x1a8] sm:$0xff]  }
0x1a9a   : > { %9970 = vmatprep.subr.bf16.mxu1 %v11477_v5  ;;  %v3535_v57 = vsel %vm1032_vm1, %v3516_v1, 0  ;;  %v10625_v1 = vld [vmem:[#allocation16 + $0x118] sm:$0xff]  }
0x1a9b   : > { %9941 = vmatpush3.bf16.xpose.msra.mxu0 %v3547_v36  ;;  %v10619_v36 = vld [vmem:[#allocation16 + $0x160] sm:$0xff]  }
0x1a9c   : > { %9942 = vmatprep.subr.bf16.mxu0 %v11477_v5 }
0x1aa1   : > { %9971 = vmatpush3.bf16.xpose.msra.mxu1 %v3762_v41  ;;  %v10622_v41 = vld [vmem:[#allocation16 + $0x1a0] sm:$0xff]  }
0x1aa2   : > { %9972 = vmatprep.subr.bf16.mxu1 %v11477_v5 }
0x1aa3   : > { %9943 = vmatpush3.bf16.xpose.msra.mxu0 %v3544_v42  ;;  %v10623_v42 = vld [vmem:[#allocation16 + $0x158] sm:$0xff]  }
0x1aa4   : > { %9944 = vmatprep.subr.bf16.mxu0 %v11477_v5 }
0x1aa9   : > { %9973 = vmatpush3.bf16.xpose.msra.mxu1 %v3759_v44 }
0x1aaa   : > { %9974 = vmatprep.subr.bf16.mxu1 %v11477_v5 }
0x1aab   : > { %9945 = vmatpush3.bf16.xpose.msra.mxu0 %v3541_v49 }
0x1aac   : > { %9946 = vmatprep.subr.bf16.mxu0 %v11477_v5 }
0x1ab1   : > { %9975 = vmatpush3.bf16.xpose.msra.mxu1 %v3756_v24 }
0x1ab2   : > { %9976 = vmatprep.subr.bf16.mxu1 %v11477_v5 }
0x1ab3   : > { %9947 = vmatpush3.bf16.xpose.msra.mxu0 %v3538_v8 }
0x1ab4   : > { %9948 = vmatprep.subr.bf16.mxu0 %v11477_v5 }
0x1ab9   : > { %9977 = vmatpush3.bf16.xpose.msra.mxu1 %v3753_v56  ;;  %v10626_v56 = vld [vmem:[#allocation16 + $0x198] sm:$0xff]  }
0x1aba   : > { %9978 = vmatprep.subr.bf16.mxu1 %v11477_v5 }
0x1abb   : > { %9949 = vmatpush3.bf16.xpose.msra.mxu0 %v3535_v57  ;;  %v10627_v57 = vld [vmem:[#allocation16 + $0x150] sm:$0xff]  }
0x1ac1   : > { %9979 = vmatpush3.bf16.xpose.msra.mxu1 %v3750_v59  ;;  %v10629_v59 = vld [vmem:[#allocation16 + $0x110] sm:$0xff]  }
0x1ac2   : > { %9951 = vmatmul.mubr.msk.bf16.vlgmr.msra.gmra.mxu0 %vm1032_vm1, %v3514_v47  ;;  %9980 = vmatprep.subr.bf16.mxu1 %v11477_v5  ;;  %v3386_v47 = vadd.f32 %v12328_v10, %v12332_v55  ;;  %v10607_v10 = vld [vmem:[#allocation16 + $0x178] sm:$0xff]  }
0x1ac3   : > { %v10608_v55 = vld [vmem:[#allocation16 + $0x1f8] sm:$0xff]   ;;  %9415 = vmatprep.subr.bf16.mxu0 %v10607_v10 }
0x1ac4   : > { %9416 = vmatpush3.bf16.xpose.msra.mxu0 %v10609_v28 }
0x1ac5   : > { %9417 = vmatprep.subr.bf16.mxu0 %v10611_v29  ;;  %v10639_v29 = vld [vmem:[#allocation17 + $0x1e0] ss:$16 sps:$4 sm:$0xff]  }
0x1ac9   : > { %9981 = vmatpush3.bf16.xpose.msra.mxu1 %v3747_v23  ;;  %v10631_v23 = vld [vmem:[#allocation16 + $0x148] sm:$0xff]  }
0x1aca   : > { %9433 = vmatprep.subr.bf16.mxu1 %v10608_v55 }
0x1b50   : > { %v3719_v61 = vpop.f32.mrf.mxu1 }
0x1b52   : > { %v9964_v0 = vpop.f32.mrf.mxu1 }
0x1b53   : > { %v10633_v0 = vld [vmem:[#allocation16 + $0x108] sm:$0xff]  }
0x1b54   : > { %v3722_v62 = vpop.f32.mrf.mxu1 }
0x1b55   : > { %v3726_v2 = vpack.c.bf16 %v3722_v62, %v3719_v61  ;;  %v10632_v61 = vld [vmem:[#allocation16 + $0x1c8] sm:$0xff]  }
0x1b56   : > { %v9965_v3 = vpop.f32.mrf.mxu1  ;;  %v10634_v62 = vld [vmem:[#allocation16 + $0x188] sm:$0xff]  }
0x1b57   : > { %9983 = vmatmul.mubr.msk.bf16.vlgmr.msra.gmra.mxu1 %vm1032_vm1, %v3726_v2  ;;  %v10635_v2 = vld [vmem:[#allocation16 + $0x140] sm:$0xff]  }
0x1b58   : > { %9434 = vmatpush3.bf16.xpose.msra.mxu1 %v10610_v14  ;;  %v10636_v3 = vld [vmem:[#allocation16 + $0x1c0] sm:$0xff]  }
0x1b59   : > { %9435 = vmatprep.subr.bf16.mxu1 %v10612_v30  ;;  %v10642_v30 = vld [vmem:[#allocation17 + $0x1e8] ss:$16 sps:$4 sm:$0xff]  }
0x1b82   : > { %v3592_v7 = vpop.f32.mrf.mxu0 }
0x1b83   : > { %v3599_v43 = vadd.f32 %v3592_v7, %v3383_v37  ;;  %v10637_v37 = vld [vmem:[#allocation16 + $0x100] sm:$0xff]  }
0x1b84   : > { %v9952_v46 = vpop.f32.mrf.mxu0  ;;  %v10638_v7 = vld [vmem:[#allocation16 + $0x180] sm:$0xff]  }
0x1b85   : > { %v10644_v46 = vld [vmem:[#allocation17 + $0x1ec] ss:$16 sps:$4 sm:$0xff]  }
0x1b86   : > { %v3595_v9 = vpop.f32.mrf.mxu0 }
0x1b87   : > { %v3600_v39 = vadd.f32 %v3595_v9, %v3386_v47 }
0x1b88   : > { %v9953_v11 = vpop.f32.mrf.mxu0 }
0x1c17   : > { %v3804_v51 = vpop.f32.mrf.mxu1 }
0x1c18   : > { %v3811_v25 = vadd.f32 %v3804_v51, %v3599_v43  ;;  %v10641_v43 = vld [vmem:[#allocation17 + $0x1e4] ss:$16 sps:$4 sm:$0xff]  }
0x1c19   : > { %v9984_v13 = vpop.f32.mrf.mxu1 }
0x1c1a   : > { %v3813_v52 = vadd.f32 %v3811_v25, %v12159_v32  ;;  %v10613_v32 = vld [vmem:[#allocation16 + $0x130] sm:$0xff]  }
0x1c1b   : > { %v3807_v53 = vpop.f32.mrf.mxu1  ;;  %9418 = vmatpush3.bf16.xpose.msra.mxu0 %v10613_v32  ;;  %v10647_v32 = vld [vmem:[#allocation17 + $0x1c4] ss:$16 sps:$4 sm:$0xff]  }
0x1c1c   : > { %v3812_v16 = vadd.f32 %v3807_v53, %v3600_v39  ;;  %v12449_v26 = vadd.f32 %v8901_v27, %v3813_v52  ;;  %9419 = vmatprep.subr.bf16.mxu0 %v10615_v48  ;;  %v8902_v52 = vld [vmem:[#allocation13 + $0x1] ss:$0 sm:$0xff]  ;;  %v10645_v48 = vld [vmem:[#allocation17 + $0x1c0] ss:$16 sps:$4 sm:$0xff]  }
0x1c1d   : > { %v9985_v22 = vpop.f32.mrf.mxu1 }
0x1c1e   : > { %v3814_v18 = vadd.f32 %v3812_v16, %v12163_v45  ;;  %3829 = vadd.xlane.f32.xlu0 %v12449_v26  ;;  %v10614_v45 = vld [vmem:[#allocation16 + $0x1b0] sm:$0xff]  }
0x1c1f   : > { %9436 = vmatpush3.bf16.xpose.msra.mxu1 %v10614_v45  ;;  %v10650_v45 = vld [vmem:[#allocation17 + $0x1cc] ss:$16 sps:$4 sm:$0xff]  }
0x1c20   : > { %v12453_v54 = vadd.f32 %v8901_v27, %v3814_v18  ;;  %9437 = vmatprep.subr.bf16.mxu1 %v10616_v6  ;;  %v8903_v18 = vld [vmem:[#allocation14 + $0x1] ss:$0 sm:$0xff]  ;;  %v10648_v6 = vld [vmem:[#allocation17 + $0x1c8] ss:$16 sps:$4 sm:$0xff]  }
0x1c22   : > { %3831 = vadd.xlane.f32.xlu1 %v12453_v54 }
0x1c23   : > { %9420 = vmatpush3.bf16.xpose.msra.mxu0 %v10617_v31  ;;  %v10653_v31 = vld [vmem:[#allocation17 + $0x1a4] ss:$16 sps:$4 sm:$0xff]  }
0x1c24   : > { %9421 = vmatprep.subr.bf16.mxu0 %v10619_v36  ;;  %v10651_v36 = vld [vmem:[#allocation17 + $0x1a0] ss:$16 sps:$4 sm:$0xff]  }
0x1c27   : > { %9438 = vmatpush3.bf16.xpose.msra.mxu1 %v10618_v33  ;;  %v10656_v33 = vld [vmem:[#allocation17 + $0x1ac] ss:$16 sps:$4 sm:$0xff]  }
0x1c28   : > { %9439 = vmatprep.subr.bf16.mxu1 %v10620_v38  ;;  %v10654_v38 = vld [vmem:[#allocation17 + $0x1a8] ss:$16 sps:$4 sm:$0xff]  }
0x1c2b   : > { %9422 = vmatpush3.bf16.xpose.msra.mxu0 %v10621_v40  ;;  %v10659_v40 = vld [vmem:[#allocation17 + $0x184] ss:$16 sps:$4 sm:$0xff]  }
0x1c2c   : > { %9423 = vmatprep.subr.bf16.mxu0 %v10623_v42  ;;  %v10657_v42 = vld [vmem:[#allocation17 + $0x180] ss:$16 sps:$4 sm:$0xff]  }
0x1c2f   : > { %9440 = vmatpush3.bf16.xpose.msra.mxu1 %v10622_v41  ;;  %v10662_v41 = vld [vmem:[#allocation17 + $0x18c] ss:$16 sps:$4 sm:$0xff]  }
0x1c30   : > { %9441 = vmatprep.subr.bf16.mxu1 %v10624_v34  ;;  %v10660_v34 = vld [vmem:[#allocation17 + $0x188] ss:$16 sps:$4 sm:$0xff]  }
0x1c33   : > { %9424 = vmatpush3.bf16.xpose.msra.mxu0 %v10625_v1  ;;  %v10677_v1 = vld [vmem:[#allocation17 + $0x124] ss:$16 sps:$4 sm:$0xff]  }
0x1c34   : > { %9425 = vmatprep.subr.bf16.mxu0 %v10627_v57  ;;  %v10675_v57 = vld [vmem:[#allocation17 + $0x120] ss:$16 sps:$4 sm:$0xff]  }
0x1c37   : > { %9442 = vmatpush3.bf16.xpose.msra.mxu1 %v10626_v56  ;;  %v10680_v56 = vld [vmem:[#allocation17 + $0x12c] ss:$16 sps:$4 sm:$0xff]  }
0x1c38   : > { %9443 = vmatprep.subr.bf16.mxu1 %v10628_v58  ;;  %v10678_v58 = vld [vmem:[#allocation17 + $0x128] ss:$16 sps:$4 sm:$0xff]  }
0x1c3b   : > { %9426 = vmatpush3.bf16.xpose.msra.mxu0 %v10629_v59  ;;  %v10683_v59 = vld [vmem:[#allocation17 + $0x104] ss:$16 sps:$4 sm:$0xff]  }
0x1c3c   : > { %9427 = vmatprep.subr.bf16.mxu0 %v10631_v23  ;;  %v10681_v23 = vld [vmem:[#allocation17 + $0x100] ss:$16 sps:$4 sm:$0xff]  }
0x1c3f   : > { %9444 = vmatpush3.bf16.xpose.msra.mxu1 %v10630_v50  ;;  %v10686_v50 = vld [vmem:[#allocation17 + $0x10c] ss:$16 sps:$4 sm:$0xff]  }
0x1c40   : > { %9445 = vmatprep.subr.bf16.mxu1 %v10632_v61  ;;  %v10684_v61 = vld [vmem:[#allocation17 + $0x108] ss:$16 sps:$4 sm:$0xff]  }
0x1c43   : > { %9428 = vmatpush3.bf16.xpose.msra.mxu0 %v10633_v0  ;;  %v8904_v0 = vld [vmem:[%s13175_s9 + $0x4] sm:$0xf] }
0x1c44   : > { %9429 = vmatprep.subr.bf16.mxu0 %v10635_v2 }
0x1c47   : > { %9446 = vmatpush3.bf16.xpose.msra.mxu1 %v10634_v62 }
0x1c48   : > { %9447 = vmatprep.subr.bf16.mxu1 %v10636_v3  ;;  %v3943_v3 = vrot.slane %v8904_v0, %v12135_v15 }
0x1c4b   : > { %9430 = vmatpush3.bf16.xpose.msra.mxu0 %v10637_v37  ;;  %v3951_v37 = vrot.slane %v8904_v0, %v12138_v17 }
0x1c4c   : > { %4447 = vmatprep.subr.bf16.mxu0 %v10641_v43  ;;  %v3947_v43 = vrot.slane %v8904_v0, %v12144_v21 }
0x1c4f   : > { %9448 = vmatpush3.bf16.xpose.msra.mxu1 %v10638_v7  ;;  %v3939_v7 = vrot.slane %v8904_v0, %v12141_v19  ;;  %v10696_v0 = vld [vmem:[#allocation8 + $0x1e0] sm:$0xff]  }
0x1c50   : > { %4488 = vmatprep.subr.bf16.mxu1 %v10644_v46 }
0x1ca7   : > { %v3830_v35 = vpop.xlane.xlu0 %3829 }
0x1ca8   : > { %v3833_v44 = vmul.f32 0.0078125, %v3830_v35  ;;  %v10665_v35 = vld [vmem:[#allocation17 + $0x164] ss:$16 sps:$4 sm:$0xff]  }
0x1caa   : > { %v3835_v49 = vsub.f32 %v12449_v26, %v3833_v44  ;;  %v10668_v44 = vld [vmem:[#allocation17 + $0x16c] ss:$16 sps:$4 sm:$0xff]  }
0x1cab   : > { %v3832_v63 = vpop.xlane.xlu1 %3831 }
0x1cac   : > { %v3834_v60 = vmul.f32 0.0078125, %v3832_v63  ;;  %v3837_v24 = vmul.f32 %v3835_v49, %v3835_v49  ;;  %v10666_v63 = vld [vmem:[#allocation17 + $0x168] ss:$16 sps:$4 sm:$0xff]  }
0x1cae   : > { %v3836_v8 = vsub.f32 %v12453_v54, %v3834_v60  ;;  %3839 = vadd.xlane.f32.xlu0 %v3837_v24  ;;  %v10671_v60 = vld [vmem:[#allocation17 + $0x144] ss:$16 sps:$4 sm:$0xff]   ;;  %v10674_v24 = vld [vmem:[#allocation17 + $0x14c] ss:$16 sps:$4 sm:$0xff]  }
0x1cb0   : > { %v3838_v20 = vmul.f32 %v3836_v8, %v3836_v8 }
0x1cb2   : > { %3841 = vadd.xlane.f32.xlu0 %v3838_v20  ;;  %v10672_v20 = vld [vmem:[#allocation17 + $0x148] ss:$16 sps:$4 sm:$0xff]  }
0x1d37   : > { %v3840_v47 = vpop.xlane.xlu0 %3839 }
0x1d38   : > { %v3843_v9 = vmul.f32 0.0078125, %v3840_v47 }
0x1d3a   : > { %v3845_v39 = vadd.f32 1e-05, %v3843_v9 }
0x1d3b   : > { %v3842_v11 = vpop.xlane.xlu0 %3841 }
0x1d3c   : > { %10995 = vrsqrt.f32 %v3845_v39  ;;  %v3844_v51 = vmul.f32 0.0078125, %v3842_v11 }
0x1d3e   : > { %v3846_v25 = vadd.f32 1e-05, %v3844_v51 }
0x1d40   : > { %10997 = vrsqrt.f32 %v3846_v25 }
0x1d49   : > { %v10996_v13 = vpop.eup %10995 }
0x1d4a   : > { %v3849_v27 = vmul.f32 %v10996_v13, %v3835_v49  ;;  %v10663_v49 = vld [vmem:[#allocation17 + $0x160] ss:$16 sps:$4 sm:$0xff]  }
0x1d4c   : > { %v3857_v22 = vmul.f32 %v8902_v52, %v3849_v27 }
0x1d4d   : > { %v10998_v53 = vpop.eup %10997 }
0x1d4e   : > { %v3850_v16 = vmul.f32 %v10998_v53, %v3836_v8  ;;  %v3865_v55 = vadd.f32 %v8903_v18, %v3857_v22  ;;  %v10669_v8 = vld [vmem:[#allocation17 + $0x140] ss:$16 sps:$4 sm:$0xff]  }
0x1d50   : > { %v3858_v10 = vmul.f32 %v8902_v52, %v3850_v16 }
0x1d52   : > { %v3866_v28 = vadd.f32 %v8903_v18, %v3858_v10 }
0x1d54   : > { %v3867_v14 = vpack.c.bf16 %v3866_v28, %v3865_v55 }
0x1d56   : > { %9431 = vmatprep.mubr.bf16.mxu0 %v3867_v14  ;;  %9449 = vmatprep.mubr.bf16.mxu1 %v3867_v14 }
0x1d57   : > { %9432 = vmatmul.mubr.bf16.vlgmr.msra.gmra.mxu0 %v3867_v14  ;;  %9450 = vmatmul.mubr.bf16.vlgmr.msra.gmra.mxu1 %v3867_v14 }
0x1d58   : > { %4448 = vmatpush1.bf16.xpose.msra.mxu0 %v10639_v29  ;;  %4489 = vmatpush1.bf16.xpose.msra.mxu1 %v10642_v30 }
0x1d59   : > { %4449 = vmatprep.subr.bf16.mxu0 %v10647_v32  ;;  %4490 = vmatprep.subr.bf16.mxu1 %v10650_v45 }
0x1d60   : > { %4450 = vmatpush1.bf16.xpose.msra.mxu0 %v10645_v48  ;;  %4491 = vmatpush1.bf16.xpose.msra.mxu1 %v10648_v6 }
0x1d61   : > { %4451 = vmatprep.subr.bf16.mxu0 %v10653_v31  ;;  %4492 = vmatprep.subr.bf16.mxu1 %v10656_v33 }
0x1d68   : > { %4452 = vmatpush1.bf16.xpose.msra.mxu0 %v10651_v36  ;;  %4493 = vmatpush1.bf16.xpose.msra.mxu1 %v10654_v38  ;;  %v8938_v36 = vld [vmem:[%s13177_s11 + $0x1] ss:$0 sm:$0xff] }
0x1d69   : > { %4453 = vmatprep.subr.bf16.mxu0 %v10659_v40  ;;  %4494 = vmatprep.subr.bf16.mxu1 %v10662_v41 }
0x1d70   : > { %4454 = vmatpush1.bf16.xpose.msra.mxu0 %v10657_v42  ;;  %4495 = vmatpush1.bf16.xpose.msra.mxu1 %v10660_v34 }
0x1d71   : > { %4455 = vmatprep.subr.bf16.mxu0 %v10665_v35  ;;  %4496 = vmatprep.subr.bf16.mxu1 %v10668_v44 }
0x1d78   : > { %4456 = vmatpush1.bf16.xpose.msra.mxu0 %v10663_v49  ;;  %4497 = vmatpush1.bf16.xpose.msra.mxu1 %v10666_v63 }
0x1d79   : > { %4457 = vmatprep.subr.bf16.mxu0 %v10671_v60  ;;  %4498 = vmatprep.subr.bf16.mxu1 %v10674_v24 }
0x1d80   : > { %4458 = vmatpush1.bf16.xpose.msra.mxu0 %v10669_v8  ;;  %4499 = vmatpush1.bf16.xpose.msra.mxu1 %v10672_v20 }
0x1d81   : > { %4459 = vmatprep.subr.bf16.mxu0 %v10677_v1  ;;  %4500 = vmatprep.subr.bf16.mxu1 %v10680_v56  ;;  %v10687_v56 = vld [vmem:[#allocation8 + $0x1f8] sm:$0xff]  }
0x1d88   : > { %4460 = vmatpush1.bf16.xpose.msra.mxu0 %v10675_v57  ;;  %4501 = vmatpush1.bf16.xpose.msra.mxu1 %v10678_v58  ;;  %v10688_v57 = vld [vmem:[#allocation8 + $0x238] sm:$0xff]  }
0x1d89   : > { %4461 = vmatprep.subr.bf16.mxu0 %v10683_v59  ;;  %4502 = vmatprep.subr.bf16.mxu1 %v10686_v50  ;;  %v10689_v58 = vld [vmem:[#allocation8 + $0x1b8] sm:$0xff]   ;;  %v10690_v59 = vld [vmem:[#allocation8 + $0x1f0] sm:$0xff]  }
0x1d8a   : > { %v10692_v50 = vld [vmem:[#allocation8 + $0x1b0] sm:$0xff]  }
0x1d90   : > { %4462 = vmatpush1.bf16.xpose.msra.mxu0 %v10681_v23  ;;  %4503 = vmatpush1.bf16.xpose.msra.mxu1 %v10684_v61  ;;  %v10693_v23 = vld [vmem:[#allocation8 + $0x1e8] sm:$0xff]  }
0x1d91   : > { %9986 = vmatprep.subr.bf16.mxu1 %v11477_v5  ;;  %9451 = vmatprep.subr.bf16.mxu0 %v10687_v56  ;;  %v10695_v61 = vld [vmem:[#allocation8 + $0x1a8] sm:$0xff]  }
0x1e17   : > { %v4182_v62 = vpop.f32.mrf.mxu0  ;;  %v4225_v2 = vpop.f32.mrf.mxu1 }
0x1e18   : > { %v4183_v27 = vadd.f32 %v4182_v62, %v3939_v7  ;;  %v4226_v52 = vadd.f32 %v4225_v2, %v3947_v43  ;;  %v10697_v62 = vld [vmem:[#allocation8 + $0x220] sm:$0xff]  }
0x1e19   : > { %v4184_v46 = vpop.f32.mrf.mxu0  ;;  %v4227_v47 = vpop.f32.mrf.mxu1  ;;  %v10698_v2 = vld [vmem:[#allocation8 + $0x1a0] sm:$0xff]  }
0x1e1a   : > { %v4185_v11 = vadd.f32 %v4184_v46, %v3943_v3  ;;  %v4228_v51 = vadd.f32 %v4227_v47, %v3951_v37  ;;  %v4234_v32 = vmax.f32 %v4183_v27, 0.0  ;;  %v4236_v45 = vmax.f32 %v4226_v52, 0.0  ;;  %v10703_v27 = vld [vmem:[#allocation8 + $0x210] sm:$0xff]  }
0x1e1b   : > { %v4186_v9 = vpop.f32.mrf.mxu0  ;;  %v4229_v39 = vpop.f32.mrf.mxu1  ;;  %v10704_v52 = vld [vmem:[#allocation8 + $0x190] sm:$0xff]  }
0x1e1c   : > { %v4187_v25 = vadd.f32 %v4186_v9, %v3939_v7  ;;  %v4230_v13 = vadd.f32 %v4229_v39, %v3947_v43  ;;  %v4235_v28 = vmax.f32 %v4185_v11, 0.0  ;;  %v4237_v14 = vmax.f32 %v4228_v51, 0.0 }
0x1e1d   : > { %v4188_v53 = vpop.f32.mrf.mxu0  ;;  %v4231_v16 = vpop.f32.mrf.mxu1 }
0x1e1e   : > { %v4189_v22 = vadd.f32 %v4188_v53, %v3943_v3  ;;  %v4232_v18 = vadd.f32 %v4231_v16, %v3951_v37  ;;  %v4238_v10 = vmax.f32 %v4187_v25, 0.0  ;;  %v4240_v55 = vmax.f32 %v4230_v13, 0.0  ;;  %v10699_v3 = vld [vmem:[#allocation8 + $0x1d8] sm:$0xff]   ;;  %v10702_v13 = vld [vmem:[#allocation8 + $0x1d0] sm:$0xff]   ;;  %v10705_v53 = vld [vmem:[#allocation8 + $0x1c8] sm:$0xff]  }
0x1e1f   : > { %v10700_v37 = vld [vmem:[#allocation8 + $0x218] sm:$0xff]   ;;  %v10706_v16 = vld [vmem:[#allocation8 + $0x208] sm:$0xff]  }
0x1e20   : > { %v4239_v29 = vmax.f32 %v4189_v22, 0.0  ;;  %v4241_v30 = vmax.f32 %v4232_v18, 0.0  ;;  %v4242_v31 = vpack.c.bf16 %v4238_v10, %v4234_v32  ;;  %v4244_v33 = vpack.c.bf16 %v4240_v55, %v4236_v45  ;;  %v10701_v25 = vld [vmem:[#allocation8 + $0x198] sm:$0xff]   ;;  %v10707_v22 = vld [vmem:[#allocation8 + $0x188] sm:$0xff]   ;;  %v10708_v18 = vld [vmem:[#allocation8 + $0x1c0] sm:$0xff]  }
0x1e21   : > { %v10709_v10 = vld [vmem:[#allocation8 + $0x200] sm:$0xff]  }
0x1e22   : > { %v4243_v48 = vpack.c.bf16 %v4239_v29, %v4235_v28  ;;  %v4245_v6 = vpack.c.bf16 %v4241_v30, %v4237_v14  ;;  %v10710_v55 = vld [vmem:[#allocation8 + $0x180] sm:$0xff]  }
0x1e24   : > { %4479 = vmatprep.mubr.bf16.mxu0 %v4243_v48  ;;  %4520 = vmatprep.mubr.bf16.mxu1 %v4245_v6 }
0x1e25   : > { %4480 = vmatmul.mubr.bf16.vlgmr.msra.gmra.mxu0 %v4242_v31  ;;  %4521 = vmatmul.mubr.bf16.vlgmr.msra.gmra.mxu1 %v4244_v33  ;;  %v8971_v31 = vld [vmem:[#allocation5 + $0x2] ss:$0 sm:$0xff] }
0x1e26   : > { %10002 = vmatprep.mubr.msk.bf16.mxu1 %vm11478_vm0, %v11477_v5  ;;  %9987 = vmatpush3.bf16.xpose.msra.mxu1 %v10688_v57 }
0x1e27   : > { %9452 = vmatpush3.bf16.xpose.msra.mxu0 %v10689_v58  ;;  %9988 = vmatprep.subr.bf16.mxu1 %v11477_v5 }
0x1e28   : > { %9453 = vmatprep.subr.bf16.mxu0 %v10690_v59 }
0x1e2f   : > { %9454 = vmatpush3.bf16.xpose.msra.mxu0 %v10692_v50 }
0x1e30   : > { %9455 = vmatprep.subr.bf16.mxu0 %v10693_v23 }
0x1e37   : > { %9456 = vmatpush3.bf16.xpose.msra.mxu0 %v10695_v61 }
0x1e38   : > { %9457 = vmatprep.subr.bf16.mxu0 %v10696_v0 }
0x1e3f   : > { %9458 = vmatpush3.bf16.xpose.msra.mxu0 %v10698_v2 }
0x1e40   : > { %9459 = vmatprep.subr.bf16.mxu0 %v10699_v3 }
0x1e47   : > { %9460 = vmatpush3.bf16.xpose.msra.mxu0 %v10701_v25 }
0x1e48   : > { %9461 = vmatprep.subr.bf16.mxu0 %v10702_v13 }
0x1e4f   : > { %9462 = vmatpush3.bf16.xpose.msra.mxu0 %v10704_v52 }
0x1e50   : > { %9463 = vmatprep.subr.bf16.mxu0 %v10705_v53 }
0x1e57   : > { %9464 = vmatpush3.bf16.xpose.msra.mxu0 %v10707_v22 }
0x1e58   : > { %9465 = vmatprep.subr.bf16.mxu0 %v10708_v18 }
0x1e5f   : > { %9466 = vmatpush3.bf16.xpose.msra.mxu0 %v10710_v55 }
0x1e60   : > { %10006 = vmatprep.subr.bf16.mxu0 %v11477_v5 }
0x1ee5   : > { %v4481_v38 = vpop.f32.mrf.mxu0  ;;  %v4522_v40 = vpop.f32.mrf.mxu1 }
0x1ee6   : > { %v4482_v41 = vadd.f32 %v8938_v36, %v4481_v38 }
0x1ee7   : > { %v4483_v42 = vpop.f32.mrf.mxu0  ;;  %v4524_v34 = vpop.f32.mrf.mxu1 }
0x1ee8   : > { %v4523_v35 = vadd.f32 %v4522_v40, %v4482_v41  ;;  %v8972_v40 = vld [vmem:[#allocation7 + $0x2] ss:$0 sm:$0xff] }
0x1ee9   : > { %v4484_v44 = vpop.f32.mrf.mxu0  ;;  %v4525_v49 = vpop.f32.mrf.mxu1 }
0x1eea   : > { %v12472_v63 = vadd.f32 %v4523_v35, %v12449_v26  ;;  %v4485_v60 = vadd.f32 %v8938_v36, %v4484_v44  ;;  %v10691_v26 = vld [vmem:[#allocation8 + $0x230] sm:$0xff]  }
0x1eeb   : > { %v4486_v24 = vpop.f32.mrf.mxu0  ;;  %v4527_v8 = vpop.f32.mrf.mxu1  ;;  %9989 = vmatpush3.bf16.xpose.msra.mxu1 %v10691_v26 }
0x1eec   : > { %v4526_v20 = vadd.f32 %v4525_v49, %v4485_v60  ;;  %4535 = vadd.xlane.f32.xlu0 %v12472_v63  ;;  %9990 = vmatprep.subr.bf16.mxu1 %v11477_v5 }
0x1eee   : > { %v12476_v1 = vadd.f32 %v4526_v20, %v12453_v54  ;;  %v10694_v54 = vld [vmem:[#allocation8 + $0x228] sm:$0xff]  }
0x1ef0   : > { %4537 = vadd.xlane.f32.xlu1 %v12476_v1 }
0x1ef3   : > { %9991 = vmatpush3.bf16.xpose.msra.mxu1 %v10694_v54 }
0x1ef4   : > { %9992 = vmatprep.subr.bf16.mxu1 %v11477_v5 }
0x1efb   : > { %9993 = vmatpush3.bf16.xpose.msra.mxu1 %v10697_v62 }
0x1efc   : > { %9994 = vmatprep.subr.bf16.mxu1 %v11477_v5 }
0x1f03   : > { %9995 = vmatpush3.bf16.xpose.msra.mxu1 %v10700_v37 }
0x1f04   : > { %9996 = vmatprep.subr.bf16.mxu1 %v11477_v5 }
0x1f0b   : > { %9997 = vmatpush3.bf16.xpose.msra.mxu1 %v10703_v27 }
0x1f0c   : > { %9998 = vmatprep.subr.bf16.mxu1 %v11477_v5 }
0x1f13   : > { %9999 = vmatpush3.bf16.xpose.msra.mxu1 %v10706_v16 }
0x1f14   : > { %10000 = vmatprep.subr.bf16.mxu1 %v11477_v5 }
0x1f1b   : > { %10001 = vmatpush3.bf16.xpose.msra.mxu1 %v10709_v10 }
0x1f1c   : > { %10024 = vmatprep.subr.bf16.mxu1 %v11477_v5 }
0x1f75   : > { %v4536_v7 = vpop.xlane.xlu0 %4535 }
0x1f76   : > { %v4539_v43 = vmul.f32 0.0078125, %v4536_v7 }
0x1f78   : > { %v4541_v46 = vsub.f32 %v12472_v63, %v4539_v43 }
0x1f79   : > { %v4538_v47 = vpop.xlane.xlu1 %4537 }
0x1f7a   : > { %v4540_v9 = vmul.f32 0.0078125, %v4538_v47  ;;  %v4543_v39 = vmul.f32 %v4541_v46, %v4541_v46 }
0x1f7c   : > { %v4542_v11 = vsub.f32 %v12476_v1, %v4540_v9  ;;  %4545 = vadd.xlane.f32.xlu0 %v4543_v39 }
0x1f7e   : > { %v4544_v51 = vmul.f32 %v4542_v11, %v4542_v11 }
0x1f80   : > { %4547 = vadd.xlane.f32.xlu1 %v4544_v51 }
0x2005   : > { %v4546_v28 = vpop.xlane.xlu0 %4545 }
0x2006   : > { %v4549_v14 = vmul.f32 0.0078125, %v4546_v28 }
0x2008   : > { %v4551_v29 = vadd.f32 1e-05, %v4549_v14 }
0x2009   : > { %v4548_v30 = vpop.xlane.xlu1 %4547 }
0x200a   : > { %10999 = vrsqrt.f32 %v4551_v29  ;;  %v4550_v32 = vmul.f32 0.0078125, %v4548_v30 }
0x200c   : > { %v4552_v45 = vadd.f32 1e-05, %v4550_v32 }
0x200e   : > { %11001 = vrsqrt.f32 %v4552_v45 }
0x2017   : > { %v11000_v48 = vpop.eup %10999 }
0x2018   : > { %v4555_v6 = vmul.f32 %v11000_v48, %v4541_v46 }
0x201a   : > { %v4563_v38 = vmul.f32 %v8971_v31, %v4555_v6 }
0x201b   : > { %v11002_v33 = vpop.eup %11001 }
0x201c   : > { %v4556_v36 = vmul.f32 %v11002_v33, %v4542_v11  ;;  %v4571_v42 = vadd.f32 %v8972_v40, %v4563_v38 }
0x201e   : > { %v4564_v41 = vmul.f32 %v8971_v31, %v4556_v36 }
0x2020   : > { %v4572_v34 = vadd.f32 %v8972_v40, %v4564_v41 }
0x2022   : > { %v4573_v35 = vpack.c.bf16 %v4572_v34, %v4571_v42 }
0x2024   : > { %9467 = vmatprep.mubr.bf16.mxu0 %v4573_v35  ;;  %10003 = vmatmul.mubr.bf16.vlgmr.msra.gmra.mxu1 %v4573_v35 }
0x2025   : > { %9468 = vmatmul.mubr.bf16.vlgmr.msra.gmra.mxu0 %v4573_v35  ;;  %10026 = vmatprep.mubr.msk.bf16.mxu1 %vm11478_vm0, %v11477_v5 }
0x2026   : > { %10008 = vmatprep.mubr.msk.bf16.mxu0 %vm11478_vm0, %v11477_v5 }
0x20e4   : > { %v4844_v44 = vpop.f32.mrf.mxu1 }
0x20e5   : > { %v4801_v49 = vpop.f32.mrf.mxu0 }
0x20e6   : > { %v10004_v60 = vpop.f32.mrf.mxu1 }
0x20e7   : > { %v4803_v24 = vpop.f32.mrf.mxu0 }
0x20e8   : > { %v4847_v8 = vpop.f32.mrf.mxu1 }
0x20e9   : > { %v4805_v20 = vpop.f32.mrf.mxu0  ;;  %v12501_v50 = vpack.c.bf16 %v4847_v8, %v4844_v44 }
0x20ea   : > { %v10005_v56 = vpop.f32.mrf.mxu1  ;;  %v12499_v26 = vpack.c.bf16 %v4805_v20, %v4801_v49 }
0x20eb   : > { %v4807_v57 = vpop.f32.mrf.mxu0 }
0x20ec   : > { %v12494_v58 = vpack.c.bf16 %v4807_v57, %v4803_v24 }
0x20ee   : > { %v4875_v59 = vsel %vm1032_vm1, %v12494_v58, 0 }
0x20ef   : > { %10007 = vmatpush3.bf16.xpose.msra.mxu0 %v4875_v59 }
0x20f0   : > { %10012 = vmatprep.subr.bf16.mxu0 %v11477_v5 }
0x20f6   : > { %10009 = vmatmul.mubr.msk.bf16.vlgmr.msra.gmra.mxu0 %vm1032_vm1, %v12499_v26 }
0x20f7   : > { %10013 = vmatpush3.bf16.msra.mxu0 %v12501_v50  ;;  %10014 = vmatprep.mubr.msk.bf16.mxu0 %vm11478_vm0, %v11477_v5 }
0x20f8   : > { %10018 = vmatprep.subr.bf16.mxu0 %v11477_v5 }
0x21b6   : > { %v4911_v23 = vpop.f32.mrf.mxu0 }
0x21b7   : > { %v4918_v54 = vmul.f32 0.17677669, %v4911_v23 }
0x21b8   : > { %v10010_v61 = vpop.f32.mrf.mxu0 }
0x21b9   : > { %v4920_v0 = vsel %vm11859_vm2, %v4918_v54, -1e+30 }
0x21ba   : > { %v4914_v62 = vpop.f32.mrf.mxu0  ;;  %v4922_v2 = vsel %vm1084_vm3, %v4920_v0, -inf }
0x21bb   : > { %v4919_v3 = vmul.f32 0.17677669, %v4914_v62  ;;  %4923 = vmax.xlane.f32.xlu0 %v4922_v2  ;;  %v12547_v62 = vld [vmem:[#allocation10 + $0xb0] sm:$0xff]   ;;  %v12551_v2 = vld [vmem:[#allocation10 + $0xa0] sm:$0xff]  }
0x21bc   : > { %v10011_v37 = vpop.f32.mrf.mxu0 }
0x21bd   : > { %v4921_v7 = vsel %vm11867_vm4, %v4919_v3, -1e+30  ;;  %v12555_v3 = vld [vmem:[#allocation10 + $0xa8] sm:$0xff]   ;;  %v12559_v37 = vld [vmem:[#allocation10 + $0x90] sm:$0xff]  }
0x21be   : > { %v4925_v43 = vsel %vm1084_vm3, %v4921_v7, -inf }
0x21bf   : > { %4926 = vmax.xlane.f32.xlu1 %v4925_v43  ;;  %v12567_v43 = vld [vmem:[#allocation10 + $0x80] sm:$0xff]  }
0x2244   : > { %v4924_v46 = vpop.xlane.xlu0 %4923 }
0x2245   : > { %v4928_v47 = vsub.f32 %v4920_v0, %v4924_v46  ;;  %v12543_v0 = vld [vmem:[#allocation10 + $0xb8] sm:$0xff]   ;;  %v12571_v46 = vld [vmem:[#allocation10 + $0x88] sm:$0xff]  }
0x2247   : > { %v4930_v9 = vmul.f32 1.442695, %v4928_v47 }
0x2248   : > { %v4927_v39 = vpop.xlane.xlu1 %4926 }
0x2249   : > { %11003 = vpow2.f32 %v4930_v9  ;;  %v4929_v11 = vsub.f32 %v4921_v7, %v4927_v39  ;;  %v12563_v7 = vld [vmem:[#allocation10 + $0x98] sm:$0xff]  }
0x224b   : > { %v4932_v51 = vmul.f32 1.442695, %v4929_v11 }
0x224d   : > { %11005 = vpow2.f32 %v4932_v51 }
0x2256   : > { %v11004_v25 = vpop.eup %11003 }
0x2257   : > { %v4934_v13 = vsel %vm1084_vm3, %v11004_v25, 0.0 }
0x2258   : > { %4935 = vadd.xlane.f32.xlu0 %v4934_v13 }
0x225a   : > { %v11006_v27 = vpop.eup %11005 }
0x225b   : > { %v4937_v52 = vsel %vm1084_vm3, %v11006_v27, 0.0 }
0x225c   : > { %4938 = vadd.xlane.f32.xlu1 %v4937_v52 }
0x226d   : > { %4991 = vrot.lane.b32.xlu1 %v12499_v26, %s11479_s3 }
0x226e   : > { %4994 = vrot.lane.b32.xlu0 %v12494_v58, %s11479_s3 }
0x22e1   : > { %v4936_v53 = vpop.xlane.xlu0 %4935 }
0x22e2   : > { %11007 = vrcp.f32 %v4936_v53 }
0x22e5   : > { %v4939_v16 = vpop.xlane.xlu1 %4938  ;;  %v4995_v28 = vpop.permute.xlu0 %4994 }
0x22e6   : > { %11009 = vrcp.f32 %v4939_v16  ;;  %v5000_v29 = vsel %vm1032_vm1, %v4995_v28, 0  ;;  %v5265_v28 = vsel %vm1032_vm1, %v12547_v62, 0 }
0x22e9   : > { %v4992_v30 = vpop.permute.xlu1 %4991 }
0x22ef   : > { %v11008_v22 = vpop.eup %11007 }
0x22f0   : > { %v4942_v10 = vmul.f32 %v11008_v22, %v11004_v25 }
0x22f3   : > { %v11010_v18 = vpop.eup %11009 }
0x22f4   : > { %v4943_v55 = vmul.f32 %v11010_v18, %v11006_v27  ;;  %v5268_v18 = vsel %vm1032_vm1, %v12543_v0, 0 }
0x22f6   : > { %v4944_v14 = vpack.c.bf16 %v4943_v55, %v4942_v10 }
0x22f8   : > { %10015 = vmatmul.mubr.msk.bf16.vlgmr.msra.gmra.mxu0 %vm1084_vm3, %v4944_v14 }
0x22f9   : > { %10019 = vmatpush3.bf16.xpose.msra.mxu0 %v5000_v29  ;;  %10020 = vmatprep.mubr.msk.bf16.mxu0 %vm11478_vm0, %v11477_v5 }
0x22fa   : > { %10030 = vmatprep.subr.bf16.mxu0 %v11477_v5 }
0x2300   : > { %10021 = vmatmul.mubr.msk.bf16.vlgmr.msra.gmra.mxu0 %vm1032_vm1, %v4992_v30  ;;  %v5262_v30 = vsel %vm1032_vm1, %v12555_v3, 0 }
0x2301   : > { %10046 = vmatprep.mubr.msk.bf16.mxu0 %vm11478_vm0, %v11477_v5 }
0x23b8   : > { %v12529_v32 = vpop.f32.mrf.mxu0 }
0x23ba   : > { %v10016_v45 = vpop.f32.mrf.mxu0 }
0x23bc   : > { %v12531_v48 = vpop.f32.mrf.mxu0 }
0x23bd   : > { %v4989_v6 = vpack.c.bf16 %v12531_v48, %v12529_v32 }
0x23be   : > { %v10017_v31 = vpop.f32.mrf.mxu0 }
0x23c0   : > { %v5036_v33 = vpop.f32.mrf.mxu0 }
0x23c1   : > { %v5043_v36 = vmul.f32 0.17677669, %v5036_v33  ;;  %v5259_v33 = vsel %vm1032_vm1, %v12551_v2, 0 }
0x23c2   : > { %v10022_v38 = vpop.f32.mrf.mxu0 }
0x23c3   : > { %v5045_v40 = vsel %vm11859_vm2, %v5043_v36, -1e+30 }
0x23c4   : > { %v5039_v41 = vpop.f32.mrf.mxu0  ;;  %v5047_v42 = vsel %vm1084_vm3, %v5045_v40, -inf }
0x23c5   : > { %v5044_v34 = vmul.f32 0.17677669, %v5039_v41  ;;  %5048 = vmax.xlane.f32.xlu1 %v5047_v42 }
0x23c6   : > { %v10023_v35 = vpop.f32.mrf.mxu0 }
0x23c7   : > { %v5046_v44 = vsel %vm11867_vm4, %v5044_v34, -1e+30  ;;  %v5253_v34 = vsel %vm1032_vm1, %v12559_v37, 0 }
0x23c8   : > { %v5050_v49 = vsel %vm1084_vm3, %v5046_v44, -inf }
0x23c9   : > { %5051 = vmax.xlane.f32.xlu0 %v5050_v49  ;;  %v5250_v49 = vsel %vm1032_vm1, %v12571_v46, 0 }
0x244e   : > { %v5049_v60 = vpop.xlane.xlu1 %5048 }
0x244f   : > { %v5053_v24 = vsub.f32 %v5045_v40, %v5049_v60  ;;  %v5256_v40 = vsel %vm1032_vm1, %v12563_v7, 0  ;;  %v5247_v60 = vsel %vm1032_vm1, %v12567_v43, 0 }
0x2451   : > { %v5055_v8 = vmul.f32 1.442695, %v5053_v24 }
0x2452   : > { %v5052_v20 = vpop.xlane.xlu0 %5051 }
0x2453   : > { %11011 = vpow2.f32 %v5055_v8  ;;  %v5054_v56 = vsub.f32 %v5046_v44, %v5052_v20 }
0x2455   : > { %v5057_v57 = vmul.f32 1.442695, %v5054_v56 }
0x2457   : > { %11013 = vpow2.f32 %v5057_v57 }
0x2460   : > { %v11012_v59 = vpop.eup %11011 }
0x2461   : > { %v5059_v23 = vsel %vm1084_vm3, %v11012_v59, 0.0 }
0x2462   : > { %5060 = vadd.xlane.f32.xlu0 %v5059_v23 }
0x2464   : > { %v11014_v54 = vpop.eup %11013 }
0x2465   : > { %v5062_v61 = vsel %vm1084_vm3, %v11014_v54, 0.0 }
0x2466   : > { %5063 = vadd.xlane.f32.xlu1 %v5062_v61 }
0x2477   : > { %5173 = vrot.lane.b32.xlu1 %v12543_v0, %s11479_s3 }
0x2478   : > { %5071 = vrot.lane.b32.xlu0 %v12501_v50, %s11479_s3 }
0x247b   : > { %5171 = vrot.lane.b32.xlu1 %v12547_v62, %s11479_s3 }
0x247c   : > { %5167 = vrot.lane.b32.xlu0 %v12551_v2, %s11479_s3 }
0x247f   : > { %5169 = vrot.lane.b32.xlu1 %v12555_v3, %s11479_s3 }
0x2480   : > { %5163 = vrot.lane.b32.xlu0 %v12559_v37, %s11479_s3 }
0x2483   : > { %5165 = vrot.lane.b32.xlu1 %v12563_v7, %s11479_s3 }
0x2484   : > { %5159 = vrot.lane.b32.xlu0 %v12567_v43, %s11479_s3 }
0x2487   : > { %5161 = vrot.lane.b32.xlu1 %v12571_v46, %s11479_s3 }
0x2488   : > { %5311 = vrot.lane.b32.xlu0 %v12499_v26, %s11480_s4 }
0x248b   : > { %5313 = vrot.lane.b32.xlu1 %v12494_v58, %s11480_s4 }
0x24eb   : > { %v5061_v47 = vpop.xlane.xlu0 %5060 }
0x24ec   : > { %11015 = vrcp.f32 %v5061_v47 }
0x24ef   : > { %v5064_v9 = vpop.xlane.xlu1 %5063  ;;  %v5072_v39 = vpop.permute.xlu0 %5071 }
0x24f0   : > { %11017 = vrcp.f32 %v5064_v9  ;;  %10025 = vmatpush3.bf16.msra.mxu1 %v5072_v39 }
0x24f1   : > { %10050 = vmatprep.subr.bf16.mxu1 %v11477_v5 }
0x24f3   : > { %v5174_v11 = vpop.permute.xlu1 %5173  ;;  %v5168_v14 = vpop.permute.xlu0 %5167 }
0x24f4   : > { %v5200_v51 = vsel %vm1032_vm1, %v5174_v11, 0  ;;  %v5191_v29 = vsel %vm1032_vm1, %v5168_v14, 0 }
0x24f5   : > { %10031 = vmatpush3.bf16.xpose.msra.mxu0 %v5200_v51 }
0x24f6   : > { %10032 = vmatprep.subr.bf16.mxu0 %v11477_v5 }
0x24f7   : > { %v5172_v25 = vpop.permute.xlu1 %5171  ;;  %v5164_v36 = vpop.permute.xlu0 %5163 }
0x24f8   : > { %v5197_v13 = vsel %vm1032_vm1, %v5172_v25, 0  ;;  %v5185_v38 = vsel %vm1032_vm1, %v5164_v36, 0 }
0x24f9   : > { %v11016_v27 = vpop.eup %11015 }
0x24fa   : > { %v5067_v53 = vmul.f32 %v11016_v27, %v11012_v59 }
0x24fb   : > { %v5170_v10 = vpop.permute.xlu1 %5169  ;;  %v5160_v35 = vpop.permute.xlu0 %5159 }
0x24fc   : > { %v5194_v55 = vsel %vm1032_vm1, %v5170_v10, 0  ;;  %v5179_v44 = vsel %vm1032_vm1, %v5160_v35, 0 }
0x24fd   : > { %v11018_v52 = vpop.eup %11017  ;;  %10033 = vmatpush3.bf16.xpose.msra.mxu0 %v5197_v13 }
0x24fe   : > { %v5068_v16 = vmul.f32 %v11018_v52, %v11014_v54  ;;  %10034 = vmatprep.subr.bf16.mxu0 %v11477_v5 }
0x24ff   : > { %v5166_v45 = vpop.permute.xlu1 %5165  ;;  %v5312_v32 = vpop.permute.xlu0 %5311 }
0x2500   : > { %v5069_v22 = vpack.c.bf16 %v5068_v16, %v5067_v53  ;;  %v5188_v31 = vsel %vm1032_vm1, %v5166_v45, 0 }
0x2502   : > { %10027 = vmatmul.mubr.msk.bf16.vlgmr.msra.gmra.mxu1 %vm1084_vm3, %v5069_v22 }
0x2503   : > { %10051 = vmatpush3.bf16.xpose.msra.mxu1 %v5268_v18  ;;  %10066 = vmatprep.mubr.msk.bf16.mxu1 %vm11478_vm0, %v11477_v5  ;;  %v5162_v41 = vpop.permute.xlu1 %5161 }
0x2504   : > { %10052 = vmatprep.subr.bf16.mxu1 %v11477_v5  ;;  %v5182_v42 = vsel %vm1032_vm1, %v5162_v41, 0 }
0x2505   : > { %10035 = vmatpush3.bf16.xpose.msra.mxu0 %v5194_v55 }
0x2506   : > { %10036 = vmatprep.subr.bf16.mxu0 %v11477_v5 }
0x2507   : > { %v5314_v20 = vpop.permute.xlu1 %5313 }
0x2508   : > { %v5319_v23 = vsel %vm1032_vm1, %v5314_v20, 0 }
0x250b   : > { %10053 = vmatpush3.bf16.xpose.msra.mxu1 %v5265_v28 }
0x250c   : > { %10054 = vmatprep.subr.bf16.mxu1 %v11477_v5 }
0x250d   : > { %10037 = vmatpush3.bf16.xpose.msra.mxu0 %v5191_v29 }
0x250e   : > { %10038 = vmatprep.subr.bf16.mxu0 %v11477_v5 }
0x2513   : > { %10055 = vmatpush3.bf16.xpose.msra.mxu1 %v5262_v30 }
0x2514   : > { %10056 = vmatprep.subr.bf16.mxu1 %v11477_v5 }
0x2515   : > { %10039 = vmatpush3.bf16.xpose.msra.mxu0 %v5188_v31 }
0x2516   : > { %10040 = vmatprep.subr.bf16.mxu0 %v11477_v5 }
0x251b   : > { %10057 = vmatpush3.bf16.xpose.msra.mxu1 %v5259_v33 }
0x251c   : > { %10058 = vmatprep.subr.bf16.mxu1 %v11477_v5 }
0x251d   : > { %10041 = vmatpush3.bf16.xpose.msra.mxu0 %v5185_v38 }
0x251e   : > { %10042 = vmatprep.subr.bf16.mxu0 %v11477_v5 }
0x2523   : > { %10059 = vmatpush3.bf16.xpose.msra.mxu1 %v5256_v40 }
0x2524   : > { %10060 = vmatprep.subr.bf16.mxu1 %v11477_v5 }
0x2525   : > { %10043 = vmatpush3.bf16.xpose.msra.mxu0 %v5182_v42 }
0x2526   : > { %10044 = vmatprep.subr.bf16.mxu0 %v11477_v5 }
0x252b   : > { %10061 = vmatpush3.bf16.xpose.msra.mxu1 %v5253_v34 }
0x252c   : > { %10062 = vmatprep.subr.bf16.mxu1 %v11477_v5 }
0x252d   : > { %10045 = vmatpush3.bf16.xpose.msra.mxu0 %v5179_v44 }
0x252e   : > { %10070 = vmatprep.subr.bf16.mxu0 %v11477_v5 }
0x2533   : > { %10063 = vmatpush3.bf16.xpose.msra.mxu1 %v5250_v49 }
0x2534   : > { %10064 = vmatprep.subr.bf16.mxu1 %v11477_v5 }
0x253b   : > { %10065 = vmatpush3.bf16.xpose.msra.mxu1 %v5247_v60 }
0x253c   : > { %10076 = vmatprep.subr.bf16.mxu1 %v11477_v5 }
0x2542   : > { %10067 = vmatmul.mubr.msk.bf16.vlgmr.msra.gmra.mxu1 %vm1032_vm1, %v4989_v6 }
0x2543   : > { %10078 = vmatprep.mubr.msk.bf16.mxu1 %vm11478_vm0, %v11477_v5 }
0x25c2   : > { %v5111_v24 = vpop.f32.mrf.mxu1 }
0x25c4   : > { %v10028_v8 = vpop.f32.mrf.mxu1 }
0x25c6   : > { %v5114_v56 = vpop.f32.mrf.mxu1 }
0x25c7   : > { %v5118_v57 = vpack.c.bf16 %v5114_v56, %v5111_v24 }
0x25c8   : > { %v10029_v59 = vpop.f32.mrf.mxu1 }
0x25c9   : > { %10047 = vmatmul.mubr.msk.bf16.vlgmr.msra.gmra.mxu0 %vm1032_vm1, %v5118_v57 }
0x25ca   : > { %10071 = vmatpush3.bf16.xpose.msra.mxu0 %v5319_v23  ;;  %10072 = vmatprep.mubr.msk.bf16.mxu0 %vm11478_vm0, %v11477_v5 }
0x25cb   : > { %10082 = vmatprep.subr.bf16.mxu0 %v11477_v5 }
0x25d1   : > { %10073 = vmatmul.mubr.msk.bf16.vlgmr.msra.gmra.mxu0 %vm1032_vm1, %v5312_v32 }
0x25d2   : > { %10098 = vmatprep.mubr.msk.bf16.mxu0 %vm11478_vm0, %v11477_v5 }
0x2602   : > { %v12639_v48 = vpop.f32.mrf.mxu1 }
0x2604   : > { %v10068_v6 = vpop.f32.mrf.mxu1 }
0x2606   : > { %v12641_v54 = vpop.f32.mrf.mxu1 }
0x2608   : > { %v10069_v61 = vpop.f32.mrf.mxu1 }
0x2689   : > { %v12643_v47 = vpop.f32.mrf.mxu0 }
0x268b   : > { %v10048_v9 = vpop.f32.mrf.mxu0 }
0x268d   : > { %v12645_v39 = vpop.f32.mrf.mxu0 }
0x268f   : > { %v10049_v11 = vpop.f32.mrf.mxu0 }
0x2691   : > { %v5355_v51 = vpop.f32.mrf.mxu0 }
0x2692   : > { %v5362_v25 = vmul.f32 0.17677669, %v5355_v51 }
0x2693   : > { %v10074_v13 = vpop.f32.mrf.mxu0 }
0x2694   : > { %v5364_v27 = vsel %vm11859_vm2, %v5362_v25, -1e+30 }
0x2695   : > { %v5358_v52 = vpop.f32.mrf.mxu0  ;;  %v5366_v53 = vsel %vm1084_vm3, %v5364_v27, -inf }
0x2696   : > { %v5363_v16 = vmul.f32 0.17677669, %v5358_v52  ;;  %5367 = vmax.xlane.f32.xlu1 %v5366_v53 }
0x2697   : > { %v10075_v22 = vpop.f32.mrf.mxu0 }
0x2698   : > { %v5365_v18 = vsel %vm11867_vm4, %v5363_v16, -1e+30 }
0x2699   : > { %v5369_v10 = vsel %vm1084_vm3, %v5365_v18, -inf }
0x269a   : > { %5370 = vmax.xlane.f32.xlu0 %v5369_v10 }
0x26a7   : > { %5389 = vrot.lane.b32.xlu1 %v12501_v50, %s11480_s4 }
0x26ab   : > { %5523 = vrot.lane.b32.xlu1 %v12499_v26, %s11481_s28 }
0x271f   : > { %v5368_v55 = vpop.xlane.xlu1 %5367 }
0x2720   : > { %v5372_v28 = vsub.f32 %v5364_v27, %v5368_v55 }
0x2722   : > { %v5374_v14 = vmul.f32 1.442695, %v5372_v28 }
0x2723   : > { %v5390_v29 = vpop.permute.xlu1 %5389  ;;  %v5371_v30 = vpop.xlane.xlu0 %5370 }
0x2724   : > { %11019 = vpow2.f32 %v5374_v14  ;;  %v5373_v45 = vsub.f32 %v5365_v18, %v5371_v30  ;;  %10077 = vmatpush3.bf16.msra.mxu1 %v5390_v29 }
0x2725   : > { %10102 = vmatprep.subr.bf16.mxu1 %v11477_v5 }
0x2726   : > { %v5376_v31 = vmul.f32 1.442695, %v5373_v45 }
0x2728   : > { %11021 = vpow2.f32 %v5376_v31 }
0x2731   : > { %v11020_v33 = vpop.eup %11019 }
0x2732   : > { %v5378_v36 = vsel %vm1084_vm3, %v11020_v33, 0.0 }
0x2733   : > { %5379 = vadd.xlane.f32.xlu0 %v5378_v36 }
0x2735   : > { %v11022_v38 = vpop.eup %11021 }
0x2736   : > { %v5381_v40 = vsel %vm1084_vm3, %v11022_v38, 0.0 }
0x2737   : > { %5382 = vadd.xlane.f32.xlu0 %v5381_v40 }
0x274d   : > { %5525 = vrot.lane.b32.xlu0 %v12494_v58, %s11481_s28  ;;  %v5524_v58 = vpop.permute.xlu1 %5523 }
0x27bc   : > { %v5380_v26 = vpop.xlane.xlu0 %5379 }
0x27bd   : > { %11023 = vrcp.f32 %v5380_v26 }
0x27c0   : > { %v5383_v41 = vpop.xlane.xlu0 %5382 }
0x27c1   : > { %11025 = vrcp.f32 %v5383_v41 }
0x27c4   : > { %v5526_v49 = vpop.permute.xlu0 %5525 }
0x27c5   : > { %v5531_v24 = vsel %vm1032_vm1, %v5526_v49, 0 }
0x27ca   : > { %v11024_v42 = vpop.eup %11023 }
0x27cb   : > { %v5386_v35 = vmul.f32 %v11024_v42, %v11020_v33 }
0x27ce   : > { %v11026_v34 = vpop.eup %11025 }
0x27cf   : > { %v5387_v44 = vmul.f32 %v11026_v34, %v11022_v38 }
0x27d1   : > { %v5388_v60 = vpack.c.bf16 %v5387_v44, %v5386_v35 }
0x27d3   : > { %10079 = vmatmul.mubr.msk.bf16.vlgmr.msra.gmra.mxu1 %vm1084_vm3, %v5388_v60 }
0x27d4   : > { %10103 = vmatpush3.bf16.xpose.msra.mxu1 %v5531_v24  ;;  %10104 = vmatprep.mubr.msk.bf16.mxu1 %vm11478_vm0, %v11477_v5 }
0x27d5   : > { %10108 = vmatprep.subr.bf16.mxu1 %v11477_v5 }
0x27db   : > { %10105 = vmatmul.mubr.msk.bf16.vlgmr.msra.gmra.mxu1 %vm1032_vm1, %v5524_v58 }
0x27dc   : > { %10110 = vmatprep.mubr.msk.bf16.mxu1 %vm11478_vm0, %v11477_v5 }
0x2893   : > { %v12670_v8 = vpop.f32.mrf.mxu1 }
0x2895   : > { %v10080_v20 = vpop.f32.mrf.mxu1 }
0x2897   : > { %v12672_v56 = vpop.f32.mrf.mxu1 }
0x2898   : > { %v5436_v57 = vpack.c.bf16 %v12672_v56, %v12670_v8 }
0x2899   : > { %v10081_v59 = vpop.f32.mrf.mxu1 }
0x289b   : > { %v5567_v23 = vpop.f32.mrf.mxu1 }
0x289c   : > { %v5574_v32 = vmul.f32 0.17677669, %v5567_v23 }
0x289d   : > { %v10106_v6 = vpop.f32.mrf.mxu1 }
0x289e   : > { %v5576_v61 = vsel %vm11859_vm2, %v5574_v32, -1e+30 }
0x289f   : > { %v5570_v9 = vpop.f32.mrf.mxu1  ;;  %v5578_v11 = vsel %vm1084_vm3, %v5576_v61, -inf }
0x28a0   : > { %v5575_v51 = vmul.f32 0.17677669, %v5570_v9  ;;  %5579 = vmax.xlane.f32.xlu1 %v5578_v11 }
0x28a1   : > { %v10107_v25 = vpop.f32.mrf.mxu1 }
0x28a2   : > { %v5577_v13 = vsel %vm11867_vm4, %v5575_v51, -1e+30 }
0x28a3   : > { %v5581_v27 = vsel %vm1084_vm3, %v5577_v13, -inf }
0x28a4   : > { %5582 = vmax.xlane.f32.xlu0 %v5581_v27 }
0x2929   : > { %v5580_v52 = vpop.xlane.xlu1 %5579 }
0x292a   : > { %v5584_v53 = vsub.f32 %v5576_v61, %v5580_v52 }
0x292c   : > { %v5586_v16 = vmul.f32 1.442695, %v5584_v53 }
0x292d   : > { %v5583_v22 = vpop.xlane.xlu0 %5582 }
0x292e   : > { %11027 = vpow2.f32 %v5586_v16  ;;  %v5585_v18 = vsub.f32 %v5577_v13, %v5583_v22 }
0x2930   : > { %v5588_v10 = vmul.f32 1.442695, %v5585_v18 }
0x2932   : > { %11029 = vpow2.f32 %v5588_v10 }
0x293b   : > { %v11028_v55 = vpop.eup %11027 }
0x293c   : > { %v5590_v28 = vsel %vm1084_vm3, %v11028_v55, 0.0 }
0x293d   : > { %5591 = vadd.xlane.f32.xlu0 %v5590_v28  ;;  %v5305_v28 = vadd.f32 %v12639_v48, %v12643_v47 }
0x293f   : > { %v11030_v14 = vpop.eup %11029 }
0x2940   : > { %v5593_v29 = vsel %vm1084_vm3, %v11030_v14, 0.0 }
0x2941   : > { %5594 = vadd.xlane.f32.xlu1 %v5593_v29 }
0x2952   : > { %5451 = vrot.lane.b32.xlu1 %v12543_v0, %s11480_s4 }
0x2953   : > { %5601 = vrot.lane.b32.xlu0 %v12501_v50, %s11481_s28 }
0x2956   : > { %5663 = vrot.lane.b32.xlu1 %v12543_v0, %s11481_s28 }
0x2957   : > { %5661 = vrot.lane.b32.xlu0 %v12547_v62, %s11481_s28 }
0x295a   : > { %5449 = vrot.lane.b32.xlu1 %v12547_v62, %s11480_s4 }
0x295b   : > { %5659 = vrot.lane.b32.xlu0 %v12555_v3, %s11481_s28 }
0x295e   : > { %5447 = vrot.lane.b32.xlu1 %v12555_v3, %s11480_s4 }
0x295f   : > { %5657 = vrot.lane.b32.xlu0 %v12551_v2, %s11481_s28 }
0x2962   : > { %5445 = vrot.lane.b32.xlu1 %v12551_v2, %s11480_s4 }
0x2963   : > { %5655 = vrot.lane.b32.xlu0 %v12563_v7, %s11481_s28 }
0x2966   : > { %5443 = vrot.lane.b32.xlu1 %v12563_v7, %s11480_s4 }
0x2967   : > { %5653 = vrot.lane.b32.xlu0 %v12559_v37, %s11481_s28 }
0x296a   : > { %5441 = vrot.lane.b32.xlu1 %v12559_v37, %s11480_s4 }
0x296b   : > { %5651 = vrot.lane.b32.xlu0 %v12571_v46, %s11481_s28 }
0x296e   : > { %5439 = vrot.lane.b32.xlu1 %v12571_v46, %s11480_s4 }
0x296f   : > { %5649 = vrot.lane.b32.xlu0 %v12567_v43, %s11481_s28 }
0x2972   : > { %5437 = vrot.lane.b32.xlu1 %v12567_v43, %s11480_s4 }
0x29c6   : > { %v5592_v50 = vpop.xlane.xlu0 %5591 }
0x29c7   : > { %11031 = vrcp.f32 %v5592_v50 }
0x29ca   : > { %v5595_v0 = vpop.xlane.xlu1 %5594  ;;  %v5602_v62 = vpop.permute.xlu0 %5601 }
0x29cb   : > { %11033 = vrcp.f32 %v5595_v0  ;;  %10109 = vmatpush3.bf16.msra.mxu1 %v5602_v62 }
0x29cc   : > { %10114 = vmatprep.subr.bf16.mxu1 %v11477_v5 }
0x29ce   : > { %v5452_v2 = vpop.permute.xlu1 %5451  ;;  %v5662_v26 = vpop.permute.xlu0 %5661 }
0x29cf   : > { %v5478_v3 = vsel %vm1032_vm1, %v5452_v2, 0  ;;  %v5687_v42 = vsel %vm1032_vm1, %v5662_v26, 0  ;;  %v10728_v26 = vld [vmem:[#allocation16 + $0x2e8] sm:$0xff]  }
0x29d0   : > { %10083 = vmatpush3.bf16.xpose.msra.mxu0 %v5478_v3 }
0x29d1   : > { %10084 = vmatprep.subr.bf16.mxu0 %v11477_v5 }
0x29d2   : > { %v5664_v37 = vpop.permute.xlu1 %5663  ;;  %v5660_v35 = vpop.permute.xlu0 %5659 }
0x29d3   : > { %v5690_v36 = vsel %vm1032_vm1, %v5664_v37, 0  ;;  %v5684_v49 = vsel %vm1032_vm1, %v5660_v35, 0  ;;  %v9017_v37 = vld [vmem:[#allocation11 + $0x2] ss:$0 sm:$0xff]  ;;  %v10732_v35 = vld [vmem:[#allocation16 + $0x2e0] sm:$0xff]  }
0x29d4   : > { %v11032_v7 = vpop.eup %11031 }
0x29d5   : > { %v5598_v45 = vmul.f32 %v11032_v7, %v11028_v55 }
0x29d6   : > { %v5450_v46 = vpop.permute.xlu1 %5449  ;;  %v5658_v24 = vpop.permute.xlu0 %5657 }
0x29d7   : > { %v5475_v30 = vsel %vm1032_vm1, %v5450_v46, 0  ;;  %v5681_v20 = vsel %vm1032_vm1, %v5658_v24, 0  ;;  %v10736_v24 = vld [vmem:[#allocation16 + $0x2d8] sm:$0xff]  }
0x29d8   : > { %v11034_v43 = vpop.eup %11033  ;;  %10085 = vmatpush3.bf16.xpose.msra.mxu0 %v5475_v30 }
0x29d9   : > { %v5599_v31 = vmul.f32 %v11034_v43, %v11030_v14  ;;  %10086 = vmatprep.subr.bf16.mxu0 %v11477_v5 }
0x29da   : > { %v5448_v33 = vpop.permute.xlu1 %5447  ;;  %v5656_v23 = vpop.permute.xlu0 %5655 }
0x29db   : > { %v5600_v38 = vpack.c.bf16 %v5599_v31, %v5598_v45  ;;  %v5472_v40 = vsel %vm1032_vm1, %v5448_v33, 0  ;;  %v5678_v6 = vsel %vm1032_vm1, %v5656_v23, 0  ;;  %v10721_v31 = vld [vmem:[#allocation16 + $0x238] sm:$0xff]  }
0x29dc   : > { %v10722_v33 = vld [vmem:[#allocation16 + $0x2b8] sm:$0xff]  }
0x29dd   : > { %10111 = vmatmul.mubr.msk.bf16.vlgmr.msra.gmra.mxu1 %vm1084_vm3, %v5600_v38  ;;  %v10724_v38 = vld [vmem:[#allocation16 + $0x2f0] sm:$0xff]  }
0x29de   : > { %10115 = vmatpush3.bf16.xpose.msra.mxu1 %v5690_v36  ;;  %10130 = vmatprep.mubr.msk.bf16.mxu1 %vm11478_vm0, %v11477_v5  ;;  %v5446_v41 = vpop.permute.xlu1 %5445  ;;  %v5654_v9 = vpop.permute.xlu0 %5653  ;;  %v10723_v36 = vld [vmem:[#allocation16 + $0x270] sm:$0xff]  }
0x29df   : > { %10116 = vmatprep.subr.bf16.mxu1 %v11477_v5  ;;  %v5469_v34 = vsel %vm1032_vm1, %v5446_v41, 0  ;;  %v5675_v51 = vsel %vm1032_vm1, %v5654_v9, 0  ;;  %v10729_v41 = vld [vmem:[#allocation16 + $0x228] sm:$0xff]  }
0x29e0   : > { %10087 = vmatpush3.bf16.xpose.msra.mxu0 %v5472_v40  ;;  %v10727_v40 = vld [vmem:[#allocation16 + $0x268] sm:$0xff]  }
0x29e1   : > { %10088 = vmatprep.subr.bf16.mxu0 %v11477_v5 }
0x29e2   : > { %v5444_v44 = vpop.permute.xlu1 %5443  ;;  %v5652_v13 = vpop.permute.xlu0 %5651 }
0x29e3   : > { %v5466_v60 = vsel %vm1032_vm1, %v5444_v44, 0  ;;  %v5672_v27 = vsel %vm1032_vm1, %v5652_v13, 0  ;;  %v10733_v44 = vld [vmem:[#allocation16 + $0x220] sm:$0xff]   ;;  %v10740_v13 = vld [vmem:[#allocation16 + $0x2d0] sm:$0xff]  }
0x29e6   : > { %10117 = vmatpush3.bf16.xpose.msra.mxu1 %v5687_v42  ;;  %v5442_v58 = vpop.permute.xlu1 %5441  ;;  %v5650_v52 = vpop.permute.xlu0 %5649  ;;  %v10730_v42 = vld [vmem:[#allocation16 + $0x2a8] sm:$0xff]  }
0x29e7   : > { %10118 = vmatprep.subr.bf16.mxu1 %v11477_v5  ;;  %v5463_v59 = vsel %vm1032_vm1, %v5442_v58, 0  ;;  %v5669_v53 = vsel %vm1032_vm1, %v5650_v52, 0  ;;  %v10742_v52 = vld [vmem:[#allocation16 + $0x290] sm:$0xff]  }
0x29e8   : > { %10089 = vmatpush3.bf16.xpose.msra.mxu0 %v5469_v34  ;;  %v10731_v34 = vld [vmem:[#allocation16 + $0x260] sm:$0xff]  }
0x29e9   : > { %10090 = vmatprep.subr.bf16.mxu0 %v11477_v5 }
0x29ea   : > { %v5440_v32 = vpop.permute.xlu1 %5439 }
0x29eb   : > { %v5460_v61 = vsel %vm1032_vm1, %v5440_v32, 0 }
0x29ee   : > { %10119 = vmatpush3.bf16.xpose.msra.mxu1 %v5684_v49  ;;  %v5438_v11 = vpop.permute.xlu1 %5437  ;;  %v10734_v49 = vld [vmem:[#allocation16 + $0x2a0] sm:$0xff]  }
0x29ef   : > { %10120 = vmatprep.subr.bf16.mxu1 %v11477_v5  ;;  %v5457_v25 = vsel %vm1032_vm1, %v5438_v11, 0  ;;  %v10737_v11 = vld [vmem:[#allocation16 + $0x218] sm:$0xff]  }
0x29f0   : > { %10091 = vmatpush3.bf16.xpose.msra.mxu0 %v5466_v60  ;;  %v10735_v60 = vld [vmem:[#allocation16 + $0x258] sm:$0xff]  }
0x29f1   : > { %10092 = vmatprep.subr.bf16.mxu0 %v11477_v5 }
0x29f6   : > { %10121 = vmatpush3.bf16.xpose.msra.mxu1 %v5681_v20 }
0x29f7   : > { %10122 = vmatprep.subr.bf16.mxu1 %v11477_v5 }
0x29f8   : > { %10093 = vmatpush3.bf16.xpose.msra.mxu0 %v5463_v59 }
0x29f9   : > { %10094 = vmatprep.subr.bf16.mxu0 %v11477_v5 }
0x29fe   : > { %10123 = vmatpush3.bf16.xpose.msra.mxu1 %v5678_v6 }
0x29ff   : > { %10124 = vmatprep.subr.bf16.mxu1 %v11477_v5 }
0x2a00   : > { %10095 = vmatpush3.bf16.xpose.msra.mxu0 %v5460_v61 }
0x2a01   : > { %10096 = vmatprep.subr.bf16.mxu0 %v11477_v5 }
0x2a06   : > { %10125 = vmatpush3.bf16.xpose.msra.mxu1 %v5675_v51  ;;  %v10738_v51 = vld [vmem:[#allocation16 + $0x298] sm:$0xff]  }
0x2a07   : > { %10126 = vmatprep.subr.bf16.mxu1 %v11477_v5 }
0x2a08   : > { %10097 = vmatpush3.bf16.xpose.msra.mxu0 %v5457_v25  ;;  %v10739_v25 = vld [vmem:[#allocation16 + $0x250] sm:$0xff]  }
0x2a0e   : > { %10127 = vmatpush3.bf16.xpose.msra.mxu1 %v5672_v27  ;;  %v10741_v27 = vld [vmem:[#allocation16 + $0x210] sm:$0xff]  }
0x2a0f   : > { %10099 = vmatmul.mubr.msk.bf16.vlgmr.msra.gmra.mxu0 %vm1032_vm1, %v5436_v57  ;;  %10128 = vmatprep.subr.bf16.mxu1 %v11477_v5  ;;  %v5308_v57 = vadd.f32 %v12641_v54, %v12645_v39  ;;  %v10719_v54 = vld [vmem:[#allocation16 + $0x278] sm:$0xff]  }
0x2a10   : > { %v10720_v39 = vld [vmem:[#allocation16 + $0x2f8] sm:$0xff]   ;;  %9530 = vmatprep.subr.bf16.mxu0 %v10719_v54 }
0x2a11   : > { %9531 = vmatpush3.bf16.xpose.msra.mxu0 %v10721_v31 }
0x2a12   : > { %9532 = vmatprep.subr.bf16.mxu0 %v10723_v36  ;;  %v10751_v36 = vld [vmem:[#allocation17 + $0x2e0] ss:$16 sps:$4 sm:$0xff]  }
0x2a16   : > { %10129 = vmatpush3.bf16.xpose.msra.mxu1 %v5669_v53  ;;  %v10743_v53 = vld [vmem:[#allocation16 + $0x248] sm:$0xff]  }
0x2a17   : > { %9548 = vmatprep.subr.bf16.mxu1 %v10720_v39 }
0x2a9d   : > { %v5641_v16 = vpop.f32.mrf.mxu1 }
0x2a9f   : > { %v10112_v22 = vpop.f32.mrf.mxu1 }
0x2aa0   : > { %v10745_v22 = vld [vmem:[#allocation16 + $0x208] sm:$0xff]  }
0x2aa1   : > { %v5644_v18 = vpop.f32.mrf.mxu1 }
0x2aa2   : > { %v5648_v10 = vpack.c.bf16 %v5644_v18, %v5641_v16  ;;  %v10744_v16 = vld [vmem:[#allocation16 + $0x2c8] sm:$0xff]  }
0x2aa3   : > { %v10113_v55 = vpop.f32.mrf.mxu1  ;;  %v10746_v18 = vld [vmem:[#allocation16 + $0x288] sm:$0xff]  }
0x2aa4   : > { %10131 = vmatmul.mubr.msk.bf16.vlgmr.msra.gmra.mxu1 %vm1032_vm1, %v5648_v10  ;;  %v10747_v10 = vld [vmem:[#allocation16 + $0x240] sm:$0xff]  }
0x2aa5   : > { %9549 = vmatpush3.bf16.xpose.msra.mxu1 %v10722_v33  ;;  %v10748_v55 = vld [vmem:[#allocation16 + $0x2c0] sm:$0xff]  }
0x2aa6   : > { %9550 = vmatprep.subr.bf16.mxu1 %v10724_v38  ;;  %v10754_v38 = vld [vmem:[#allocation17 + $0x2e8] ss:$16 sps:$4 sm:$0xff]  }
0x2acf   : > { %v5514_v14 = vpop.f32.mrf.mxu0 }
0x2ad0   : > { %v5521_v8 = vadd.f32 %v5514_v14, %v5305_v28  ;;  %v10749_v28 = vld [vmem:[#allocation16 + $0x200] sm:$0xff]  }
0x2ad1   : > { %v10100_v56 = vpop.f32.mrf.mxu0  ;;  %v10750_v14 = vld [vmem:[#allocation16 + $0x280] sm:$0xff]  }
0x2ad2   : > { %v10756_v56 = vld [vmem:[#allocation17 + $0x2ec] ss:$16 sps:$4 sm:$0xff]  }
0x2ad3   : > { %v5517_v29 = vpop.f32.mrf.mxu0 }
0x2ad4   : > { %v5522_v50 = vadd.f32 %v5517_v29, %v5308_v57 }
0x2ad5   : > { %v10101_v0 = vpop.f32.mrf.mxu0 }
0x2b64   : > { %v5726_v62 = vpop.f32.mrf.mxu1 }
0x2b65   : > { %v5733_v2 = vadd.f32 %v5726_v62, %v5521_v8  ;;  %v10753_v8 = vld [vmem:[#allocation17 + $0x2e4] ss:$16 sps:$4 sm:$0xff]  }
0x2b66   : > { %v10132_v3 = vpop.f32.mrf.mxu1 }
0x2b67   : > { %v5735_v7 = vadd.f32 %v5733_v2, %v12472_v63  ;;  %v10725_v63 = vld [vmem:[#allocation16 + $0x230] sm:$0xff]  }
0x2b68   : > { %v5729_v46 = vpop.f32.mrf.mxu1  ;;  %9533 = vmatpush3.bf16.xpose.msra.mxu0 %v10725_v63  ;;  %v10759_v63 = vld [vmem:[#allocation17 + $0x2c4] ss:$16 sps:$4 sm:$0xff]  }
0x2b69   : > { %v5734_v30 = vadd.f32 %v5729_v46, %v5522_v50  ;;  %v12762_v43 = vadd.f32 %v9017_v37, %v5735_v7  ;;  %9534 = vmatprep.subr.bf16.mxu0 %v10727_v40  ;;  %v9018_v7 = vld [vmem:[#allocation13 + $0x2] ss:$0 sm:$0xff]  ;;  %v10757_v40 = vld [vmem:[#allocation17 + $0x2c0] ss:$16 sps:$4 sm:$0xff]  }
0x2b6a   : > { %v10133_v48 = vpop.f32.mrf.mxu1 }
0x2b6b   : > { %v5736_v47 = vadd.f32 %v5734_v30, %v12476_v1  ;;  %5751 = vadd.xlane.f32.xlu1 %v12762_v43  ;;  %v10726_v1 = vld [vmem:[#allocation16 + $0x2b0] sm:$0xff]  }
0x2b6c   : > { %9551 = vmatpush3.bf16.xpose.msra.mxu1 %v10726_v1  ;;  %v10762_v1 = vld [vmem:[#allocation17 + $0x2cc] ss:$16 sps:$4 sm:$0xff]  }
0x2b6d   : > { %v12766_v45 = vadd.f32 %v9017_v37, %v5736_v47  ;;  %9552 = vmatprep.subr.bf16.mxu1 %v10728_v26  ;;  %v9019_v47 = vld [vmem:[#allocation14 + $0x2] ss:$0 sm:$0xff]  ;;  %v10760_v26 = vld [vmem:[#allocation17 + $0x2c8] ss:$16 sps:$4 sm:$0xff]  }
0x2b6f   : > { %5753 = vadd.xlane.f32.xlu0 %v12766_v45 }
0x2b70   : > { %9535 = vmatpush3.bf16.xpose.msra.mxu0 %v10729_v41  ;;  %v10765_v41 = vld [vmem:[#allocation17 + $0x2a4] ss:$16 sps:$4 sm:$0xff]  }
0x2b71   : > { %9536 = vmatprep.subr.bf16.mxu0 %v10731_v34  ;;  %v10763_v34 = vld [vmem:[#allocation17 + $0x2a0] ss:$16 sps:$4 sm:$0xff]  }
0x2b74   : > { %9553 = vmatpush3.bf16.xpose.msra.mxu1 %v10730_v42  ;;  %v10768_v42 = vld [vmem:[#allocation17 + $0x2ac] ss:$16 sps:$4 sm:$0xff]  }
0x2b75   : > { %9554 = vmatprep.subr.bf16.mxu1 %v10732_v35  ;;  %v10766_v35 = vld [vmem:[#allocation17 + $0x2a8] ss:$16 sps:$4 sm:$0xff]  }
0x2b78   : > { %9537 = vmatpush3.bf16.xpose.msra.mxu0 %v10733_v44  ;;  %v10771_v44 = vld [vmem:[#allocation17 + $0x284] ss:$16 sps:$4 sm:$0xff]  }
0x2b79   : > { %9538 = vmatprep.subr.bf16.mxu0 %v10735_v60  ;;  %v10769_v60 = vld [vmem:[#allocation17 + $0x280] ss:$16 sps:$4 sm:$0xff]  }
0x2b7c   : > { %9555 = vmatpush3.bf16.xpose.msra.mxu1 %v10734_v49  ;;  %v10774_v49 = vld [vmem:[#allocation17 + $0x28c] ss:$16 sps:$4 sm:$0xff]  }
0x2b7d   : > { %9556 = vmatprep.subr.bf16.mxu1 %v10736_v24  ;;  %v10772_v24 = vld [vmem:[#allocation17 + $0x288] ss:$16 sps:$4 sm:$0xff]  }
0x2b80   : > { %9539 = vmatpush3.bf16.xpose.msra.mxu0 %v10737_v11  ;;  %v10789_v11 = vld [vmem:[#allocation17 + $0x224] ss:$16 sps:$4 sm:$0xff]  }
0x2b81   : > { %9540 = vmatprep.subr.bf16.mxu0 %v10739_v25  ;;  %v10787_v25 = vld [vmem:[#allocation17 + $0x220] ss:$16 sps:$4 sm:$0xff]  }
0x2b84   : > { %9557 = vmatpush3.bf16.xpose.msra.mxu1 %v10738_v51  ;;  %v10792_v51 = vld [vmem:[#allocation17 + $0x22c] ss:$16 sps:$4 sm:$0xff]  }
0x2b85   : > { %9558 = vmatprep.subr.bf16.mxu1 %v10740_v13  ;;  %v10790_v13 = vld [vmem:[#allocation17 + $0x228] ss:$16 sps:$4 sm:$0xff]  }
0x2b88   : > { %9541 = vmatpush3.bf16.xpose.msra.mxu0 %v10741_v27  ;;  %v10795_v27 = vld [vmem:[#allocation17 + $0x204] ss:$16 sps:$4 sm:$0xff]  }
0x2b89   : > { %9542 = vmatprep.subr.bf16.mxu0 %v10743_v53  ;;  %v10793_v53 = vld [vmem:[#allocation17 + $0x200] ss:$16 sps:$4 sm:$0xff]  }
0x2b8c   : > { %9559 = vmatpush3.bf16.xpose.msra.mxu1 %v10742_v52  ;;  %v10798_v52 = vld [vmem:[#allocation17 + $0x20c] ss:$16 sps:$4 sm:$0xff]  }
0x2b8d   : > { %9560 = vmatprep.subr.bf16.mxu1 %v10744_v16  ;;  %v10796_v16 = vld [vmem:[#allocation17 + $0x208] ss:$16 sps:$4 sm:$0xff]  }
0x2b90   : > { %9543 = vmatpush3.bf16.xpose.msra.mxu0 %v10745_v22  ;;  %v9020_v22 = vld [vmem:[%s13175_s9 + $0x8] sm:$0xf] }
0x2b91   : > { %9544 = vmatprep.subr.bf16.mxu0 %v10747_v10 }
0x2b94   : > { %9561 = vmatpush3.bf16.xpose.msra.mxu1 %v10746_v18 }
0x2b95   : > { %9562 = vmatprep.subr.bf16.mxu1 %v10748_v55  ;;  %v5865_v55 = vrot.slane %v9020_v22, %v12135_v15 }
0x2b98   : > { %9545 = vmatpush3.bf16.xpose.msra.mxu0 %v10749_v28  ;;  %v5873_v28 = vrot.slane %v9020_v22, %v12138_v17 }
0x2b99   : > { %6369 = vmatprep.subr.bf16.mxu0 %v10753_v8  ;;  %v5869_v8 = vrot.slane %v9020_v22, %v12144_v21 }
0x2b9c   : > { %9563 = vmatpush3.bf16.xpose.msra.mxu1 %v10750_v14  ;;  %v5861_v14 = vrot.slane %v9020_v22, %v12141_v19  ;;  %v10808_v22 = vld [vmem:[#allocation8 + $0x2a0] sm:$0xff]  }
0x2b9d   : > { %6410 = vmatprep.subr.bf16.mxu1 %v10756_v56 }
0x2bf4   : > { %v5752_v58 = vpop.xlane.xlu1 %5751 }
0x2bf5   : > { %v5755_v20 = vmul.f32 0.0078125, %v5752_v58  ;;  %v10777_v58 = vld [vmem:[#allocation17 + $0x264] ss:$16 sps:$4 sm:$0xff]  }
0x2bf7   : > { %v5757_v59 = vsub.f32 %v12762_v43, %v5755_v20  ;;  %v10780_v20 = vld [vmem:[#allocation17 + $0x26c] ss:$16 sps:$4 sm:$0xff]  }
0x2bf8   : > { %v5754_v23 = vpop.xlane.xlu0 %5753 }
0x2bf9   : > { %v5756_v32 = vmul.f32 0.0078125, %v5754_v23  ;;  %v5759_v6 = vmul.f32 %v5757_v59, %v5757_v59  ;;  %v10778_v23 = vld [vmem:[#allocation17 + $0x268] ss:$16 sps:$4 sm:$0xff]  }
0x2bfb   : > { %v5758_v61 = vsub.f32 %v12766_v45, %v5756_v32  ;;  %5761 = vadd.xlane.f32.xlu0 %v5759_v6  ;;  %v10783_v32 = vld [vmem:[#allocation17 + $0x244] ss:$16 sps:$4 sm:$0xff]   ;;  %v10786_v6 = vld [vmem:[#allocation17 + $0x24c] ss:$16 sps:$4 sm:$0xff]  }
0x2bfd   : > { %v5760_v9 = vmul.f32 %v5758_v61, %v5758_v61 }
0x2bff   : > { %5763 = vadd.xlane.f32.xlu0 %v5760_v9  ;;  %v10784_v9 = vld [vmem:[#allocation17 + $0x248] ss:$16 sps:$4 sm:$0xff]  }
0x2c84   : > { %v5762_v57 = vpop.xlane.xlu0 %5761 }
0x2c85   : > { %v5765_v29 = vmul.f32 0.0078125, %v5762_v57 }
0x2c87   : > { %v5767_v50 = vadd.f32 1e-05, %v5765_v29 }
0x2c88   : > { %v5764_v0 = vpop.xlane.xlu0 %5763 }
0x2c89   : > { %11035 = vrsqrt.f32 %v5767_v50  ;;  %v5766_v62 = vmul.f32 0.0078125, %v5764_v0 }
0x2c8b   : > { %v5768_v2 = vadd.f32 1e-05, %v5766_v62 }
0x2c8d   : > { %11037 = vrsqrt.f32 %v5768_v2 }
0x2c96   : > { %v11036_v3 = vpop.eup %11035 }
0x2c97   : > { %v5771_v37 = vmul.f32 %v11036_v3, %v5757_v59  ;;  %v10775_v59 = vld [vmem:[#allocation17 + $0x260] ss:$16 sps:$4 sm:$0xff]  }
0x2c99   : > { %v5779_v48 = vmul.f32 %v9018_v7, %v5771_v37 }
0x2c9a   : > { %v11038_v46 = vpop.eup %11037 }
0x2c9b   : > { %v5772_v30 = vmul.f32 %v11038_v46, %v5758_v61  ;;  %v5787_v39 = vadd.f32 %v9019_v47, %v5779_v48  ;;  %v10781_v61 = vld [vmem:[#allocation17 + $0x240] ss:$16 sps:$4 sm:$0xff]  }
0x2c9d   : > { %v5780_v54 = vmul.f32 %v9018_v7, %v5772_v30 }
0x2c9f   : > { %v5788_v31 = vadd.f32 %v9019_v47, %v5780_v54 }
0x2ca1   : > { %v5789_v33 = vpack.c.bf16 %v5788_v31, %v5787_v39 }
0x2ca3   : > { %9546 = vmatprep.mubr.bf16.mxu0 %v5789_v33  ;;  %9564 = vmatprep.mubr.bf16.mxu1 %v5789_v33 }
0x2ca4   : > { %9547 = vmatmul.mubr.bf16.vlgmr.msra.gmra.mxu0 %v5789_v33  ;;  %9565 = vmatmul.mubr.bf16.vlgmr.msra.gmra.mxu1 %v5789_v33 }
0x2ca5   : > { %6370 = vmatpush1.bf16.xpose.msra.mxu0 %v10751_v36  ;;  %6411 = vmatpush1.bf16.xpose.msra.mxu1 %v10754_v38 }
0x2ca6   : > { %6371 = vmatprep.subr.bf16.mxu0 %v10759_v63  ;;  %6412 = vmatprep.subr.bf16.mxu1 %v10762_v1 }
0x2cad   : > { %6372 = vmatpush1.bf16.xpose.msra.mxu0 %v10757_v40  ;;  %6413 = vmatpush1.bf16.xpose.msra.mxu1 %v10760_v26 }
0x2cae   : > { %6373 = vmatprep.subr.bf16.mxu0 %v10765_v41  ;;  %6414 = vmatprep.subr.bf16.mxu1 %v10768_v42 }
0x2cb5   : > { %6374 = vmatpush1.bf16.xpose.msra.mxu0 %v10763_v34  ;;  %6415 = vmatpush1.bf16.xpose.msra.mxu1 %v10766_v35  ;;  %v9054_v34 = vld [vmem:[%s13177_s11 + $0x2] ss:$0 sm:$0xff] }
0x2cb6   : > { %6375 = vmatprep.subr.bf16.mxu0 %v10771_v44  ;;  %6416 = vmatprep.subr.bf16.mxu1 %v10774_v49 }
0x2cbd   : > { %6376 = vmatpush1.bf16.xpose.msra.mxu0 %v10769_v60  ;;  %6417 = vmatpush1.bf16.xpose.msra.mxu1 %v10772_v24 }
0x2cbe   : > { %6377 = vmatprep.subr.bf16.mxu0 %v10777_v58  ;;  %6418 = vmatprep.subr.bf16.mxu1 %v10780_v20 }
0x2cc5   : > { %6378 = vmatpush1.bf16.xpose.msra.mxu0 %v10775_v59  ;;  %6419 = vmatpush1.bf16.xpose.msra.mxu1 %v10778_v23 }
0x2cc6   : > { %6379 = vmatprep.subr.bf16.mxu0 %v10783_v32  ;;  %6420 = vmatprep.subr.bf16.mxu1 %v10786_v6 }
0x2ccd   : > { %6380 = vmatpush1.bf16.xpose.msra.mxu0 %v10781_v61  ;;  %6421 = vmatpush1.bf16.xpose.msra.mxu1 %v10784_v9 }
0x2cce   : > { %6381 = vmatprep.subr.bf16.mxu0 %v10789_v11  ;;  %6422 = vmatprep.subr.bf16.mxu1 %v10792_v51  ;;  %v10799_v51 = vld [vmem:[#allocation8 + $0x2b8] sm:$0xff]  }
0x2cd5   : > { %6382 = vmatpush1.bf16.xpose.msra.mxu0 %v10787_v25  ;;  %6423 = vmatpush1.bf16.xpose.msra.mxu1 %v10790_v13  ;;  %v10800_v25 = vld [vmem:[#allocation8 + $0x2f8] sm:$0xff]  }
0x2cd6   : > { %6383 = vmatprep.subr.bf16.mxu0 %v10795_v27  ;;  %6424 = vmatprep.subr.bf16.mxu1 %v10798_v52  ;;  %v10801_v13 = vld [vmem:[#allocation8 + $0x278] sm:$0xff]   ;;  %v10802_v27 = vld [vmem:[#allocation8 + $0x2b0] sm:$0xff]  }
0x2cd7   : > { %v10804_v52 = vld [vmem:[#allocation8 + $0x270] sm:$0xff]  }
0x2cdd   : > { %6384 = vmatpush1.bf16.xpose.msra.mxu0 %v10793_v53  ;;  %6425 = vmatpush1.bf16.xpose.msra.mxu1 %v10796_v16  ;;  %v10805_v53 = vld [vmem:[#allocation8 + $0x2a8] sm:$0xff]  }
0x2cde   : > { %10134 = vmatprep.subr.bf16.mxu1 %v11477_v5  ;;  %9566 = vmatprep.subr.bf16.mxu0 %v10799_v51  ;;  %v10807_v16 = vld [vmem:[#allocation8 + $0x268] sm:$0xff]  }
0x2d64   : > { %v6104_v18 = vpop.f32.mrf.mxu0  ;;  %v6147_v10 = vpop.f32.mrf.mxu1 }
0x2d65   : > { %v6105_v37 = vadd.f32 %v6104_v18, %v5861_v14  ;;  %v6148_v7 = vadd.f32 %v6147_v10, %v5869_v8  ;;  %v10809_v18 = vld [vmem:[#allocation8 + $0x2e0] sm:$0xff]  }
0x2d66   : > { %v6106_v56 = vpop.f32.mrf.mxu0  ;;  %v6149_v57 = vpop.f32.mrf.mxu1  ;;  %v10810_v10 = vld [vmem:[#allocation8 + $0x260] sm:$0xff]  }
0x2d67   : > { %v6107_v0 = vadd.f32 %v6106_v56, %v5865_v55  ;;  %v6150_v62 = vadd.f32 %v6149_v57, %v5873_v28  ;;  %v6156_v63 = vmax.f32 %v6105_v37, 0.0  ;;  %v6158_v1 = vmax.f32 %v6148_v7, 0.0  ;;  %v10815_v37 = vld [vmem:[#allocation8 + $0x2d0] sm:$0xff]  }
0x2d68   : > { %v6108_v29 = vpop.f32.mrf.mxu0  ;;  %v6151_v50 = vpop.f32.mrf.mxu1  ;;  %v10816_v7 = vld [vmem:[#allocation8 + $0x250] sm:$0xff]  }
0x2d69   : > { %v6109_v2 = vadd.f32 %v6108_v29, %v5861_v14  ;;  %v6152_v3 = vadd.f32 %v6151_v50, %v5869_v8  ;;  %v6157_v31 = vmax.f32 %v6107_v0, 0.0  ;;  %v6159_v33 = vmax.f32 %v6150_v62, 0.0 }
0x2d6a   : > { %v6110_v46 = vpop.f32.mrf.mxu0  ;;  %v6153_v30 = vpop.f32.mrf.mxu1 }
0x2d6b   : > { %v6111_v48 = vadd.f32 %v6110_v46, %v5865_v55  ;;  %v6154_v47 = vadd.f32 %v6153_v30, %v5873_v28  ;;  %v6160_v54 = vmax.f32 %v6109_v2, 0.0  ;;  %v6162_v39 = vmax.f32 %v6152_v3, 0.0  ;;  %v10811_v55 = vld [vmem:[#allocation8 + $0x298] sm:$0xff]   ;;  %v10814_v3 = vld [vmem:[#allocation8 + $0x290] sm:$0xff]   ;;  %v10817_v46 = vld [vmem:[#allocation8 + $0x288] sm:$0xff]  }
0x2d6c   : > { %v10812_v28 = vld [vmem:[#allocation8 + $0x2d8] sm:$0xff]   ;;  %v10818_v30 = vld [vmem:[#allocation8 + $0x2c8] sm:$0xff]  }
0x2d6d   : > { %v6161_v36 = vmax.f32 %v6111_v48, 0.0  ;;  %v6163_v38 = vmax.f32 %v6154_v47, 0.0  ;;  %v6164_v41 = vpack.c.bf16 %v6160_v54, %v6156_v63  ;;  %v6166_v42 = vpack.c.bf16 %v6162_v39, %v6158_v1  ;;  %v10813_v2 = vld [vmem:[#allocation8 + $0x258] sm:$0xff]   ;;  %v10819_v48 = vld [vmem:[#allocation8 + $0x248] sm:$0xff]   ;;  %v10820_v47 = vld [vmem:[#allocation8 + $0x280] sm:$0xff]  }
0x2d6e   : > { %v10821_v54 = vld [vmem:[#allocation8 + $0x2c0] sm:$0xff]  }
0x2d6f   : > { %v6165_v40 = vpack.c.bf16 %v6161_v36, %v6157_v31  ;;  %v6167_v26 = vpack.c.bf16 %v6163_v38, %v6159_v33  ;;  %v10822_v39 = vld [vmem:[#allocation8 + $0x240] sm:$0xff]  }
0x2d71   : > { %6401 = vmatprep.mubr.bf16.mxu0 %v6165_v40  ;;  %6442 = vmatprep.mubr.bf16.mxu1 %v6167_v26 }
0x2d72   : > { %6402 = vmatmul.mubr.bf16.vlgmr.msra.gmra.mxu0 %v6164_v41  ;;  %6443 = vmatmul.mubr.bf16.vlgmr.msra.gmra.mxu1 %v6166_v42  ;;  %v9087_v41 = vld [vmem:[#allocation5 + $0x3] ss:$0 sm:$0xff] }
0x2d73   : > { %10150 = vmatprep.mubr.msk.bf16.mxu1 %vm11478_vm0, %v11477_v5  ;;  %10135 = vmatpush3.bf16.xpose.msra.mxu1 %v10800_v25 }
0x2d74   : > { %9567 = vmatpush3.bf16.xpose.msra.mxu0 %v10801_v13  ;;  %10136 = vmatprep.subr.bf16.mxu1 %v11477_v5 }
0x2d75   : > { %9568 = vmatprep.subr.bf16.mxu0 %v10802_v27 }
0x2d7c   : > { %9569 = vmatpush3.bf16.xpose.msra.mxu0 %v10804_v52 }
0x2d7d   : > { %9570 = vmatprep.subr.bf16.mxu0 %v10805_v53 }
0x2d84   : > { %9571 = vmatpush3.bf16.xpose.msra.mxu0 %v10807_v16 }
0x2d85   : > { %9572 = vmatprep.subr.bf16.mxu0 %v10808_v22 }
0x2d8c   : > { %9573 = vmatpush3.bf16.xpose.msra.mxu0 %v10810_v10 }
0x2d8d   : > { %9574 = vmatprep.subr.bf16.mxu0 %v10811_v55 }
0x2d94   : > { %9575 = vmatpush3.bf16.xpose.msra.mxu0 %v10813_v2 }
0x2d95   : > { %9576 = vmatprep.subr.bf16.mxu0 %v10814_v3 }
0x2d9c   : > { %9577 = vmatpush3.bf16.xpose.msra.mxu0 %v10816_v7 }
0x2d9d   : > { %9578 = vmatprep.subr.bf16.mxu0 %v10817_v46 }
0x2da4   : > { %9579 = vmatpush3.bf16.xpose.msra.mxu0 %v10819_v48 }
0x2da5   : > { %9580 = vmatprep.subr.bf16.mxu0 %v10820_v47 }
0x2dac   : > { %9581 = vmatpush3.bf16.xpose.msra.mxu0 %v10822_v39 }
0x2dad   : > { %10154 = vmatprep.subr.bf16.mxu0 %v11477_v5 }
0x2e32   : > { %v6403_v35 = vpop.f32.mrf.mxu0  ;;  %v6444_v44 = vpop.f32.mrf.mxu1 }
0x2e33   : > { %v6404_v49 = vadd.f32 %v9054_v34, %v6403_v35 }
0x2e34   : > { %v6405_v60 = vpop.f32.mrf.mxu0  ;;  %v6446_v24 = vpop.f32.mrf.mxu1 }
0x2e35   : > { %v6445_v58 = vadd.f32 %v6444_v44, %v6404_v49  ;;  %v9088_v44 = vld [vmem:[#allocation7 + $0x3] ss:$0 sm:$0xff] }
0x2e36   : > { %v6406_v20 = vpop.f32.mrf.mxu0  ;;  %v6447_v59 = vpop.f32.mrf.mxu1 }
0x2e37   : > { %v12785_v23 = vadd.f32 %v6445_v58, %v12762_v43  ;;  %v6407_v32 = vadd.f32 %v9054_v34, %v6406_v20  ;;  %v10803_v43 = vld [vmem:[#allocation8 + $0x2f0] sm:$0xff]  }
0x2e38   : > { %v6408_v6 = vpop.f32.mrf.mxu0  ;;  %v6449_v61 = vpop.f32.mrf.mxu1  ;;  %10137 = vmatpush3.bf16.xpose.msra.mxu1 %v10803_v43 }
0x2e39   : > { %v6448_v9 = vadd.f32 %v6447_v59, %v6407_v32  ;;  %6457 = vadd.xlane.f32.xlu1 %v12785_v23  ;;  %10138 = vmatprep.subr.bf16.mxu1 %v11477_v5 }
0x2e3b   : > { %v12789_v11 = vadd.f32 %v6448_v9, %v12766_v45  ;;  %v10806_v45 = vld [vmem:[#allocation8 + $0x2e8] sm:$0xff]  }
0x2e3d   : > { %6459 = vadd.xlane.f32.xlu0 %v12789_v11 }
0x2e40   : > { %10139 = vmatpush3.bf16.xpose.msra.mxu1 %v10806_v45 }
0x2e41   : > { %10140 = vmatprep.subr.bf16.mxu1 %v11477_v5 }
0x2e48   : > { %10141 = vmatpush3.bf16.xpose.msra.mxu1 %v10809_v18 }
0x2e49   : > { %10142 = vmatprep.subr.bf16.mxu1 %v11477_v5 }
0x2e50   : > { %10143 = vmatpush3.bf16.xpose.msra.mxu1 %v10812_v28 }
0x2e51   : > { %10144 = vmatprep.subr.bf16.mxu1 %v11477_v5 }
0x2e58   : > { %10145 = vmatpush3.bf16.xpose.msra.mxu1 %v10815_v37 }
0x2e59   : > { %10146 = vmatprep.subr.bf16.mxu1 %v11477_v5 }
0x2e60   : > { %10147 = vmatpush3.bf16.xpose.msra.mxu1 %v10818_v30 }
0x2e61   : > { %10148 = vmatprep.subr.bf16.mxu1 %v11477_v5 }
0x2e68   : > { %10149 = vmatpush3.bf16.xpose.msra.mxu1 %v10821_v54 }
0x2e69   : > { %10172 = vmatprep.subr.bf16.mxu1 %v11477_v5 }
0x2ec2   : > { %v6458_v14 = vpop.xlane.xlu1 %6457 }
0x2ec3   : > { %v6461_v8 = vmul.f32 0.0078125, %v6458_v14 }
0x2ec5   : > { %v6463_v56 = vsub.f32 %v12785_v23, %v6461_v8 }
0x2ec6   : > { %v6460_v57 = vpop.xlane.xlu0 %6459 }
0x2ec7   : > { %v6462_v29 = vmul.f32 0.0078125, %v6460_v57  ;;  %v6465_v50 = vmul.f32 %v6463_v56, %v6463_v56 }
0x2ec9   : > { %v6464_v0 = vsub.f32 %v12789_v11, %v6462_v29  ;;  %6467 = vadd.xlane.f32.xlu1 %v6465_v50 }
0x2ecb   : > { %v6466_v62 = vmul.f32 %v6464_v0, %v6464_v0 }
0x2ecd   : > { %6469 = vadd.xlane.f32.xlu0 %v6466_v62 }
0x2f52   : > { %v6468_v31 = vpop.xlane.xlu1 %6467 }
0x2f53   : > { %v6471_v33 = vmul.f32 0.0078125, %v6468_v31 }
0x2f55   : > { %v6473_v36 = vadd.f32 1e-05, %v6471_v33 }
0x2f56   : > { %v6470_v38 = vpop.xlane.xlu0 %6469 }
0x2f57   : > { %11039 = vrsqrt.f32 %v6473_v36  ;;  %v6472_v63 = vmul.f32 0.0078125, %v6470_v38 }
0x2f59   : > { %v6474_v1 = vadd.f32 1e-05, %v6472_v63 }
0x2f5b   : > { %11041 = vrsqrt.f32 %v6474_v1 }
0x2f64   : > { %v11040_v40 = vpop.eup %11039 }
0x2f65   : > { %v6477_v26 = vmul.f32 %v11040_v40, %v6463_v56 }
0x2f67   : > { %v6485_v35 = vmul.f32 %v9087_v41, %v6477_v26 }
0x2f68   : > { %v11042_v42 = vpop.eup %11041 }
0x2f69   : > { %v6478_v34 = vmul.f32 %v11042_v42, %v6464_v0  ;;  %v6493_v60 = vadd.f32 %v9088_v44, %v6485_v35 }
0x2f6b   : > { %v6486_v49 = vmul.f32 %v9087_v41, %v6478_v34 }
0x2f6d   : > { %v6494_v24 = vadd.f32 %v9088_v44, %v6486_v49 }
0x2f6f   : > { %v6495_v58 = vpack.c.bf16 %v6494_v24, %v6493_v60 }
0x2f71   : > { %9582 = vmatprep.mubr.bf16.mxu0 %v6495_v58  ;;  %10151 = vmatmul.mubr.bf16.vlgmr.msra.gmra.mxu1 %v6495_v58 }
0x2f72   : > { %9583 = vmatmul.mubr.bf16.vlgmr.msra.gmra.mxu0 %v6495_v58  ;;  %10174 = vmatprep.mubr.msk.bf16.mxu1 %vm11478_vm0, %v11477_v5 }
0x2f73   : > { %10156 = vmatprep.mubr.msk.bf16.mxu0 %vm11478_vm0, %v11477_v5 }
0x3031   : > { %v6766_v20 = vpop.f32.mrf.mxu1 }
0x3032   : > { %v6723_v59 = vpop.f32.mrf.mxu0 }
0x3033   : > { %v10152_v32 = vpop.f32.mrf.mxu1 }
0x3034   : > { %v6725_v6 = vpop.f32.mrf.mxu0 }
0x3035   : > { %v6769_v61 = vpop.f32.mrf.mxu1 }
0x3036   : > { %v6727_v9 = vpop.f32.mrf.mxu0  ;;  %v12814_v52 = vpack.c.bf16 %v6769_v61, %v6766_v20 }
0x3037   : > { %v10153_v51 = vpop.f32.mrf.mxu1  ;;  %v12812_v43 = vpack.c.bf16 %v6727_v9, %v6723_v59 }
0x3038   : > { %v6729_v25 = vpop.f32.mrf.mxu0 }
0x3039   : > { %v12807_v13 = vpack.c.bf16 %v6729_v25, %v6725_v6 }
0x303b   : > { %v6797_v27 = vsel %vm1032_vm1, %v12807_v13, 0 }
0x303c   : > { %10155 = vmatpush3.bf16.xpose.msra.mxu0 %v6797_v27 }
0x303d   : > { %10160 = vmatprep.subr.bf16.mxu0 %v11477_v5 }
0x3043   : > { %10157 = vmatmul.mubr.msk.bf16.vlgmr.msra.gmra.mxu0 %vm1032_vm1, %v12812_v43 }
0x3044   : > { %10161 = vmatpush3.bf16.msra.mxu0 %v12814_v52  ;;  %10162 = vmatprep.mubr.msk.bf16.mxu0 %vm11478_vm0, %v11477_v5 }
0x3045   : > { %10166 = vmatprep.subr.bf16.mxu0 %v11477_v5 }
0x3103   : > { %v6833_v53 = vpop.f32.mrf.mxu0 }
0x3104   : > { %v6840_v45 = vmul.f32 0.17677669, %v6833_v53 }
0x3105   : > { %v10158_v16 = vpop.f32.mrf.mxu0 }
0x3106   : > { %v6842_v22 = vsel %vm11859_vm2, %v6840_v45, -1e+30 }
0x3107   : > { %v6836_v18 = vpop.f32.mrf.mxu0  ;;  %v6844_v10 = vsel %vm1084_vm3, %v6842_v22, -inf }
0x3108   : > { %v6841_v55 = vmul.f32 0.17677669, %v6836_v18  ;;  %6845 = vmax.xlane.f32.xlu1 %v6844_v10  ;;  %v12862_v18 = vld [vmem:[#allocation10 + $0xe8] sm:$0xff]   ;;  %v12864_v10 = vld [vmem:[#allocation10 + $0xf8] sm:$0xff]  }
0x3109   : > { %v10159_v28 = vpop.f32.mrf.mxu0 }
0x310a   : > { %v6843_v14 = vsel %vm11867_vm4, %v6841_v55, -1e+30  ;;  %v12868_v55 = vld [vmem:[#allocation10 + $0xe0] sm:$0xff]   ;;  %v12872_v28 = vld [vmem:[#allocation10 + $0xd8] sm:$0xff]  }
0x310b   : > { %v6847_v8 = vsel %vm1084_vm3, %v6843_v14, -inf }
0x310c   : > { %6848 = vmax.xlane.f32.xlu0 %v6847_v8  ;;  %v12880_v8 = vld [vmem:[#allocation10 + $0xc8] sm:$0xff]  }
0x3191   : > { %v6846_v56 = vpop.xlane.xlu1 %6845 }
0x3192   : > { %v6850_v57 = vsub.f32 %v6842_v22, %v6846_v56  ;;  %v12858_v22 = vld [vmem:[#allocation10 + $0xf0] sm:$0xff]   ;;  %v12884_v56 = vld [vmem:[#allocation10 + $0xc0] sm:$0xff]  }
0x3194   : > { %v6852_v29 = vmul.f32 1.442695, %v6850_v57 }
0x3195   : > { %v6849_v50 = vpop.xlane.xlu0 %6848 }
0x3196   : > { %11043 = vpow2.f32 %v6852_v29  ;;  %v6851_v0 = vsub.f32 %v6843_v14, %v6849_v50  ;;  %v12876_v14 = vld [vmem:[#allocation10 + $0xd0] sm:$0xff]  }
0x3198   : > { %v6854_v62 = vmul.f32 1.442695, %v6851_v0 }
0x319a   : > { %11045 = vpow2.f32 %v6854_v62 }
0x31a3   : > { %v11044_v2 = vpop.eup %11043 }
0x31a4   : > { %v6856_v3 = vsel %vm1084_vm3, %v11044_v2, 0.0 }
0x31a5   : > { %6857 = vadd.xlane.f32.xlu1 %v6856_v3 }
0x31a7   : > { %v11046_v37 = vpop.eup %11045 }
0x31a8   : > { %v6859_v7 = vsel %vm1084_vm3, %v11046_v37, 0.0 }
0x31a9   : > { %6860 = vadd.xlane.f32.xlu0 %v6859_v7 }
0x31b6   : > { %6916 = vrot.lane.b32.xlu1 %v12807_v13, %s11479_s3 }
0x31bf   : > { %6913 = vrot.lane.b32.xlu0 %v12812_v43, %s11479_s3 }
0x322e   : > { %v6858_v46 = vpop.xlane.xlu1 %6857 }
0x322f   : > { %11047 = vrcp.f32 %v6858_v46 }
0x3232   : > { %v6861_v30 = vpop.xlane.xlu0 %6860  ;;  %v6917_v31 = vpop.permute.xlu1 %6916 }
0x3233   : > { %11049 = vrcp.f32 %v6861_v30  ;;  %v6922_v36 = vsel %vm1032_vm1, %v6917_v31, 0  ;;  %v7187_v31 = vsel %vm1032_vm1, %v12858_v22, 0 }
0x3236   : > { %v6914_v38 = vpop.permute.xlu0 %6913 }
0x323c   : > { %v11048_v48 = vpop.eup %11047 }
0x323d   : > { %v6864_v54 = vmul.f32 %v11048_v48, %v11044_v2 }
0x3240   : > { %v11050_v47 = vpop.eup %11049 }
0x3241   : > { %v6865_v39 = vmul.f32 %v11050_v47, %v11046_v37  ;;  %v7190_v47 = vsel %vm1032_vm1, %v12864_v10, 0 }
0x3243   : > { %v6866_v33 = vpack.c.bf16 %v6865_v39, %v6864_v54 }
0x3245   : > { %10163 = vmatmul.mubr.msk.bf16.vlgmr.msra.gmra.mxu0 %vm1084_vm3, %v6866_v33 }
0x3246   : > { %10167 = vmatpush3.bf16.xpose.msra.mxu0 %v6922_v36  ;;  %10168 = vmatprep.mubr.msk.bf16.mxu0 %vm11478_vm0, %v11477_v5 }
0x3247   : > { %10178 = vmatprep.subr.bf16.mxu0 %v11477_v5 }
0x324d   : > { %10169 = vmatmul.mubr.msk.bf16.vlgmr.msra.gmra.mxu0 %vm1032_vm1, %v6914_v38  ;;  %v7184_v38 = vsel %vm1032_vm1, %v12862_v18, 0 }
0x324e   : > { %10194 = vmatprep.mubr.msk.bf16.mxu0 %vm11478_vm0, %v11477_v5 }
0x3305   : > { %v12842_v63 = vpop.f32.mrf.mxu0 }
0x3307   : > { %v10164_v1 = vpop.f32.mrf.mxu0 }
0x3309   : > { %v12844_v40 = vpop.f32.mrf.mxu0 }
0x330a   : > { %v6911_v26 = vpack.c.bf16 %v12844_v40, %v12842_v63 }
0x330b   : > { %v10165_v41 = vpop.f32.mrf.mxu0 }
0x330d   : > { %v6958_v42 = vpop.f32.mrf.mxu0 }
0x330e   : > { %v6965_v34 = vmul.f32 0.17677669, %v6958_v42  ;;  %v7181_v42 = vsel %vm1032_vm1, %v12868_v55, 0 }
0x330f   : > { %v10170_v35 = vpop.f32.mrf.mxu0 }
0x3310   : > { %v6967_v44 = vsel %vm11859_vm2, %v6965_v34, -1e+30 }
0x3311   : > { %v6961_v49 = vpop.f32.mrf.mxu0  ;;  %v6969_v60 = vsel %vm1084_vm3, %v6967_v44, -inf }
0x3312   : > { %v6966_v24 = vmul.f32 0.17677669, %v6961_v49  ;;  %6970 = vmax.xlane.f32.xlu1 %v6969_v60 }
0x3313   : > { %v10171_v58 = vpop.f32.mrf.mxu0 }
0x3314   : > { %v6968_v20 = vsel %vm11867_vm4, %v6966_v24, -1e+30  ;;  %v7175_v24 = vsel %vm1032_vm1, %v12876_v14, 0 }
0x3315   : > { %v6972_v59 = vsel %vm1084_vm3, %v6968_v20, -inf }
0x3316   : > { %6973 = vmax.xlane.f32.xlu0 %v6972_v59  ;;  %v7172_v59 = vsel %vm1032_vm1, %v12880_v8, 0 }
0x339b   : > { %v6971_v32 = vpop.xlane.xlu1 %6970 }
0x339c   : > { %v6975_v6 = vsub.f32 %v6967_v44, %v6971_v32  ;;  %v7178_v44 = vsel %vm1032_vm1, %v12872_v28, 0  ;;  %v7169_v32 = vsel %vm1032_vm1, %v12884_v56, 0 }
0x339e   : > { %v6977_v61 = vmul.f32 1.442695, %v6975_v6 }
0x339f   : > { %v6974_v9 = vpop.xlane.xlu0 %6973 }
0x33a0   : > { %11051 = vpow2.f32 %v6977_v61  ;;  %v6976_v51 = vsub.f32 %v6968_v20, %v6974_v9 }
0x33a2   : > { %v6979_v25 = vmul.f32 1.442695, %v6976_v51 }
0x33a4   : > { %11053 = vpow2.f32 %v6979_v25 }
0x33ad   : > { %v11052_v27 = vpop.eup %11051 }
0x33ae   : > { %v6981_v53 = vsel %vm1084_vm3, %v11052_v27, 0.0 }
0x33af   : > { %6982 = vadd.xlane.f32.xlu1 %v6981_v53 }
0x33b1   : > { %v11054_v45 = vpop.eup %11053 }
0x33b2   : > { %v6984_v16 = vsel %vm1084_vm3, %v11054_v45, 0.0 }
0x33b3   : > { %6985 = vadd.xlane.f32.xlu0 %v6984_v16 }
0x33c0   : > { %6993 = vrot.lane.b32.xlu1 %v12814_v52, %s11479_s3 }
0x33c4   : > { %7093 = vrot.lane.b32.xlu1 %v12858_v22, %s11479_s3 }
0x33c8   : > { %7091 = vrot.lane.b32.xlu1 %v12862_v18, %s11479_s3 }
0x33c9   : > { %7095 = vrot.lane.b32.xlu0 %v12864_v10, %s11479_s3 }
0x33cc   : > { %7089 = vrot.lane.b32.xlu1 %v12868_v55, %s11479_s3 }
0x33cd   : > { %7087 = vrot.lane.b32.xlu0 %v12872_v28, %s11479_s3 }
0x33d0   : > { %7085 = vrot.lane.b32.xlu1 %v12876_v14, %s11479_s3 }
0x33d1   : > { %7083 = vrot.lane.b32.xlu0 %v12880_v8, %s11479_s3 }
0x33d4   : > { %7081 = vrot.lane.b32.xlu1 %v12884_v56, %s11479_s3  ;;  %s8544_s3 = sshll.u32 %s684_s26, 4  ;;  %s13118_s3 = int_to_ptr.vmem [resolvable:$true] %s8544_s3 }
0x33d5   : > { %7235 = vrot.lane.b32.xlu0 %v12807_v13, %s11480_s4  ;;  %s11373_s18 = scalar_lea.vmem %s13118_s3, 256 }
0x33d6   : > { %p11374_p7 = scmp.ne.s32.totalorder %s13118_s3, %s11373_s18 }
0x33d8   : > { %7233 = vrot.lane.b32.xlu1 %v12812_v43, %s11480_s4  ;;  %p11375_p1 = pnand %p11374_p7, %p13245_p0 }
0x33da   : > { %p11376_p3 = pneg %p11375_p1 }
0x3438   : > { %v6983_v57 = vpop.xlane.xlu1 %6982 }
0x3439   : > { %11055 = vrcp.f32 %v6983_v57 }
0x343c   : > { %v6994_v29 = vpop.permute.xlu1 %6993  ;;  %v6986_v50 = vpop.xlane.xlu0 %6985 }
0x343d   : > { %11057 = vrcp.f32 %v6986_v50  ;;  %10173 = vmatpush3.bf16.msra.mxu1 %v6994_v29 }
0x343e   : > { %10198 = vmatprep.subr.bf16.mxu1 %v11477_v5 }
0x3440   : > { %v7096_v0 = vpop.permute.xlu0 %7095  ;;  %v7094_v2 = vpop.permute.xlu1 %7093 }
0x3441   : > { %v7122_v62 = vsel %vm1032_vm1, %v7096_v0, 0  ;;  %v7119_v3 = vsel %vm1032_vm1, %v7094_v2, 0 }
0x3442   : > { %10179 = vmatpush3.bf16.xpose.msra.mxu0 %v7122_v62 }
0x3443   : > { %10180 = vmatprep.subr.bf16.mxu0 %v11477_v5 }
0x3444   : > { %v7092_v54 = vpop.permute.xlu1 %7091  ;;  %v7088_v1 = vpop.permute.xlu0 %7087 }
0x3445   : > { %v7116_v39 = vsel %vm1032_vm1, %v7092_v54, 0  ;;  %v7110_v41 = vsel %vm1032_vm1, %v7088_v1, 0 }
0x3446   : > { %v11056_v37 = vpop.eup %11055 }
0x3447   : > { %v6989_v46 = vmul.f32 %v11056_v37, %v11052_v27 }
0x3448   : > { %v7090_v33 = vpop.permute.xlu1 %7089  ;;  %v7084_v49 = vpop.permute.xlu0 %7083 }
0x3449   : > { %v7113_v36 = vsel %vm1032_vm1, %v7090_v33, 0  ;;  %v7104_v60 = vsel %vm1032_vm1, %v7084_v49, 0 }
0x344a   : > { %v11058_v7 = vpop.eup %11057  ;;  %10181 = vmatpush3.bf16.xpose.msra.mxu0 %v7119_v3 }
0x344b   : > { %v6990_v30 = vmul.f32 %v11058_v7, %v11054_v45  ;;  %10182 = vmatprep.subr.bf16.mxu0 %v11477_v5 }
0x344c   : > { %v7086_v34 = vpop.permute.xlu1 %7085  ;;  %v7236_v9 = vpop.permute.xlu0 %7235 }
0x344d   : > { %v6991_v48 = vpack.c.bf16 %v6990_v30, %v6989_v46  ;;  %v7107_v35 = vsel %vm1032_vm1, %v7086_v34, 0  ;;  %v7241_v53 = vsel %vm1032_vm1, %v7236_v9, 0 }
0x344f   : > { %10175 = vmatmul.mubr.msk.bf16.vlgmr.msra.gmra.mxu1 %vm1084_vm3, %v6991_v48 }
0x3450   : > { %10199 = vmatpush3.bf16.xpose.msra.mxu1 %v7190_v47  ;;  %10214 = vmatprep.mubr.msk.bf16.mxu1 %vm11478_vm0, %v11477_v5  ;;  %v7082_v58 = vpop.permute.xlu1 %7081 }
0x3451   : > { %10200 = vmatprep.subr.bf16.mxu1 %v11477_v5  ;;  %v7101_v20 = vsel %vm1032_vm1, %v7082_v58, 0 }
0x3452   : > { %10183 = vmatpush3.bf16.xpose.msra.mxu0 %v7116_v39 }
0x3453   : > { %10184 = vmatprep.subr.bf16.mxu0 %v11477_v5 }
0x3454   : > { %v7234_v63 = vpop.permute.xlu1 %7233 }
0x3458   : > { %10201 = vmatpush3.bf16.xpose.msra.mxu1 %v7187_v31 }
0x3459   : > { %10202 = vmatprep.subr.bf16.mxu1 %v11477_v5 }
0x345a   : > { %10185 = vmatpush3.bf16.xpose.msra.mxu0 %v7113_v36 }
0x345b   : > { %10186 = vmatprep.subr.bf16.mxu0 %v11477_v5 }
0x3460   : > { %10203 = vmatpush3.bf16.xpose.msra.mxu1 %v7184_v38 }
0x3461   : > { %10204 = vmatprep.subr.bf16.mxu1 %v11477_v5 }
0x3462   : > { %10187 = vmatpush3.bf16.xpose.msra.mxu0 %v7110_v41 }
0x3463   : > { %10188 = vmatprep.subr.bf16.mxu0 %v11477_v5 }
0x3468   : > { %10205 = vmatpush3.bf16.xpose.msra.mxu1 %v7181_v42 }
0x3469   : > { %10206 = vmatprep.subr.bf16.mxu1 %v11477_v5 }
0x346a   : > { %10189 = vmatpush3.bf16.xpose.msra.mxu0 %v7107_v35 }
0x346b   : > { %10190 = vmatprep.subr.bf16.mxu0 %v11477_v5 }
0x3470   : > { %10207 = vmatpush3.bf16.xpose.msra.mxu1 %v7178_v44 }
0x3471   : > { %10208 = vmatprep.subr.bf16.mxu1 %v11477_v5 }
0x3472   : > { %10191 = vmatpush3.bf16.xpose.msra.mxu0 %v7104_v60 }
0x3473   : > { %10192 = vmatprep.subr.bf16.mxu0 %v11477_v5 }
0x3478   : > { %10209 = vmatpush3.bf16.xpose.msra.mxu1 %v7175_v24 }
0x3479   : > { %10210 = vmatprep.subr.bf16.mxu1 %v11477_v5 }
0x347a   : > { %10193 = vmatpush3.bf16.xpose.msra.mxu0 %v7101_v20 }
0x347b   : > { %10218 = vmatprep.subr.bf16.mxu0 %v11477_v5 }
0x3480   : > { %10211 = vmatpush3.bf16.xpose.msra.mxu1 %v7172_v59 }
0x3481   : > { %10212 = vmatprep.subr.bf16.mxu1 %v11477_v5 }
0x3488   : > { %10213 = vmatpush3.bf16.xpose.msra.mxu1 %v7169_v32 }
0x3489   : > { %10224 = vmatprep.subr.bf16.mxu1 %v11477_v5 }
0x348f   : > { %10215 = vmatmul.mubr.msk.bf16.vlgmr.msra.gmra.mxu1 %vm1032_vm1, %v6911_v26 }
0x3490   : > { %10226 = vmatprep.mubr.msk.bf16.mxu1 %vm11478_vm0, %v11477_v5 }
0x350f   : > { %v7033_v6 = vpop.f32.mrf.mxu1 }
0x3511   : > { %v10176_v61 = vpop.f32.mrf.mxu1 }
0x3513   : > { %v7036_v51 = vpop.f32.mrf.mxu1 }
0x3514   : > { %v7040_v25 = vpack.c.bf16 %v7036_v51, %v7033_v6 }
0x3515   : > { %v10177_v27 = vpop.f32.mrf.mxu1 }
0x3516   : > { %10195 = vmatmul.mubr.msk.bf16.vlgmr.msra.gmra.mxu0 %vm1032_vm1, %v7040_v25 }
0x3517   : > { %10219 = vmatpush3.bf16.xpose.msra.mxu0 %v7241_v53  ;;  %10220 = vmatprep.mubr.msk.bf16.mxu0 %vm11478_vm0, %v11477_v5 }
0x3518   : > { %10230 = vmatprep.subr.bf16.mxu0 %v11477_v5 }
0x351e   : > { %10221 = vmatmul.mubr.msk.bf16.vlgmr.msra.gmra.mxu0 %vm1032_vm1, %v7234_v63 }
0x351f   : > { %10246 = vmatprep.mubr.msk.bf16.mxu0 %vm11478_vm0, %v11477_v5 }
0x354f   : > { %v12952_v40 = vpop.f32.mrf.mxu1 }
0x3551   : > { %v10216_v26 = vpop.f32.mrf.mxu1 }
0x3553   : > { %v12954_v45 = vpop.f32.mrf.mxu1 }
0x3555   : > { %v10217_v16 = vpop.f32.mrf.mxu1 }
0x35d6   : > { %v12956_v57 = vpop.f32.mrf.mxu0 }
0x35d8   : > { %v10196_v29 = vpop.f32.mrf.mxu0 }
0x35da   : > { %v12958_v50 = vpop.f32.mrf.mxu0 }
0x35dc   : > { %v10197_v0 = vpop.f32.mrf.mxu0 }
0x35de   : > { %v7277_v62 = vpop.f32.mrf.mxu0 }
0x35df   : > { %v7284_v2 = vmul.f32 0.17677669, %v7277_v62 }
0x35e0   : > { %v10222_v3 = vpop.f32.mrf.mxu0 }
0x35e1   : > { %v7286_v37 = vsel %vm11859_vm2, %v7284_v2, -1e+30 }
0x35e2   : > { %v7280_v7 = vpop.f32.mrf.mxu0  ;;  %v7288_v46 = vsel %vm1084_vm3, %v7286_v37, -inf }
0x35e3   : > { %v7285_v30 = vmul.f32 0.17677669, %v7280_v7  ;;  %7289 = vmax.xlane.f32.xlu0 %v7288_v46 }
0x35e4   : > { %v10223_v48 = vpop.f32.mrf.mxu0 }
0x35e5   : > { %v7287_v47 = vsel %vm11867_vm4, %v7285_v30, -1e+30 }
0x35e6   : > { %v7291_v54 = vsel %vm1084_vm3, %v7287_v47, -inf }
0x35e7   : > { %7292 = vmax.xlane.f32.xlu1 %v7291_v54 }
0x35f8   : > { %7447 = vrot.lane.b32.xlu1 %v12807_v13, %s11481_s28 }
0x35fc   : > { %7445 = vrot.lane.b32.xlu1 %v12812_v43, %s11481_s28 }
0x366c   : > { %v7290_v39 = vpop.xlane.xlu0 %7289 }
0x366d   : > { %v7294_v31 = vsub.f32 %v7286_v37, %v7290_v39 }
0x366f   : > { %v7296_v33 = vmul.f32 1.442695, %v7294_v31 }
0x3670   : > { %v7293_v36 = vpop.xlane.xlu1 %7292 }
0x3671   : > { %11059 = vpow2.f32 %v7296_v33  ;;  %v7295_v38 = vsub.f32 %v7287_v47, %v7293_v36 }
0x3673   : > { %v7298_v1 = vmul.f32 1.442695, %v7295_v38 }
0x3674   : > { %v7448_v20 = vpop.permute.xlu1 %7447 }
0x3675   : > { %11061 = vpow2.f32 %v7298_v1  ;;  %v7453_v32 = vsel %vm1032_vm1, %v7448_v20, 0 }
0x3678   : > { %v7446_v6 = vpop.permute.xlu1 %7445 }
0x367e   : > { %v11060_v41 = vpop.eup %11059 }
0x367f   : > { %v7300_v42 = vsel %vm1084_vm3, %v11060_v41, 0.0 }
0x3680   : > { %7301 = vadd.xlane.f32.xlu0 %v7300_v42 }
0x3682   : > { %v11062_v34 = vpop.eup %11061 }
0x3683   : > { %v7303_v35 = vsel %vm1084_vm3, %v11062_v34, 0.0 }
0x3684   : > { %7304 = vadd.xlane.f32.xlu0 %v7303_v35 }
0x369a   : > { %7311 = vrot.lane.b32.xlu0 %v12814_v52, %s11480_s4 }
0x3709   : > { %v7302_v13 = vpop.xlane.xlu0 %7301 }
0x370a   : > { %11063 = vrcp.f32 %v7302_v13 }
0x370d   : > { %v7305_v43 = vpop.xlane.xlu0 %7304 }
0x370e   : > { %11065 = vrcp.f32 %v7305_v43 }
0x3711   : > { %v7312_v44 = vpop.permute.xlu0 %7311 }
0x3712   : > { %10225 = vmatpush3.bf16.msra.mxu1 %v7312_v44 }
0x3713   : > { %10250 = vmatprep.subr.bf16.mxu1 %v11477_v5 }
0x3717   : > { %v11064_v49 = vpop.eup %11063 }
0x3718   : > { %v7308_v24 = vmul.f32 %v11064_v49, %v11060_v41 }
0x371b   : > { %v11066_v60 = vpop.eup %11065 }
0x371c   : > { %v7309_v58 = vmul.f32 %v11066_v60, %v11062_v34 }
0x371e   : > { %v7310_v59 = vpack.c.bf16 %v7309_v58, %v7308_v24 }
0x3720   : > { %10227 = vmatmul.mubr.msk.bf16.vlgmr.msra.gmra.mxu1 %vm1084_vm3, %v7310_v59 }
0x3721   : > { %10251 = vmatpush3.bf16.xpose.msra.mxu1 %v7453_v32  ;;  %10252 = vmatprep.mubr.msk.bf16.mxu1 %vm11478_vm0, %v11477_v5 }
0x3722   : > { %10256 = vmatprep.subr.bf16.mxu1 %v11477_v5 }
0x3728   : > { %10253 = vmatmul.mubr.msk.bf16.vlgmr.msra.gmra.mxu1 %vm1032_vm1, %v7446_v6 }
0x3729   : > { %10258 = vmatprep.mubr.msk.bf16.mxu1 %vm11478_vm0, %v11477_v5 }
0x37e0   : > { %v12983_v61 = vpop.f32.mrf.mxu1 }
0x37e2   : > { %v10228_v9 = vpop.f32.mrf.mxu1 }
0x37e4   : > { %v12985_v51 = vpop.f32.mrf.mxu1 }
0x37e5   : > { %v7358_v25 = vpack.c.bf16 %v12985_v51, %v12983_v61 }
0x37e6   : > { %v10229_v27 = vpop.f32.mrf.mxu1 }
0x37e8   : > { %v7489_v53 = vpop.f32.mrf.mxu1 }
0x37e9   : > { %v7496_v63 = vmul.f32 0.17677669, %v7489_v53 }
0x37ea   : > { %v10254_v26 = vpop.f32.mrf.mxu1 }
0x37eb   : > { %v7498_v16 = vsel %vm11859_vm2, %v7496_v63, -1e+30 }
0x37ec   : > { %v7492_v29 = vpop.f32.mrf.mxu1  ;;  %v7500_v0 = vsel %vm1084_vm3, %v7498_v16, -inf }
0x37ed   : > { %v7497_v62 = vmul.f32 0.17677669, %v7492_v29  ;;  %7501 = vmax.xlane.f32.xlu1 %v7500_v0 }
0x37ee   : > { %v10255_v2 = vpop.f32.mrf.mxu1 }
0x37ef   : > { %v7499_v3 = vsel %vm11867_vm4, %v7497_v62, -1e+30 }
0x37f0   : > { %v7503_v37 = vsel %vm1084_vm3, %v7499_v3, -inf }
0x37f1   : > { %7504 = vmax.xlane.f32.xlu0 %v7503_v37 }
0x37fe   : > { %7523 = vrot.lane.b32.xlu1 %v12814_v52, %s11481_s28 }
0x3802   : > { %7585 = vrot.lane.b32.xlu1 %v12864_v10, %s11481_s28 }
0x3806   : > { %7371 = vrot.lane.b32.xlu1 %v12858_v22, %s11480_s4 }
0x380a   : > { %7583 = vrot.lane.b32.xlu1 %v12858_v22, %s11481_s28 }
0x380e   : > { %7581 = vrot.lane.b32.xlu1 %v12862_v18, %s11481_s28 }
0x3812   : > { %7579 = vrot.lane.b32.xlu1 %v12868_v55, %s11481_s28 }
0x3816   : > { %7577 = vrot.lane.b32.xlu1 %v12872_v28, %s11481_s28 }
0x381a   : > { %7575 = vrot.lane.b32.xlu1 %v12876_v14, %s11481_s28 }
0x381e   : > { %7573 = vrot.lane.b32.xlu1 %v12880_v8, %s11481_s28 }
0x3822   : > { %7571 = vrot.lane.b32.xlu1 %v12884_v56, %s11481_s28 }
0x3876   : > { %v7502_v4 = vpop.xlane.xlu1 %7501 }
0x3877   : > { %v7506_v12 = vsub.f32 %v7498_v16, %v7502_v4 }
0x3879   : > { %v7508_v52 = vmul.f32 1.442695, %v7506_v12 }
0x387a   : > { %v7524_v22 = vpop.permute.xlu1 %7523  ;;  %v7505_v7 = vpop.xlane.xlu0 %7504 }
0x387b   : > { %11067 = vpow2.f32 %v7508_v52  ;;  %v7507_v46 = vsub.f32 %v7499_v3, %v7505_v7  ;;  %10257 = vmatpush3.bf16.msra.mxu1 %v7524_v22 }
0x387c   : > { %10262 = vmatprep.subr.bf16.mxu1 %v11477_v5 }
0x387d   : > { %v7510_v30 = vmul.f32 1.442695, %v7507_v46  ;;  %v7227_v46 = vadd.f32 %v12952_v40, %v12956_v57 }
0x387f   : > { %11069 = vpow2.f32 %v7510_v30 }
0x3888   : > { %v11068_v48 = vpop.eup %11067 }
0x3889   : > { %v7512_v47 = vsel %vm1084_vm3, %v11068_v48, 0.0 }
0x388a   : > { %7513 = vadd.xlane.f32.xlu0 %v7512_v47 }
0x388c   : > { %v11070_v54 = vpop.eup %11069 }
0x388d   : > { %v7515_v39 = vsel %vm1084_vm3, %v11070_v54, 0.0 }
0x388e   : > { %7516 = vadd.xlane.f32.xlu0 %v7515_v39 }
0x38a4   : > { %7373 = vrot.lane.b32.xlu0 %v12864_v10, %s11480_s4 }
0x38a8   : > { %7369 = vrot.lane.b32.xlu0 %v12862_v18, %s11480_s4  ;;  %v7586_v18 = vpop.permute.xlu1 %7585 }
0x38a9   : > { %v7612_v42 = vsel %vm1032_vm1, %v7586_v18, 0  ;;  %v9133_v18 = vld [vmem:[#allocation11 + $0x3] ss:$0 sm:$0xff] }
0x38ac   : > { %7367 = vrot.lane.b32.xlu0 %v12868_v55, %s11480_s4 }
0x38b0   : > { %7365 = vrot.lane.b32.xlu0 %v12872_v28, %s11480_s4  ;;  %v7372_v28 = vpop.permute.xlu1 %7371 }
0x38b4   : > { %7363 = vrot.lane.b32.xlu0 %v12876_v14, %s11480_s4  ;;  %v7397_v14 = vsel %vm1032_vm1, %v7372_v28, 0  ;;  %v7584_v35 = vpop.permute.xlu1 %7583 }
0x38b5   : > { %v7609_v43 = vsel %vm1032_vm1, %v7584_v35, 0  ;;  %v10842_v35 = vld [vmem:[#allocation16 + $0x3a8] sm:$0xff]  }
0x38b8   : > { %7361 = vrot.lane.b32.xlu0 %v12880_v8, %s11480_s4  ;;  %v7582_v49 = vpop.permute.xlu1 %7581 }
0x38b9   : > { %v7606_v24 = vsel %vm1032_vm1, %v7582_v49, 0  ;;  %v10846_v49 = vld [vmem:[#allocation16 + $0x3a0] sm:$0xff]  }
0x38bc   : > { %7359 = vrot.lane.b32.xlu0 %v12884_v56, %s11480_s4  ;;  %v7580_v20 = vpop.permute.xlu1 %7579  ;;  %s9220_s4 = sshll.u32 %s11591_s27, 8  ;;  %s11482_s27 = smov [#allocation20]  }
0x38bd   : > { %v7603_v32 = vsel %vm1032_vm1, %v7580_v20, 0  ;;  %s13123_s30 = scalar_lea.hbm %s13244_s25, %s9220_s4  ;;  %s11377_s5 = sshll.u32 %s11482_s27, 4  ;;  %s11378_s5 = int_to_ptr.vmem [resolvable:$false] %s11377_s5 }
0x38be   : > { %p11380_p5 = scmp.lt.s32.totalorder %s13118_s3, %s11378_s5 }
0x38c0   : > { %v7578_v9 = vpop.permute.xlu1 %7577 }
0x38c1   : > { %v7600_v53 = vsel %vm1032_vm1, %v7578_v9, 0 }
0x38c4   : > { %v7576_v26 = vpop.permute.xlu1 %7575 }
0x38c5   : > { %v7597_v29 = vsel %vm1032_vm1, %v7576_v26, 0  ;;  %v10850_v26 = vld [vmem:[#allocation16 + $0x398] sm:$0xff]  }
0x38c8   : > { %v7574_v62 = vpop.permute.xlu1 %7573 }
0x38c9   : > { %v7594_v2 = vsel %vm1032_vm1, %v7574_v62, 0  ;;  %v10854_v62 = vld [vmem:[#allocation16 + $0x390] sm:$0xff]  }
0x38cc   : > { %v7572_v3 = vpop.permute.xlu1 %7571 }
0x38cd   : > { %v7591_v37 = vsel %vm1032_vm1, %v7572_v3, 0  ;;  %v10856_v3 = vld [vmem:[#allocation16 + $0x3c8] sm:$0xff]  }
0x3913   : > { %v7514_v31 = vpop.xlane.xlu0 %7513 }
0x3914   : > { %11071 = vrcp.f32 %v7514_v31 }
0x3917   : > { %v7517_v10 = vpop.xlane.xlu0 %7516 }
0x3918   : > { %11073 = vrcp.f32 %v7517_v10 }
0x391b   : > { %v7374_v33 = vpop.permute.xlu0 %7373 }
0x391c   : > { %v7400_v55 = vsel %vm1032_vm1, %v7374_v33, 0 }
0x391d   : > { %10231 = vmatpush3.bf16.xpose.msra.mxu0 %v7400_v55 }
0x391e   : > { %10232 = vmatprep.subr.bf16.mxu0 %v11477_v5 }
0x391f   : > { %v7370_v56 = vpop.permute.xlu0 %7369 }
0x3920   : > { %v7394_v34 = vsel %vm1032_vm1, %v7370_v56, 0  ;;  %v10836_v56 = vld [vmem:[#allocation16 + $0x3f0] sm:$0xff]  }
0x3921   : > { %v11072_v36 = vpop.eup %11071 }
0x3922   : > { %v7520_v8 = vmul.f32 %v11072_v36, %v11068_v48 }
0x3923   : > { %v7368_v13 = vpop.permute.xlu0 %7367 }
0x3924   : > { %v7391_v44 = vsel %vm1032_vm1, %v7368_v13, 0  ;;  %v10843_v13 = vld [vmem:[#allocation16 + $0x360] sm:$0xff]  }
0x3925   : > { %v11074_v38 = vpop.eup %11073  ;;  %10233 = vmatpush3.bf16.xpose.msra.mxu0 %v7397_v14 }
0x3926   : > { %v7521_v1 = vmul.f32 %v11074_v38, %v11070_v54  ;;  %10234 = vmatprep.subr.bf16.mxu0 %v11477_v5  ;;  %v10833_v38 = vld [vmem:[#allocation16 + $0x338] sm:$0xff]  }
0x3927   : > { %v7366_v60 = vpop.permute.xlu0 %7365 }
0x3928   : > { %v7522_v41 = vpack.c.bf16 %v7521_v1, %v7520_v8  ;;  %v7388_v58 = vsel %vm1032_vm1, %v7366_v60, 0  ;;  %v10834_v8 = vld [vmem:[#allocation16 + $0x3b8] sm:$0xff]   ;;  %v10835_v1 = vld [vmem:[#allocation16 + $0x370] sm:$0xff]  }
0x3929   : > { %v10847_v60 = vld [vmem:[#allocation16 + $0x358] sm:$0xff]  }
0x392a   : > { %10259 = vmatmul.mubr.msk.bf16.vlgmr.msra.gmra.mxu1 %vm1084_vm3, %v7522_v41  ;;  %v10839_v41 = vld [vmem:[#allocation16 + $0x368] sm:$0xff]  }
0x392b   : > { %10263 = vmatpush3.bf16.xpose.msra.mxu1 %v7612_v42  ;;  %10278 = vmatprep.mubr.msk.bf16.mxu1 %vm11478_vm0, %v11477_v5  ;;  %v7364_v59 = vpop.permute.xlu0 %7363  ;;  %v10840_v42 = vld [vmem:[#allocation16 + $0x3e8] sm:$0xff]  }
0x392c   : > { %10264 = vmatprep.subr.bf16.mxu1 %v11477_v5  ;;  %v7385_v6 = vsel %vm1032_vm1, %v7364_v59, 0 }
0x392d   : > { %10235 = vmatpush3.bf16.xpose.msra.mxu0 %v7394_v34  ;;  %v10841_v34 = vld [vmem:[#allocation16 + $0x328] sm:$0xff]  }
0x392e   : > { %10236 = vmatprep.subr.bf16.mxu0 %v11477_v5 }
0x392f   : > { %v7362_v27 = vpop.permute.xlu0 %7361 }
0x3930   : > { %v7382_v63 = vsel %vm1032_vm1, %v7362_v27, 0 }
0x3933   : > { %10265 = vmatpush3.bf16.xpose.msra.mxu1 %v7609_v43  ;;  %v7360_v16 = vpop.permute.xlu0 %7359  ;;  %v10844_v43 = vld [vmem:[#allocation16 + $0x3e0] sm:$0xff]  }
0x3934   : > { %10266 = vmatprep.subr.bf16.mxu1 %v11477_v5  ;;  %v7379_v0 = vsel %vm1032_vm1, %v7360_v16, 0  ;;  %v10851_v16 = vld [vmem:[#allocation16 + $0x350] sm:$0xff]  }
0x3935   : > { %10237 = vmatpush3.bf16.xpose.msra.mxu0 %v7391_v44  ;;  %v10845_v44 = vld [vmem:[#allocation16 + $0x320] sm:$0xff]  }
0x3936   : > { %10238 = vmatprep.subr.bf16.mxu0 %v11477_v5 }
0x393b   : > { %10267 = vmatpush3.bf16.xpose.msra.mxu1 %v7606_v24  ;;  %v10848_v24 = vld [vmem:[#allocation16 + $0x3d8] sm:$0xff]  }
0x393c   : > { %10268 = vmatprep.subr.bf16.mxu1 %v11477_v5 }
0x393d   : > { %10239 = vmatpush3.bf16.xpose.msra.mxu0 %v7388_v58 }
0x393e   : > { %10240 = vmatprep.subr.bf16.mxu0 %v11477_v5 }
0x3943   : > { %10269 = vmatpush3.bf16.xpose.msra.mxu1 %v7603_v32 }
0x3944   : > { %10270 = vmatprep.subr.bf16.mxu1 %v11477_v5 }
0x3945   : > { %10241 = vmatpush3.bf16.xpose.msra.mxu0 %v7385_v6 }
0x3946   : > { %10242 = vmatprep.subr.bf16.mxu0 %v11477_v5 }
0x394b   : > { %10271 = vmatpush3.bf16.xpose.msra.mxu1 %v7600_v53 }
0x394c   : > { %10272 = vmatprep.subr.bf16.mxu1 %v11477_v5 }
0x394d   : > { %10243 = vmatpush3.bf16.xpose.msra.mxu0 %v7382_v63  ;;  %v10849_v63 = vld [vmem:[#allocation16 + $0x318] sm:$0xff]  }
0x394e   : > { %10244 = vmatprep.subr.bf16.mxu0 %v11477_v5 }
0x3953   : > { %10273 = vmatpush3.bf16.xpose.msra.mxu1 %v7597_v29  ;;  %v10852_v29 = vld [vmem:[#allocation16 + $0x3d0] sm:$0xff]  }
0x3954   : > { %10274 = vmatprep.subr.bf16.mxu1 %v11477_v5 }
0x3955   : > { %10245 = vmatpush3.bf16.xpose.msra.mxu0 %v7379_v0  ;;  %v10853_v0 = vld [vmem:[#allocation16 + $0x310] sm:$0xff]  }
0x395b   : > { %10275 = vmatpush3.bf16.xpose.msra.mxu1 %v7594_v2  ;;  %v10855_v2 = vld [vmem:[#allocation16 + $0x348] sm:$0xff]  }
0x395c   : > { %10247 = vmatmul.mubr.msk.bf16.vlgmr.msra.gmra.mxu0 %vm1032_vm1, %v7358_v25  ;;  %10276 = vmatprep.subr.bf16.mxu1 %v11477_v5  ;;  %v7230_v25 = vadd.f32 %v12954_v45, %v12958_v50  ;;  %v10831_v45 = vld [vmem:[#allocation16 + $0x378] sm:$0xff]  }
0x395d   : > { %v10832_v50 = vld [vmem:[#allocation16 + $0x3f8] sm:$0xff]   ;;  %9645 = vmatprep.subr.bf16.mxu0 %v10831_v45 }
0x395e   : > { %9646 = vmatpush3.bf16.xpose.msra.mxu0 %v10833_v38  ;;  %v10863_v38 = vld [vmem:[#allocation17 + $0x3e0] ss:$16 sps:$4 sm:$0xff]  }
0x395f   : > { %9647 = vmatprep.subr.bf16.mxu0 %v10835_v1  ;;  %v10871_v1 = vld [vmem:[#allocation17 + $0x3c4] ss:$16 sps:$4 sm:$0xff]  }
0x3963   : > { %10277 = vmatpush3.bf16.xpose.msra.mxu1 %v7591_v37  ;;  %v10857_v37 = vld [vmem:[#allocation16 + $0x308] sm:$0xff]  }
0x3964   : > { %9663 = vmatprep.subr.bf16.mxu1 %v10832_v50 }
0x39ea   : > { %v7563_v4 = vpop.f32.mrf.mxu1 }
0x39ec   : > { %v10260_v12 = vpop.f32.mrf.mxu1 }
0x39ed   : > { %v10859_v12 = vld [vmem:[#allocation16 + $0x340] sm:$0xff]  }
0x39ee   : > { %v7566_v52 = vpop.f32.mrf.mxu1 }
0x39ef   : > { %v7570_v22 = vpack.c.bf16 %v7566_v52, %v7563_v4  ;;  %v10858_v4 = vld [vmem:[#allocation16 + $0x388] sm:$0xff]   ;;  %v10860_v52 = vld [vmem:[#allocation16 + $0x3c0] sm:$0xff]  }
0x39f0   : > { %v10261_v7 = vpop.f32.mrf.mxu1 }
0x39f1   : > { %10279 = vmatmul.mubr.msk.bf16.vlgmr.msra.gmra.mxu1 %vm1032_vm1, %v7570_v22  ;;  %v10861_v22 = vld [vmem:[#allocation16 + $0x300] sm:$0xff]  }
0x39f2   : > { %9664 = vmatpush3.bf16.xpose.msra.mxu1 %v10834_v8  ;;  %v10862_v7 = vld [vmem:[#allocation16 + $0x380] sm:$0xff]   ;;  %v10866_v8 = vld [vmem:[#allocation17 + $0x3e8] ss:$16 sps:$4 sm:$0xff]  }
0x39f3   : > { %9665 = vmatprep.subr.bf16.mxu1 %v10836_v56  ;;  %v10874_v56 = vld [vmem:[#allocation17 + $0x3cc] ss:$16 sps:$4 sm:$0xff]  }
0x3a1c   : > { %v7436_v30 = vpop.f32.mrf.mxu0 }
0x3a1d   : > { %v7443_v61 = vadd.f32 %v7436_v30, %v7227_v46  ;;  %v10865_v46 = vld [vmem:[#allocation17 + $0x3e4] ss:$16 sps:$4 sm:$0xff]   ;;  %v10868_v30 = vld [vmem:[#allocation17 + $0x3ec] ss:$16 sps:$4 sm:$0xff]  }
0x3a1e   : > { %v10248_v51 = vpop.f32.mrf.mxu0 }
0x3a20   : > { %v7439_v48 = vpop.f32.mrf.mxu0 }
0x3a21   : > { %v7444_v47 = vadd.f32 %v7439_v48, %v7230_v25 }
0x3a22   : > { %v10249_v54 = vpop.f32.mrf.mxu0 }
0x3ab1   : > { %v7648_v39 = vpop.f32.mrf.mxu1 }
0x3ab2   : > { %v7655_v31 = vadd.f32 %v7648_v39, %v7443_v61 }
0x3ab3   : > { %v10280_v10 = vpop.f32.mrf.mxu1 }
0x3ab4   : > { %v7657_v33 = vadd.f32 %v7655_v31, %v12785_v23  ;;  %v10837_v23 = vld [vmem:[#allocation16 + $0x330] sm:$0xff]   ;;  %v9134_v10 = vld [vmem:[#allocation13 + $0x3] ss:$0 sm:$0xff] }
0x3ab5   : > { %v7651_v55 = vpop.f32.mrf.mxu1  ;;  %9648 = vmatpush3.bf16.xpose.msra.mxu0 %v10837_v23  ;;  %v10869_v23 = vld [vmem:[#allocation17 + $0x3c0] ss:$16 sps:$4 sm:$0xff]  }
0x3ab6   : > { %v7656_v28 = vadd.f32 %v7651_v55, %v7444_v47  ;;  %v13075_v14 = vadd.f32 %v9133_v18, %v7657_v33  ;;  %9649 = vmatprep.subr.bf16.mxu0 %v10839_v41  ;;  %v10877_v41 = vld [vmem:[#allocation17 + $0x3a4] ss:$16 sps:$4 sm:$0xff]  }
0x3ab7   : > { %v10281_v40 = vpop.f32.mrf.mxu1 }
0x3ab8   : > { %v7658_v57 = vadd.f32 %v7656_v28, %v12789_v11  ;;  %7673 = vadd.xlane.f32.xlu0 %v13075_v14  ;;  %v10838_v11 = vld [vmem:[#allocation16 + $0x3b0] sm:$0xff]   ;;  %v9135_v28 = vld [vmem:[#allocation14 + $0x3] ss:$0 sm:$0xff] }
0x3ab9   : > { %9666 = vmatpush3.bf16.xpose.msra.mxu1 %v10838_v11  ;;  %v10872_v11 = vld [vmem:[#allocation17 + $0x3c8] ss:$16 sps:$4 sm:$0xff]  }
0x3aba   : > { %v13079_v36 = vadd.f32 %v9133_v18, %v7658_v57  ;;  %9667 = vmatprep.subr.bf16.mxu1 %v10840_v42  ;;  %v10880_v42 = vld [vmem:[#allocation17 + $0x3ac] ss:$16 sps:$4 sm:$0xff]  }
0x3abc   : > { %7675 = vadd.xlane.f32.xlu1 %v13079_v36 }
0x3abd   : > { %9650 = vmatpush3.bf16.xpose.msra.mxu0 %v10841_v34  ;;  %v10875_v34 = vld [vmem:[#allocation17 + $0x3a0] ss:$16 sps:$4 sm:$0xff]  }
0x3abe   : > { %9651 = vmatprep.subr.bf16.mxu0 %v10843_v13  ;;  %v10883_v13 = vld [vmem:[#allocation17 + $0x384] ss:$16 sps:$4 sm:$0xff]  }
0x3ac1   : > { %9668 = vmatpush3.bf16.xpose.msra.mxu1 %v10842_v35  ;;  %v10878_v35 = vld [vmem:[#allocation17 + $0x3a8] ss:$16 sps:$4 sm:$0xff]  }
0x3ac2   : > { %9669 = vmatprep.subr.bf16.mxu1 %v10844_v43  ;;  %v10886_v43 = vld [vmem:[#allocation17 + $0x38c] ss:$16 sps:$4 sm:$0xff]  }
0x3ac5   : > { %9652 = vmatpush3.bf16.xpose.msra.mxu0 %v10845_v44  ;;  %v10881_v44 = vld [vmem:[#allocation17 + $0x380] ss:$16 sps:$4 sm:$0xff]  }
0x3ac6   : > { %9653 = vmatprep.subr.bf16.mxu0 %v10847_v60  ;;  %v10889_v60 = vld [vmem:[#allocation17 + $0x364] ss:$16 sps:$4 sm:$0xff]  }
0x3ac9   : > { %9670 = vmatpush3.bf16.xpose.msra.mxu1 %v10846_v49  ;;  %v10884_v49 = vld [vmem:[#allocation17 + $0x388] ss:$16 sps:$4 sm:$0xff]  }
0x3aca   : > { %9671 = vmatprep.subr.bf16.mxu1 %v10848_v24  ;;  %v10892_v24 = vld [vmem:[#allocation17 + $0x36c] ss:$16 sps:$4 sm:$0xff]  }
0x3acd   : > { %9654 = vmatpush3.bf16.xpose.msra.mxu0 %v10849_v63  ;;  %v10899_v63 = vld [vmem:[#allocation17 + $0x320] ss:$16 sps:$4 sm:$0xff]  }
0x3ace   : > { %9655 = vmatprep.subr.bf16.mxu0 %v10851_v16  ;;  %v10907_v16 = vld [vmem:[#allocation17 + $0x304] ss:$16 sps:$4 sm:$0xff]  }
0x3ad1   : > { %9672 = vmatpush3.bf16.xpose.msra.mxu1 %v10850_v26  ;;  %v10902_v26 = vld [vmem:[#allocation17 + $0x328] ss:$16 sps:$4 sm:$0xff]  }
0x3ad2   : > { %9673 = vmatprep.subr.bf16.mxu1 %v10852_v29  ;;  %v10910_v29 = vld [vmem:[#allocation17 + $0x30c] ss:$16 sps:$4 sm:$0xff]  }
0x3ad5   : > { %9656 = vmatpush3.bf16.xpose.msra.mxu0 %v10853_v0  ;;  %v10905_v0 = vld [vmem:[#allocation17 + $0x300] ss:$16 sps:$4 sm:$0xff]  }
0x3ad6   : > { %9657 = vmatprep.subr.bf16.mxu0 %v10855_v2  ;;  %v9136_v2 = vld [vmem:[%s13175_s9 + $0xc] sm:$0xf] }
0x3ad9   : > { %9674 = vmatpush3.bf16.xpose.msra.mxu1 %v10854_v62  ;;  %v10908_v62 = vld [vmem:[#allocation17 + $0x308] ss:$16 sps:$4 sm:$0xff]  }
0x3ada   : > { %9675 = vmatprep.subr.bf16.mxu1 %v10856_v3 }
0x3add   : > { %9658 = vmatpush3.bf16.xpose.msra.mxu0 %v10857_v37 }
0x3ade   : > { %9659 = vmatprep.subr.bf16.mxu0 %v10859_v12  ;;  %v7795_v12 = vrot.slane %v9136_v2, %v12138_v17 }
0x3ae1   : > { %9676 = vmatpush3.bf16.xpose.msra.mxu1 %v10858_v4  ;;  %v7787_v4 = vrot.slane %v9136_v2, %v12135_v15 }
0x3ae2   : > { %9677 = vmatprep.subr.bf16.mxu1 %v10860_v52  ;;  %v7783_v52 = vrot.slane %v9136_v2, %v12141_v19 }
0x3ae5   : > { %9660 = vmatpush3.bf16.xpose.msra.mxu0 %v10861_v22  ;;  %v7791_v22 = vrot.slane %v9136_v2, %v12144_v21  ;;  %v10918_v2 = vld [vmem:[#allocation19] sm:$0xff]  }
0x3ae6   : > { %8291 = vmatprep.subr.bf16.mxu0 %v10865_v46 }
0x3ae9   : > { %9678 = vmatpush3.bf16.xpose.msra.mxu1 %v10862_v7 }
0x3aea   : > { %8332 = vmatprep.subr.bf16.mxu1 %v10868_v30 }
0x3b41   : > { %v7674_v58 = vpop.xlane.xlu0 %7673 }
0x3b42   : > { %v7677_v20 = vmul.f32 0.0078125, %v7674_v58  ;;  %v10887_v58 = vld [vmem:[#allocation17 + $0x360] ss:$16 sps:$4 sm:$0xff]  }
0x3b44   : > { %v7679_v59 = vsub.f32 %v13075_v14, %v7677_v20  ;;  %v10890_v20 = vld [vmem:[#allocation17 + $0x368] ss:$16 sps:$4 sm:$0xff]  }
0x3b45   : > { %v7676_v32 = vpop.xlane.xlu1 %7675 }
0x3b46   : > { %v7678_v6 = vmul.f32 0.0078125, %v7676_v32  ;;  %v7681_v9 = vmul.f32 %v7679_v59, %v7679_v59  ;;  %v10898_v32 = vld [vmem:[#allocation17 + $0x34c] ss:$16 sps:$4 sm:$0xff]  }
0x3b48   : > { %v7680_v27 = vsub.f32 %v13079_v36, %v7678_v6  ;;  %7683 = vadd.xlane.f32.xlu0 %v7681_v9  ;;  %v10893_v6 = vld [vmem:[#allocation17 + $0x340] ss:$16 sps:$4 sm:$0xff]   ;;  %v10896_v9 = vld [vmem:[#allocation17 + $0x348] ss:$16 sps:$4 sm:$0xff]  }
0x3b4a   : > { %v7682_v53 = vmul.f32 %v7680_v27, %v7680_v27 }
0x3b4c   : > { %7685 = vadd.xlane.f32.xlu0 %v7682_v53  ;;  %v10904_v53 = vld [vmem:[#allocation17 + $0x32c] ss:$16 sps:$4 sm:$0xff]  }
0x3bd1   : > { %v7684_v61 = vpop.xlane.xlu0 %7683 }
0x3bd2   : > { %v7687_v51 = vmul.f32 0.0078125, %v7684_v61 }
0x3bd4   : > { %v7689_v25 = vadd.f32 1e-05, %v7687_v51 }
0x3bd5   : > { %v7686_v48 = vpop.xlane.xlu0 %7685 }
0x3bd6   : > { %11075 = vrsqrt.f32 %v7689_v25  ;;  %v7688_v47 = vmul.f32 0.0078125, %v7686_v48 }
0x3bd8   : > { %v7690_v54 = vadd.f32 1e-05, %v7688_v47 }
0x3bda   : > { %11077 = vrsqrt.f32 %v7690_v54 }
0x3be3   : > { %v11076_v39 = vpop.eup %11075 }
0x3be4   : > { %v7693_v31 = vmul.f32 %v11076_v39, %v7679_v59  ;;  %v10895_v59 = vld [vmem:[#allocation17 + $0x344] ss:$16 sps:$4 sm:$0xff]  }
0x3be6   : > { %v7701_v55 = vmul.f32 %v9134_v10, %v7693_v31 }
0x3be7   : > { %v11078_v18 = vpop.eup %11077 }
0x3be8   : > { %v7694_v33 = vmul.f32 %v11078_v18, %v7680_v27  ;;  %v7709_v57 = vadd.f32 %v9135_v28, %v7701_v55  ;;  %v10901_v27 = vld [vmem:[#allocation17 + $0x324] ss:$16 sps:$4 sm:$0xff]  }
0x3bea   : > { %v7702_v40 = vmul.f32 %v9134_v10, %v7694_v33 }
0x3bec   : > { %v7710_v45 = vadd.f32 %v9135_v28, %v7702_v40 }
0x3bee   : > { %v7711_v50 = vpack.c.bf16 %v7710_v45, %v7709_v57 }
0x3bf0   : > { %9661 = vmatprep.mubr.bf16.mxu0 %v7711_v50  ;;  %9679 = vmatprep.mubr.bf16.mxu1 %v7711_v50 }
0x3bf1   : > { %9662 = vmatmul.mubr.bf16.vlgmr.msra.gmra.mxu0 %v7711_v50  ;;  %9680 = vmatmul.mubr.bf16.vlgmr.msra.gmra.mxu1 %v7711_v50 }
0x3bf2   : > { %8292 = vmatpush1.bf16.xpose.msra.mxu0 %v10863_v38  ;;  %8333 = vmatpush1.bf16.xpose.msra.mxu1 %v10866_v8 }
0x3bf3   : > { %8293 = vmatprep.subr.bf16.mxu0 %v10871_v1  ;;  %8334 = vmatprep.subr.bf16.mxu1 %v10874_v56  ;;  %v9170_v1 = vld [vmem:[%s13177_s11 + $0x3] ss:$0 sm:$0xff] }
0x3bfa   : > { %8294 = vmatpush1.bf16.xpose.msra.mxu0 %v10869_v23  ;;  %8335 = vmatpush1.bf16.xpose.msra.mxu1 %v10872_v11 }
0x3bfb   : > { %8295 = vmatprep.subr.bf16.mxu0 %v10877_v41  ;;  %8336 = vmatprep.subr.bf16.mxu1 %v10880_v42 }
0x3c02   : > { %8296 = vmatpush1.bf16.xpose.msra.mxu0 %v10875_v34  ;;  %8337 = vmatpush1.bf16.xpose.msra.mxu1 %v10878_v35 }
0x3c03   : > { %8297 = vmatprep.subr.bf16.mxu0 %v10883_v13  ;;  %8338 = vmatprep.subr.bf16.mxu1 %v10886_v43 }
0x3c0a   : > { %8298 = vmatpush1.bf16.xpose.msra.mxu0 %v10881_v44  ;;  %8339 = vmatpush1.bf16.xpose.msra.mxu1 %v10884_v49 }
0x3c0b   : > { %8299 = vmatprep.subr.bf16.mxu0 %v10889_v60  ;;  %8340 = vmatprep.subr.bf16.mxu1 %v10892_v24 }
0x3c12   : > { %8300 = vmatpush1.bf16.xpose.msra.mxu0 %v10887_v58  ;;  %8341 = vmatpush1.bf16.xpose.msra.mxu1 %v10890_v20  ;;  %v10911_v20 = vld [vmem:[#allocation19 + $0x38] sm:$0xff]  }
0x3c13   : > { %8301 = vmatprep.subr.bf16.mxu0 %v10895_v59  ;;  %8342 = vmatprep.subr.bf16.mxu1 %v10898_v32  ;;  %v10912_v59 = vld [vmem:[#allocation19 + $0x30] sm:$0xff]   ;;  %v10913_v32 = vld [vmem:[#allocation19 + $0x28] sm:$0xff]  }
0x3c1a   : > { %8302 = vmatpush1.bf16.xpose.msra.mxu0 %v10893_v6  ;;  %8343 = vmatpush1.bf16.xpose.msra.mxu1 %v10896_v9  ;;  %v10915_v6 = vld [vmem:[#allocation19 + $0x18] sm:$0xff]  }
0x3c1b   : > { %8303 = vmatprep.subr.bf16.mxu0 %v10901_v27  ;;  %8344 = vmatprep.subr.bf16.mxu1 %v10904_v53 }
0x3c22   : > { %8304 = vmatpush1.bf16.xpose.msra.mxu0 %v10899_v63  ;;  %8345 = vmatpush1.bf16.xpose.msra.mxu1 %v10902_v26 }
0x3c23   : > { %8305 = vmatprep.subr.bf16.mxu0 %v10907_v16  ;;  %8346 = vmatprep.subr.bf16.mxu1 %v10910_v29 }
0x3c2a   : > { %8306 = vmatpush1.bf16.xpose.msra.mxu0 %v10905_v0  ;;  %8347 = vmatpush1.bf16.xpose.msra.mxu1 %v10908_v62  ;;  %v10916_v0 = vld [vmem:[#allocation19 + $0x10] sm:$0xff]   ;;  %v10917_v62 = vld [vmem:[#allocation19 + $0x8] sm:$0xff]  }
0x3c2b   : > { %10282 = vmatprep.subr.bf16.mxu0 %v11477_v5 }
0x3cb1   : > { %v8026_v3 = vpop.f32.mrf.mxu0  ;;  %v8069_v37 = vpop.f32.mrf.mxu1 }
0x3cb2   : > { %v8027_v54 = vadd.f32 %v8026_v3, %v7783_v52  ;;  %v8070_v39 = vadd.f32 %v8069_v37, %v7791_v22 }
0x3cb3   : > { %v8028_v7 = vpop.f32.mrf.mxu0  ;;  %v8071_v46 = vpop.f32.mrf.mxu1 }
0x3cb4   : > { %v8029_v51 = vadd.f32 %v8028_v7, %v7787_v4  ;;  %v8072_v25 = vadd.f32 %v8071_v46, %v7795_v12  ;;  %v8078_v40 = vmax.f32 %v8027_v54, 0.0  ;;  %v8080_v57 = vmax.f32 %v8070_v39, 0.0 }
0x3cb5   : > { %v8030_v30 = vpop.f32.mrf.mxu0  ;;  %v8073_v61 = vpop.f32.mrf.mxu1 }
0x3cb6   : > { %v8031_v48 = vadd.f32 %v8030_v30, %v7783_v52  ;;  %v8074_v47 = vadd.f32 %v8073_v61, %v7791_v22  ;;  %v8079_v55 = vmax.f32 %v8029_v51, 0.0  ;;  %v8081_v19 = vmax.f32 %v8072_v25, 0.0  ;;  %v9203_v30 = vld [vmem:[%s13178_s12] ss:$0 sm:$0xff] }
0x3cb7   : > { %v8032_v31 = vpop.f32.mrf.mxu0  ;;  %v8075_v10 = vpop.f32.mrf.mxu1  ;;  %v9204_v25 = vld [vmem:[%s13242_s16] ss:$0 sm:$0xff]  ;;  %s11379_s16 = scalar_lea.vmem %s11378_s5, 512 }
0x3cb8   : > { %v8033_v18 = vadd.f32 %v8032_v31, %v7787_v4  ;;  %v8076_v15 = vadd.f32 %v8075_v10, %v7795_v12  ;;  %v8082_v33 = vmax.f32 %v8031_v48, 0.0  ;;  %v8084_v17 = vmax.f32 %v8074_v47, 0.0  ;;  %v9205_v31 = vld [vmem:[%s13243_s15] ss:$0 sm:$0xff]  ;;  %p11381_p6 = scmp.lt.s32.totalorder %s11379_s16, %s11373_s18 }
0x3cba   : > { %v8083_v28 = vmax.f32 %v8033_v18, 0.0  ;;  %v8085_v21 = vmax.f32 %v8076_v15, 0.0  ;;  %v8086_v38 = vpack.c.bf16 %v8082_v33, %v8078_v40  ;;  %v8088_v8 = vpack.c.bf16 %v8084_v17, %v8080_v57  ;;  %p11382_p9 = por %p11381_p6, %p11380_p5 }
0x3cbc   : > { %v8087_v45 = vpack.c.bf16 %v8083_v28, %v8079_v55  ;;  %v8089_v50 = vpack.c.bf16 %v8085_v21, %v8081_v19  ;;  %p11383_p4 = pnand %p11382_p9, %p11376_p3 }
0x3cbe   : > { %8323 = vmatprep.mubr.bf16.mxu0 %v8087_v45  ;;  %8364 = vmatprep.mubr.bf16.mxu1 %v8089_v50 }
0x3cbf   : > { %8324 = vmatmul.mubr.bf16.vlgmr.msra.gmra.mxu0 %v8086_v38  ;;  %8365 = vmatmul.mubr.bf16.vlgmr.msra.gmra.mxu1 %v8088_v8 }
0x3cc0   : > { %10298 = vmatprep.mubr.msk.bf16.mxu0 %vm11478_vm0, %v11477_v5  ;;  %10283 = vmatpush3.bf16.xpose.msra.mxu0 %v10911_v20 }
0x3cc1   : > { %10284 = vmatprep.subr.bf16.mxu0 %v11477_v5 }
0x3cc8   : > { %10285 = vmatpush3.bf16.xpose.msra.mxu0 %v10912_v59 }
0x3cc9   : > { %10286 = vmatprep.subr.bf16.mxu0 %v11477_v5 }
0x3cd0   : > { %10287 = vmatpush3.bf16.xpose.msra.mxu0 %v10913_v32 }
0x3cd1   : > { %10288 = vmatprep.subr.bf16.mxu0 %v11477_v5 }
0x3d7f   : > { %v8325_v56 = vpop.f32.mrf.mxu0  ;;  %v8366_v23 = vpop.f32.mrf.mxu1 }
0x3d80   : > { %v8326_v11 = vadd.f32 %v9170_v1, %v8325_v56 }
0x3d81   : > { %v8327_v41 = vpop.f32.mrf.mxu0  ;;  %v8368_v42 = vpop.f32.mrf.mxu1 }
0x3d82   : > { %v8367_v34 = vadd.f32 %v8366_v23, %v8326_v11 }
0x3d83   : > { %v8328_v35 = vpop.f32.mrf.mxu0  ;;  %v8369_v13 = vpop.f32.mrf.mxu1 }
0x3d84   : > { %v8373_v43 = vadd.f32 %v8367_v34, %v13075_v14  ;;  %v8329_v44 = vadd.f32 %v9170_v1, %v8328_v35  ;;  %v10914_v14 = vld [vmem:[#allocation19 + $0x20] sm:$0xff]  }
0x3d85   : > { %v8330_v49 = vpop.f32.mrf.mxu0  ;;  %v8371_v60 = vpop.f32.mrf.mxu1  ;;  %10289 = vmatpush3.bf16.xpose.msra.mxu0 %v10914_v14 }
0x3d86   : > { %v8370_v24 = vadd.f32 %v8369_v13, %v8329_v44  ;;  %8377 = vadd.xlane.f32.xlu0 %v8373_v43  ;;  %10290 = vmatprep.subr.bf16.mxu0 %v11477_v5 }
0x3d88   : > { %v8374_v58 = vadd.f32 %v8370_v24, %v13079_v36 }
0x3d8a   : > { %8379 = vadd.xlane.f32.xlu1 %v8374_v58 }
0x3d8d   : > { %10291 = vmatpush3.bf16.xpose.msra.mxu0 %v10915_v6 }
0x3d8e   : > { %10292 = vmatprep.subr.bf16.mxu0 %v11477_v5 }
0x3d95   : > { %10293 = vmatpush3.bf16.xpose.msra.mxu0 %v10916_v0 }
0x3d96   : > { %10294 = vmatprep.subr.bf16.mxu0 %v11477_v5 }
0x3d9d   : > { %10295 = vmatpush3.bf16.xpose.msra.mxu0 %v10917_v62 }
0x3d9e   : > { %10296 = vmatprep.subr.bf16.mxu0 %v11477_v5 }
0x3da5   : > { %10297 = vmatpush3.bf16.xpose.msra.mxu0 %v10918_v2 }
0x3e0f   : > { %v8378_v36 = vpop.xlane.xlu0 %8377 }
0x3e10   : > { %v8381_v9 = vmul.f32 0.0078125, %v8378_v36 }
0x3e12   : > { %v8383_v27 = vsub.f32 %v8373_v43, %v8381_v9 }
0x3e13   : > { %v8380_v53 = vpop.xlane.xlu1 %8379 }
0x3e14   : > { %v8382_v63 = vmul.f32 0.0078125, %v8380_v53  ;;  %v8385_v26 = vmul.f32 %v8383_v27, %v8383_v27 }
0x3e16   : > { %v8384_v16 = vsub.f32 %v8374_v58, %v8382_v63  ;;  %8387 = vadd.xlane.f32.xlu0 %v8385_v26 }
0x3e18   : > { %v8386_v29 = vmul.f32 %v8384_v16, %v8384_v16 }
0x3e1a   : > { %8389 = vadd.xlane.f32.xlu1 %v8386_v29 }
0x3e9f   : > { %v8388_v3 = vpop.xlane.xlu0 %8387 }
0x3ea0   : > { %v8391_v37 = vmul.f32 0.0078125, %v8388_v3 }
0x3ea2   : > { %v8393_v4 = vadd.f32 1e-05, %v8391_v37 }
0x3ea3   : > { %v8390_v12 = vpop.xlane.xlu1 %8389 }
0x3ea4   : > { %11079 = vrsqrt.f32 %v8393_v4  ;;  %v8392_v52 = vmul.f32 0.0078125, %v8390_v12 }
0x3ea6   : > { %v8394_v22 = vadd.f32 1e-05, %v8392_v52 }
0x3ea8   : > { %11081 = vrsqrt.f32 %v8394_v22 }
0x3eb1   : > { %v11080_v7 = vpop.eup %11079 }
0x3eb2   : > { %v8397_v46 = vmul.f32 %v11080_v7, %v8383_v27 }
0x3eb4   : > { %v8405_v51 = vmul.f32 %v9203_v30, %v8397_v46 }
0x3eb5   : > { %v11082_v61 = vpop.eup %11081 }
0x3eb6   : > { %v8398_v5 = vmul.f32 %v11082_v61, %v8384_v16  ;;  %v8413_v47 = vadd.f32 %v9204_v25, %v8405_v51 }
0x3eb8   : > { %v8406_v48 = vmul.f32 %v9203_v30, %v8398_v5 }
0x3eba   : > { %v8414_v54 = vadd.f32 %v9204_v25, %v8406_v48 }
0x3ebc   : > { %v8415_v39 = vpack.c.bf16 %v8414_v54, %v8413_v47 }
0x3ebe   : > { %10299 = vmatmul.mubr.bf16.vlgmr.msra.gmra.mxu0 %v8415_v39 }
0x3f7e   : > { %v8521_v10 = vpop.f32.mrf.mxu0 }
0x3f7f   : > { %v8522_v18 = vadd.f32 %v9205_v31, %v8521_v10 }
0x3f80   : > { %v10300_v15 = vpop.f32.mrf.mxu0 }
0x3f81   : > { %8528 = vst [vmem:[%s684_s26] sm:$0xff] %v8522_v18 }
0x3f82   : > { %v8524_v33 = vpop.f32.mrf.mxu0 }
0x3f83   : > { %v8525_v17 = vadd.f32 %v9205_v31, %v8524_v33 }
0x3f84   : > { %v10301_v55 = vpop.f32.mrf.mxu0 }
0x3f85   : > { %8529 = vst [vmem:[%s684_s26 + $0x8] sm:$0xff] %v8525_v17 }
0x3f86   : > { %11386 = shalt.err (!%p11383_p4)
}
0x3f87   : > { %s11387_s20 = scalar_lea.hbm %s13123_s30, 256  ;;  %s11391_s26 = scalar_lea.hbm %s13244_s25, 512 }
0x3f88   : > { %p11388_p11 = scmp.ne.s32.totalorder %s13123_s30, %s11387_s20  ;;  %p11392_p2 = scmp.lt.s32.totalorder %s13123_s30, %s13244_s25 }
0x3f89   : > { %p11393_p8 = scmp.lt.s32.totalorder %s11391_s26, %s11387_s20 }
0x3f8a   : > { %p11389_p12 = pnand %p11388_p11, %p13245_p0 }
0x3f8b   : > { %p11394_p10 = por %p11393_p8, %p11392_p2 }
0x3f8c   : > { %p11390_p13 = pneg %p11389_p12 }
0x3f8e   : > { %p11395_p7 = pnand %p11394_p10, %p11390_p13 }
0x3f90   : > { %11398 = shalt.err (!%p11395_p7)
}
0x3f91   : > { %s11483_s0 = smov 128   ;;  %s11484_s18 = smov 8  }
0x3f92   : > { %10344 = dma.vmem_to_hbm [thread:$0]  (%p13245_p0), %s13118_s3, 256, %s13123_s30, %s8531_s7, %s11483_s0, %s11483_s0, %s11484_s18  }
0x3f93 PF: > { %s8559_s27 = sand.u32 1, %s11445_s21   ;;  %p13246_p1 = scmp.ne.s32.totalorder %s13223_s17, 0 }
0x3f94   : > { %p13247_p3 = scmp.ge.s32.totalorder %s11457_s24, 2  ;;  %s8560_s5 = scalar_lea.sflag [#allocation4], %s8559_s27 }
0x3f96   : > { %p10382_p5 = pnand %p13247_p3, %p13246_p1 }
0x3f98   : > { %p10383_p6 = pneg %p10382_p5 }
0x3f9a   : > { %11440 = dma.done.wait (%p10383_p6), %s8560_s5, 256  }
0x3f9b   : > { %11442 = vsyncadd (%p10383_p6), %s8560_s5, 4294967040  ;;  %p34_p9 = scmp.ge.s32.totalorder %s11725_s19, 4   ;;  %s13248_s21 = smov %s11449_s22 }
0x3f9c   : > { %s13249_s22 = smov %s11453_s23  ;;  %s13250_s23 = smov %s11737_s13 }
0x3f9d   : > { %s13251_s24 = smov %s11725_s19  ;;  %36 = sbr.rel (!%p34_p9) target bundleno = 22 (0x16), region = 202 }
0x3fa2   :  { %8565 = vsyncpa [#allocation3], 1 }
0x3fa3   :  { %8567 = vsyncpa [#allocation3 + $0x1], 1 }
0x3fa4   :  { %8568 = vsyncpa [#allocation6], 1 }
0x3fa5   :  { %8569 = vsyncpa [#allocation9], 1 }
0x3fa6   :  { %8570 = vsyncpa [#allocation12], 1 }
0x3fa7   :  { %8571 = vsyncpa [#allocation15], 1 }
0x3fa8   :  { %8572 = vsyncpa [#allocation18], 1 }
0x3fa9   :  { %8573 = vsyncpa [#allocation4], 1 }
0x3faa   :  { %8575 = vsyncpa [#allocation4 + $0x1], 1 }

</bundles_post_ra>
